<compile_context>
chip_gen: v7x
topology: tpu7x:2x2x1
jax: 0.10.0
libtpu: 0.0.40
codegen_flags: <defaults>
</compile_context>

<pallas_src>
import functools

import numpy as np
import jax
import jax.numpy as jnp
from jax import lax
from jax.experimental import pallas as pl
from jax.experimental.pallas import tpu as pltpu


# --------------------- in-kernel filter-matrix builders --------------------- #

def _band(n, p):
    """(n, n) 0/1 band matrix: B[i, j] = 1 iff |i - j| <= p (zero-padded box)."""
    r = lax.broadcasted_iota(jnp.int32, (n, n), 0)
    c = lax.broadcasted_iota(jnp.int32, (n, n), 1)
    return (jnp.abs(r - c) <= p).astype(jnp.float32)


def _pool_right(n, n_out):
    """(n, n_out) matrix so that x @ M is a 1-D avg-pool
    (kernel=3, stride=2, padding=1, count_include_pad=False) on the last dim."""
    src = lax.broadcasted_iota(jnp.int32, (n, n_out), 0)
    dst = lax.broadcasted_iota(jnp.int32, (n, n_out), 1)
    hit = (jnp.abs(src - 2 * dst) <= 1).astype(jnp.float32)
    cnt = jnp.sum(hit, axis=0, keepdims=True)            # per-output valid count
    return hit / cnt


def _pool_left(n_out, n):
    """(n_out, n) matrix so that M @ x is the same 1-D avg-pool."""
    dst = lax.broadcasted_iota(jnp.int32, (n_out, n), 0)
    src = lax.broadcasted_iota(jnp.int32, (n_out, n), 1)
    hit = (jnp.abs(src - 2 * dst) <= 1).astype(jnp.float32)
    cnt = jnp.sum(hit, axis=1, keepdims=True)
    return hit / cnt


# --------------------------- separable primitives --------------------------- #

def _box_sum_axis1(x, p):
    """Zero-padded box sum of half-width p along axis 1 (leading axis => no relayout)."""
    if p <= 0:
        return x
    b, d, h, w = x.shape
    acc = x
    for k in range(1, p + 1):
        if k >= d:
            break
        z = jnp.zeros((b, k, h, w), x.dtype)
        acc = acc + jnp.concatenate([x[:, k:], z], axis=1)       # x[d + k]
        acc = acc + jnp.concatenate([z, x[:, :d - k]], axis=1)   # x[d - k]
    return acc


def _box3d(x, p):
    """Separable zero-padded (2p+1)^3 all-ones box filter; x: (B, D, H, W) f32."""
    b, d, h, w = x.shape
    # W axis: single lane-dim matmul; M = B*D*H (5-stack + batch block => fat M).
    y = jnp.dot(x.reshape(b * d * h, w), _band(w, p),
                preferred_element_type=jnp.float32)
    y = y.reshape(b * d, h, w)
    # H axis: one batched matmul over B*D.
    y = jnp.einsum('geh,ghw->gew',
                   jnp.broadcast_to(_band(h, p), (b * d, h, h)), y,
                   preferred_element_type=jnp.float32)
    y = y.reshape(b, d, h, w)
    # D axis: shift-and-add along the leading axis (VALU, no relayout).
    return _box_sum_axis1(y, p)


def _avg_pool3d(x):
    """avg_pool3d(kernel=3, stride=2, padding=1, count_include_pad=False);
    x: (B, D, H, W) -> (B, Do, Ho, Wo)."""
    b, d, h, w = x.shape
    do = (d - 1) // 2 + 1
    ho = (h - 1) // 2 + 1
    wo = (w - 1) // 2 + 1
    # W axis (lane matmul, per-axis divisor baked into the pool matrix).
    y = jnp.dot(x.reshape(b * d * h, w), _pool_right(w, wo),
                preferred_element_type=jnp.float32)
    y = y.reshape(b * d, h, wo)
    # H axis (batched matmul over B*D).
    y = jnp.einsum('geh,ghw->gew',
                   jnp.broadcast_to(_pool_left(ho, h), (b * d, ho, h)), y,
                   preferred_element_type=jnp.float32)
    y = y.reshape(b, d, ho, wo)
    # D axis: 3-tap zero-padded sum, keep even rows, divide by the valid count.
    s = _box_sum_axis1(y, 1)                                     # (b, d, ho, wo)
    pad = 2 * do - d                                             # 1 iff d is odd
    if pad:
        s = jnp.concatenate([s, jnp.zeros((b, pad, ho, wo), s.dtype)], axis=1)
    s = s.reshape(b * do, 2, ho, wo)[:, 0].reshape(b, do, ho, wo)
    parts = [s[:, 0:1] * 0.5]                                    # front: rows {0, 1}
    if do > 1:
        if d % 2 == 1:
            if do > 2:
                parts.append(s[:, 1:do - 1] * (1.0 / 3.0))
            parts.append(s[:, do - 1:do] * 0.5)                  # back: rows {d-2, d-1}
        else:
            parts.append(s[:, 1:] * (1.0 / 3.0))
    return parts[0] if len(parts) == 1 else jnp.concatenate(parts, axis=1)


# ------------------------------- fused kernel ------------------------------- #

def _fused_ncc_kernel(i_ref, j_ref, o_ref, *, wins, weights, eps, nb):
    """All NCC levels + inter-level pooling for one block of `nb` batch elements."""
    I = i_ref[...]                                     # (nb, D, H, W) f32
    J = j_ref[...]
    total = jnp.float32(0.0)
    nscale = len(wins)
    for s in range(nscale):
        p = wins[s] // 2
        wsz = float(wins[s] ** 3)
        # Stack the five filter inputs so each box-filter axis is ONE big matmul.
        X = jnp.concatenate([I, J, I * I, J * J, I * J], axis=0)   # (5*nb, d, h, w)
        F = _box3d(X, p)
        I_sum, J_sum, I2_sum, J2_sum, IJ_sum = (
            F[k * nb:(k + 1) * nb] for k in range(5))
        u_I = I_sum * (1.0 / wsz)
        u_J = J_sum * (1.0 / wsz)
        cross = IJ_sum - u_J * I_sum - u_I * J_sum + u_I * u_J * wsz
        I_var = I2_sum - 2.0 * u_I * I_sum + u_I * u_I * wsz
        J_var = J2_sum - 2.0 * u_J * J_sum + u_J * u_J * wsz
        # EUP reciprocal (free VLIW slot next to MXU/VALU); ~2^-12 rel. error is
        # fine for a scalar loss and is validated against the conv reference.
        cc = (cross * cross) * pl.reciprocal(I_var * J_var + eps, approx=True)
        # weights[s] folds -1 / (N * D_s * H_s * W_s * 2**s).
        total = total + weights[s] * jnp.sum(cc)
        if s < nscale - 1:
            P = _avg_pool3d(jnp.concatenate([I, J], axis=0))
            I, J = P[:nb], P[nb:]
    o_ref[...] = jnp.full((1, 1, 1), total, jnp.float32)


# ---------------------------------- wrapper --------------------------------- #

def _pick_batch_block(n):
    """Batch elements folded into one grid step.

    Keep >= 2 parallel grid steps when N >= 2 (two TensorCores on v7x); within
    that, pick the largest divisor (capped for VMEM) so the stacked matmul M
    dim grows and the per-grid-step overhead is amortized."""
    best = 1
    for nb in range(1, min(n, 8) + 1):
        if n % nb == 0 and (n // nb >= 2 or n == 1):
            best = nb
    return best


@functools.partial(jax.jit, static_argnames=("win", "scale", "eps"))
def multi_resolution_ncc(I, J, win, scale=3, eps=1e-8):
    """sum_s NCC_loss(win-2s)(pool^s(I), pool^s(J)) / 2**s for NCDHW, C == 1."""
    N, C, D, H, W = I.shape
    assert C == 1, "conv3d weight (1,1,k,k,k) requires a single channel"
    Iv = jnp.asarray(I, jnp.float32).reshape(N, D, H, W)
    Jv = jnp.asarray(J, jnp.float32).reshape(N, D, H, W)

    # Static per-scale geometry of avg_pool3d(kernel=3, stride=2, padding=1).
    dims = [(D, H, W)]
    for _ in range(scale - 1):
        dims.append(tuple((x - 1) // 2 + 1 for x in dims[-1]))
    wins = tuple(int(win - 2 * s) for s in range(scale))
    for wn in wins:
        assert wn >= 1, "window must stay positive across scales"
        assert wn % 2 == 1, "even windows diverge from the PyTorch pad=win//2 conv"
    # NOTE: 1/N is baked in at trace time (static N); recompute if the batch is
    # later sharded via vmap/pmap.
    weights = tuple(-1.0 / (N * d * h * w * (2 ** s))
                    for s, (d, h, w) in enumerate(dims))

    nb = _pick_batch_block(N)
    steps = N // nb

    kernel = functools.partial(_fused_ncc_kernel, wins=wins, weights=weights,
                               eps=float(eps), nb=nb)
    partials = pl.pallas_call(
        kernel,
        out_shape=jax.ShapeDtypeStruct((steps, 1, 1), jnp.float32),
        grid=(steps,),
        in_specs=[pl.BlockSpec((nb, D, H, W), lambda b: (b, 0, 0, 0)),
                  pl.BlockSpec((nb, D, H, W), lambda b: (b, 0, 0, 0))],
        out_specs=pl.BlockSpec((1, 1, 1), lambda b: (b, 0, 0)),
        compiler_params=pltpu.CompilerParams(
            dimension_semantics=("parallel",),
            vmem_limit_bytes=32 * 1024 * 1024),
    )(Iv, Jv)
    return jnp.sum(partials)


# ------------------------------- pure-JAX ref -------------------------------- #

def _avg_pool3d_ref(x):
    """avg_pool3d(kernel=3, stride=2, padding=1, count_include_pad=False)."""
    window = (1, 1, 3, 3, 3)
    strides = (1, 1, 2, 2, 2)
    pads = ((0, 0), (0, 0), (1, 1), (1, 1), (1, 1))
    s = lax.reduce_window(x, 0.0, lax.add, window, strides, pads)
    c = lax.reduce_window(jnp.ones_like(x), 0.0, lax.add, window, strides, pads)
    return s / c


def _ncc_ref(I, J, win, eps=1e-8):
    w = jnp.ones((1, 1, win, win, win), jnp.float32)
    pad = win // 2
    conv = lambda x: lax.conv_general_dilated(
        x, w, (1, 1, 1), [(pad, pad)] * 3,
        dimension_numbers=("NCDHW", "OIDHW", "NCDHW"),
        precision=lax.Precision.HIGHEST)
    I_sum, J_sum = conv(I), conv(J)
    I2_sum, J2_sum, IJ_sum = conv(I * I), conv(J * J), conv(I * J)
    wsz = win ** 3
    u_I, u_J = I_sum / wsz, J_sum / wsz
    cross = IJ_sum - u_J * I_sum - u_I * J_sum + u_I * u_J * wsz
    I_var = I2_sum - 2 * u_I * I_sum + u_I * u_I * wsz
    J_var = J2_sum - 2 * u_J * J_sum + u_J * u_J * wsz
    cc = cross * cross / (I_var * J_var + eps)
    return -1.0 * jnp.mean(cc)


def _multi_resolution_ncc_ref(I, J, win, scale=3, eps=1e-8):
    total = jnp.float32(0.0)
    for i in range(scale):
        total = total + _ncc_ref(I, J, win - 2 * i, eps) / (2 ** i)
        if i < scale - 1:
            I = _avg_pool3d_ref(I)
            J = _avg_pool3d_ref(J)
    return total


# ------------------------------------ main ----------------------------------- #

if __name__ == "__main__":
    key = jax.random.PRNGKey(0)
    k1, k2 = jax.random.split(key)
    N, C, D, H, W = 2, 1, 16, 16, 16
    I = jax.random.uniform(k1, (N, C, D, H, W), dtype=jnp.float32)
    J = jax.random.uniform(k2, (N, C, D, H, W), dtype=jnp.float32)

    win, scale = 7, 3          # multi_resolution_NCC(win=7, scale=3)
    out = jax.block_until_ready(multi_resolution_ncc(I, J, win=win, scale=scale))

    ref = jax.block_until_ready(
        _multi_resolution_ncc_ref(I, J, win=win, scale=scale))
    np.testing.assert_allclose(np.asarray(out), np.asarray(ref),
                               rtol=1e-3, atol=1e-3)

    print("KERNEL_OK")
</pallas_src>

<mosaic_0001>
module attributes {stable_mosaic.version = 11 : i64} {
  func.func @_fused_ncc_kernel(%arg0: i32, %arg1: memref<1x16x16x16xf32, #tpu.memory_space<vmem>>, %arg2: memref<1x16x16x16xf32, #tpu.memory_space<vmem>>, %arg3: memref<1x1x1xf32, #tpu.memory_space<vmem>>) attributes {dimension_semantics = [#tpu.dimension_semantics<parallel>], iteration_bounds = array<i64: 2>, scalar_prefetch = 0 : i64, scratch_operands = 0 : i64, tpu.core_type = #tpu.core_type<tc>, window_params = [{transform_indices = @transform_0, window_bounds = array<i64: 1, 16, 16, 16>}, {transform_indices = @transform_1, window_bounds = array<i64: 1, 16, 16, 16>}, {transform_indices = @transform_2, window_bounds = array<i64: 1, 1, 1>}]} {
    %c0 = arith.constant 0 : index
    %c0_0 = arith.constant 0 : index
    %c0_1 = arith.constant 0 : index
    %c0_2 = arith.constant 0 : index
    %0 = vector.load %arg1[%c0, %c0_0, %c0_1, %c0_2] : memref<1x16x16x16xf32, #tpu.memory_space<vmem>>, vector<1x16x16x16xf32>
    %c0_3 = arith.constant 0 : index
    %c0_4 = arith.constant 0 : index
    %c0_5 = arith.constant 0 : index
    %c0_6 = arith.constant 0 : index
    %1 = vector.load %arg2[%c0_3, %c0_4, %c0_5, %c0_6] : memref<1x16x16x16xf32, #tpu.memory_space<vmem>>, vector<1x16x16x16xf32>
    %2 = arith.mulf %0, %0 : vector<1x16x16x16xf32>
    %3 = arith.mulf %1, %1 : vector<1x16x16x16xf32>
    %4 = arith.mulf %0, %1 : vector<1x16x16x16xf32>
    %5 = tpu.concatenate %0, %1, %2, %3, %4 in 0 : vector<1x16x16x16xf32>, vector<1x16x16x16xf32>, vector<1x16x16x16xf32>, vector<1x16x16x16xf32>, vector<1x16x16x16xf32> -> vector<5x16x16x16xf32>
    %6 = vector.shape_cast %5 : vector<5x16x16x16xf32> to vector<1280x16xf32>
    %7 = tpu.iota {dimensions = array<i32: 0>} : vector<16x16xi32>
    %8 = tpu.iota {dimensions = array<i32: 1>} : vector<16x16xi32>
    %9 = arith.subi %7, %8 : vector<16x16xi32>
    %10 = math.absi %9 : vector<16x16xi32>
    %c3_i32 = arith.constant 3 : i32
    %11 = vector.broadcast %c3_i32 : i32 to vector<16x16xi32>
    %12 = arith.cmpi sle, %10, %11 : vector<16x16xi32>
    %13 = arith.extui %12 : vector<16x16xi1> to vector<16x16xi32>
    %14 = arith.sitofp %13 : vector<16x16xi32> to vector<16x16xf32>
    %cst = arith.constant dense<0.000000e+00> : vector<1280x16xf32>
    %15 = tpu.matmul %6, %14, %cst {dimension_numbers = #tpu.dot_dimension_numbers<[1], [0], [0], [1], [0, 0, 1, 1], [], []>} : vector<1280x16xf32>, vector<16x16xf32>, vector<1280x16xf32> -> vector<1280x16xf32>
    %16 = vector.shape_cast %15 : vector<1280x16xf32> to vector<80x16x16xf32>
    %17 = tpu.iota {dimensions = array<i32: 0>} : vector<16x16xi32>
    %18 = tpu.iota {dimensions = array<i32: 1>} : vector<16x16xi32>
    %19 = arith.subi %17, %18 : vector<16x16xi32>
    %20 = math.absi %19 : vector<16x16xi32>
    %c3_i32_7 = arith.constant 3 : i32
    %21 = vector.broadcast %c3_i32_7 : i32 to vector<16x16xi32>
    %22 = arith.cmpi sle, %20, %21 : vector<16x16xi32>
    %23 = arith.extui %22 : vector<16x16xi1> to vector<16x16xi32>
    %24 = arith.sitofp %23 : vector<16x16xi32> to vector<16x16xf32>
    %25 = vector.shape_cast %24 : vector<16x16xf32> to vector<1x16x16xf32>
    %26 = vector.broadcast %25 : vector<1x16x16xf32> to vector<80x16x16xf32>
    "tpu.trace_start"() <{level = 10 : i32, message = "geh,ghw->gew"}> : () -> ()
    %cst_8 = arith.constant dense<0.000000e+00> : vector<80x16x16xf32>
    %27 = tpu.matmul %26, %16, %cst_8 {dimension_numbers = #tpu.dot_dimension_numbers<[2], [1], [1], [2], [0, 0, 0, 1, 1, 2], [0], [0]>} : vector<80x16x16xf32>, vector<80x16x16xf32>, vector<80x16x16xf32> -> vector<80x16x16xf32>
    "tpu.trace_stop"() : () -> ()
    %28 = vector.shape_cast %27 : vector<80x16x16xf32> to vector<5x16x16x16xf32>
    %cst_9 = arith.constant 0.000000e+00 : f32
    %29 = vector.broadcast %cst_9 : f32 to vector<5x1x16x16xf32>
    %30 = vector.extract_strided_slice %28 {offsets = [0, 1, 0, 0], sizes = [5, 15, 16, 16], strides = [1, 1, 1, 1]} : vector<5x16x16x16xf32> to vector<5x15x16x16xf32>
    %31 = tpu.concatenate %30, %29 in 1 : vector<5x15x16x16xf32>, vector<5x1x16x16xf32> -> vector<5x16x16x16xf32>
    %32 = arith.addf %28, %31 : vector<5x16x16x16xf32>
    %33 = vector.extract_strided_slice %28 {offsets = [0, 0, 0, 0], sizes = [5, 15, 16, 16], strides = [1, 1, 1, 1]} : vector<5x16x16x16xf32> to vector<5x15x16x16xf32>
    %34 = tpu.concatenate %29, %33 in 1 : vector<5x1x16x16xf32>, vector<5x15x16x16xf32> -> vector<5x16x16x16xf32>
    %35 = arith.addf %32, %34 : vector<5x16x16x16xf32>
    %cst_10 = arith.constant 0.000000e+00 : f32
    %36 = vector.broadcast %cst_10 : f32 to vector<5x2x16x16xf32>
    %37 = vector.extract_strided_slice %28 {offsets = [0, 2, 0, 0], sizes = [5, 14, 16, 16], strides = [1, 1, 1, 1]} : vector<5x16x16x16xf32> to vector<5x14x16x16xf32>
    %38 = tpu.concatenate %37, %36 in 1 : vector<5x14x16x16xf32>, vector<5x2x16x16xf32> -> vector<5x16x16x16xf32>
    %39 = arith.addf %35, %38 : vector<5x16x16x16xf32>
    %40 = vector.extract_strided_slice %28 {offsets = [0, 0, 0, 0], sizes = [5, 14, 16, 16], strides = [1, 1, 1, 1]} : vector<5x16x16x16xf32> to vector<5x14x16x16xf32>
    %41 = tpu.concatenate %36, %40 in 1 : vector<5x2x16x16xf32>, vector<5x14x16x16xf32> -> vector<5x16x16x16xf32>
    %42 = arith.addf %39, %41 : vector<5x16x16x16xf32>
    %cst_11 = arith.constant 0.000000e+00 : f32
    %43 = vector.broadcast %cst_11 : f32 to vector<5x3x16x16xf32>
    %44 = vector.extract_strided_slice %28 {offsets = [0, 3, 0, 0], sizes = [5, 13, 16, 16], strides = [1, 1, 1, 1]} : vector<5x16x16x16xf32> to vector<5x13x16x16xf32>
    %45 = tpu.concatenate %44, %43 in 1 : vector<5x13x16x16xf32>, vector<5x3x16x16xf32> -> vector<5x16x16x16xf32>
    %46 = arith.addf %42, %45 : vector<5x16x16x16xf32>
    %47 = vector.extract_strided_slice %28 {offsets = [0, 0, 0, 0], sizes = [5, 13, 16, 16], strides = [1, 1, 1, 1]} : vector<5x16x16x16xf32> to vector<5x13x16x16xf32>
    %48 = tpu.concatenate %43, %47 in 1 : vector<5x3x16x16xf32>, vector<5x13x16x16xf32> -> vector<5x16x16x16xf32>
    %49 = arith.addf %46, %48 : vector<5x16x16x16xf32>
    %50 = vector.extract_strided_slice %49 {offsets = [0, 0, 0, 0], sizes = [1, 16, 16, 16], strides = [1, 1, 1, 1]} : vector<5x16x16x16xf32> to vector<1x16x16x16xf32>
    %51 = vector.extract_strided_slice %49 {offsets = [1, 0, 0, 0], sizes = [1, 16, 16, 16], strides = [1, 1, 1, 1]} : vector<5x16x16x16xf32> to vector<1x16x16x16xf32>
    %52 = vector.extract_strided_slice %49 {offsets = [2, 0, 0, 0], sizes = [1, 16, 16, 16], strides = [1, 1, 1, 1]} : vector<5x16x16x16xf32> to vector<1x16x16x16xf32>
    %53 = vector.extract_strided_slice %49 {offsets = [3, 0, 0, 0], sizes = [1, 16, 16, 16], strides = [1, 1, 1, 1]} : vector<5x16x16x16xf32> to vector<1x16x16x16xf32>
    %54 = vector.extract_strided_slice %49 {offsets = [4, 0, 0, 0], sizes = [1, 16, 16, 16], strides = [1, 1, 1, 1]} : vector<5x16x16x16xf32> to vector<1x16x16x16xf32>
    %cst_12 = arith.constant 0.002915452 : f32
    %55 = vector.broadcast %cst_12 : f32 to vector<1x16x16x16xf32>
    %56 = arith.mulf %50, %55 : vector<1x16x16x16xf32>
    %cst_13 = arith.constant 0.002915452 : f32
    %57 = vector.broadcast %cst_13 : f32 to vector<1x16x16x16xf32>
    %58 = arith.mulf %51, %57 : vector<1x16x16x16xf32>
    %59 = arith.mulf %58, %50 : vector<1x16x16x16xf32>
    %60 = arith.subf %54, %59 : vector<1x16x16x16xf32>
    %61 = arith.mulf %56, %51 : vector<1x16x16x16xf32>
    %62 = arith.subf %60, %61 : vector<1x16x16x16xf32>
    %63 = arith.mulf %56, %58 : vector<1x16x16x16xf32>
    %cst_14 = arith.constant 3.430000e+02 : f32
    %64 = vector.broadcast %cst_14 : f32 to vector<1x16x16x16xf32>
    %65 = arith.mulf %63, %64 : vector<1x16x16x16xf32>
    %66 = arith.addf %62, %65 : vector<1x16x16x16xf32>
    %cst_15 = arith.constant 2.000000e+00 : f32
    %67 = vector.broadcast %cst_15 : f32 to vector<1x16x16x16xf32>
    %68 = arith.mulf %67, %56 : vector<1x16x16x16xf32>
    %69 = arith.mulf %68, %50 : vector<1x16x16x16xf32>
    %70 = arith.subf %52, %69 : vector<1x16x16x16xf32>
    %71 = arith.mulf %56, %56 : vector<1x16x16x16xf32>
    %cst_16 = arith.constant 3.430000e+02 : f32
    %72 = vector.broadcast %cst_16 : f32 to vector<1x16x16x16xf32>
    %73 = arith.mulf %71, %72 : vector<1x16x16x16xf32>
    %74 = arith.addf %70, %73 : vector<1x16x16x16xf32>
    %cst_17 = arith.constant 2.000000e+00 : f32
    %75 = vector.broadcast %cst_17 : f32 to vector<1x16x16x16xf32>
    %76 = arith.mulf %75, %58 : vector<1x16x16x16xf32>
    %77 = arith.mulf %76, %51 : vector<1x16x16x16xf32>
    %78 = arith.subf %53, %77 : vector<1x16x16x16xf32>
    %79 = arith.mulf %58, %58 : vector<1x16x16x16xf32>
    %cst_18 = arith.constant 3.430000e+02 : f32
    %80 = vector.broadcast %cst_18 : f32 to vector<1x16x16x16xf32>
    %81 = arith.mulf %79, %80 : vector<1x16x16x16xf32>
    %82 = arith.addf %78, %81 : vector<1x16x16x16xf32>
    %83 = arith.mulf %66, %66 : vector<1x16x16x16xf32>
    %84 = arith.mulf %74, %82 : vector<1x16x16x16xf32>
    %cst_19 = arith.constant 9.99999993E-9 : f32
    %85 = vector.broadcast %cst_19 : f32 to vector<1x16x16x16xf32>
    %86 = arith.addf %84, %85 : vector<1x16x16x16xf32>
    %87 = tpu.reciprocal %86 {approx = true} : vector<1x16x16x16xf32> -> vector<1x16x16x16xf32>
    %88 = arith.mulf %83, %87 : vector<1x16x16x16xf32>
    %89 = vector.shape_cast %88 : vector<1x16x16x16xf32> to vector<1x1x16x16x16xf32>
    %cst_20 = arith.constant dense<0.000000e+00> : vector<1xf32>
    %90 = vector.multi_reduction <add>, %89, %cst_20 [1, 2, 3, 4] : vector<1x1x16x16x16xf32> to vector<1xf32>
    %91 = vector.shape_cast %90 : vector<1xf32> to vector<1x1x1x1x1xf32>
    %92 = vector.extract %91[0, 0, 0, 0, 0] : f32 from vector<1x1x1x1x1xf32>
    %cst_21 = arith.constant -1.22070313E-4 : f32
    %93 = arith.mulf %cst_21, %92 : f32
    %cst_22 = arith.constant 0.000000e+00 : f32
    %94 = arith.addf %cst_22, %93 : f32
    %95 = tpu.concatenate %0, %1 in 0 : vector<1x16x16x16xf32>, vector<1x16x16x16xf32> -> vector<2x16x16x16xf32>
    %96 = vector.shape_cast %95 : vector<2x16x16x16xf32> to vector<512x16xf32>
    %97 = tpu.iota {dimensions = array<i32: 0>} : vector<16x8xi32>
    %98 = tpu.iota {dimensions = array<i32: 1>} : vector<16x8xi32>
    %c2_i32 = arith.constant 2 : i32
    %99 = vector.broadcast %c2_i32 : i32 to vector<16x8xi32>
    %100 = arith.muli %99, %98 : vector<16x8xi32>
    %101 = arith.subi %97, %100 : vector<16x8xi32>
    %102 = math.absi %101 : vector<16x8xi32>
    %c1_i32 = arith.constant 1 : i32
    %103 = vector.broadcast %c1_i32 : i32 to vector<16x8xi32>
    %104 = arith.cmpi sle, %102, %103 : vector<16x8xi32>
    %105 = arith.extui %104 : vector<16x8xi1> to vector<16x8xi32>
    %106 = arith.sitofp %105 : vector<16x8xi32> to vector<16x8xf32>
    %cst_23 = arith.constant dense<0.000000e+00> : vector<8xf32>
    %107 = vector.multi_reduction <add>, %106, %cst_23 [0] : vector<16x8xf32> to vector<8xf32>
    %108 = vector.shape_cast %107 : vector<8xf32> to vector<1x8xf32>
    %109 = vector.broadcast %108 : vector<1x8xf32> to vector<16x8xf32>
    %110 = arith.divf %106, %109 : vector<16x8xf32>
    %cst_24 = arith.constant dense<0.000000e+00> : vector<512x8xf32>
    %111 = tpu.matmul %96, %110, %cst_24 {dimension_numbers = #tpu.dot_dimension_numbers<[1], [0], [0], [1], [0, 0, 1, 1], [], []>} : vector<512x16xf32>, vector<16x8xf32>, vector<512x8xf32> -> vector<512x8xf32>
    %112 = vector.shape_cast %111 : vector<512x8xf32> to vector<32x16x8xf32>
    %113 = tpu.iota {dimensions = array<i32: 0>} : vector<8x16xi32>
    %114 = tpu.iota {dimensions = array<i32: 1>} : vector<8x16xi32>
    %c2_i32_25 = arith.constant 2 : i32
    %115 = vector.broadcast %c2_i32_25 : i32 to vector<8x16xi32>
    %116 = arith.muli %115, %113 : vector<8x16xi32>
    %117 = arith.subi %114, %116 : vector<8x16xi32>
    %118 = math.absi %117 : vector<8x16xi32>
    %c1_i32_26 = arith.constant 1 : i32
    %119 = vector.broadcast %c1_i32_26 : i32 to vector<8x16xi32>
    %120 = arith.cmpi sle, %118, %119 : vector<8x16xi32>
    %121 = arith.extui %120 : vector<8x16xi1> to vector<8x16xi32>
    %122 = arith.sitofp %121 : vector<8x16xi32> to vector<8x16xf32>
    %cst_27 = arith.constant dense<0.000000e+00> : vector<8xf32>
    %123 = vector.multi_reduction <add>, %122, %cst_27 [1] : vector<8x16xf32> to vector<8xf32>
    %124 = vector.shape_cast %123 : vector<8xf32> to vector<8x1xf32>
    %125 = vector.broadcast %124 : vector<8x1xf32> to vector<8x16xf32>
    %126 = arith.divf %122, %125 : vector<8x16xf32>
    %127 = vector.shape_cast %126 : vector<8x16xf32> to vector<1x8x16xf32>
    %128 = vector.broadcast %127 : vector<1x8x16xf32> to vector<32x8x16xf32>
    "tpu.trace_start"() <{level = 10 : i32, message = "geh,ghw->gew"}> : () -> ()
    %cst_28 = arith.constant dense<0.000000e+00> : vector<32x8x8xf32>
    %129 = tpu.matmul %128, %112, %cst_28 {dimension_numbers = #tpu.dot_dimension_numbers<[2], [1], [1], [2], [0, 0, 0, 1, 1, 2], [0], [0]>} : vector<32x8x16xf32>, vector<32x16x8xf32>, vector<32x8x8xf32> -> vector<32x8x8xf32>
    "tpu.trace_stop"() : () -> ()
    %130 = vector.shape_cast %129 : vector<32x8x8xf32> to vector<2x16x8x8xf32>
    %cst_29 = arith.constant 0.000000e+00 : f32
    %131 = vector.broadcast %cst_29 : f32 to vector<2x1x8x8xf32>
    %132 = vector.extract_strided_slice %130 {offsets = [0, 1, 0, 0], sizes = [2, 15, 8, 8], strides = [1, 1, 1, 1]} : vector<2x16x8x8xf32> to vector<2x15x8x8xf32>
    %133 = tpu.concatenate %132, %131 in 1 : vector<2x15x8x8xf32>, vector<2x1x8x8xf32> -> vector<2x16x8x8xf32>
    %134 = arith.addf %130, %133 : vector<2x16x8x8xf32>
    %135 = vector.extract_strided_slice %130 {offsets = [0, 0, 0, 0], sizes = [2, 15, 8, 8], strides = [1, 1, 1, 1]} : vector<2x16x8x8xf32> to vector<2x15x8x8xf32>
    %136 = tpu.concatenate %131, %135 in 1 : vector<2x1x8x8xf32>, vector<2x15x8x8xf32> -> vector<2x16x8x8xf32>
    %137 = arith.addf %134, %136 : vector<2x16x8x8xf32>
    %138 = vector.shape_cast %137 : vector<2x16x8x8xf32> to vector<16x2x8x8xf32>
    %139 = vector.extract_strided_slice %138 {offsets = [0, 0, 0, 0], sizes = [16, 1, 8, 8], strides = [1, 1, 1, 1]} : vector<16x2x8x8xf32> to vector<16x1x8x8xf32>
    %140 = vector.shape_cast %139 : vector<16x1x8x8xf32> to vector<16x8x8xf32>
    %141 = vector.shape_cast %140 : vector<16x8x8xf32> to vector<2x8x8x8xf32>
    %142 = vector.extract_strided_slice %141 {offsets = [0, 0, 0, 0], sizes = [2, 1, 8, 8], strides = [1, 1, 1, 1]} : vector<2x8x8x8xf32> to vector<2x1x8x8xf32>
    %cst_30 = arith.constant 5.000000e-01 : f32
    %143 = vector.broadcast %cst_30 : f32 to vector<2x1x8x8xf32>
    %144 = arith.mulf %142, %143 : vector<2x1x8x8xf32>
    %145 = vector.extract_strided_slice %141 {offsets = [0, 1, 0, 0], sizes = [2, 7, 8, 8], strides = [1, 1, 1, 1]} : vector<2x8x8x8xf32> to vector<2x7x8x8xf32>
    %cst_31 = arith.constant 0.333333343 : f32
    %146 = vector.broadcast %cst_31 : f32 to vector<2x7x8x8xf32>
    %147 = arith.mulf %145, %146 : vector<2x7x8x8xf32>
    %148 = tpu.concatenate %144, %147 in 1 : vector<2x1x8x8xf32>, vector<2x7x8x8xf32> -> vector<2x8x8x8xf32>
    %149 = vector.extract_strided_slice %148 {offsets = [0, 0, 0, 0], sizes = [1, 8, 8, 8], strides = [1, 1, 1, 1]} : vector<2x8x8x8xf32> to vector<1x8x8x8xf32>
    %150 = vector.extract_strided_slice %148 {offsets = [1, 0, 0, 0], sizes = [1, 8, 8, 8], strides = [1, 1, 1, 1]} : vector<2x8x8x8xf32> to vector<1x8x8x8xf32>
    %151 = arith.mulf %149, %149 : vector<1x8x8x8xf32>
    %152 = arith.mulf %150, %150 : vector<1x8x8x8xf32>
    %153 = arith.mulf %149, %150 : vector<1x8x8x8xf32>
    %154 = tpu.concatenate %149, %150, %151, %152, %153 in 0 : vector<1x8x8x8xf32>, vector<1x8x8x8xf32>, vector<1x8x8x8xf32>, vector<1x8x8x8xf32>, vector<1x8x8x8xf32> -> vector<5x8x8x8xf32>
    %155 = vector.shape_cast %154 : vector<5x8x8x8xf32> to vector<320x8xf32>
    %156 = tpu.iota {dimensions = array<i32: 0>} : vector<8x8xi32>
    %157 = tpu.iota {dimensions = array<i32: 1>} : vector<8x8xi32>
    %158 = arith.subi %156, %157 : vector<8x8xi32>
    %159 = math.absi %158 : vector<8x8xi32>
    %c2_i32_32 = arith.constant 2 : i32
    %160 = vector.broadcast %c2_i32_32 : i32 to vector<8x8xi32>
    %161 = arith.cmpi sle, %159, %160 : vector<8x8xi32>
    %162 = arith.extui %161 : vector<8x8xi1> to vector<8x8xi32>
    %163 = arith.sitofp %162 : vector<8x8xi32> to vector<8x8xf32>
    %cst_33 = arith.constant dense<0.000000e+00> : vector<320x8xf32>
    %164 = tpu.matmul %155, %163, %cst_33 {dimension_numbers = #tpu.dot_dimension_numbers<[1], [0], [0], [1], [0, 0, 1, 1], [], []>} : vector<320x8xf32>, vector<8x8xf32>, vector<320x8xf32> -> vector<320x8xf32>
    %165 = vector.shape_cast %164 : vector<320x8xf32> to vector<40x8x8xf32>
    %166 = tpu.iota {dimensions = array<i32: 0>} : vector<8x8xi32>
    %167 = tpu.iota {dimensions = array<i32: 1>} : vector<8x8xi32>
    %168 = arith.subi %166, %167 : vector<8x8xi32>
    %169 = math.absi %168 : vector<8x8xi32>
    %c2_i32_34 = arith.constant 2 : i32
    %170 = vector.broadcast %c2_i32_34 : i32 to vector<8x8xi32>
    %171 = arith.cmpi sle, %169, %170 : vector<8x8xi32>
    %172 = arith.extui %171 : vector<8x8xi1> to vector<8x8xi32>
    %173 = arith.sitofp %172 : vector<8x8xi32> to vector<8x8xf32>
    %174 = vector.shape_cast %173 : vector<8x8xf32> to vector<1x8x8xf32>
    %175 = vector.broadcast %174 : vector<1x8x8xf32> to vector<40x8x8xf32>
    "tpu.trace_start"() <{level = 10 : i32, message = "geh,ghw->gew"}> : () -> ()
    %cst_35 = arith.constant dense<0.000000e+00> : vector<40x8x8xf32>
    %176 = tpu.matmul %175, %165, %cst_35 {dimension_numbers = #tpu.dot_dimension_numbers<[2], [1], [1], [2], [0, 0, 0, 1, 1, 2], [0], [0]>} : vector<40x8x8xf32>, vector<40x8x8xf32>, vector<40x8x8xf32> -> vector<40x8x8xf32>
    "tpu.trace_stop"() : () -> ()
    %177 = vector.shape_cast %176 : vector<40x8x8xf32> to vector<5x8x8x8xf32>
    %cst_36 = arith.constant 0.000000e+00 : f32
    %178 = vector.broadcast %cst_36 : f32 to vector<5x1x8x8xf32>
    %179 = vector.extract_strided_slice %177 {offsets = [0, 1, 0, 0], sizes = [5, 7, 8, 8], strides = [1, 1, 1, 1]} : vector<5x8x8x8xf32> to vector<5x7x8x8xf32>
    %180 = tpu.concatenate %179, %178 in 1 : vector<5x7x8x8xf32>, vector<5x1x8x8xf32> -> vector<5x8x8x8xf32>
    %181 = arith.addf %177, %180 : vector<5x8x8x8xf32>
    %182 = vector.extract_strided_slice %177 {offsets = [0, 0, 0, 0], sizes = [5, 7, 8, 8], strides = [1, 1, 1, 1]} : vector<5x8x8x8xf32> to vector<5x7x8x8xf32>
    %183 = tpu.concatenate %178, %182 in 1 : vector<5x1x8x8xf32>, vector<5x7x8x8xf32> -> vector<5x8x8x8xf32>
    %184 = arith.addf %181, %183 : vector<5x8x8x8xf32>
    %cst_37 = arith.constant 0.000000e+00 : f32
    %185 = vector.broadcast %cst_37 : f32 to vector<5x2x8x8xf32>
    %186 = vector.extract_strided_slice %177 {offsets = [0, 2, 0, 0], sizes = [5, 6, 8, 8], strides = [1, 1, 1, 1]} : vector<5x8x8x8xf32> to vector<5x6x8x8xf32>
    %187 = tpu.concatenate %186, %185 in 1 : vector<5x6x8x8xf32>, vector<5x2x8x8xf32> -> vector<5x8x8x8xf32>
    %188 = arith.addf %184, %187 : vector<5x8x8x8xf32>
    %189 = vector.extract_strided_slice %177 {offsets = [0, 0, 0, 0], sizes = [5, 6, 8, 8], strides = [1, 1, 1, 1]} : vector<5x8x8x8xf32> to vector<5x6x8x8xf32>
    %190 = tpu.concatenate %185, %189 in 1 : vector<5x2x8x8xf32>, vector<5x6x8x8xf32> -> vector<5x8x8x8xf32>
    %191 = arith.addf %188, %190 : vector<5x8x8x8xf32>
    %192 = vector.extract_strided_slice %191 {offsets = [0, 0, 0, 0], sizes = [1, 8, 8, 8], strides = [1, 1, 1, 1]} : vector<5x8x8x8xf32> to vector<1x8x8x8xf32>
    %193 = vector.extract_strided_slice %191 {offsets = [1, 0, 0, 0], sizes = [1, 8, 8, 8], strides = [1, 1, 1, 1]} : vector<5x8x8x8xf32> to vector<1x8x8x8xf32>
    %194 = vector.extract_strided_slice %191 {offsets = [2, 0, 0, 0], sizes = [1, 8, 8, 8], strides = [1, 1, 1, 1]} : vector<5x8x8x8xf32> to vector<1x8x8x8xf32>
    %195 = vector.extract_strided_slice %191 {offsets = [3, 0, 0, 0], sizes = [1, 8, 8, 8], strides = [1, 1, 1, 1]} : vector<5x8x8x8xf32> to vector<1x8x8x8xf32>
    %196 = vector.extract_strided_slice %191 {offsets = [4, 0, 0, 0], sizes = [1, 8, 8, 8], strides = [1, 1, 1, 1]} : vector<5x8x8x8xf32> to vector<1x8x8x8xf32>
    %cst_38 = arith.constant 8.000000e-03 : f32
    %197 = vector.broadcast %cst_38 : f32 to vector<1x8x8x8xf32>
    %198 = arith.mulf %192, %197 : vector<1x8x8x8xf32>
    %cst_39 = arith.constant 8.000000e-03 : f32
    %199 = vector.broadcast %cst_39 : f32 to vector<1x8x8x8xf32>
    %200 = arith.mulf %193, %199 : vector<1x8x8x8xf32>
    %201 = arith.mulf %200, %192 : vector<1x8x8x8xf32>
    %202 = arith.subf %196, %201 : vector<1x8x8x8xf32>
    %203 = arith.mulf %198, %193 : vector<1x8x8x8xf32>
    %204 = arith.subf %202, %203 : vector<1x8x8x8xf32>
    %205 = arith.mulf %198, %200 : vector<1x8x8x8xf32>
    %cst_40 = arith.constant 1.250000e+02 : f32
    %206 = vector.broadcast %cst_40 : f32 to vector<1x8x8x8xf32>
    %207 = arith.mulf %205, %206 : vector<1x8x8x8xf32>
    %208 = arith.addf %204, %207 : vector<1x8x8x8xf32>
    %cst_41 = arith.constant 2.000000e+00 : f32
    %209 = vector.broadcast %cst_41 : f32 to vector<1x8x8x8xf32>
    %210 = arith.mulf %209, %198 : vector<1x8x8x8xf32>
    %211 = arith.mulf %210, %192 : vector<1x8x8x8xf32>
    %212 = arith.subf %194, %211 : vector<1x8x8x8xf32>
    %213 = arith.mulf %198, %198 : vector<1x8x8x8xf32>
    %cst_42 = arith.constant 1.250000e+02 : f32
    %214 = vector.broadcast %cst_42 : f32 to vector<1x8x8x8xf32>
    %215 = arith.mulf %213, %214 : vector<1x8x8x8xf32>
    %216 = arith.addf %212, %215 : vector<1x8x8x8xf32>
    %cst_43 = arith.constant 2.000000e+00 : f32
    %217 = vector.broadcast %cst_43 : f32 to vector<1x8x8x8xf32>
    %218 = arith.mulf %217, %200 : vector<1x8x8x8xf32>
    %219 = arith.mulf %218, %193 : vector<1x8x8x8xf32>
    %220 = arith.subf %195, %219 : vector<1x8x8x8xf32>
    %221 = arith.mulf %200, %200 : vector<1x8x8x8xf32>
    %cst_44 = arith.constant 1.250000e+02 : f32
    %222 = vector.broadcast %cst_44 : f32 to vector<1x8x8x8xf32>
    %223 = arith.mulf %221, %222 : vector<1x8x8x8xf32>
    %224 = arith.addf %220, %223 : vector<1x8x8x8xf32>
    %225 = arith.mulf %208, %208 : vector<1x8x8x8xf32>
    %226 = arith.mulf %216, %224 : vector<1x8x8x8xf32>
    %cst_45 = arith.constant 9.99999993E-9 : f32
    %227 = vector.broadcast %cst_45 : f32 to vector<1x8x8x8xf32>
    %228 = arith.addf %226, %227 : vector<1x8x8x8xf32>
    %229 = tpu.reciprocal %228 {approx = true} : vector<1x8x8x8xf32> -> vector<1x8x8x8xf32>
    %230 = arith.mulf %225, %229 : vector<1x8x8x8xf32>
    %231 = vector.shape_cast %230 : vector<1x8x8x8xf32> to vector<1x1x8x8x8xf32>
    %cst_46 = arith.constant dense<0.000000e+00> : vector<1xf32>
    %232 = vector.multi_reduction <add>, %231, %cst_46 [1, 2, 3, 4] : vector<1x1x8x8x8xf32> to vector<1xf32>
    %233 = vector.shape_cast %232 : vector<1xf32> to vector<1x1x1x1x1xf32>
    %234 = vector.extract %233[0, 0, 0, 0, 0] : f32 from vector<1x1x1x1x1xf32>
    %cst_47 = arith.constant -4.8828125E-4 : f32
    %235 = arith.mulf %cst_47, %234 : f32
    %236 = arith.addf %94, %235 : f32
    %237 = tpu.concatenate %149, %150 in 0 : vector<1x8x8x8xf32>, vector<1x8x8x8xf32> -> vector<2x8x8x8xf32>
    %238 = vector.shape_cast %237 : vector<2x8x8x8xf32> to vector<128x8xf32>
    %239 = tpu.iota {dimensions = array<i32: 0>} : vector<8x4xi32>
    %240 = tpu.iota {dimensions = array<i32: 1>} : vector<8x4xi32>
    %c2_i32_48 = arith.constant 2 : i32
    %241 = vector.broadcast %c2_i32_48 : i32 to vector<8x4xi32>
    %242 = arith.muli %241, %240 : vector<8x4xi32>
    %243 = arith.subi %239, %242 : vector<8x4xi32>
    %244 = math.absi %243 : vector<8x4xi32>
    %c1_i32_49 = arith.constant 1 : i32
    %245 = vector.broadcast %c1_i32_49 : i32 to vector<8x4xi32>
    %246 = arith.cmpi sle, %244, %245 : vector<8x4xi32>
    %247 = arith.extui %246 : vector<8x4xi1> to vector<8x4xi32>
    %248 = arith.sitofp %247 : vector<8x4xi32> to vector<8x4xf32>
    %cst_50 = arith.constant dense<0.000000e+00> : vector<4xf32>
    %249 = vector.multi_reduction <add>, %248, %cst_50 [0] : vector<8x4xf32> to vector<4xf32>
    %250 = vector.shape_cast %249 : vector<4xf32> to vector<1x4xf32>
    %251 = vector.broadcast %250 : vector<1x4xf32> to vector<8x4xf32>
    %252 = arith.divf %248, %251 : vector<8x4xf32>
    %cst_51 = arith.constant dense<0.000000e+00> : vector<128x4xf32>
    %253 = tpu.matmul %238, %252, %cst_51 {dimension_numbers = #tpu.dot_dimension_numbers<[1], [0], [0], [1], [0, 0, 1, 1], [], []>} : vector<128x8xf32>, vector<8x4xf32>, vector<128x4xf32> -> vector<128x4xf32>
    %254 = vector.shape_cast %253 : vector<128x4xf32> to vector<16x8x4xf32>
    %255 = tpu.iota {dimensions = array<i32: 0>} : vector<4x8xi32>
    %256 = tpu.iota {dimensions = array<i32: 1>} : vector<4x8xi32>
    %c2_i32_52 = arith.constant 2 : i32
    %257 = vector.broadcast %c2_i32_52 : i32 to vector<4x8xi32>
    %258 = arith.muli %257, %255 : vector<4x8xi32>
    %259 = arith.subi %256, %258 : vector<4x8xi32>
    %260 = math.absi %259 : vector<4x8xi32>
    %c1_i32_53 = arith.constant 1 : i32
    %261 = vector.broadcast %c1_i32_53 : i32 to vector<4x8xi32>
    %262 = arith.cmpi sle, %260, %261 : vector<4x8xi32>
    %263 = arith.extui %262 : vector<4x8xi1> to vector<4x8xi32>
    %264 = arith.sitofp %263 : vector<4x8xi32> to vector<4x8xf32>
    %cst_54 = arith.constant dense<0.000000e+00> : vector<4xf32>
    %265 = vector.multi_reduction <add>, %264, %cst_54 [1] : vector<4x8xf32> to vector<4xf32>
    %266 = vector.shape_cast %265 : vector<4xf32> to vector<4x1xf32>
    %267 = vector.broadcast %266 : vector<4x1xf32> to vector<4x8xf32>
    %268 = arith.divf %264, %267 : vector<4x8xf32>
    %269 = vector.shape_cast %268 : vector<4x8xf32> to vector<1x4x8xf32>
    %270 = vector.broadcast %269 : vector<1x4x8xf32> to vector<16x4x8xf32>
    "tpu.trace_start"() <{level = 10 : i32, message = "geh,ghw->gew"}> : () -> ()
    %cst_55 = arith.constant dense<0.000000e+00> : vector<16x4x4xf32>
    %271 = tpu.matmul %270, %254, %cst_55 {dimension_numbers = #tpu.dot_dimension_numbers<[2], [1], [1], [2], [0, 0, 0, 1, 1, 2], [0], [0]>} : vector<16x4x8xf32>, vector<16x8x4xf32>, vector<16x4x4xf32> -> vector<16x4x4xf32>
    "tpu.trace_stop"() : () -> ()
    %272 = vector.shape_cast %271 : vector<16x4x4xf32> to vector<2x8x4x4xf32>
    %cst_56 = arith.constant 0.000000e+00 : f32
    %273 = vector.broadcast %cst_56 : f32 to vector<2x1x4x4xf32>
    %274 = vector.extract_strided_slice %272 {offsets = [0, 1, 0, 0], sizes = [2, 7, 4, 4], strides = [1, 1, 1, 1]} : vector<2x8x4x4xf32> to vector<2x7x4x4xf32>
    %275 = tpu.concatenate %274, %273 in 1 : vector<2x7x4x4xf32>, vector<2x1x4x4xf32> -> vector<2x8x4x4xf32>
    %276 = arith.addf %272, %275 : vector<2x8x4x4xf32>
    %277 = vector.extract_strided_slice %272 {offsets = [0, 0, 0, 0], sizes = [2, 7, 4, 4], strides = [1, 1, 1, 1]} : vector<2x8x4x4xf32> to vector<2x7x4x4xf32>
    %278 = tpu.concatenate %273, %277 in 1 : vector<2x1x4x4xf32>, vector<2x7x4x4xf32> -> vector<2x8x4x4xf32>
    %279 = arith.addf %276, %278 : vector<2x8x4x4xf32>
    %280 = vector.shape_cast %279 : vector<2x8x4x4xf32> to vector<8x2x4x4xf32>
    %281 = vector.extract_strided_slice %280 {offsets = [0, 0, 0, 0], sizes = [8, 1, 4, 4], strides = [1, 1, 1, 1]} : vector<8x2x4x4xf32> to vector<8x1x4x4xf32>
    %282 = vector.shape_cast %281 : vector<8x1x4x4xf32> to vector<8x4x4xf32>
    %283 = vector.shape_cast %282 : vector<8x4x4xf32> to vector<2x4x4x4xf32>
    %284 = vector.extract_strided_slice %283 {offsets = [0, 0, 0, 0], sizes = [2, 1, 4, 4], strides = [1, 1, 1, 1]} : vector<2x4x4x4xf32> to vector<2x1x4x4xf32>
    %cst_57 = arith.constant 5.000000e-01 : f32
    %285 = vector.broadcast %cst_57 : f32 to vector<2x1x4x4xf32>
    %286 = arith.mulf %284, %285 : vector<2x1x4x4xf32>
    %287 = vector.extract_strided_slice %283 {offsets = [0, 1, 0, 0], sizes = [2, 3, 4, 4], strides = [1, 1, 1, 1]} : vector<2x4x4x4xf32> to vector<2x3x4x4xf32>
    %cst_58 = arith.constant 0.333333343 : f32
    %288 = vector.broadcast %cst_58 : f32 to vector<2x3x4x4xf32>
    %289 = arith.mulf %287, %288 : vector<2x3x4x4xf32>
    %290 = tpu.concatenate %286, %289 in 1 : vector<2x1x4x4xf32>, vector<2x3x4x4xf32> -> vector<2x4x4x4xf32>
    %291 = vector.extract_strided_slice %290 {offsets = [0, 0, 0, 0], sizes = [1, 4, 4, 4], strides = [1, 1, 1, 1]} : vector<2x4x4x4xf32> to vector<1x4x4x4xf32>
    %292 = vector.extract_strided_slice %290 {offsets = [1, 0, 0, 0], sizes = [1, 4, 4, 4], strides = [1, 1, 1, 1]} : vector<2x4x4x4xf32> to vector<1x4x4x4xf32>
    %293 = arith.mulf %291, %291 : vector<1x4x4x4xf32>
    %294 = arith.mulf %292, %292 : vector<1x4x4x4xf32>
    %295 = arith.mulf %291, %292 : vector<1x4x4x4xf32>
    %296 = tpu.concatenate %291, %292, %293, %294, %295 in 0 : vector<1x4x4x4xf32>, vector<1x4x4x4xf32>, vector<1x4x4x4xf32>, vector<1x4x4x4xf32>, vector<1x4x4x4xf32> -> vector<5x4x4x4xf32>
    %297 = vector.shape_cast %296 : vector<5x4x4x4xf32> to vector<80x4xf32>
    %298 = tpu.iota {dimensions = array<i32: 0>} : vector<4x4xi32>
    %299 = tpu.iota {dimensions = array<i32: 1>} : vector<4x4xi32>
    %300 = arith.subi %298, %299 : vector<4x4xi32>
    %301 = math.absi %300 : vector<4x4xi32>
    %c1_i32_59 = arith.constant 1 : i32
    %302 = vector.broadcast %c1_i32_59 : i32 to vector<4x4xi32>
    %303 = arith.cmpi sle, %301, %302 : vector<4x4xi32>
    %304 = arith.extui %303 : vector<4x4xi1> to vector<4x4xi32>
    %305 = arith.sitofp %304 : vector<4x4xi32> to vector<4x4xf32>
    %cst_60 = arith.constant dense<0.000000e+00> : vector<80x4xf32>
    %306 = tpu.matmul %297, %305, %cst_60 {dimension_numbers = #tpu.dot_dimension_numbers<[1], [0], [0], [1], [0, 0, 1, 1], [], []>} : vector<80x4xf32>, vector<4x4xf32>, vector<80x4xf32> -> vector<80x4xf32>
    %307 = vector.shape_cast %306 : vector<80x4xf32> to vector<20x4x4xf32>
    %308 = tpu.iota {dimensions = array<i32: 0>} : vector<4x4xi32>
    %309 = tpu.iota {dimensions = array<i32: 1>} : vector<4x4xi32>
    %310 = arith.subi %308, %309 : vector<4x4xi32>
    %311 = math.absi %310 : vector<4x4xi32>
    %c1_i32_61 = arith.constant 1 : i32
    %312 = vector.broadcast %c1_i32_61 : i32 to vector<4x4xi32>
    %313 = arith.cmpi sle, %311, %312 : vector<4x4xi32>
    %314 = arith.extui %313 : vector<4x4xi1> to vector<4x4xi32>
    %315 = arith.sitofp %314 : vector<4x4xi32> to vector<4x4xf32>
    %316 = vector.shape_cast %315 : vector<4x4xf32> to vector<1x4x4xf32>
    %317 = vector.broadcast %316 : vector<1x4x4xf32> to vector<20x4x4xf32>
    "tpu.trace_start"() <{level = 10 : i32, message = "geh,ghw->gew"}> : () -> ()
    %cst_62 = arith.constant dense<0.000000e+00> : vector<20x4x4xf32>
    %318 = tpu.matmul %317, %307, %cst_62 {dimension_numbers = #tpu.dot_dimension_numbers<[2], [1], [1], [2], [0, 0, 0, 1, 1, 2], [0], [0]>} : vector<20x4x4xf32>, vector<20x4x4xf32>, vector<20x4x4xf32> -> vector<20x4x4xf32>
    "tpu.trace_stop"() : () -> ()
    %319 = vector.shape_cast %318 : vector<20x4x4xf32> to vector<5x4x4x4xf32>
    %cst_63 = arith.constant 0.000000e+00 : f32
    %320 = vector.broadcast %cst_63 : f32 to vector<5x1x4x4xf32>
    %321 = vector.extract_strided_slice %319 {offsets = [0, 1, 0, 0], sizes = [5, 3, 4, 4], strides = [1, 1, 1, 1]} : vector<5x4x4x4xf32> to vector<5x3x4x4xf32>
    %322 = tpu.concatenate %321, %320 in 1 : vector<5x3x4x4xf32>, vector<5x1x4x4xf32> -> vector<5x4x4x4xf32>
    %323 = arith.addf %319, %322 : vector<5x4x4x4xf32>
    %324 = vector.extract_strided_slice %319 {offsets = [0, 0, 0, 0], sizes = [5, 3, 4, 4], strides = [1, 1, 1, 1]} : vector<5x4x4x4xf32> to vector<5x3x4x4xf32>
    %325 = tpu.concatenate %320, %324 in 1 : vector<5x1x4x4xf32>, vector<5x3x4x4xf32> -> vector<5x4x4x4xf32>
    %326 = arith.addf %323, %325 : vector<5x4x4x4xf32>
    %327 = vector.extract_strided_slice %326 {offsets = [0, 0, 0, 0], sizes = [1, 4, 4, 4], strides = [1, 1, 1, 1]} : vector<5x4x4x4xf32> to vector<1x4x4x4xf32>
    %328 = vector.extract_strided_slice %326 {offsets = [1, 0, 0, 0], sizes = [1, 4, 4, 4], strides = [1, 1, 1, 1]} : vector<5x4x4x4xf32> to vector<1x4x4x4xf32>
    %329 = vector.extract_strided_slice %326 {offsets = [2, 0, 0, 0], sizes = [1, 4, 4, 4], strides = [1, 1, 1, 1]} : vector<5x4x4x4xf32> to vector<1x4x4x4xf32>
    %330 = vector.extract_strided_slice %326 {offsets = [3, 0, 0, 0], sizes = [1, 4, 4, 4], strides = [1, 1, 1, 1]} : vector<5x4x4x4xf32> to vector<1x4x4x4xf32>
    %331 = vector.extract_strided_slice %326 {offsets = [4, 0, 0, 0], sizes = [1, 4, 4, 4], strides = [1, 1, 1, 1]} : vector<5x4x4x4xf32> to vector<1x4x4x4xf32>
    %cst_64 = arith.constant 0.0370370373 : f32
    %332 = vector.broadcast %cst_64 : f32 to vector<1x4x4x4xf32>
    %333 = arith.mulf %327, %332 : vector<1x4x4x4xf32>
    %cst_65 = arith.constant 0.0370370373 : f32
    %334 = vector.broadcast %cst_65 : f32 to vector<1x4x4x4xf32>
    %335 = arith.mulf %328, %334 : vector<1x4x4x4xf32>
    %336 = arith.mulf %335, %327 : vector<1x4x4x4xf32>
    %337 = arith.subf %331, %336 : vector<1x4x4x4xf32>
    %338 = arith.mulf %333, %328 : vector<1x4x4x4xf32>
    %339 = arith.subf %337, %338 : vector<1x4x4x4xf32>
    %340 = arith.mulf %333, %335 : vector<1x4x4x4xf32>
    %cst_66 = arith.constant 2.700000e+01 : f32
    %341 = vector.broadcast %cst_66 : f32 to vector<1x4x4x4xf32>
    %342 = arith.mulf %340, %341 : vector<1x4x4x4xf32>
    %343 = arith.addf %339, %342 : vector<1x4x4x4xf32>
    %cst_67 = arith.constant 2.000000e+00 : f32
    %344 = vector.broadcast %cst_67 : f32 to vector<1x4x4x4xf32>
    %345 = arith.mulf %344, %333 : vector<1x4x4x4xf32>
    %346 = arith.mulf %345, %327 : vector<1x4x4x4xf32>
    %347 = arith.subf %329, %346 : vector<1x4x4x4xf32>
    %348 = arith.mulf %333, %333 : vector<1x4x4x4xf32>
    %cst_68 = arith.constant 2.700000e+01 : f32
    %349 = vector.broadcast %cst_68 : f32 to vector<1x4x4x4xf32>
    %350 = arith.mulf %348, %349 : vector<1x4x4x4xf32>
    %351 = arith.addf %347, %350 : vector<1x4x4x4xf32>
    %cst_69 = arith.constant 2.000000e+00 : f32
    %352 = vector.broadcast %cst_69 : f32 to vector<1x4x4x4xf32>
    %353 = arith.mulf %352, %335 : vector<1x4x4x4xf32>
    %354 = arith.mulf %353, %328 : vector<1x4x4x4xf32>
    %355 = arith.subf %330, %354 : vector<1x4x4x4xf32>
    %356 = arith.mulf %335, %335 : vector<1x4x4x4xf32>
    %cst_70 = arith.constant 2.700000e+01 : f32
    %357 = vector.broadcast %cst_70 : f32 to vector<1x4x4x4xf32>
    %358 = arith.mulf %356, %357 : vector<1x4x4x4xf32>
    %359 = arith.addf %355, %358 : vector<1x4x4x4xf32>
    %360 = arith.mulf %343, %343 : vector<1x4x4x4xf32>
    %361 = arith.mulf %351, %359 : vector<1x4x4x4xf32>
    %cst_71 = arith.constant 9.99999993E-9 : f32
    %362 = vector.broadcast %cst_71 : f32 to vector<1x4x4x4xf32>
    %363 = arith.addf %361, %362 : vector<1x4x4x4xf32>
    %364 = tpu.reciprocal %363 {approx = true} : vector<1x4x4x4xf32> -> vector<1x4x4x4xf32>
    %365 = arith.mulf %360, %364 : vector<1x4x4x4xf32>
    %366 = vector.shape_cast %365 : vector<1x4x4x4xf32> to vector<1x1x4x4x4xf32>
    %cst_72 = arith.constant dense<0.000000e+00> : vector<1xf32>
    %367 = vector.multi_reduction <add>, %366, %cst_72 [1, 2, 3, 4] : vector<1x1x4x4x4xf32> to vector<1xf32>
    %368 = vector.shape_cast %367 : vector<1xf32> to vector<1x1x1x1x1xf32>
    %369 = vector.extract %368[0, 0, 0, 0, 0] : f32 from vector<1x1x1x1x1xf32>
    %cst_73 = arith.constant -0.001953125 : f32
    %370 = arith.mulf %cst_73, %369 : f32
    %371 = arith.addf %236, %370 : f32
    %372 = vector.broadcast %371 : f32 to vector<1x1x1xf32>
    %c0_74 = arith.constant 0 : index
    %c0_75 = arith.constant 0 : index
    %c0_76 = arith.constant 0 : index
    %373 = vector.load %arg3[%c0_74, %c0_75, %c0_76] : memref<1x1x1xf32, #tpu.memory_space<vmem>>, vector<1x1x1xf32>
    tpu.vector_store %arg3[%c0_74, %c0_75, %c0_76], %372 {strides = array<i32>} : memref<1x1x1xf32, #tpu.memory_space<vmem>>, vector<1x1x1xf32>,
    return
  }
  func.func @transform_0(%arg0: i32) -> (i32, i32, i32, i32) {
    %c0_i32 = arith.constant 0 : i32
    %c0_i32_0 = arith.constant 0 : i32
    %c0_i32_1 = arith.constant 0 : i32
    %c0_i32_2 = arith.constant 0 : i32
    return %arg0, %c0_i32, %c0_i32_0, %c0_i32_1 : i32, i32, i32, i32
  }
  func.func @transform_1(%arg0: i32) -> (i32, i32, i32, i32) {
    %c0_i32 = arith.constant 0 : i32
    %c0_i32_0 = arith.constant 0 : i32
    %c0_i32_1 = arith.constant 0 : i32
    %c0_i32_2 = arith.constant 0 : i32
    return %arg0, %c0_i32, %c0_i32_0, %c0_i32_1 : i32, i32, i32, i32
  }
  func.func @transform_2(%arg0: i32) -> (i32, i32, i32) {
    %c0_i32 = arith.constant 0 : i32
    %c0_i32_0 = arith.constant 0 : i32
    %c0_i32_1 = arith.constant 0 : i32
    return %arg0, %c0_i32, %c0_i32_0 : i32, i32, i32
  }
}

</mosaic_0001>

<bundles_post_ra>
// kernel: multi_resolution_ncc.1
= control target key start
LH: loop header
LB: loop body
LE: loop exit
PB: predicated region body
PF: predicated region fallthrough
CT: control target
= control target key end

     0   :  { %7 = vsyncpa [#allocation3], 0  ;;  %s28288_s0 = inlined_call_operand.hbm [shape: f32[2,16,16,16], index: 0, kind: input, shape index: {}]   ;;  %s28289_s1 = inlined_call_operand.hbm [shape: f32[2,16,16,16], index: 1, kind: input, shape index: {}]   ;;  %s28290_s2 = inlined_call_operand.vmem [shape: f32[2,1,1], index: 2, kind: output, shape index: {}]  }
   0x1   :  { %9 = vsyncpa [#allocation3 + $0x1], 0 }
   0x2   :  { %10 = vsyncpa [#allocation5], 0 }
   0x3   :  { %12 = vsyncpa [#allocation5 + $0x1], 0  ;;  %s22978_s9 = smov 0   ;;  %s22980_s10 = smov 0  }
   0x4   :  { %s22982_s11 = smov 0   ;;  %s22984_s12 = smov 0  }
   0x5 LB: > { %s22997_s13 = sadd.s32 4294967295, %s22952_s12   ;;  %s23000_s14 = sadd.s32 1, %s22952_s12   ;;  %s22952_s12 = sphi %s22984_s12, %s29252_s12   ;;  %s22948_s11 = sphi %s22982_s11, %s29251_s11   ;;  %s22944_s10 = sphi %s22980_s10, %s29250_s10   ;;  %s22940_s9 = sphi %s22978_s9, %s29249_s9  }
   0x6   : > { %s22_s15 = ssub.s32 %s22952_s12, %s23000_s14  ;;  %s25_s16 = sadd.s32 1, %s22948_s11 }
   0x7   : > { %p23_p0 = scmp.eq.s32.totalorder %s22_s15, 0  ;;  %p32_p1 = scmp.ne.s32.totalorder %s22948_s11, %s22944_s10 }
   0x8   : > { %p33_p2 = scmp.eq.s32.totalorder %s22952_s12, 0  ;;  %p38_p3 = scmp.ne.s32.totalorder %s22944_s10, %s22940_s9 }
   0x9   : > { %s23010_s17 = scalar_select %p23_p0, %s22948_s11, %s25_s16  }
   0xa   : > { %p34_p4 = por %p33_p2, %p32_p1  ;;  %p39_p5 = scmp.eq.s32.totalorder %s22997_s13, 0 }
   0xb   : > { %p22654_p6 = scmp.lt.s32.totalorder %s22952_s12, 2  ;;  %s23019_s19 = sand.u32 1, %s22948_s11  }
   0xc   : > { %p23014_p7 = por %p39_p5, %p38_p3  ;;  %s19128_s20 = sshll.u32 %s23019_s19, 8 }
   0xd   : > { %s19733_s21 = sshll.u32 %s22952_s12, 12  ;;  %s118_s25 = scalar_lea.vmem [#allocation2], %s19128_s20 }
   0xe   : > { %s28571_s18 = scalar_select %p23014_p7, 1, 0 }
   0xf   : > { %s23028_s24 = scalar_lea.hbm %s28288_s0, %s19733_s21  ;;  %s125_s26 = sshll.u32 %s118_s25, 4  ;;  %s23032_s26 = int_to_ptr.vmem [resolvable:$true] %s125_s26 }
  0x10   : > { %p23034_p8 = pnand %p22654_p6, %p34_p4  ;;  %s115_s28 = scalar_lea.sflag [#allocation3], %s23019_s19 }
  0x11   : > { %s22854_s29 = scalar_lea.hbm %s23028_s24, 4096  ;;  %s22859_s4 = scalar_lea.hbm %s28288_s0, 8192 }
  0x12   : > { %p22855_p10 = scmp.ne.s32.totalorder %s23028_s24, %s22854_s29  ;;  %p22856_p11 = pneg %p23034_p8 }
  0x13   : > { %p22860_p0 = scmp.lt.u32.totalorder %s23028_s24, %s28288_s0  ;;  %p22861_p1 = scmp.lt.u32.totalorder %s22859_s4, %s22854_s29 }
  0x14   : > { %p22857_p12 = pnand %p22856_p11, %p22855_p10  ;;  %p22863_p3 = scmp.lt.u32.totalorder %s22854_s29, %s23028_s24 }
  0x15   : > { %p22862_p2 = por %p22861_p1, %p22860_p0 }
  0x16   : > { %p22858_p13 = pneg %p22857_p12 }
  0x17   : > { %p22864_p4 = por %p22863_p3, %p22862_p2 }
  0x19   : > { %p22865_p5 = pnand %p22864_p4, %p22858_p13 }
  0x1b   : > { %22868 = shalt.err (!%p22865_p5)
}
  0x1c   : > { %s22869_s7 = scalar_lea.vmem %s23032_s26, 4096  ;;  %s22954_s8 = smov [#allocation2]  }
  0x1d   : > { %p22870_p6 = scmp.ne.s32.totalorder %s23032_s26, %s22869_s7  ;;  %s22874_s9 = sshll.u32 %s22954_s8, 4  ;;  %s22875_s9 = int_to_ptr.vmem [resolvable:$false] %s22874_s9 }
  0x1e   : > { %s22876_s15 = scalar_lea.vmem %s22875_s9, 8192  ;;  %p22877_p9 = scmp.lt.s32.totalorder %s23032_s26, %s22875_s9 }
  0x1f   : > { %p22872_p10 = pnand %p22870_p6, %p22856_p11  ;;  %p22878_p0 = scmp.lt.s32.totalorder %s22876_s15, %s22869_s7 }
  0x21   : > { %p22873_p12 = pneg %p22872_p10  ;;  %p22879_p1 = por %p22878_p0, %p22877_p9 }
  0x23   : > { %p22880_p2 = pnand %p22879_p1, %p22873_p12 }
  0x25   : > { %22883 = shalt.err (!%p22880_p2)
}
  0x26   : > { %s22955_s16 = smov 128   ;;  %s22956_s22 = smov 8  }
  0x27   : > { %22650 = dma.hbm_to_vmem [thread:$0]  (!%p23034_p8), %s23028_s24, 4096, %s23032_s26, %s115_s28, %s22955_s16, %s22955_s16, %s22956_s22  }
  0x28   : > { %p154_p9 = scmp.lt.s32.totalorder %s22952_s12, 3  ;;  %s23076_s29 = scalar_lea.hbm %s28289_s1, %s19733_s21 }
  0x29   : > { %p28573_p13 = scmp.ge.s32.totalorder %s22952_s12, 1  ;;  %s139_s3 = scalar_lea.vmem [#allocation4], %s19128_s20 }
  0x2a   : > { %s146_s4 = sshll.u32 %s139_s3, 4  ;;  %s136_s24 = scalar_lea.sflag [#allocation5], %s23019_s19  ;;  %s23086_s4 = int_to_ptr.vmem [resolvable:$true] %s146_s4 }
  0x2b   : > { %p23080_p3 = pnand %p28573_p13, %p154_p9  ;;  %s22884_s26 = scalar_lea.hbm %s23076_s29, 4096 }
  0x2c   : > { %p22885_p4 = scmp.ne.s32.totalorder %s23076_s29, %s22884_s26  ;;  %s22889_s28 = scalar_lea.hbm %s28289_s1, 8192 }
  0x2d   : > { %p22890_p10 = scmp.lt.u32.totalorder %s23076_s29, %s28289_s1  ;;  %p22891_p12 = scmp.lt.u32.totalorder %s22889_s28, %s22884_s26 }
  0x2e   : > { %p22887_p5 = pnand %p22885_p4, %p22856_p11  ;;  %p22893_p1 = scmp.lt.u32.totalorder %s22884_s26, %s23076_s29 }
  0x2f   : > { %p22892_p0 = por %p22891_p12, %p22890_p10 }
  0x30   : > { %p22888_p6 = pneg %p22887_p5 }
  0x31   : > { %p22894_p2 = por %p22893_p1, %p22892_p0 }
  0x33   : > { %p22895_p9 = pnand %p22894_p2, %p22888_p6 }
  0x35   : > { %22898 = shalt.err (!%p22895_p9)
}
  0x36   : > { %s22899_s20 = scalar_lea.vmem %s23086_s4, 4096  ;;  %s22957_s7 = smov [#allocation4]  }
  0x37   : > { %p22900_p13 = scmp.ne.s32.totalorder %s23086_s4, %s22899_s20  ;;  %s22904_s8 = sshll.u32 %s22957_s7, 4  ;;  %s22905_s8 = int_to_ptr.vmem [resolvable:$false] %s22904_s8 }
  0x38   : > { %s22906_s9 = scalar_lea.vmem %s22905_s8, 8192  ;;  %p22907_p7 = scmp.lt.s32.totalorder %s23086_s4, %s22905_s8 }
  0x39   : > { %p22902_p4 = pnand %p22900_p13, %p22856_p11  ;;  %p22908_p10 = scmp.lt.s32.totalorder %s22906_s9, %s22899_s20 }
  0x3b   : > { %p22903_p5 = pneg %p22902_p4  ;;  %p22909_p12 = por %p22908_p10, %p22907_p7 }
  0x3d   : > { %p22910_p0 = pnand %p22909_p12, %p22903_p5 }
  0x3f   : > { %22913 = shalt.err (!%p22910_p0)
}
  0x40   : > { %22653 = dma.hbm_to_vmem [thread:$0]  (!%p23034_p8), %s23076_s29, 4096, %s23086_s4, %s136_s24, %s22955_s16, %s22955_s16, %s22956_s22  }
  0x41   : > { %158 = sbr.rel (%p23080_p3) target bundleno = 2453 (0x995), region = 28 }
  0x48   : > { %s160_s15 = sand.u32 1, %s22944_s10   ;;  %p28575_p7 = scmp.ne.s32.totalorder %s28571_s18, 0 }
  0x49   : > { %s19135_s23 = sshll.u32 %s160_s15, 8  ;;  %s161_s25 = scalar_lea.sflag [#allocation3], %s160_s15 }
  0x4a   : > { %s23120_s3 = scalar_lea.vmem [#allocation2], %s19135_s23 }
  0x4b   : > { %22931 = dma.done.wait (%p28575_p7), %s161_s25, 4096  }
  0x4c   : > { %22933 = vsyncadd (%p28575_p7), %s161_s25, 4294963200  ;;  %s170_s19 = scalar_lea.sflag [#allocation5], %s160_s15  ;;  %s23126_s27 = scalar_lea.vmem [#allocation4], %s19135_s23 }
  0x4d   : > { %22935 = dma.done.wait (%p28575_p7), %s170_s19, 4096  }
  0x4e   : > { %22937 = vsyncadd (%p28575_p7), %s170_s19, 4294963200  ;;  %v360_v0 = vlaneseq  ;;  %vm379_vm0 = vcmask 130048   ;;  %v23143_v10 = vld [vmem:[%s23120_s3] sm:$0xff]  ;;  %v28292_v17 = vmov 0.0   ;;  %vm9612_vm2 = vcmask 64512   ;;  %v23167_v24 = vld [vmem:[%s23120_s3 + $0x8] sm:$0xff] }
  0x4f   : > { %28578 = vst [vmem:[#allocation10_spill] sm:$0xff] %v23143_v10  ;;  %20604 = vmatprep.mubr.msk.f32.mxu0 %vm379_vm0, %v23143_v10  ;;  %v22959_v21 = vmov 1.0|1.0   ;;  %28581 = vst [vmem:[#allocation13_spill] sm:$0xff] %v23167_v24  ;;  %v23171_v26 = vld [vmem:[%s23120_s3 + $0x10] sm:$0xff]  ;;  %v23178_v29 = vld [vmem:[%s23120_s3 + $0x18] sm:$0xff] }
  0x50   : > { %v23132_v1 = vshrl.u32 %v360_v0, 7  ;;  %v23134_v2 = vand.u32 127, %v360_v0  ;;  %v23181_v30 = vld [vmem:[%s23120_s3 + $0x20] sm:$0xff]  ;;  %v23188_v33 = vld [vmem:[%s23120_s3 + $0x28] sm:$0xff]  ;;  %v23191_v34 = vld [vmem:[%s23120_s3 + $0x30] sm:$0xff]  ;;  %vm22961_vm8 = vmmov 0  }
  0x51   : > { %v23198_v37 = vld [vmem:[%s23120_s3 + $0x38] sm:$0xff]  ;;  %v23201_v38 = vld [vmem:[%s23120_s3 + $0x40] sm:$0xff]  ;;  %v23208_v40 = vld [vmem:[%s23120_s3 + $0x48] sm:$0xff]  ;;  %vm16078_vm10 = vcmask 60416   ;;  %vm15923_vm11 = vcmask 31744   ;;  %vm17296_vm13 = vcmask 1043456  }
  0x52   : > { %28576 = vst [vmem:[#allocation8_spill] sm:$0xff] %v23132_v1  ;;  %28577 = vst [vmem:[#allocation9_spill] sm:$0xff] %v23134_v2  ;;  %v362_v3 = vadd.s32 8, %v23132_v1  ;;  %v365_v4 = vsub.s32 %v23132_v1, %v23134_v2  ;;  %v9597_v5 = vmul.u32 2, %v23134_v2  ;;  %v23211_v41 = vld [vmem:[%s23120_s3 + $0x50] sm:$0xff]  ;;  %v23218_v42 = vld [vmem:[%s23120_s3 + $0x58] sm:$0xff] }
  0x53   : > { %v23221_v43 = vld [vmem:[%s23120_s3 + $0x60] sm:$0xff]  ;;  %v23228_v44 = vld [vmem:[%s23120_s3 + $0x68] sm:$0xff]  ;;  %v23231_v46 = vld [vmem:[%s23120_s3 + $0x70] sm:$0xff]  ;;  %vm19021_vm14 = vcmask 27648   ;;  %p197_p8 = scmp.lt.s32.totalorder %s22997_s13, 1  ;;  %vm19041_vm15 = vcmask 0  }
  0x54   : > { %v366_v6 = vsub.s32 %v362_v3, %v23134_v2  ;;  %v368_v7 = vsub.s32 0, %v365_v4  ;;  %v9598_v8 = vsub.s32 %v23132_v1, %v9597_v5  ;;  %v9599_v9 = vsub.s32 %v362_v3, %v9597_v5  ;;  %v23239_v49 = vld [vmem:[%s23120_s3 + $0x78] sm:$0xff]  ;;  %v23242_v51 = vld [vmem:[%s23120_s3 + $0x80] sm:$0xff]  ;;  %v23249_v52 = vld [vmem:[%s23120_s3 + $0x88] sm:$0xff] }
  0x55   : > { %v23252_v53 = vld [vmem:[%s23120_s3 + $0x90] sm:$0xff]  ;;  %v23259_v54 = vld [vmem:[%s23120_s3 + $0x98] sm:$0xff]  ;;  %v23262_v55 = vld [vmem:[%s23120_s3 + $0xa0] sm:$0xff]  ;;  %s29254_s13 = smov (!%p197_p8, %s22997_s13), 1 }
  0x56   : > { %v23145_v11 = vmin.u32 %v368_v7, %v365_v4  ;;  %v371_v12 = vsub.s32 0, %v366_v6  ;;  %v9604_v13 = vsub.s32 0, %v9599_v9  ;;  %v9601_v14 = vsub.s32 0, %v9598_v8  ;;  %v23269_v56 = vld [vmem:[%s23120_s3 + $0xa8] sm:$0xff]  ;;  %v23272_v57 = vld [vmem:[%s23120_s3 + $0xb0] sm:$0xff]  ;;  %v23279_v58 = vld [vmem:[%s23120_s3 + $0xb8] sm:$0xff]  ;;  %s199_s21 = scalar_lea.vmem %s28290_s2, %s29254_s13 }
  0x57   : > { %v23282_v59 = vld [vmem:[%s23120_s3 + $0xc0] sm:$0xff]  ;;  %v23289_v60 = vld [vmem:[%s23120_s3 + $0xc8] sm:$0xff]  ;;  %v23292_v61 = vld [vmem:[%s23120_s3 + $0xd0] sm:$0xff] }
  0x58   : > { %28579 = vst [vmem:[#allocation11_spill] sm:$0xff] %v23145_v11  ;;  %v23149_v15 = vmin.u32 %v371_v12, %v366_v6  ;;  %vm373_vm1 = vcmp.le.s32.totalorder %v23145_v11, 3  ;;  %v19463_v16 = vmin.u32 %v9601_v14, %v9598_v8  ;;  %v19464_v19 = vmin.u32 %v9604_v13, %v9599_v9  ;;  %28582 = vst [vmem:[#allocation14_spill] sm:$0xff] %v23282_v59  ;;  %v23299_v62 = vld [vmem:[%s23120_s3 + $0xd8] sm:$0xff]  ;;  %v23302_v63 = vld [vmem:[%s23120_s3 + $0xe0] sm:$0xff] }
  0x59   : > { %v23153_v18 = vsel %vm373_vm1, 1.0, %v28292_v17  ;;  %28583 = vst [vmem:[#allocation15_spill] sm:$0xff] %v23289_v60  ;;  %28584 = vst [vmem:[#allocation16_spill] sm:$0xff] %v23292_v61  ;;  %v23309_v0 = vld [vmem:[%s23120_s3 + $0xe8] sm:$0xff]  ;;  %v23312_v3 = vld [vmem:[%s23120_s3 + $0xf0] sm:$0xff] }
  0x5a   : > { %vm374_vm3 = vcmp.le.s32.totalorder %v23149_v15, 3  ;;  %vm9606_vm4 = vcmp.le.s32.totalorder %v19463_v16, 1  ;;  %20848 = vmatprep.mubr.msk.f32.mxu1 %vm379_vm0, %v23153_v18  ;;  %vm9607_vm6 = vcmp.le.s32.totalorder %v19464_v19, 1  ;;  %28585 = vst [vmem:[#allocation17_spill] sm:$0xff] %v23299_v62  ;;  %28586 = vst [vmem:[#allocation18_spill] sm:$0xff] %v23302_v63  ;;  %v23319_v4 = vld [vmem:[%s23120_s3 + $0xf8] sm:$0xff] }
  0x5b   : > { %vm22213_vm5 = vmpackc.low %vm374_vm3, %vm373_vm1  ;;  %v23161_v20 = vsel %vm9606_vm4, 1.0, %v28292_v17  ;;  %v19466_v22 = vsel %vm9607_vm6, 1.0, %v28292_v17  ;;  %28587 = vst [vmem:[#allocation19_spill] sm:$0xff] %v23309_v0  ;;  %v23322_v5 = vld [vmem:[%s23126_s27] sm:$0xff]  ;;  %v23329_v6 = vld [vmem:[%s23126_s27 + $0x8] sm:$0xff] }
  0x5c   : > { %28580 = vst [vmem:[#allocation12_spill] sm:$0xff] %v23161_v20  ;;  %22214 = vmatprep.subr.msk.bf16.mxu0 %vm22213_vm5, %v22959_v21  ;;  %v9613_v23 = vsel %vm9612_vm2, %v23161_v20, 0.0  ;;  %v9614_v25 = vsel %vm9612_vm2, %v19466_v22, 0.0  ;;  %28588 = vst [vmem:[#allocation20_spill] sm:$0xff] %v23312_v3  ;;  %v23332_v7 = vld [vmem:[%s23126_s27 + $0x10] sm:$0xff]  ;;  %v23339_v8 = vld [vmem:[%s23126_s27 + $0x18] sm:$0xff] }
  0x5d   : > { %22216 = vmatpush3.bf16.msk.msra.mxu0 %vm22213_vm5, %v22959_v21  ;;  %v9615_v27 = vadd.f32 %v9614_v25, %v9613_v23  ;;  %28589 = vst [vmem:[#allocation21_spill] sm:$0xff] %v23319_v4  ;;  %v23342_v9 = vld [vmem:[%s23126_s27 + $0x20] sm:$0xff]  ;;  %v23349_v12 = vld [vmem:[%s23126_s27 + $0x28] sm:$0xff]  ;;  %v23352_v13 = vld [vmem:[%s23126_s27 + $0x30] sm:$0xff] }
  0x5e   : > { %v23359_v14 = vld [vmem:[%s23126_s27 + $0x38] sm:$0xff]  ;;  %v23362_v16 = vld [vmem:[%s23126_s27 + $0x40] sm:$0xff]  ;;  %v23369_v19 = vld [vmem:[%s23126_s27 + $0x48] sm:$0xff] }
  0x5f   : > { %v9616_v28 = vrot.slane %v9615_v27, 4  ;;  %v23372_v21 = vld [vmem:[%s23126_s27 + $0x50] sm:$0xff]  ;;  %v23382_v23 = vld [vmem:[%s23126_s27 + $0x60] sm:$0xff]  ;;  %v23389_v25 = vld [vmem:[%s23126_s27 + $0x68] sm:$0xff] }
  0x60   : > { %20605 = vmatmul.mubr.msk.f32.vlgmr.msra.gmra.mrb[0].mxu0 %vm379_vm0, %v23167_v24  ;;  %v23449_v17 = vld [vmem:[%s23126_s27 + $0xc8] sm:$0xff]  ;;  %v23459_v11 = vld [vmem:[%s23126_s27 + $0xd8] sm:$0xff]  ;;  %v23462_v2 = vld [vmem:[%s23126_s27 + $0xe0] sm:$0xff] }
  0x61   : > { %20607 = vmatprep.mubr.msk.f32.mxu0 %vm379_vm0, %v23171_v26  ;;  %v9617_v31 = vadd.f32 %v9616_v28, %v9615_v27  ;;  %v23392_v27 = vld [vmem:[%s23126_s27 + $0x70] sm:$0xff]  ;;  %v23399_v28 = vld [vmem:[%s23126_s27 + $0x78] sm:$0xff]  ;;  %28591 = vst [vmem:[#allocation23_spill] sm:$0xff] %v23449_v17  ;;  %28593 = vst [vmem:[#allocation25_spill] sm:$0xff] %v23459_v11 }
  0x62   : > { %28594 = vst [vmem:[#allocation26_spill] sm:$0xff] %v23462_v2  ;;  %v23469_v1 = vld [vmem:[%s23126_s27 + $0xe8] sm:$0xff] }
  0x63   : > { %v9618_v32 = vrot.slane %v9617_v31, 2  ;;  %28595 = vst [vmem:[#allocation27_spill] sm:$0xff] %v23469_v1 }
  0x64   : > { %20608 = vmatmul.mubr.msk.f32.gmra.mrb[2].mxu0 %vm379_vm0, %v23178_v29 }
  0x65   : > { %20610 = vmatprep.mubr.msk.f32.mxu0 %vm379_vm0, %v23181_v30  ;;  %v9619_v35 = vadd.f32 %v9618_v32, %v9617_v31  ;;  %v23402_v31 = vld [vmem:[%s23126_s27 + $0x80] sm:$0xff]  ;;  %v23409_v32 = vld [vmem:[%s23126_s27 + $0x88] sm:$0xff] }
  0x67   : > { %v9620_v36 = vrot.slane %v9619_v35, 1 }
  0x68   : > { %20611 = vmatmul.mubr.msk.f32.gmra.mrb[4].mxu0 %vm379_vm0, %v23188_v33 }
  0x69   : > { %20613 = vmatprep.mubr.msk.f32.mxu0 %vm379_vm0, %v23191_v34  ;;  %v9621_v39 = vadd.f32 %v9620_v36, %v9619_v35  ;;  %v23412_v35 = vld [vmem:[%s23126_s27 + $0x90] sm:$0xff]  ;;  %v23419_v36 = vld [vmem:[%s23126_s27 + $0x98] sm:$0xff] }
  0x6b   : > { %22694 = vrcp.f32 %v9621_v39  ;;  %v23422_v39 = vld [vmem:[%s23126_s27 + $0xa0] sm:$0xff] }
  0x6c   : > { %20614 = vmatmul.mubr.msk.f32.gmra.mrb[6].mxu0 %vm379_vm0, %v23198_v37 }
  0x6d   : > { %20616 = vmatprep.mubr.msk.f32.mxu0 %vm379_vm0, %v23201_v38 }
  0x70   : > { %20617 = vmatmul.mubr.msk.f32.gmra.mrb[8].mxu0 %vm379_vm0, %v23208_v40 }
  0x71   : > { %20619 = vmatprep.mubr.msk.f32.mxu0 %vm379_vm0, %v23211_v41 }
  0x74   : > { %20620 = vmatmul.mubr.msk.f32.gmra.mrb[10].mxu0 %vm379_vm0, %v23218_v42 }
  0x75   : > { %20622 = vmatprep.mubr.msk.f32.mxu0 %vm379_vm0, %v23221_v43  ;;  %v22695_v45 = vpop.eup %22694 }
  0x76   : > { %v9623_v47 = vmul.f32 %v22695_v45, %v23161_v20  ;;  %v9624_v48 = vmul.f32 %v22695_v45, %v19466_v22  ;;  %v23379_v22 = vld [vmem:[%s23126_s27 + $0x58] sm:$0xff]  ;;  %v23429_v45 = vld [vmem:[%s23126_s27 + $0xa8] sm:$0xff]  ;;  %v23452_v20 = vld [vmem:[%s23126_s27 + $0xd0] sm:$0xff] }
  0x77   : > { %28592 = vst [vmem:[#allocation24_spill] sm:$0xff] %v23452_v20 }
  0x78   : > { %20623 = vmatmul.mubr.msk.f32.gmra.mrb[12].mxu0 %vm379_vm0, %v23228_v44  ;;  %v22537_v50 = vpack.c.bf16 %v9624_v48, %v9623_v47  ;;  %v23432_v47 = vld [vmem:[%s23126_s27 + $0xb0] sm:$0xff]  ;;  %v23439_v48 = vld [vmem:[%s23126_s27 + $0xb8] sm:$0xff] }
  0x79   : > { %20625 = vmatprep.mubr.msk.f32.mxu0 %vm379_vm0, %v23231_v46 }
  0x7a   : > { %22538 = vmatprep.subr.bf16.mxu0 %v22537_v50 }
  0x7b   : > { %22540 = vmatpush3.bf16.msra.mxu0 %v22537_v50  ;;  %v23442_v50 = vld [vmem:[%s23126_s27 + $0xc0] sm:$0xff] }
  0x7c   : > { %20626 = vmatmul.mubr.msk.f32.gmra.mrb[14].mxu0 %vm379_vm0, %v23239_v49  ;;  %28590 = vst [vmem:[#allocation22_spill] sm:$0xff] %v23442_v50 }
  0x7d   : > { %20628 = vmatprep.mubr.msk.f32.mxu0 %vm379_vm0, %v23242_v51 }
  0x80   : > { %20629 = vmatmul.mubr.msk.f32.gmra.mrb[16].mxu0 %vm379_vm0, %v23249_v52 }
  0x81   : > { %20631 = vmatprep.mubr.msk.f32.mxu0 %vm379_vm0, %v23252_v53 }
  0x84   : > { %20632 = vmatmul.mubr.msk.f32.gmra.mrb[18].mxu0 %vm379_vm0, %v23259_v54 }
  0x85   : > { %20634 = vmatprep.mubr.msk.f32.mxu0 %vm379_vm0, %v23262_v55 }
  0x88   : > { %20635 = vmatmul.mubr.msk.f32.gmra.mrb[20].mxu0 %vm379_vm0, %v23269_v56 }
  0x89   : > { %20637 = vmatprep.mubr.msk.f32.mxu0 %vm379_vm0, %v23272_v57 }
  0x8c   : > { %20638 = vmatmul.mubr.msk.f32.gmra.mrb[22].mxu0 %vm379_vm0, %v23279_v58 }
  0x8d   : > { %20640 = vmatprep.mubr.msk.f32.mxu0 %vm379_vm0, %v23282_v59 }
  0x90   : > { %20641 = vmatmul.mubr.msk.f32.gmra.mrb[24].mxu0 %vm379_vm0, %v23289_v60 }
  0x91   : > { %20643 = vmatprep.mubr.msk.f32.mxu0 %vm379_vm0, %v23292_v61 }
  0x94   : > { %20644 = vmatmul.mubr.msk.f32.gmra.mrb[26].mxu0 %vm379_vm0, %v23299_v62 }
  0x95   : > { %20646 = vmatprep.mubr.msk.f32.mxu0 %vm379_vm0, %v23302_v63 }
  0x98   : > { %20647 = vmatmul.mubr.msk.f32.gmra.mrb[28].mxu0 %vm379_vm0, %v23309_v0 }
  0x99   : > { %20649 = vmatprep.mubr.msk.f32.mxu0 %vm379_vm0, %v23312_v3 }
  0x9c   : > { %20650 = vmatmul.mubr.msk.f32.gmra.mrb[30].mxu0 %vm379_vm0, %v23319_v4 }
  0x9d   : > { %20652 = vmatprep.mubr.msk.f32.mxu0 %vm379_vm0, %v23322_v5 }
  0xa0   : > { %20653 = vmatmul.mubr.msk.f32.gmra.mrb[32].mxu0 %vm379_vm0, %v23329_v6 }
  0xa1   : > { %20655 = vmatprep.mubr.msk.f32.mxu0 %vm379_vm0, %v23332_v7 }
  0xa4   : > { %20656 = vmatmul.mubr.msk.f32.gmra.mrb[34].mxu0 %vm379_vm0, %v23339_v8 }
  0xa5   : > { %20658 = vmatprep.mubr.msk.f32.mxu0 %vm379_vm0, %v23342_v9 }
  0xa8   : > { %20659 = vmatmul.mubr.msk.f32.gmra.mrb[36].mxu0 %vm379_vm0, %v23349_v12 }
  0xa9   : > { %20661 = vmatprep.mubr.msk.f32.mxu0 %vm379_vm0, %v23352_v13 }
  0xac   : > { %20662 = vmatmul.mubr.msk.f32.gmra.mrb[38].mxu0 %vm379_vm0, %v23359_v14 }
  0xad   : > { %20664 = vmatprep.mubr.msk.f32.mxu0 %vm379_vm0, %v23362_v16 }
  0xb0   : > { %20665 = vmatmul.mubr.msk.f32.gmra.mrb[40].mxu0 %vm379_vm0, %v23369_v19 }
  0xb1   : > { %20667 = vmatprep.mubr.msk.f32.mxu0 %vm379_vm0, %v23372_v21 }
  0xb4   : > { %20668 = vmatmul.mubr.msk.f32.gmra.mrb[42].mxu0 %vm379_vm0, %v23379_v22 }
  0xb5   : > { %20670 = vmatprep.mubr.msk.f32.mxu0 %vm379_vm0, %v23382_v23 }
  0xb8   : > { %20671 = vmatmul.mubr.msk.f32.gmra.mrb[44].mxu0 %vm379_vm0, %v23389_v25 }
  0xb9   : > { %20673 = vmatprep.mubr.msk.f32.mxu0 %vm379_vm0, %v23392_v27 }
  0xbc   : > { %20674 = vmatmul.mubr.msk.f32.gmra.mrb[46].mxu0 %vm379_vm0, %v23399_v28 }
  0xbd   : > { %20676 = vmatprep.mubr.msk.f32.mxu0 %vm379_vm0, %v23402_v31 }
  0xc0   : > { %20677 = vmatmul.mubr.msk.f32.gmra.mrb[48].mxu0 %vm379_vm0, %v23409_v32 }
  0xc1   : > { %20679 = vmatprep.mubr.msk.f32.mxu0 %vm379_vm0, %v23412_v35 }
  0xc4   : > { %20680 = vmatmul.mubr.msk.f32.gmra.mrb[50].mxu0 %vm379_vm0, %v23419_v36 }
  0xc5   : > { %20682 = vmatprep.mubr.msk.f32.mxu0 %vm379_vm0, %v23422_v39 }
  0xc8   : > { %20683 = vmatmul.mubr.msk.f32.gmra.mrb[52].mxu0 %vm379_vm0, %v23429_v45 }
  0xc9   : > { %20685 = vmatprep.mubr.msk.f32.mxu0 %vm379_vm0, %v23432_v47 }
  0xcc   : > { %20686 = vmatmul.mubr.msk.f32.gmra.mrb[54].mxu0 %vm379_vm0, %v23439_v48 }
  0xcd   : > { %20688 = vmatprep.mubr.msk.f32.mxu0 %vm379_vm0, %v23442_v50  ;;  %v23472_v50 = vld [vmem:[%s23126_s27 + $0xf0] sm:$0xff] }
  0xce   : > { %28596 = vst [vmem:[#allocation28_spill] sm:$0xff] %v23472_v50 }
  0xd0   : > { %20689 = vmatmul.mubr.msk.f32.gmra.mrb[56].mxu0 %vm379_vm0, %v23449_v17  ;;  %v264_v17 = vmul.f32 %v23143_v10, %v23143_v10  ;;  %v268_v10 = vmul.f32 %v23181_v30, %v23181_v30 }
  0xd1   : > { %20691 = vmatprep.mubr.msk.f32.mxu0 %vm379_vm0, %v23452_v20  ;;  %v23479_v20 = vld [vmem:[%s23126_s27 + $0xf8] sm:$0xff] }
  0xd4   : > { %20692 = vmatmul.mubr.msk.f32.gmra.mrb[58].mxu0 %vm379_vm0, %v23459_v11  ;;  %v266_v11 = vmul.f32 %v23171_v26, %v23171_v26 }
  0xd5   : > { %20694 = vmatprep.mubr.msk.f32.mxu0 %vm379_vm0, %v23462_v2  ;;  %v265_v2 = vmul.f32 %v23167_v24, %v23167_v24  ;;  %v269_v24 = vmul.f32 %v23188_v33, %v23188_v33 }
  0xd8   : > { %20695 = vmatmul.mubr.msk.f32.gmra.mrb[60].mxu0 %vm379_vm0, %v23469_v1 }
  0xd9   : > { %20697 = vmatprep.mubr.msk.f32.mxu0 %vm379_vm0, %v23472_v50  ;;  %v267_v50 = vmul.f32 %v23178_v29, %v23178_v29 }
  0xdc   : > { %20698 = vmatmul.mubr.msk.f32.gmra.mrb[62].mxu0 %vm379_vm0, %v23479_v20 }
  0xdd   : > { %20700 = vmatprep.mubr.msk.f32.mxu0 %vm379_vm0, %v264_v17  ;;  %v270_v17 = vmul.f32 %v23191_v34, %v23191_v34 }
  0xe0   : > { %20701 = vmatmul.mubr.msk.f32.gmra.mrb[64].mxu0 %vm379_vm0, %v265_v2  ;;  %v271_v2 = vmul.f32 %v23198_v37, %v23198_v37 }
  0xe1   : > { %20703 = vmatprep.mubr.msk.f32.mxu0 %vm379_vm0, %v266_v11  ;;  %v272_v11 = vmul.f32 %v23201_v38, %v23201_v38 }
  0xe4   : > { %20704 = vmatmul.mubr.msk.f32.gmra.mrb[66].mxu0 %vm379_vm0, %v267_v50  ;;  %v273_v50 = vmul.f32 %v23208_v40, %v23208_v40 }
  0xe5   : > { %20706 = vmatprep.mubr.msk.f32.mxu0 %vm379_vm0, %v268_v10  ;;  %v274_v10 = vmul.f32 %v23211_v41, %v23211_v41 }
  0xe8   : > { %20707 = vmatmul.mubr.msk.f32.gmra.mrb[68].mxu0 %vm379_vm0, %v269_v24  ;;  %v275_v24 = vmul.f32 %v23218_v42, %v23218_v42 }
  0xe9   : > { %20709 = vmatprep.mubr.msk.f32.mxu0 %vm379_vm0, %v270_v17  ;;  %v276_v17 = vmul.f32 %v23221_v43, %v23221_v43 }
  0xec   : > { %20710 = vmatmul.mubr.msk.f32.gmra.mrb[70].mxu0 %vm379_vm0, %v271_v2  ;;  %v277_v2 = vmul.f32 %v23228_v44, %v23228_v44 }
  0xed   : > { %20712 = vmatprep.mubr.msk.f32.mxu0 %vm379_vm0, %v272_v11  ;;  %v278_v11 = vmul.f32 %v23231_v46, %v23231_v46 }
  0xf0   : > { %20713 = vmatmul.mubr.msk.f32.gmra.mrb[72].mxu0 %vm379_vm0, %v273_v50  ;;  %v279_v50 = vmul.f32 %v23239_v49, %v23239_v49 }
  0xf1   : > { %20715 = vmatprep.mubr.msk.f32.mxu0 %vm379_vm0, %v274_v10  ;;  %v280_v10 = vmul.f32 %v23242_v51, %v23242_v51 }
  0xf4   : > { %20716 = vmatmul.mubr.msk.f32.gmra.mrb[74].mxu0 %vm379_vm0, %v275_v24  ;;  %v281_v24 = vmul.f32 %v23249_v52, %v23249_v52 }
  0xf5   : > { %20718 = vmatprep.mubr.msk.f32.mxu0 %vm379_vm0, %v276_v17  ;;  %v282_v17 = vmul.f32 %v23252_v53, %v23252_v53 }
  0xf8   : > { %20719 = vmatmul.mubr.msk.f32.gmra.mrb[76].mxu0 %vm379_vm0, %v277_v2  ;;  %v283_v2 = vmul.f32 %v23259_v54, %v23259_v54 }
  0xf9   : > { %20721 = vmatprep.mubr.msk.f32.mxu0 %vm379_vm0, %v278_v11  ;;  %v284_v11 = vmul.f32 %v23262_v55, %v23262_v55 }
  0xfc   : > { %20722 = vmatmul.mubr.msk.f32.gmra.mrb[78].mxu0 %vm379_vm0, %v279_v50  ;;  %v285_v50 = vmul.f32 %v23269_v56, %v23269_v56 }
  0xfd   : > { %20724 = vmatprep.mubr.msk.f32.mxu0 %vm379_vm0, %v280_v10  ;;  %v286_v10 = vmul.f32 %v23272_v57, %v23272_v57 }
 0x100   : > { %20725 = vmatmul.mubr.msk.f32.gmra.mrb[80].mxu0 %vm379_vm0, %v281_v24  ;;  %v287_v24 = vmul.f32 %v23279_v58, %v23279_v58 }
 0x101   : > { %20727 = vmatprep.mubr.msk.f32.mxu0 %vm379_vm0, %v282_v17  ;;  %v288_v17 = vmul.f32 %v23282_v59, %v23282_v59 }
 0x104   : > { %20728 = vmatmul.mubr.msk.f32.gmra.mrb[82].mxu0 %vm379_vm0, %v283_v2  ;;  %v289_v2 = vmul.f32 %v23289_v60, %v23289_v60 }
 0x105   : > { %20730 = vmatprep.mubr.msk.f32.mxu0 %vm379_vm0, %v284_v11  ;;  %v290_v11 = vmul.f32 %v23292_v61, %v23292_v61 }
 0x108   : > { %20731 = vmatmul.mubr.msk.f32.gmra.mrb[84].mxu0 %vm379_vm0, %v285_v50  ;;  %v291_v50 = vmul.f32 %v23299_v62, %v23299_v62 }
 0x109   : > { %20733 = vmatprep.mubr.msk.f32.mxu0 %vm379_vm0, %v286_v10  ;;  %v292_v10 = vmul.f32 %v23302_v63, %v23302_v63  ;;  %v28597_v63 = vmov 0.0  }
 0x10c   : > { %20734 = vmatmul.mubr.msk.f32.gmra.mrb[86].mxu0 %vm379_vm0, %v287_v24  ;;  %v293_v24 = vmul.f32 %v23309_v0, %v23309_v0 }
 0x10d   : > { %20736 = vmatprep.mubr.msk.f32.mxu0 %vm379_vm0, %v288_v17  ;;  %v294_v17 = vmul.f32 %v23312_v3, %v23312_v3 }
 0x110   : > { %20737 = vmatmul.mubr.msk.f32.gmra.mrb[88].mxu0 %vm379_vm0, %v289_v2  ;;  %v295_v2 = vmul.f32 %v23319_v4, %v23319_v4 }
 0x111   : > { %20739 = vmatprep.mubr.msk.f32.mxu0 %vm379_vm0, %v290_v11  ;;  %v296_v11 = vmul.f32 %v23322_v5, %v23322_v5 }
 0x114   : > { %20740 = vmatmul.mubr.msk.f32.gmra.mrb[90].mxu0 %vm379_vm0, %v291_v50  ;;  %v297_v50 = vmul.f32 %v23329_v6, %v23329_v6 }
 0x115   : > { %20742 = vmatprep.mubr.msk.f32.mxu0 %vm379_vm0, %v292_v10  ;;  %v298_v10 = vmul.f32 %v23332_v7, %v23332_v7 }
 0x118   : > { %20743 = vmatmul.mubr.msk.f32.gmra.mrb[92].mxu0 %vm379_vm0, %v293_v24  ;;  %v299_v24 = vmul.f32 %v23339_v8, %v23339_v8 }
 0x119   : > { %20745 = vmatprep.mubr.msk.f32.mxu0 %vm379_vm0, %v294_v17  ;;  %v300_v17 = vmul.f32 %v23342_v9, %v23342_v9 }
 0x11c   : > { %20746 = vmatmul.mubr.msk.f32.gmra.mrb[94].mxu0 %vm379_vm0, %v295_v2  ;;  %v301_v2 = vmul.f32 %v23349_v12, %v23349_v12 }
 0x11d   : > { %20748 = vmatprep.mubr.msk.f32.mxu0 %vm379_vm0, %v296_v11  ;;  %v302_v11 = vmul.f32 %v23352_v13, %v23352_v13 }
 0x120   : > { %20749 = vmatmul.mubr.msk.f32.gmra.mrb[96].mxu0 %vm379_vm0, %v297_v50  ;;  %v303_v50 = vmul.f32 %v23359_v14, %v23359_v14 }
 0x121   : > { %20751 = vmatprep.mubr.msk.f32.mxu0 %vm379_vm0, %v298_v10  ;;  %v304_v10 = vmul.f32 %v23362_v16, %v23362_v16 }
 0x124   : > { %20752 = vmatmul.mubr.msk.f32.gmra.mrb[98].mxu0 %vm379_vm0, %v299_v24  ;;  %v305_v24 = vmul.f32 %v23369_v19, %v23369_v19 }
 0x125   : > { %20754 = vmatprep.mubr.msk.f32.mxu0 %vm379_vm0, %v300_v17  ;;  %v306_v17 = vmul.f32 %v23372_v21, %v23372_v21 }
 0x128   : > { %20755 = vmatmul.mubr.msk.f32.gmra.mrb[100].mxu0 %vm379_vm0, %v301_v2  ;;  %v307_v2 = vmul.f32 %v23379_v22, %v23379_v22 }
 0x129   : > { %20757 = vmatprep.mubr.msk.f32.mxu0 %vm379_vm0, %v302_v11  ;;  %v308_v11 = vmul.f32 %v23382_v23, %v23382_v23 }
 0x12c   : > { %20758 = vmatmul.mubr.msk.f32.gmra.mrb[102].mxu0 %vm379_vm0, %v303_v50 }
 0x12d   : > { %20760 = vmatprep.mubr.msk.f32.mxu0 %vm379_vm0, %v304_v10  ;;  %v309_v10 = vmul.f32 %v23389_v25, %v23389_v25 }
 0x130   : > { %20761 = vmatmul.mubr.msk.f32.gmra.mrb[104].mxu0 %vm379_vm0, %v305_v24  ;;  %v310_v24 = vmul.f32 %v23392_v27, %v23392_v27 }
 0x131   : > { %20763 = vmatprep.mubr.msk.f32.mxu0 %vm379_vm0, %v306_v17  ;;  %v23625_v17 = vsel %vm374_vm3, 1.0, %v28597_v63 }
 0x133   : > { %v20606_v4 = vpop.f32.mrb[0].mxu0 }
 0x134   : > { %v926_v50 = vpop.f32.mrb[1].mxu0  ;;  %20764 = vmatmul.mubr.msk.f32.gmra.mrb[106].mxu0 %vm379_vm0, %v307_v2  ;;  %v311_v2 = vmul.f32 %v23399_v28, %v23399_v28 }
 0x135   : > { %20766 = vmatprep.mubr.msk.f32.mxu0 %vm379_vm0, %v308_v11  ;;  %v22217_v3 = vpack.c.bf16 %v20606_v4, %v926_v50  ;;  %v312_v4 = vmul.f32 %v23402_v31, %v23402_v31 }
 0x137   : > { %v20609_v0 = vpop.f32.mrb[2].mxu0  ;;  %22218 = vmatprep.subr.bf16.mxu1 %v22217_v3 }
 0x138   : > { %v936_v62 = vpop.f32.mrb[3].mxu0  ;;  %20767 = vmatmul.mubr.msk.f32.gmra.mrb[108].mxu0 %vm379_vm0, %v309_v10  ;;  %22220 = vmatpush3.bf16.msra.mxu1 %v22217_v3  ;;  %v313_v3 = vmul.f32 %v23409_v32, %v23409_v32 }
 0x139   : > { %v22221_v61 = vpack.c.bf16 %v20609_v0, %v936_v62  ;;  %20769 = vmatprep.mubr.msk.f32.mxu0 %vm379_vm0, %v310_v24  ;;  %v314_v62 = vmul.f32 %v23412_v35, %v23412_v35 }
 0x13b   : > { %v20612_v11 = vpop.f32.mrb[4].mxu0  ;;  %20849 = vmatmul.mubr.msk.f32.vlgmr.msra.gmra.mrb[0].mxu1 %vm379_vm0, %v23625_v17  ;;  %22222 = vmatprep.subr.bf16.mxu1 %v22221_v61 }
 0x13c   : > { %v946_v15 = vpop.f32.mrb[5].mxu0  ;;  %20770 = vmatmul.mubr.msk.f32.gmra.mrb[110].mxu0 %vm379_vm0, %v311_v2  ;;  %22224 = vmatpush3.bf16.msra.mxu1 %v22221_v61  ;;  %v315_v61 = vmul.f32 %v23419_v36, %v23419_v36  ;;  %v316_v2 = vmul.f32 %v23422_v39, %v23422_v39 }
 0x13d   : > { %v22225_v50 = vpack.c.bf16 %v20612_v11, %v946_v15  ;;  %20855 = vmatprep.mubr.msk.f32.mxu1 %vm379_vm0, %v23153_v18  ;;  %20772 = vmatprep.mubr.msk.f32.mxu0 %vm379_vm0, %v312_v4  ;;  %v317_v15 = vmul.f32 %v23429_v45, %v23429_v45 }
 0x13f   : > { %v20615_v0 = vpop.f32.mrb[6].mxu0  ;;  %20856 = vmatmul.mubr.msk.f32.vlgmr.msra.gmra.mrb[2].mxu1 %vm379_vm0, %v23625_v17  ;;  %22226 = vmatprep.subr.bf16.mxu1 %v22225_v50 }
 0x140   : > { %v956_v10 = vpop.f32.mrb[7].mxu0  ;;  %20773 = vmatmul.mubr.msk.f32.gmra.mrb[112].mxu0 %vm379_vm0, %v313_v3  ;;  %22228 = vmatpush3.bf16.msra.mxu1 %v22225_v50  ;;  %v318_v50 = vmul.f32 %v23432_v47, %v23432_v47 }
 0x141   : > { %v22229_v24 = vpack.c.bf16 %v20615_v0, %v956_v10  ;;  %20862 = vmatprep.mubr.msk.f32.mxu1 %vm379_vm0, %v23153_v18  ;;  %20775 = vmatprep.mubr.msk.f32.mxu0 %vm379_vm0, %v314_v62  ;;  %v319_v10 = vmul.f32 %v23439_v48, %v23439_v48 }
 0x143   : > { %v20618_v4 = vpop.f32.mrb[8].mxu0  ;;  %20863 = vmatmul.mubr.msk.f32.vlgmr.msra.gmra.mrb[4].mxu1 %vm379_vm0, %v23625_v17  ;;  %22230 = vmatprep.subr.bf16.mxu1 %v22229_v24 }
 0x144   : > { %v966_v11 = vpop.f32.mrb[9].mxu0  ;;  %20776 = vmatmul.mubr.msk.f32.gmra.mrb[114].mxu0 %vm379_vm0, %v315_v61  ;;  %22232 = vmatpush3.bf16.msra.mxu1 %v22229_v24  ;;  %v28598_v24 = vld [vmem:[#allocation22_spill] sm:$0xff] }
 0x145   : > { %v22233_v3 = vpack.c.bf16 %v20618_v4, %v966_v11  ;;  %20869 = vmatprep.mubr.msk.f32.mxu1 %vm379_vm0, %v23153_v18  ;;  %20778 = vmatprep.mubr.msk.f32.mxu0 %vm379_vm0, %v316_v2  ;;  %v320_v2 = vmul.f32 %v28598_v24, %v28598_v24 }
 0x147   : > { %v20621_v62 = vpop.f32.mrb[10].mxu0  ;;  %20870 = vmatmul.mubr.msk.f32.vlgmr.msra.gmra.mrb[6].mxu1 %vm379_vm0, %v23625_v17  ;;  %22234 = vmatprep.subr.bf16.mxu1 %v22233_v3 }
 0x148   : > { %v976_v0 = vpop.f32.mrb[11].mxu0  ;;  %20779 = vmatmul.mubr.msk.f32.gmra.mrb[116].mxu0 %vm379_vm0, %v317_v15  ;;  %22236 = vmatpush3.bf16.msra.mxu1 %v22233_v3  ;;  %v28599_v15 = vld [vmem:[#allocation23_spill] sm:$0xff] }
 0x149   : > { %v22237_v61 = vpack.c.bf16 %v20621_v62, %v976_v0  ;;  %20876 = vmatprep.mubr.msk.f32.mxu1 %vm379_vm0, %v23153_v18  ;;  %20781 = vmatprep.mubr.msk.f32.mxu0 %vm379_vm0, %v318_v50  ;;  %v321_v3 = vmul.f32 %v28599_v15, %v28599_v15  ;;  %v28600_v50 = vld [vmem:[#allocation24_spill] sm:$0xff] }
 0x14a   : > { %v322_v0 = vmul.f32 %v28600_v50, %v28600_v50 }
 0x14b   : > { %v20624_v4 = vpop.f32.mrb[12].mxu0  ;;  %20877 = vmatmul.mubr.msk.f32.vlgmr.msra.gmra.mrb[8].mxu1 %vm379_vm0, %v23625_v17  ;;  %22238 = vmatprep.subr.bf16.mxu1 %v22237_v61 }
 0x14c   : > { %v986_v11 = vpop.f32.mrb[13].mxu0  ;;  %20782 = vmatmul.mubr.msk.f32.gmra.mrb[118].mxu0 %vm379_vm0, %v319_v10  ;;  %22240 = vmatpush3.bf16.msra.mxu1 %v22237_v61  ;;  %v28601_v10 = vld [vmem:[#allocation25_spill] sm:$0xff] }
 0x14d   : > { %v22241_v62 = vpack.c.bf16 %v20624_v4, %v986_v11  ;;  %20883 = vmatprep.mubr.msk.f32.mxu1 %vm379_vm0, %v23153_v18  ;;  %20784 = vmatprep.mubr.msk.f32.mxu0 %vm379_vm0, %v320_v2  ;;  %v323_v61 = vmul.f32 %v28601_v10, %v28601_v10  ;;  %v28602_v2 = vld [vmem:[#allocation26_spill] sm:$0xff] }
 0x14e   : > { %v324_v11 = vmul.f32 %v28602_v2, %v28602_v2 }
 0x14f   : > { %v20627_v60 = vpop.f32.mrb[14].mxu0  ;;  %20884 = vmatmul.mubr.msk.f32.vlgmr.msra.gmra.mrb[10].mxu1 %vm379_vm0, %v23625_v17  ;;  %22242 = vmatprep.subr.bf16.mxu1 %v22241_v62 }
 0x150   : > { %v996_v24 = vpop.f32.mrb[15].mxu0  ;;  %20785 = vmatmul.mubr.msk.f32.gmra.mrb[120].mxu0 %vm379_vm0, %v321_v3  ;;  %22244 = vmatpush3.bf16.msra.mxu1 %v22241_v62  ;;  %v28603_v3 = vld [vmem:[#allocation28_spill] sm:$0xff] }
 0x151   : > { %v22245_v4 = vpack.c.bf16 %v20627_v60, %v996_v24  ;;  %20890 = vmatprep.mubr.msk.f32.mxu1 %vm379_vm0, %v23153_v18  ;;  %20787 = vmatprep.mubr.msk.f32.mxu0 %vm379_vm0, %v322_v0  ;;  %v325_v60 = vmul.f32 %v23469_v1, %v23469_v1  ;;  %v326_v62 = vmul.f32 %v28603_v3, %v28603_v3  ;;  %v28604_v0 = vld [vmem:[#allocation8_spill] sm:$0xff] }
 0x152   : > { %v10010_v2 = vmul.u32 2, %v28604_v0 }
 0x153   : > { %v20630_v50 = vpop.f32.mrb[16].mxu0  ;;  %20891 = vmatmul.mubr.msk.f32.vlgmr.msra.gmra.mrb[12].mxu1 %vm379_vm0, %v23625_v17  ;;  %22246 = vmatprep.subr.bf16.mxu1 %v22245_v4 }
 0x154   : > { %v1006_v15 = vpop.f32.mrb[17].mxu0  ;;  %20788 = vmatmul.mubr.msk.f32.gmra.mrb[122].mxu0 %vm379_vm0, %v323_v61  ;;  %22248 = vmatpush3.bf16.msra.mxu1 %v22245_v4  ;;  %v28605_v61 = vld [vmem:[#allocation9_spill] sm:$0xff] }
 0x155   : > { %v22249_v24 = vpack.c.bf16 %v20630_v50, %v1006_v15  ;;  %20897 = vmatprep.mubr.msk.f32.mxu1 %vm379_vm0, %v23153_v18  ;;  %20790 = vmatprep.mubr.msk.f32.mxu0 %vm379_vm0, %v324_v11  ;;  %v10011_v4 = vsub.s32 %v28605_v61, %v10010_v2  ;;  %v327_v15 = vmul.f32 %v23479_v20, %v23479_v20  ;;  %v28606_v11 = vld [vmem:[#allocation10_spill] sm:$0xff] }
 0x156   : > { %v328_v0 = vmul.f32 %v23322_v5, %v28606_v11  ;;  %v330_v5 = vmul.f32 %v23332_v7, %v23171_v26  ;;  %v331_v61 = vmul.f32 %v23339_v8, %v23178_v29  ;;  %v332_v7 = vmul.f32 %v23342_v9, %v23181_v30 }
 0x157   : > { %v20633_v10 = vpop.f32.mrb[18].mxu0  ;;  %20898 = vmatmul.mubr.msk.f32.vlgmr.msra.gmra.mrb[14].mxu1 %vm379_vm0, %v23625_v17  ;;  %22250 = vmatprep.subr.bf16.mxu1 %v22249_v24  ;;  %v10013_v3 = vsub.s32 0, %v10011_v4  ;;  %v333_v29 = vmul.f32 %v23349_v12, %v23188_v33  ;;  %v334_v30 = vmul.f32 %v23352_v13, %v23191_v34  ;;  %v335_v33 = vmul.f32 %v23359_v14, %v23198_v37 }
 0x158   : > { %v1016_v59 = vpop.f32.mrb[19].mxu0  ;;  %20791 = vmatmul.mubr.msk.f32.gmra.mrb[124].mxu0 %vm379_vm0, %v325_v60  ;;  %22252 = vmatpush3.bf16.msra.mxu1 %v22249_v24  ;;  %v336_v34 = vmul.f32 %v23362_v16, %v23201_v38  ;;  %v337_v37 = vmul.f32 %v23369_v19, %v23208_v40  ;;  %v338_v38 = vmul.f32 %v23372_v21, %v23211_v41 }
 0x159   : > { %v22253_v50 = vpack.c.bf16 %v20633_v10, %v1016_v59  ;;  %20904 = vmatprep.mubr.msk.f32.mxu1 %vm379_vm0, %v23153_v18  ;;  %20793 = vmatprep.mubr.msk.f32.mxu0 %vm379_vm0, %v326_v62  ;;  %v19531_v2 = vmin.u32 %v10013_v3, %v10011_v4  ;;  %v28607_v59 = vld [vmem:[#allocation13_spill] sm:$0xff]  ;;  %v339_v40 = vmul.f32 %v23379_v22, %v23218_v42 }
 0x15a   : > { %v329_v10 = vmul.f32 %v23329_v6, %v28607_v59  ;;  %v340_v41 = vmul.f32 %v23382_v23, %v23221_v43  ;;  %v341_v42 = vmul.f32 %v23389_v25, %v23228_v44  ;;  %v342_v43 = vmul.f32 %v23392_v27, %v23231_v46 }
 0x15b   : > { %v20636_v1 = vpop.f32.mrb[20].mxu0  ;;  %20905 = vmatmul.mubr.msk.f32.vlgmr.msra.gmra.mrb[16].mxu1 %vm379_vm0, %v23625_v17  ;;  %22254 = vmatprep.subr.bf16.mxu1 %v22253_v50  ;;  %vm10015_vm7 = vcmp.le.s32.totalorder %v19531_v2, 1  ;;  %v343_v44 = vmul.f32 %v23399_v28, %v23239_v49  ;;  %v344_v46 = vmul.f32 %v23402_v31, %v23242_v51  ;;  %v345_v49 = vmul.f32 %v23409_v32, %v23249_v52 }
 0x15c   : > { %v1026_v60 = vpop.f32.mrb[21].mxu0  ;;  %20794 = vmatmul.mubr.msk.f32.gmra.mrb[126].mxu0 %vm379_vm0, %v327_v15  ;;  %22256 = vmatpush3.bf16.msra.mxu1 %v22253_v50  ;;  %v23726_v62 = vsel %vm10015_vm7, 1.0, %v28597_v63  ;;  %v346_v51 = vmul.f32 %v23412_v35, %v23252_v53  ;;  %v347_v52 = vmul.f32 %v23419_v36, %v23259_v54  ;;  %v348_v53 = vmul.f32 %v23422_v39, %v23262_v55 }
 0x15d   : > { %v22257_v24 = vpack.c.bf16 %v20636_v1, %v1026_v60  ;;  %20911 = vmatprep.mubr.msk.f32.mxu1 %vm379_vm0, %v23153_v18  ;;  %20796 = vmatprep.mubr.msk.f32.mxu0 %vm379_vm0, %v328_v0  ;;  %28608 = vst [vmem:[#allocation8_spill] sm:$0xff] %v23726_v62  ;;  %v10018_v1 = vsel %vm379_vm0, %v23726_v62, 0.0  ;;  %v349_v54 = vmul.f32 %v23429_v45, %v23269_v56 }
 0x15e   : > { %10019 = vadd.xlane.f32.xlu0 %v10018_v1  ;;  %v350_v55 = vmul.f32 %v23432_v47, %v23272_v57  ;;  %v351_v56 = vmul.f32 %v23439_v48, %v23279_v58  ;;  %v28610_v57 = vld [vmem:[#allocation22_spill] sm:$0xff]  ;;  %v28612_v58 = vld [vmem:[#allocation23_spill] sm:$0xff] }
 0x15f   : > { %v20639_v3 = vpop.f32.mrb[22].mxu0  ;;  %20912 = vmatmul.mubr.msk.f32.vlgmr.msra.gmra.mrb[18].mxu1 %vm379_vm0, %v23625_v17  ;;  %22258 = vmatprep.subr.bf16.mxu1 %v22257_v24 }
 0x160   : > { %v1036_v6 = vpop.f32.mrb[23].mxu0  ;;  %20797 = vmatmul.mubr.msk.f32.gmra.mrb[128].mxu0 %vm379_vm0, %v329_v10  ;;  %22260 = vmatpush3.bf16.msra.mxu1 %v22257_v24 }
 0x161   : > { %v22261_v26 = vpack.c.bf16 %v20639_v3, %v1036_v6  ;;  %20918 = vmatprep.mubr.msk.f32.mxu1 %vm379_vm0, %v23153_v18  ;;  %20799 = vmatprep.mubr.msk.f32.mxu0 %vm379_vm0, %v330_v5  ;;  %v28609_v3 = vld [vmem:[#allocation14_spill] sm:$0xff] }
 0x162   : > { %v352_v47 = vmul.f32 %v28610_v57, %v28609_v3  ;;  %v22799_v57 = vld [vmem:[%s23120_s3 + $0x48] sm:$0xff] }
 0x163   : > { %v20642_v4 = vpop.f32.mrb[24].mxu0  ;;  %20919 = vmatmul.mubr.msk.f32.vlgmr.msra.gmra.mrb[20].mxu1 %vm379_vm0, %v23625_v17  ;;  %22262 = vmatprep.subr.bf16.mxu1 %v22261_v26 }
 0x164   : > { %v1046_v15 = vpop.f32.mrb[25].mxu0  ;;  %20800 = vmatmul.mubr.msk.f32.gmra.mrb[130].mxu0 %vm379_vm0, %v331_v61  ;;  %22264 = vmatpush3.bf16.msra.mxu1 %v22261_v26  ;;  %v28611_v61 = vld [vmem:[#allocation15_spill] sm:$0xff] }
 0x165   : > { %v22265_v8 = vpack.c.bf16 %v20642_v4, %v1046_v15  ;;  %20925 = vmatprep.mubr.msk.f32.mxu1 %vm379_vm0, %v23153_v18  ;;  %20802 = vmatprep.mubr.msk.f32.mxu0 %vm379_vm0, %v332_v7  ;;  %v353_v48 = vmul.f32 %v28612_v58, %v28611_v61  ;;  %v28613_v7 = vld [vmem:[#allocation16_spill] sm:$0xff]  ;;  %v22801_v58 = vld [vmem:[%s23120_s3 + $0x58] sm:$0xff] }
 0x166   : > { %v28614_v4 = vld [vmem:[#allocation24_spill] sm:$0xff] }
 0x167   : > { %v20645_v9 = vpop.f32.mrb[26].mxu0  ;;  %20926 = vmatmul.mubr.msk.f32.vlgmr.msra.gmra.mrb[22].mxu1 %vm379_vm0, %v23625_v17  ;;  %22266 = vmatprep.subr.bf16.mxu1 %v22265_v8  ;;  %v354_v15 = vmul.f32 %v28614_v4, %v28613_v7 }
 0x168   : > { %v1056_v50 = vpop.f32.mrb[27].mxu0  ;;  %20803 = vmatmul.mubr.msk.f32.gmra.mrb[132].mxu0 %vm379_vm0, %v333_v29  ;;  %22268 = vmatpush3.bf16.msra.mxu1 %v22265_v8 }
 0x169   : > { %v22269_v12 = vpack.c.bf16 %v20645_v9, %v1056_v50  ;;  %20932 = vmatprep.mubr.msk.f32.mxu1 %vm379_vm0, %v23153_v18  ;;  %20805 = vmatprep.mubr.msk.f32.mxu0 %vm379_vm0, %v334_v30  ;;  %v28615_v30 = vld [vmem:[#allocation17_spill] sm:$0xff] }
 0x16a   : > { %v28616_v9 = vld [vmem:[#allocation25_spill] sm:$0xff] }
 0x16b   : > { %v20648_v13 = vpop.f32.mrb[28].mxu0  ;;  %20933 = vmatmul.mubr.msk.f32.vlgmr.msra.gmra.mrb[24].mxu1 %vm379_vm0, %v23625_v17  ;;  %22270 = vmatprep.subr.bf16.mxu1 %v22269_v12  ;;  %v355_v50 = vmul.f32 %v28616_v9, %v28615_v30 }
 0x16c   : > { %v1066_v11 = vpop.f32.mrb[29].mxu0  ;;  %20806 = vmatmul.mubr.msk.f32.gmra.mrb[134].mxu0 %vm379_vm0, %v335_v33  ;;  %22272 = vmatpush3.bf16.msra.mxu1 %v22269_v12  ;;  %v28617_v12 = vld [vmem:[#allocation18_spill] sm:$0xff] }
 0x16d   : > { %v22273_v14 = vpack.c.bf16 %v20648_v13, %v1066_v11  ;;  %20939 = vmatprep.mubr.msk.f32.mxu1 %vm379_vm0, %v23153_v18  ;;  %20808 = vmatprep.mubr.msk.f32.mxu0 %vm379_vm0, %v336_v34  ;;  %v28618_v34 = vld [vmem:[#allocation26_spill] sm:$0xff] }
 0x16e   : > { %v356_v13 = vmul.f32 %v28618_v34, %v28617_v12  ;;  %v22806_v12 = vld [vmem:[%s23120_s3 + $0x80] sm:$0xff] }
 0x16f   : > { %v20651_v16 = vpop.f32.mrb[30].mxu0  ;;  %20940 = vmatmul.mubr.msk.f32.vlgmr.msra.gmra.mrb[26].mxu1 %vm379_vm0, %v23625_v17  ;;  %22274 = vmatprep.subr.bf16.mxu1 %v22273_v14 }
 0x170   : > { %v1076_v0 = vpop.f32.mrb[31].mxu0  ;;  %20809 = vmatmul.mubr.msk.f32.gmra.mrb[136].mxu0 %vm379_vm0, %v337_v37  ;;  %22276 = vmatpush3.bf16.msra.mxu1 %v22273_v14  ;;  %v28619_v14 = vld [vmem:[#allocation19_spill] sm:$0xff] }
 0x171   : > { %v22277_v19 = vpack.c.bf16 %v20651_v16, %v1076_v0  ;;  %20946 = vmatprep.mubr.msk.f32.mxu1 %vm379_vm0, %v23153_v18  ;;  %20811 = vmatprep.mubr.msk.f32.mxu0 %vm379_vm0, %v338_v38  ;;  %v28620_v38 = vld [vmem:[#allocation27_spill] sm:$0xff] }
 0x172   : > { %v357_v16 = vmul.f32 %v28620_v38, %v28619_v14  ;;  %v22808_v14 = vld [vmem:[%s23120_s3 + $0x90] sm:$0xff] }
 0x173   : > { %v20654_v21 = vpop.f32.mrb[32].mxu0  ;;  %20947 = vmatmul.mubr.msk.f32.vlgmr.msra.gmra.mrb[28].mxu1 %vm379_vm0, %v23625_v17  ;;  %22278 = vmatprep.subr.bf16.mxu1 %v22277_v19 }
 0x174   : > { %v1086_v2 = vpop.f32.mrb[33].mxu0  ;;  %20812 = vmatmul.mubr.msk.f32.gmra.mrb[138].mxu0 %vm379_vm0, %v339_v40  ;;  %22280 = vmatpush3.bf16.msra.mxu1 %v22277_v19  ;;  %v28621_v40 = vld [vmem:[#allocation20_spill] sm:$0xff] }
 0x175   : > { %v22281_v22 = vpack.c.bf16 %v20654_v21, %v1086_v2  ;;  %20953 = vmatprep.mubr.msk.f32.mxu1 %vm379_vm0, %v23153_v18  ;;  %20814 = vmatprep.mubr.msk.f32.mxu0 %vm379_vm0, %v340_v41  ;;  %v28622_v19 = vld [vmem:[#allocation28_spill] sm:$0xff] }
 0x176   : > { %v358_v41 = vmul.f32 %v28622_v19, %v28621_v40  ;;  %v22810_v19 = vld [vmem:[%s23120_s3 + $0xa0] sm:$0xff] }
 0x177   : > { %v20657_v23 = vpop.f32.mrb[34].mxu0  ;;  %20954 = vmatmul.mubr.msk.f32.vlgmr.msra.gmra.mrb[30].mxu1 %vm379_vm0, %v23625_v17  ;;  %22282 = vmatprep.subr.bf16.mxu1 %v22281_v22 }
 0x178   : > { %v1096_v60 = vpop.f32.mrb[35].mxu0  ;;  %20815 = vmatmul.mubr.msk.f32.gmra.mrb[140].mxu0 %vm379_vm0, %v341_v42  ;;  %22284 = vmatpush3.bf16.msra.mxu1 %v22281_v22  ;;  %v28623_v42 = vld [vmem:[#allocation21_spill] sm:$0xff] }
 0x179   : > { %v22285_v25 = vpack.c.bf16 %v20657_v23, %v1096_v60  ;;  %20960 = vmatprep.mubr.msk.f32.mxu1 %vm379_vm0, %v23153_v18  ;;  %20817 = vmatprep.mubr.msk.f32.mxu0 %vm379_vm0, %v342_v43  ;;  %v359_v22 = vmul.f32 %v23479_v20, %v28623_v42  ;;  %v22790_v20 = vld [vmem:[%s23120_s3] sm:$0xff] }
 0x17b   : > { %v20660_v27 = vpop.f32.mrb[36].mxu0  ;;  %20961 = vmatmul.mubr.msk.f32.vlgmr.msra.gmra.mrb[32].mxu1 %vm379_vm0, %v23625_v17  ;;  %22286 = vmatprep.subr.bf16.mxu1 %v22285_v25 }
 0x17c   : > { %v1106_v59 = vpop.f32.mrb[37].mxu0  ;;  %20818 = vmatmul.mubr.msk.f32.gmra.mrb[142].mxu0 %vm379_vm0, %v343_v44  ;;  %22288 = vmatpush3.bf16.msra.mxu1 %v22285_v25 }
 0x17d   : > { %v22289_v28 = vpack.c.bf16 %v20660_v27, %v1106_v59  ;;  %20967 = vmatprep.mubr.msk.f32.mxu1 %vm379_vm0, %v23153_v18  ;;  %20820 = vmatprep.mubr.msk.f32.mxu0 %vm379_vm0, %v344_v46  ;;  %v22791_v27 = vld [vmem:[%s23120_s3 + $0x8] sm:$0xff] }
 0x17f   : > { %v20663_v31 = vpop.f32.mrb[38].mxu0  ;;  %20968 = vmatmul.mubr.msk.f32.vlgmr.msra.gmra.mrb[34].mxu1 %vm379_vm0, %v23625_v17  ;;  %22290 = vmatprep.subr.bf16.mxu1 %v22289_v28 }
 0x180   : > { %v1116_v10 = vpop.f32.mrb[39].mxu0  ;;  %20821 = vmatmul.mubr.msk.f32.gmra.mrb[144].mxu0 %vm379_vm0, %v345_v49  ;;  %22292 = vmatpush3.bf16.msra.mxu1 %v22289_v28  ;;  %v22792_v49 = vld [vmem:[%s23120_s3 + $0x10] sm:$0xff] }
 0x181   : > { %v22293_v32 = vpack.c.bf16 %v20663_v31, %v1116_v10  ;;  %20974 = vmatprep.mubr.msk.f32.mxu1 %vm379_vm0, %v23153_v18  ;;  %20823 = vmatprep.mubr.msk.f32.mxu0 %vm379_vm0, %v346_v51  ;;  %v22793_v31 = vld [vmem:[%s23120_s3 + $0x18] sm:$0xff] }
 0x183   : > { %v20666_v35 = vpop.f32.mrb[40].mxu0  ;;  %20975 = vmatmul.mubr.msk.f32.vlgmr.msra.gmra.mrb[36].mxu1 %vm379_vm0, %v23625_v17  ;;  %22294 = vmatprep.subr.bf16.mxu1 %v22293_v32 }
 0x184   : > { %v1126_v24 = vpop.f32.mrb[41].mxu0  ;;  %20824 = vmatmul.mubr.msk.f32.gmra.mrb[146].mxu0 %vm379_vm0, %v347_v52  ;;  %22296 = vmatpush3.bf16.msra.mxu1 %v22293_v32  ;;  %v22794_v52 = vld [vmem:[%s23120_s3 + $0x20] sm:$0xff] }
 0x185   : > { %v22297_v36 = vpack.c.bf16 %v20666_v35, %v1126_v24  ;;  %20981 = vmatprep.mubr.msk.f32.mxu1 %vm379_vm0, %v23153_v18  ;;  %20826 = vmatprep.mubr.msk.f32.mxu0 %vm379_vm0, %v348_v53  ;;  %v22795_v35 = vld [vmem:[%s23120_s3 + $0x28] sm:$0xff] }
 0x187   : > { %v20669_v39 = vpop.f32.mrb[42].mxu0  ;;  %20982 = vmatmul.mubr.msk.f32.vlgmr.msra.gmra.mrb[38].mxu1 %vm379_vm0, %v23625_v17  ;;  %22298 = vmatprep.subr.bf16.mxu1 %v22297_v36 }
 0x188   : > { %v1136_v5 = vpop.f32.mrb[43].mxu0  ;;  %20827 = vmatmul.mubr.msk.f32.gmra.mrb[148].mxu0 %vm379_vm0, %v349_v54  ;;  %22300 = vmatpush3.bf16.msra.mxu1 %v22297_v36  ;;  %v22796_v54 = vld [vmem:[%s23120_s3 + $0x30] sm:$0xff] }
 0x189   : > { %v22301_v45 = vpack.c.bf16 %v20669_v39, %v1136_v5  ;;  %20988 = vmatprep.mubr.msk.f32.mxu1 %vm379_vm0, %v23153_v18  ;;  %20829 = vmatprep.mubr.msk.f32.mxu0 %vm379_vm0, %v350_v55  ;;  %v22797_v39 = vld [vmem:[%s23120_s3 + $0x38] sm:$0xff] }
 0x18b   : > { %v20672_v1 = vpop.f32.mrb[44].mxu0  ;;  %20989 = vmatmul.mubr.msk.f32.vlgmr.msra.gmra.mrb[40].mxu1 %vm379_vm0, %v23625_v17  ;;  %22302 = vmatprep.subr.bf16.mxu1 %v22301_v45 }
 0x18c   : > { %v1146_v6 = vpop.f32.mrb[45].mxu0  ;;  %20830 = vmatmul.mubr.msk.f32.gmra.mrb[150].mxu0 %vm379_vm0, %v351_v56  ;;  %22304 = vmatpush3.bf16.msra.mxu1 %v22301_v45  ;;  %v22798_v56 = vld [vmem:[%s23120_s3 + $0x40] sm:$0xff] }
 0x18d   : > { %v22305_v26 = vpack.c.bf16 %v20672_v1, %v1146_v6  ;;  %20995 = vmatprep.mubr.msk.f32.mxu1 %vm379_vm0, %v23153_v18  ;;  %20832 = vmatprep.mubr.msk.f32.mxu0 %vm379_vm0, %v352_v47  ;;  %v22800_v1 = vld [vmem:[%s23120_s3 + $0x50] sm:$0xff] }
 0x18f   : > { %v20675_v29 = vpop.f32.mrb[46].mxu0  ;;  %20996 = vmatmul.mubr.msk.f32.vlgmr.msra.gmra.mrb[42].mxu1 %vm379_vm0, %v23625_v17  ;;  %22306 = vmatprep.subr.bf16.mxu1 %v22305_v26 }
 0x190   : > { %v1156_v8 = vpop.f32.mrb[47].mxu0  ;;  %20833 = vmatmul.mubr.msk.f32.gmra.mrb[152].mxu0 %vm379_vm0, %v353_v48  ;;  %22308 = vmatpush3.bf16.msra.mxu1 %v22305_v26  ;;  %v22802_v26 = vld [vmem:[%s23120_s3 + $0x60] sm:$0xff] }
 0x191   : > { %v22309_v33 = vpack.c.bf16 %v20675_v29, %v1156_v8  ;;  %21002 = vmatprep.mubr.msk.f32.mxu1 %vm379_vm0, %v23153_v18  ;;  %20835 = vmatprep.mubr.msk.f32.mxu0 %vm379_vm0, %v354_v15  ;;  %v22803_v15 = vld [vmem:[%s23120_s3 + $0x68] sm:$0xff]  ;;  %v22804_v8 = vld [vmem:[%s23120_s3 + $0x70] sm:$0xff] }
 0x193   : > { %v20678_v11 = vpop.f32.mrb[48].mxu0  ;;  %21003 = vmatmul.mubr.msk.f32.vlgmr.msra.gmra.mrb[44].mxu1 %vm379_vm0, %v23625_v17  ;;  %22310 = vmatprep.subr.bf16.mxu1 %v22309_v33 }
 0x194   : > { %v1166_v37 = vpop.f32.mrb[49].mxu0  ;;  %20836 = vmatmul.mubr.msk.f32.gmra.mrb[154].mxu0 %vm379_vm0, %v355_v50  ;;  %22312 = vmatpush3.bf16.msra.mxu1 %v22309_v33  ;;  %v22805_v50 = vld [vmem:[%s23120_s3 + $0x78] sm:$0xff] }
 0x195   : > { %v22313_v0 = vpack.c.bf16 %v20678_v11, %v1166_v37  ;;  %21009 = vmatprep.mubr.msk.f32.mxu1 %vm379_vm0, %v23153_v18  ;;  %20838 = vmatprep.mubr.msk.f32.mxu0 %vm379_vm0, %v356_v13  ;;  %v22807_v11 = vld [vmem:[%s23120_s3 + $0x88] sm:$0xff] }
 0x197   : > { %v20681_v21 = vpop.f32.mrb[50].mxu0  ;;  %21010 = vmatmul.mubr.msk.f32.vlgmr.msra.gmra.mrb[46].mxu1 %vm379_vm0, %v23625_v17  ;;  %22314 = vmatprep.subr.bf16.mxu1 %v22313_v0 }
 0x198   : > { %v1176_v2 = vpop.f32.mrb[51].mxu0  ;;  %20839 = vmatmul.mubr.msk.f32.gmra.mrb[156].mxu0 %vm379_vm0, %v357_v16  ;;  %22316 = vmatpush3.bf16.msra.mxu1 %v22313_v0  ;;  %v22809_v0 = vld [vmem:[%s23120_s3 + $0x98] sm:$0xff] }
 0x199   : > { %v22317_v43 = vpack.c.bf16 %v20681_v21, %v1176_v2  ;;  %21016 = vmatprep.mubr.msk.f32.mxu1 %vm379_vm0, %v23153_v18  ;;  %20841 = vmatprep.mubr.msk.f32.mxu0 %vm379_vm0, %v358_v41  ;;  %v22811_v2 = vld [vmem:[%s23120_s3 + $0xa8] sm:$0xff] }
 0x19b   : > { %v20684_v23 = vpop.f32.mrb[52].mxu0  ;;  %21017 = vmatmul.mubr.msk.f32.vlgmr.msra.gmra.mrb[48].mxu1 %vm379_vm0, %v23625_v17  ;;  %22318 = vmatprep.subr.bf16.mxu1 %v22317_v43 }
 0x19c   : > { %v1186_v60 = vpop.f32.mrb[53].mxu0  ;;  %20842 = vmatmul.mubr.msk.f32.gmra.mrb[158].mxu0 %vm379_vm0, %v359_v22  ;;  %22320 = vmatpush3.bf16.msra.mxu1 %v22317_v43  ;;  %v22812_v22 = vld [vmem:[%s23120_s3 + $0xb0] sm:$0xff] }
 0x19d   : > { %v22321_v44 = vpack.c.bf16 %v20684_v23, %v1186_v60  ;;  %21023 = vmatprep.mubr.msk.f32.mxu1 %vm379_vm0, %v23153_v18  ;;  %21408 = vmatprep.mubr.msk.f32.mxu0 %vm379_vm0, %v22790_v20  ;;  %v22813_v60 = vld [vmem:[%s23120_s3 + $0xb8] sm:$0xff]  ;;  %v22814_v20 = vld [vmem:[%s23120_s3 + $0xc0] sm:$0xff] }
 0x19f   : > { %v20687_v25 = vpop.f32.mrb[54].mxu0  ;;  %21024 = vmatmul.mubr.msk.f32.vlgmr.msra.gmra.mrb[50].mxu1 %vm379_vm0, %v23625_v17  ;;  %22322 = vmatprep.subr.bf16.mxu1 %v22321_v44 }
 0x1a0   : > { %v1196_v46 = vpop.f32.mrb[55].mxu0  ;;  %22324 = vmatpush3.bf16.msra.mxu1 %v22321_v44  ;;  %21409 = vmatmul.mubr.msk.f32.vlgmr.msra.gmra.mrb[160].mxu0 %vm379_vm0, %v22791_v27  ;;  %v22815_v27 = vld [vmem:[%s23120_s3 + $0xc8] sm:$0xff] }
 0x1a1   : > { %v22325_v59 = vpack.c.bf16 %v20687_v25, %v1196_v46  ;;  %21030 = vmatprep.mubr.msk.f32.mxu1 %vm379_vm0, %v23153_v18  ;;  %21411 = vmatprep.mubr.msk.f32.mxu0 %vm379_vm0, %v22792_v49  ;;  %v22816_v49 = vld [vmem:[%s23120_s3 + $0xd0] sm:$0xff] }
 0x1a3   : > { %v20690_v28 = vpop.f32.mrb[56].mxu0  ;;  %21031 = vmatmul.mubr.msk.f32.vlgmr.msra.gmra.mrb[52].mxu1 %vm379_vm0, %v23625_v17  ;;  %22326 = vmatprep.subr.bf16.mxu1 %v22325_v59 }
 0x1a4   : > { %v1206_v51 = vpop.f32.mrb[57].mxu0  ;;  %22328 = vmatpush3.bf16.msra.mxu1 %v22325_v59  ;;  %21412 = vmatmul.mubr.msk.f32.gmra.mrb[162].mxu0 %vm379_vm0, %v22793_v31  ;;  %v22817_v31 = vld [vmem:[%s23120_s3 + $0xd8] sm:$0xff] }
 0x1a5   : > { %v22329_v10 = vpack.c.bf16 %v20690_v28, %v1206_v51  ;;  %21037 = vmatprep.mubr.msk.f32.mxu1 %vm379_vm0, %v23153_v18  ;;  %21414 = vmatprep.mubr.msk.f32.mxu0 %vm379_vm0, %v22794_v52  ;;  %v22818_v52 = vld [vmem:[%s23120_s3 + $0xe0] sm:$0xff] }
 0x1a7   : > { %v20693_v32 = vpop.f32.mrb[58].mxu0  ;;  %21038 = vmatmul.mubr.msk.f32.vlgmr.msra.gmra.mrb[54].mxu1 %vm379_vm0, %v23625_v17  ;;  %22330 = vmatprep.subr.bf16.mxu1 %v22329_v10 }
 0x1a8   : > { %v1216_v53 = vpop.f32.mrb[59].mxu0  ;;  %22332 = vmatpush3.bf16.msra.mxu1 %v22329_v10  ;;  %21415 = vmatmul.mubr.msk.f32.gmra.mrb[164].mxu0 %vm379_vm0, %v22795_v35  ;;  %v22819_v35 = vld [vmem:[%s23120_s3 + $0xe8] sm:$0xff] }
 0x1a9   : > { %v22333_v24 = vpack.c.bf16 %v20693_v32, %v1216_v53  ;;  %21044 = vmatprep.mubr.msk.f32.mxu1 %vm379_vm0, %v23153_v18  ;;  %21417 = vmatprep.mubr.msk.f32.mxu0 %vm379_vm0, %v22796_v54  ;;  %v22820_v54 = vld [vmem:[%s23120_s3 + $0xf0] sm:$0xff] }
 0x1ab   : > { %v20696_v36 = vpop.f32.mrb[60].mxu0  ;;  %21045 = vmatmul.mubr.msk.f32.vlgmr.msra.gmra.mrb[56].mxu1 %vm379_vm0, %v23625_v17  ;;  %22334 = vmatprep.subr.bf16.mxu1 %v22333_v24 }
 0x1ac   : > { %v1226_v55 = vpop.f32.mrb[61].mxu0  ;;  %22336 = vmatpush3.bf16.msra.mxu1 %v22333_v24  ;;  %21418 = vmatmul.mubr.msk.f32.gmra.mrb[166].mxu0 %vm379_vm0, %v22797_v39  ;;  %v22821_v39 = vld [vmem:[%s23120_s3 + $0xf8] sm:$0xff] }
 0x1ad   : > { %v22337_v5 = vpack.c.bf16 %v20696_v36, %v1226_v55  ;;  %21051 = vmatprep.mubr.msk.f32.mxu1 %vm379_vm0, %v23153_v18  ;;  %21420 = vmatprep.mubr.msk.f32.mxu0 %vm379_vm0, %v22798_v56  ;;  %v22822_v56 = vld [vmem:[%s23126_s27] sm:$0xff] }
 0x1af   : > { %v20699_v45 = vpop.f32.mrb[62].mxu0  ;;  %21052 = vmatmul.mubr.msk.f32.vlgmr.msra.gmra.mrb[58].mxu1 %vm379_vm0, %v23625_v17  ;;  %22338 = vmatprep.subr.bf16.mxu1 %v22337_v5 }
 0x1b0   : > { %v1236_v3 = vpop.f32.mrb[63].mxu0  ;;  %22340 = vmatpush3.bf16.msra.mxu1 %v22337_v5  ;;  %21421 = vmatmul.mubr.msk.f32.gmra.mrb[168].mxu0 %vm379_vm0, %v22799_v57  ;;  %v22823_v57 = vld [vmem:[%s23126_s27 + $0x8] sm:$0xff] }
 0x1b1   : > { %v22341_v47 = vpack.c.bf16 %v20699_v45, %v1236_v3  ;;  %21058 = vmatprep.mubr.msk.f32.mxu1 %vm379_vm0, %v23153_v18  ;;  %21423 = vmatprep.mubr.msk.f32.mxu0 %vm379_vm0, %v22800_v1  ;;  %v22824_v1 = vld [vmem:[%s23126_s27 + $0x10] sm:$0xff] }
 0x1b3   : > { %v20702_v6 = vpop.f32.mrb[64].mxu0  ;;  %21059 = vmatmul.mubr.msk.f32.vlgmr.msra.gmra.mrb[60].mxu1 %vm379_vm0, %v23625_v17  ;;  %22342 = vmatprep.subr.bf16.mxu1 %v22341_v47 }
 0x1b4   : > { %v1246_v61 = vpop.f32.mrb[65].mxu0  ;;  %22344 = vmatpush3.bf16.msra.mxu1 %v22341_v47  ;;  %21424 = vmatmul.mubr.msk.f32.gmra.mrb[170].mxu0 %vm379_vm0, %v22801_v58  ;;  %v22825_v58 = vld [vmem:[%s23126_s27 + $0x18] sm:$0xff] }
 0x1b5   : > { %v22345_v48 = vpack.c.bf16 %v20702_v6, %v1246_v61  ;;  %21065 = vmatprep.mubr.msk.f32.mxu1 %vm379_vm0, %v23153_v18  ;;  %21426 = vmatprep.mubr.msk.f32.mxu0 %vm379_vm0, %v22802_v26  ;;  %v22826_v26 = vld [vmem:[%s23126_s27 + $0x20] sm:$0xff] }
 0x1b7   : > { %v20705_v7 = vpop.f32.mrb[66].mxu0  ;;  %21066 = vmatmul.mubr.msk.f32.vlgmr.msra.gmra.mrb[62].mxu1 %vm379_vm0, %v23625_v17  ;;  %22346 = vmatprep.subr.bf16.mxu1 %v22345_v48 }
 0x1b8   : > { %v1256_v4 = vpop.f32.mrb[67].mxu0  ;;  %22348 = vmatpush3.bf16.msra.mxu1 %v22345_v48  ;;  %21427 = vmatmul.mubr.msk.f32.gmra.mrb[172].mxu0 %vm379_vm0, %v22803_v15  ;;  %v22827_v15 = vld [vmem:[%s23126_s27 + $0x28] sm:$0xff] }
 0x1b9   : > { %v22349_v29 = vpack.c.bf16 %v20705_v7, %v1256_v4  ;;  %21072 = vmatprep.mubr.msk.f32.mxu1 %vm379_vm0, %v23153_v18  ;;  %21429 = vmatprep.mubr.msk.f32.mxu0 %vm379_vm0, %v22804_v8  ;;  %v22828_v8 = vld [vmem:[%s23126_s27 + $0x30] sm:$0xff] }
 0x1bb   : > { %v20708_v30 = vpop.f32.mrb[68].mxu0  ;;  %21073 = vmatmul.mubr.msk.f32.vlgmr.msra.gmra.mrb[64].mxu1 %vm379_vm0, %v23625_v17  ;;  %22350 = vmatprep.subr.bf16.mxu1 %v22349_v29 }
 0x1bc   : > { %v1266_v9 = vpop.f32.mrb[69].mxu0  ;;  %22352 = vmatpush3.bf16.msra.mxu1 %v22349_v29  ;;  %21430 = vmatmul.mubr.msk.f32.gmra.mrb[174].mxu0 %vm379_vm0, %v22805_v50  ;;  %v22829_v50 = vld [vmem:[%s23126_s27 + $0x38] sm:$0xff] }
 0x1bd   : > { %v22353_v33 = vpack.c.bf16 %v20708_v30, %v1266_v9  ;;  %21079 = vmatprep.mubr.msk.f32.mxu1 %vm379_vm0, %v23153_v18  ;;  %21432 = vmatprep.mubr.msk.f32.mxu0 %vm379_vm0, %v22806_v12  ;;  %v22830_v12 = vld [vmem:[%s23126_s27 + $0x40] sm:$0xff] }
 0x1bf   : > { %v20711_v34 = vpop.f32.mrb[70].mxu0  ;;  %21080 = vmatmul.mubr.msk.f32.vlgmr.msra.gmra.mrb[66].mxu1 %vm379_vm0, %v23625_v17  ;;  %22354 = vmatprep.subr.bf16.mxu1 %v22353_v33 }
 0x1c0   : > { %v1276_v13 = vpop.f32.mrb[71].mxu0  ;;  %22356 = vmatpush3.bf16.msra.mxu1 %v22353_v33  ;;  %21433 = vmatmul.mubr.msk.f32.gmra.mrb[176].mxu0 %vm379_vm0, %v22807_v11  ;;  %v22831_v11 = vld [vmem:[%s23126_s27 + $0x48] sm:$0xff] }
 0x1c1   : > { %v22357_v37 = vpack.c.bf16 %v20711_v34, %v1276_v13  ;;  %21086 = vmatprep.mubr.msk.f32.mxu1 %vm379_vm0, %v23153_v18  ;;  %21435 = vmatprep.mubr.msk.f32.mxu0 %vm379_vm0, %v22808_v14  ;;  %v22832_v14 = vld [vmem:[%s23126_s27 + $0x50] sm:$0xff] }
 0x1c3   : > { %v20714_v38 = vpop.f32.mrb[72].mxu0  ;;  %21087 = vmatmul.mubr.msk.f32.vlgmr.msra.gmra.mrb[68].mxu1 %vm379_vm0, %v23625_v17  ;;  %22358 = vmatprep.subr.bf16.mxu1 %v22357_v37 }
 0x1c4   : > { %v1286_v16 = vpop.f32.mrb[73].mxu0  ;;  %22360 = vmatpush3.bf16.msra.mxu1 %v22357_v37  ;;  %21436 = vmatmul.mubr.msk.f32.gmra.mrb[178].mxu0 %vm379_vm0, %v22809_v0  ;;  %v22833_v0 = vld [vmem:[%s23126_s27 + $0x58] sm:$0xff] }
 0x1c5   : > { %v22361_v40 = vpack.c.bf16 %v20714_v38, %v1286_v16  ;;  %21093 = vmatprep.mubr.msk.f32.mxu1 %vm379_vm0, %v23153_v18  ;;  %21438 = vmatprep.mubr.msk.f32.mxu0 %vm379_vm0, %v22810_v19  ;;  %v22834_v19 = vld [vmem:[%s23126_s27 + $0x60] sm:$0xff] }
 0x1c7   : > { %v20717_v41 = vpop.f32.mrb[74].mxu0  ;;  %21094 = vmatmul.mubr.msk.f32.vlgmr.msra.gmra.mrb[70].mxu1 %vm379_vm0, %v23625_v17  ;;  %22362 = vmatprep.subr.bf16.mxu1 %v22361_v40 }
 0x1c8   : > { %v1296_v21 = vpop.f32.mrb[75].mxu0  ;;  %22364 = vmatpush3.bf16.msra.mxu1 %v22361_v40  ;;  %21439 = vmatmul.mubr.msk.f32.gmra.mrb[180].mxu0 %vm379_vm0, %v22811_v2  ;;  %v22835_v2 = vld [vmem:[%s23126_s27 + $0x68] sm:$0xff] }
 0x1c9   : > { %v22365_v42 = vpack.c.bf16 %v20717_v41, %v1296_v21  ;;  %21100 = vmatprep.mubr.msk.f32.mxu1 %vm379_vm0, %v23153_v18  ;;  %21441 = vmatprep.mubr.msk.f32.mxu0 %vm379_vm0, %v22812_v22  ;;  %v22836_v22 = vld [vmem:[%s23126_s27 + $0x70] sm:$0xff] }
 0x1cb   : > { %v20720_v43 = vpop.f32.mrb[76].mxu0  ;;  %21101 = vmatmul.mubr.msk.f32.vlgmr.msra.gmra.mrb[72].mxu1 %vm379_vm0, %v23625_v17  ;;  %22366 = vmatprep.subr.bf16.mxu1 %v22365_v42 }
 0x1cc   : > { %v1306_v23 = vpop.f32.mrb[77].mxu0  ;;  %22368 = vmatpush3.bf16.msra.mxu1 %v22365_v42  ;;  %21442 = vmatmul.mubr.msk.f32.gmra.mrb[182].mxu0 %vm379_vm0, %v22813_v60  ;;  %v22837_v60 = vld [vmem:[%s23126_s27 + $0x78] sm:$0xff] }
 0x1cd   : > { %v22369_v44 = vpack.c.bf16 %v20720_v43, %v1306_v23  ;;  %21107 = vmatprep.mubr.msk.f32.mxu1 %vm379_vm0, %v23153_v18  ;;  %21444 = vmatprep.mubr.msk.f32.mxu0 %vm379_vm0, %v22814_v20  ;;  %v22838_v20 = vld [vmem:[%s23126_s27 + $0x80] sm:$0xff] }
 0x1cf   : > { %v20723_v25 = vpop.f32.mrb[78].mxu0  ;;  %21108 = vmatmul.mubr.msk.f32.vlgmr.msra.gmra.mrb[74].mxu1 %vm379_vm0, %v23625_v17  ;;  %22370 = vmatprep.subr.bf16.mxu1 %v22369_v44 }
 0x1d0   : > { %v1316_v46 = vpop.f32.mrb[79].mxu0  ;;  %22372 = vmatpush3.bf16.msra.mxu1 %v22369_v44  ;;  %21445 = vmatmul.mubr.msk.f32.gmra.mrb[184].mxu0 %vm379_vm0, %v22815_v27  ;;  %v22839_v27 = vld [vmem:[%s23126_s27 + $0x88] sm:$0xff] }
 0x1d1   : > { %v22373_v59 = vpack.c.bf16 %v20723_v25, %v1316_v46  ;;  %21114 = vmatprep.mubr.msk.f32.mxu1 %vm379_vm0, %v23153_v18  ;;  %21447 = vmatprep.mubr.msk.f32.mxu0 %vm379_vm0, %v22816_v49  ;;  %v22840_v49 = vld [vmem:[%s23126_s27 + $0x90] sm:$0xff] }
 0x1d3   : > { %v20726_v28 = vpop.f32.mrb[80].mxu0  ;;  %21115 = vmatmul.mubr.msk.f32.vlgmr.msra.gmra.mrb[76].mxu1 %vm379_vm0, %v23625_v17  ;;  %22374 = vmatprep.subr.bf16.mxu1 %v22373_v59 }
 0x1d4   : > { %v1326_v51 = vpop.f32.mrb[81].mxu0  ;;  %22376 = vmatpush3.bf16.msra.mxu1 %v22373_v59  ;;  %21448 = vmatmul.mubr.msk.f32.gmra.mrb[186].mxu0 %vm379_vm0, %v22817_v31  ;;  %v22841_v31 = vld [vmem:[%s23126_s27 + $0x98] sm:$0xff] }
 0x1d5   : > { %v22377_v10 = vpack.c.bf16 %v20726_v28, %v1326_v51  ;;  %21121 = vmatprep.mubr.msk.f32.mxu1 %vm379_vm0, %v23153_v18  ;;  %21450 = vmatprep.mubr.msk.f32.mxu0 %vm379_vm0, %v22818_v52  ;;  %v22842_v52 = vld [vmem:[%s23126_s27 + $0xa0] sm:$0xff] }
 0x1d7   : > { %v20729_v32 = vpop.f32.mrb[82].mxu0  ;;  %21122 = vmatmul.mubr.msk.f32.vlgmr.msra.gmra.mrb[78].mxu1 %vm379_vm0, %v23625_v17  ;;  %22378 = vmatprep.subr.bf16.mxu1 %v22377_v10 }
 0x1d8   : > { %v1336_v53 = vpop.f32.mrb[83].mxu0  ;;  %22380 = vmatpush3.bf16.msra.mxu1 %v22377_v10  ;;  %21451 = vmatmul.mubr.msk.f32.gmra.mrb[188].mxu0 %vm379_vm0, %v22819_v35  ;;  %v22843_v35 = vld [vmem:[%s23126_s27 + $0xa8] sm:$0xff] }
 0x1d9   : > { %v22381_v24 = vpack.c.bf16 %v20729_v32, %v1336_v53  ;;  %21128 = vmatprep.mubr.msk.f32.mxu1 %vm379_vm0, %v23153_v18  ;;  %21453 = vmatprep.mubr.msk.f32.mxu0 %vm379_vm0, %v22820_v54  ;;  %v22844_v54 = vld [vmem:[%s23126_s27 + $0xb0] sm:$0xff] }
 0x1db   : > { %v20732_v36 = vpop.f32.mrb[84].mxu0  ;;  %21129 = vmatmul.mubr.msk.f32.vlgmr.msra.gmra.mrb[80].mxu1 %vm379_vm0, %v23625_v17  ;;  %22382 = vmatprep.subr.bf16.mxu1 %v22381_v24 }
 0x1dc   : > { %v1346_v55 = vpop.f32.mrb[85].mxu0  ;;  %22384 = vmatpush3.bf16.msra.mxu1 %v22381_v24  ;;  %21454 = vmatmul.mubr.msk.f32.gmra.mrb[190].mxu0 %vm379_vm0, %v22821_v39  ;;  %v22845_v39 = vld [vmem:[%s23126_s27 + $0xb8] sm:$0xff] }
 0x1dd   : > { %v22385_v5 = vpack.c.bf16 %v20732_v36, %v1346_v55  ;;  %21135 = vmatprep.mubr.msk.f32.mxu1 %vm379_vm0, %v23153_v18  ;;  %21456 = vmatprep.mubr.msk.f32.mxu0 %vm379_vm0, %v22822_v56  ;;  %v22846_v56 = vld [vmem:[%s23126_s27 + $0xc0] sm:$0xff] }
 0x1df   : > { %v20735_v45 = vpop.f32.mrb[86].mxu0  ;;  %21136 = vmatmul.mubr.msk.f32.vlgmr.msra.gmra.mrb[82].mxu1 %vm379_vm0, %v23625_v17  ;;  %22386 = vmatprep.subr.bf16.mxu1 %v22385_v5 }
 0x1e0   : > { %v1356_v3 = vpop.f32.mrb[87].mxu0  ;;  %22388 = vmatpush3.bf16.msra.mxu1 %v22385_v5  ;;  %21457 = vmatmul.mubr.msk.f32.gmra.mrb[192].mxu0 %vm379_vm0, %v22823_v57 }
 0x1e1   : > { %v22389_v47 = vpack.c.bf16 %v20735_v45, %v1356_v3  ;;  %21142 = vmatprep.mubr.msk.f32.mxu1 %vm379_vm0, %v23153_v18  ;;  %21459 = vmatprep.mubr.msk.f32.mxu0 %vm379_vm0, %v22824_v1  ;;  %v22847_v1 = vld [vmem:[%s23126_s27 + $0xc8] sm:$0xff] }
 0x1e3   : > { %v20738_v6 = vpop.f32.mrb[88].mxu0  ;;  %21143 = vmatmul.mubr.msk.f32.vlgmr.msra.gmra.mrb[84].mxu1 %vm379_vm0, %v23625_v17  ;;  %22390 = vmatprep.subr.bf16.mxu1 %v22389_v47 }
 0x1e4   : > { %v1366_v61 = vpop.f32.mrb[89].mxu0  ;;  %22392 = vmatpush3.bf16.msra.mxu1 %v22389_v47  ;;  %21460 = vmatmul.mubr.msk.f32.gmra.mrb[194].mxu0 %vm379_vm0, %v22825_v58 }
 0x1e5   : > { %v22393_v48 = vpack.c.bf16 %v20738_v6, %v1366_v61  ;;  %21149 = vmatprep.mubr.msk.f32.mxu1 %vm379_vm0, %v23153_v18  ;;  %21462 = vmatprep.mubr.msk.f32.mxu0 %vm379_vm0, %v22826_v26  ;;  %v22848_v61 = vld [vmem:[%s23126_s27 + $0xd0] sm:$0xff] }
 0x1e7   : > { %v20741_v7 = vpop.f32.mrb[90].mxu0  ;;  %21150 = vmatmul.mubr.msk.f32.vlgmr.msra.gmra.mrb[86].mxu1 %vm379_vm0, %v23625_v17  ;;  %22394 = vmatprep.subr.bf16.mxu1 %v22393_v48 }
 0x1e8   : > { %v1376_v4 = vpop.f32.mrb[91].mxu0  ;;  %22396 = vmatpush3.bf16.msra.mxu1 %v22393_v48  ;;  %21463 = vmatmul.mubr.msk.f32.gmra.mrb[196].mxu0 %vm379_vm0, %v22827_v15 }
 0x1e9   : > { %v22397_v29 = vpack.c.bf16 %v20741_v7, %v1376_v4  ;;  %21156 = vmatprep.mubr.msk.f32.mxu1 %vm379_vm0, %v23153_v18  ;;  %21465 = vmatprep.mubr.msk.f32.mxu0 %vm379_vm0, %v22828_v8  ;;  %v22849_v8 = vld [vmem:[%s23126_s27 + $0xd8] sm:$0xff] }
 0x1eb   : > { %v20744_v30 = vpop.f32.mrb[92].mxu0  ;;  %21157 = vmatmul.mubr.msk.f32.vlgmr.msra.gmra.mrb[88].mxu1 %vm379_vm0, %v23625_v17  ;;  %22398 = vmatprep.subr.bf16.mxu1 %v22397_v29  ;;  %v10020_v48 = vpop.xlane.xlu0 %10019 }
 0x1ec   : > { %v1386_v9 = vpop.f32.mrb[93].mxu0  ;;  %22400 = vmatpush3.bf16.msra.mxu1 %v22397_v29  ;;  %21466 = vmatmul.mubr.msk.f32.gmra.mrb[198].mxu0 %vm379_vm0, %v22829_v50  ;;  %22696 = vrcp.f32 %v10020_v48 }
 0x1ed   : > { %v22401_v33 = vpack.c.bf16 %v20744_v30, %v1386_v9  ;;  %21163 = vmatprep.mubr.msk.f32.mxu1 %vm379_vm0, %v23153_v18  ;;  %21468 = vmatprep.mubr.msk.f32.mxu0 %vm379_vm0, %v22830_v12  ;;  %v22850_v9 = vld [vmem:[%s23126_s27 + $0xe0] sm:$0xff] }
 0x1ef   : > { %v20747_v34 = vpop.f32.mrb[94].mxu0  ;;  %21164 = vmatmul.mubr.msk.f32.vlgmr.msra.gmra.mrb[90].mxu1 %vm379_vm0, %v23625_v17  ;;  %22402 = vmatprep.subr.bf16.mxu1 %v22401_v33 }
 0x1f0   : > { %v1396_v13 = vpop.f32.mrb[95].mxu0  ;;  %22404 = vmatpush3.bf16.msra.mxu1 %v22401_v33  ;;  %21469 = vmatmul.mubr.msk.f32.gmra.mrb[200].mxu0 %vm379_vm0, %v22831_v11 }
 0x1f1   : > { %v22405_v37 = vpack.c.bf16 %v20747_v34, %v1396_v13  ;;  %21170 = vmatprep.mubr.msk.f32.mxu1 %vm379_vm0, %v23153_v18  ;;  %21471 = vmatprep.mubr.msk.f32.mxu0 %vm379_vm0, %v22832_v14 }
 0x1f3   : > { %v20750_v38 = vpop.f32.mrb[96].mxu0  ;;  %21171 = vmatmul.mubr.msk.f32.vlgmr.msra.gmra.mrb[92].mxu1 %vm379_vm0, %v23625_v17  ;;  %22406 = vmatprep.subr.bf16.mxu1 %v22405_v37 }
 0x1f4   : > { %v1406_v16 = vpop.f32.mrb[97].mxu0  ;;  %22408 = vmatpush3.bf16.msra.mxu1 %v22405_v37  ;;  %21472 = vmatmul.mubr.msk.f32.gmra.mrb[202].mxu0 %vm379_vm0, %v22833_v0 }
 0x1f5   : > { %v22409_v40 = vpack.c.bf16 %v20750_v38, %v1406_v16  ;;  %21177 = vmatprep.mubr.msk.f32.mxu1 %vm379_vm0, %v23153_v18  ;;  %21474 = vmatprep.mubr.msk.f32.mxu0 %vm379_vm0, %v22834_v19  ;;  %v22851_v38 = vld [vmem:[%s23126_s27 + $0xe8] sm:$0xff] }
 0x1f7   : > { %v20753_v41 = vpop.f32.mrb[98].mxu0  ;;  %21178 = vmatmul.mubr.msk.f32.vlgmr.msra.gmra.mrb[94].mxu1 %vm379_vm0, %v23625_v17  ;;  %22410 = vmatprep.subr.bf16.mxu1 %v22409_v40 }
 0x1f8   : > { %v1416_v21 = vpop.f32.mrb[99].mxu0  ;;  %22412 = vmatpush3.bf16.msra.mxu1 %v22409_v40  ;;  %21475 = vmatmul.mubr.msk.f32.gmra.mrb[204].mxu0 %vm379_vm0, %v22835_v2  ;;  %v22852_v40 = vld [vmem:[%s23126_s27 + $0xf0] sm:$0xff] }
 0x1f9   : > { %v22413_v42 = vpack.c.bf16 %v20753_v41, %v1416_v21  ;;  %21184 = vmatprep.mubr.msk.f32.mxu1 %vm379_vm0, %v23153_v18  ;;  %21477 = vmatprep.mubr.msk.f32.mxu0 %vm379_vm0, %v22836_v22 }
 0x1fb   : > { %v20756_v43 = vpop.f32.mrb[100].mxu0  ;;  %21185 = vmatmul.mubr.msk.f32.vlgmr.msra.gmra.mrb[96].mxu1 %vm379_vm0, %v23625_v17  ;;  %22414 = vmatprep.subr.bf16.mxu1 %v22413_v42 }
 0x1fc   : > { %v1426_v23 = vpop.f32.mrb[101].mxu0  ;;  %22416 = vmatpush3.bf16.msra.mxu1 %v22413_v42  ;;  %21478 = vmatmul.mubr.msk.f32.gmra.mrb[206].mxu0 %vm379_vm0, %v22837_v60 }
 0x1fd   : > { %v22417_v44 = vpack.c.bf16 %v20756_v43, %v1426_v23  ;;  %21191 = vmatprep.mubr.msk.f32.mxu1 %vm379_vm0, %v23153_v18  ;;  %21480 = vmatprep.mubr.msk.f32.mxu0 %vm379_vm0, %v22838_v20 }
 0x1ff   : > { %v20759_v25 = vpop.f32.mrb[102].mxu0  ;;  %21192 = vmatmul.mubr.msk.f32.vlgmr.msra.gmra.mrb[98].mxu1 %vm379_vm0, %v23625_v17  ;;  %22418 = vmatprep.subr.bf16.mxu1 %v22417_v44 }
 0x200   : > { %v1436_v46 = vpop.f32.mrb[103].mxu0  ;;  %22420 = vmatpush3.bf16.msra.mxu1 %v22417_v44  ;;  %21481 = vmatmul.mubr.msk.f32.gmra.mrb[208].mxu0 %vm379_vm0, %v22839_v27 }
 0x201   : > { %v22421_v59 = vpack.c.bf16 %v20759_v25, %v1436_v46  ;;  %21198 = vmatprep.mubr.msk.f32.mxu1 %vm379_vm0, %v23153_v18  ;;  %21483 = vmatprep.mubr.msk.f32.mxu0 %vm379_vm0, %v22840_v49  ;;  %v22853_v25 = vld [vmem:[%s23126_s27 + $0xf8] sm:$0xff] }
 0x203   : > { %v20762_v28 = vpop.f32.mrb[104].mxu0  ;;  %21199 = vmatmul.mubr.msk.f32.vlgmr.msra.gmra.mrb[100].mxu1 %vm379_vm0, %v23625_v17  ;;  %22422 = vmatprep.subr.bf16.mxu1 %v22421_v59 }
 0x204   : > { %v1446_v51 = vpop.f32.mrb[105].mxu0  ;;  %22424 = vmatpush3.bf16.msra.mxu1 %v22421_v59  ;;  %21484 = vmatmul.mubr.msk.f32.gmra.mrb[210].mxu0 %vm379_vm0, %v22841_v31 }
 0x205   : > { %v22425_v10 = vpack.c.bf16 %v20762_v28, %v1446_v51  ;;  %21205 = vmatprep.mubr.msk.f32.mxu1 %vm379_vm0, %v23153_v18  ;;  %21486 = vmatprep.mubr.msk.f32.mxu0 %vm379_vm0, %v22842_v52  ;;  %v22697_v51 = vpop.eup %22696 }
 0x207   : > { %v20765_v32 = vpop.f32.mrb[106].mxu0  ;;  %21206 = vmatmul.mubr.msk.f32.vlgmr.msra.gmra.mrb[102].mxu1 %vm379_vm0, %v23625_v17  ;;  %22426 = vmatprep.subr.bf16.mxu1 %v22425_v10 }
 0x208   : > { %v1456_v53 = vpop.f32.mrb[107].mxu0  ;;  %22428 = vmatpush3.bf16.msra.mxu1 %v22425_v10  ;;  %21487 = vmatmul.mubr.msk.f32.gmra.mrb[212].mxu0 %vm379_vm0, %v22843_v35 }
 0x209   : > { %v22429_v24 = vpack.c.bf16 %v20765_v32, %v1456_v53  ;;  %21212 = vmatprep.mubr.msk.f32.mxu1 %vm379_vm0, %v23153_v18  ;;  %21489 = vmatprep.mubr.msk.f32.mxu0 %vm379_vm0, %v22844_v54 }
 0x20b   : > { %v20768_v36 = vpop.f32.mrb[108].mxu0  ;;  %21213 = vmatmul.mubr.msk.f32.vlgmr.msra.gmra.mrb[104].mxu1 %vm379_vm0, %v23625_v17  ;;  %22430 = vmatprep.subr.bf16.mxu1 %v22429_v24 }
 0x20c   : > { %v1466_v55 = vpop.f32.mrb[109].mxu0  ;;  %22432 = vmatpush3.bf16.msra.mxu1 %v22429_v24  ;;  %21490 = vmatmul.mubr.msk.f32.gmra.mrb[214].mxu0 %vm379_vm0, %v22845_v39 }
 0x20d   : > { %v22433_v5 = vpack.c.bf16 %v20768_v36, %v1466_v55  ;;  %21219 = vmatprep.mubr.msk.f32.mxu1 %vm379_vm0, %v23153_v18  ;;  %21492 = vmatprep.mubr.msk.f32.mxu0 %vm379_vm0, %v22846_v56 }
 0x20e   : > { %v24109_v45 = vpop.f32.mrb[0].mxu1 }
 0x20f   : > { %v20771_v3 = vpop.f32.mrb[110].mxu0  ;;  %v24111_v57 = vpop.f32.mrb[1].mxu1  ;;  %21220 = vmatmul.mubr.msk.f32.vlgmr.msra.gmra.mrb[106].mxu1 %vm379_vm0, %v23625_v17  ;;  %22434 = vmatprep.subr.bf16.mxu1 %v22433_v5 }
 0x210   : > { %v1476_v47 = vpop.f32.mrb[111].mxu0  ;;  %22436 = vmatpush3.bf16.msra.mxu1 %v22433_v5  ;;  %21493 = vmatmul.mubr.msk.f32.gmra.mrb[216].mxu0 %vm379_vm0, %v22847_v1 }
 0x211   : > { %v22437_v6 = vpack.c.bf16 %v20771_v3, %v1476_v47  ;;  %21226 = vmatprep.mubr.msk.f32.mxu1 %vm379_vm0, %v23153_v18  ;;  %21495 = vmatprep.mubr.msk.f32.mxu0 %vm379_vm0, %v22848_v61 }
 0x212   : > { %v24121_v58 = vpop.f32.mrb[2].mxu1 }
 0x213   : > { %v7732_v26 = vadd.f32 %v24121_v58, %v24109_v45  ;;  %v20774_v7 = vpop.f32.mrb[112].mxu0  ;;  %v24125_v4 = vpop.f32.mrb[3].mxu1  ;;  %21227 = vmatmul.mubr.msk.f32.vlgmr.msra.gmra.mrb[108].mxu1 %vm379_vm0, %v23625_v17  ;;  %22438 = vmatprep.subr.bf16.mxu1 %v22437_v6 }
 0x214   : > { %v7731_v15 = vadd.f32 %v24125_v4, %v24111_v57  ;;  %v1486_v29 = vpop.f32.mrb[113].mxu0  ;;  %22440 = vmatpush3.bf16.msra.mxu1 %v22437_v6  ;;  %21496 = vmatmul.mubr.msk.f32.gmra.mrb[218].mxu0 %vm379_vm0, %v22849_v8  ;;  %v24214_v6 = vmul.f32 %v22697_v51, %v23726_v62 }
 0x215   : > { %v22441_v30 = vpack.c.bf16 %v20774_v7, %v1486_v29  ;;  %21233 = vmatprep.mubr.msk.f32.mxu1 %vm379_vm0, %v23153_v18  ;;  %21498 = vmatprep.mubr.msk.f32.mxu0 %vm379_vm0, %v22850_v9 }
 0x216   : > { %v24137_v50 = vpop.f32.mrb[4].mxu1 }
 0x217   : > { %v7734_v33 = vadd.f32 %v24137_v50, %v24121_v58  ;;  %v8052_v12 = vadd.f32 %v24137_v50, %v7732_v26  ;;  %v20777_v34 = vpop.f32.mrb[114].mxu0  ;;  %v24142_v13 = vpop.f32.mrb[5].mxu1  ;;  %21234 = vmatmul.mubr.msk.f32.vlgmr.msra.gmra.mrb[110].mxu1 %vm379_vm0, %v23625_v17  ;;  %22442 = vmatprep.subr.bf16.mxu1 %v22441_v30 }
 0x218   : > { %v7733_v11 = vadd.f32 %v24142_v13, %v24125_v4  ;;  %v8051_v37 = vadd.f32 %v7731_v15, %v24142_v13  ;;  %v1496_v14 = vpop.f32.mrb[115].mxu0  ;;  %22444 = vmatpush3.bf16.msra.mxu1 %v22441_v30  ;;  %21499 = vmatmul.mubr.msk.f32.gmra.mrb[220].mxu0 %vm379_vm0, %v22851_v38 }
 0x219   : > { %v7894_v16 = vadd.f32 %v24109_v45, %v7734_v33  ;;  %v22445_v0 = vpack.c.bf16 %v20777_v34, %v1496_v14  ;;  %21240 = vmatprep.mubr.msk.f32.mxu1 %vm379_vm0, %v23153_v18  ;;  %21501 = vmatprep.mubr.msk.f32.mxu0 %vm379_vm0, %v22852_v40 }
 0x21a   : > { %v7893_v19 = vadd.f32 %v7733_v11, %v24111_v57  ;;  %v24157_v41 = vpop.f32.mrb[6].mxu1 }
 0x21b   : > { %v7736_v21 = vadd.f32 %v24157_v41, %v24137_v50  ;;  %v8054_v2 = vadd.f32 %v24157_v41, %v7894_v16  ;;  %v24163_v42 = vadd.f32 %v24157_v41, %v8052_v12  ;;  %v20780_v22 = vpop.f32.mrb[116].mxu0  ;;  %v24165_v43 = vpop.f32.mrb[7].mxu1  ;;  %21241 = vmatmul.mubr.msk.f32.vlgmr.msra.gmra.mrb[112].mxu1 %vm379_vm0, %v23625_v17  ;;  %22446 = vmatprep.subr.bf16.mxu1 %v22445_v0 }
 0x21c   : > { %v7735_v23 = vadd.f32 %v24165_v43, %v24142_v13  ;;  %v8053_v60 = vadd.f32 %v7893_v19, %v24165_v43  ;;  %v24173_v44 = vadd.f32 %v8051_v37, %v24165_v43  ;;  %v1506_v20 = vpop.f32.mrb[117].mxu0  ;;  %22448 = vmatpush3.bf16.msra.mxu1 %v22445_v0  ;;  %21502 = vmatmul.mubr.msk.f32.gmra.mrb[222].mxu0 %vm379_vm0, %v22853_v25 }
 0x21d   : > { %28624 = vst [vmem:[#allocation9_spill] sm:$0xff] %v24163_v42  ;;  %v22449_v46 = vpack.c.bf16 %v20780_v22, %v1506_v20  ;;  %v7896_v27 = vadd.f32 %v24121_v58, %v7736_v21  ;;  %21247 = vmatprep.mubr.msk.f32.mxu1 %vm379_vm0, %v23153_v18  ;;  %v24181_v59 = vmul.f32 0.002915452, %v24163_v42 }
 0x21e   : > { %28625 = vst [vmem:[#allocation10_spill] sm:$0xff] %v24173_v44  ;;  %v24183_v49 = vpop.f32.mrb[8].mxu1  ;;  %v7895_v28 = vadd.f32 %v7735_v23, %v24125_v4  ;;  %v24205_v55 = vmul.f32 0.002915452, %v24173_v44 }
 0x21f   : > { %28626 = vst [vmem:[#allocation13_spill] sm:$0xff] %v24181_v59  ;;  %v7738_v31 = vadd.f32 %v24183_v49, %v24157_v41  ;;  %v8056_v10 = vadd.f32 %v24183_v49, %v7896_v27  ;;  %v24190_v52 = vadd.f32 %v24183_v49, %v8054_v2  ;;  %v20783_v32 = vpop.f32.mrb[118].mxu0  ;;  %v24192_v53 = vpop.f32.mrb[9].mxu1  ;;  %21248 = vmatmul.mubr.msk.f32.vlgmr.msra.gmra.mrb[114].mxu1 %vm379_vm0, %v23625_v17  ;;  %v8980_v61 = vmul.f32 2.0, %v24181_v59 }
 0x220   : > { %22450 = vmatprep.subr.bf16.mxu1 %v22449_v46  ;;  %v7737_v35 = vadd.f32 %v24192_v53, %v24165_v43  ;;  %v8055_v24 = vadd.f32 %v7895_v28, %v24192_v53  ;;  %v24200_v54 = vadd.f32 %v8053_v60, %v24192_v53  ;;  %v1516_v36 = vpop.f32.mrb[119].mxu0  ;;  %21254 = vmatprep.mubr.msk.f32.mxu1 %vm379_vm0, %v23153_v18  ;;  %v8979_v38 = vmul.f32 2.0, %v24205_v55 }
 0x221   : > { %28627 = vst [vmem:[#allocation14_spill] sm:$0xff] %v24190_v52  ;;  %22452 = vmatpush3.bf16.msra.mxu1 %v22449_v46  ;;  %28629 = vst [vmem:[#allocation15_spill] sm:$0xff] %v24205_v55  ;;  %v22453_v39 = vpack.c.bf16 %v20783_v32, %v1516_v36  ;;  %v7898_v5 = vadd.f32 %v24137_v50, %v7738_v31  ;;  %v8216_v56 = vadd.f32 %v24109_v45, %v8056_v10 }
 0x222   : > { %28628 = vst [vmem:[#allocation22_spill] sm:$0xff] %v24200_v54  ;;  %v24209_v3 = vpop.f32.mrb[10].mxu1  ;;  %v7897_v47 = vadd.f32 %v7737_v35, %v24142_v13  ;;  %v8215_v1 = vadd.f32 %v8055_v24, %v24111_v57  ;;  %v24218_v48 = vmul.f32 0.002915452, %v24190_v52  ;;  %v24231_v30 = vmul.f32 0.002915452, %v24200_v54 }
 0x223   : > { %v7740_v26 = vadd.f32 %v24209_v3, %v24183_v49  ;;  %v8058_v7 = vadd.f32 %v24209_v3, %v7898_v5  ;;  %v24224_v15 = vadd.f32 %v24209_v3, %v8216_v56  ;;  %v20786_v29 = vpop.f32.mrb[120].mxu0  ;;  %v24226_v8 = vpop.f32.mrb[11].mxu1  ;;  %22454 = vmatprep.subr.bf16.mxu1 %v22453_v39  ;;  %v24249_v19 = vmul.f32 %v8980_v61, %v24163_v42 }
 0x224   : > { %28630 = vst [vmem:[#allocation23_spill] sm:$0xff] %v24218_v48  ;;  %21255 = vmatmul.mubr.msk.f32.vlgmr.msra.gmra.mrb[116].mxu1 %vm379_vm0, %v23625_v17  ;;  %28632 = vst [vmem:[#allocation24_spill] sm:$0xff] %v24231_v30  ;;  %v7739_v9 = vadd.f32 %v24226_v8, %v24192_v53  ;;  %v8057_v33 = vadd.f32 %v7897_v47, %v24226_v8  ;;  %v24237_v12 = vadd.f32 %v8215_v1, %v24226_v8  ;;  %v1526_v34 = vpop.f32.mrb[121].mxu0 }
 0x225   : > { %28631 = vst [vmem:[#allocation16_spill] sm:$0xff] %v24224_v15  ;;  %22456 = vmatpush3.bf16.msra.mxu1 %v22453_v39  ;;  %21261 = vmatprep.mubr.msk.f32.mxu1 %vm379_vm0, %v23153_v18  ;;  %v22457_v11 = vpack.c.bf16 %v20786_v29, %v1526_v34  ;;  %v7900_v37 = vadd.f32 %v24157_v41, %v7740_v26  ;;  %28634 = vst [vmem:[#allocation25_spill] sm:$0xff] %v24249_v19  ;;  %v24264_v25 = vmul.f32 2.0, %v24218_v48 }
 0x226   : > { %28633 = vst [vmem:[#allocation17_spill] sm:$0xff] %v24237_v12  ;;  %v8218_v14 = vadd.f32 %v24121_v58, %v8058_v7  ;;  %v24244_v16 = vpop.f32.mrb[12].mxu1  ;;  %v7899_v0 = vadd.f32 %v7739_v9, %v24165_v43  ;;  %v8217_v40 = vadd.f32 %v8057_v33, %v24125_v4  ;;  %v24253_v21 = vmul.f32 %v24181_v59, %v24181_v59 }
 0x227   : > { %v7742_v2 = vadd.f32 %v24244_v16, %v24209_v3  ;;  %v8060_v22 = vadd.f32 %v24244_v16, %v7900_v37  ;;  %v20789_v60 = vpop.f32.mrb[122].mxu0  ;;  %v24259_v20 = vpop.f32.mrb[13].mxu1  ;;  %22458 = vmatprep.subr.bf16.mxu1 %v22457_v11  ;;  %28635 = vst [vmem:[#allocation18_spill] sm:$0xff] %v24264_v25  ;;  %v24273_v31 = vmul.f32 2.0, %v24231_v30  ;;  %v24288_v47 = vmul.f32 %v8979_v38, %v24173_v44 }
 0x228   : > { %v8378_v23 = vadd.f32 %v24244_v16, %v8218_v14  ;;  %21262 = vmatmul.mubr.msk.f32.vlgmr.msra.gmra.mrb[118].mxu1 %vm379_vm0, %v23625_v17  ;;  %v7741_v46 = vadd.f32 %v24259_v20, %v24226_v8  ;;  %v8059_v27 = vadd.f32 %v7899_v0, %v24259_v20  ;;  %v8377_v28 = vadd.f32 %v8217_v40, %v24259_v20  ;;  %v1536_v51 = vpop.f32.mrb[123].mxu0 }
 0x229   : > { %22460 = vmatpush3.bf16.msra.mxu1 %v22457_v11  ;;  %21268 = vmatprep.mubr.msk.f32.mxu1 %vm379_vm0, %v23153_v18  ;;  %28636 = vst [vmem:[#allocation26_spill] sm:$0xff] %v24273_v31  ;;  %v22461_v10 = vpack.c.bf16 %v20789_v60, %v1536_v51  ;;  %v7902_v32 = vadd.f32 %v24183_v49, %v7742_v2  ;;  %28639 = vst [vmem:[#allocation20_spill] sm:$0xff] %v24288_v47 }
 0x22a   : > { %v8220_v35 = vadd.f32 %v24137_v50, %v8060_v22  ;;  %v24278_v24 = vadd.f32 %v24109_v45, %v8378_v23  ;;  %v24280_v36 = vpop.f32.mrb[14].mxu1  ;;  %v7901_v39 = vadd.f32 %v7741_v46, %v24192_v53  ;;  %v8219_v5 = vadd.f32 %v8059_v27, %v24142_v13 }
 0x22b   : > { %v24285_v56 = vadd.f32 %v8377_v28, %v24111_v57  ;;  %v7744_v1 = vadd.f32 %v24280_v36, %v24244_v16  ;;  %v8062_v61 = vadd.f32 %v24280_v36, %v7902_v32  ;;  %v20792_v26 = vpop.f32.mrb[124].mxu0  ;;  %v24296_v7 = vpop.f32.mrb[15].mxu1  ;;  %22462 = vmatprep.subr.bf16.mxu1 %v22461_v10  ;;  %v24323_v46 = vmul.f32 0.002915452, %v24224_v15 }
 0x22c   : > { %28637 = vst [vmem:[#allocation19_spill] sm:$0xff] %v24278_v24  ;;  %v24294_v45 = vadd.f32 %v24280_v36, %v8220_v35  ;;  %21269 = vmatmul.mubr.msk.f32.vlgmr.msra.gmra.mrb[120].mxu1 %vm379_vm0, %v23625_v17  ;;  %v24301_v57 = vmul.f32 0.002915452, %v24278_v24  ;;  %v7743_v29 = vadd.f32 %v24296_v7, %v24259_v20  ;;  %v8061_v9 = vadd.f32 %v7901_v39, %v24296_v7  ;;  %v1546_v34 = vpop.f32.mrb[125].mxu0 }
 0x22d   : > { %28638 = vst [vmem:[#allocation27_spill] sm:$0xff] %v24285_v56  ;;  %v8379_v33 = vadd.f32 %v8219_v5, %v24296_v7  ;;  %22464 = vmatpush3.bf16.msra.mxu1 %v22461_v10  ;;  %21275 = vmatprep.mubr.msk.f32.mxu1 %vm379_vm0, %v23153_v18  ;;  %v24310_v11 = vmul.f32 0.002915452, %v24285_v56  ;;  %v22465_v37 = vpack.c.bf16 %v20792_v26, %v1546_v34  ;;  %28642 = vst [vmem:[#allocation29_spill] sm:$0xff] %v24323_v46 }
 0x22e   : > { %28640 = vst [vmem:[#allocation28_spill] sm:$0xff] %v24301_v57  ;;  %v7904_v14 = vadd.f32 %v24209_v3, %v7744_v1  ;;  %v8222_v38 = vadd.f32 %v24157_v41, %v8062_v61  ;;  %v8986_v0 = vmul.f32 2.0, %v24301_v57  ;;  %v24315_v40 = vpop.f32.mrb[16].mxu1  ;;  %v7903_v2 = vadd.f32 %v7743_v29, %v24226_v8 }
 0x22f   : > { %28641 = vst [vmem:[#allocation21_spill] sm:$0xff] %v24310_v11  ;;  %v8221_v22 = vadd.f32 %v8061_v9, %v24165_v43  ;;  %v9082_v23 = vmul.f32 %v24301_v57, %v24301_v57  ;;  %v8985_v60 = vmul.f32 2.0, %v24310_v11  ;;  %v7746_v27 = vadd.f32 %v24315_v40, %v24280_v36  ;;  %v20795_v10 = vpop.f32.mrb[126].mxu0  ;;  %v24329_v32 = vpop.f32.mrb[17].mxu1  ;;  %22466 = vmatprep.subr.bf16.mxu1 %v22465_v37 }
 0x230   : > { %v8064_v28 = vadd.f32 %v24315_v40, %v7904_v14  ;;  %v8382_v51 = vadd.f32 %v24315_v40, %v8222_v38  ;;  %21276 = vmatmul.mubr.msk.f32.vlgmr.msra.gmra.mrb[122].mxu1 %vm379_vm0, %v23625_v17  ;;  %v24334_v35 = vmul.f32 0.002915452, %v24237_v12  ;;  %v7745_v39 = vadd.f32 %v24329_v32, %v24296_v7  ;;  %v1556_v61 = vpop.f32.mrb[127].mxu0 }
 0x231   : > { %v8063_v5 = vadd.f32 %v7903_v2, %v24329_v32  ;;  %v24340_v1 = vadd.f32 %v8221_v22, %v24329_v32  ;;  %22468 = vmatpush3.bf16.msra.mxu1 %v22465_v37  ;;  %21282 = vmatprep.mubr.msk.f32.mxu1 %vm379_vm0, %v23153_v18  ;;  %v22469_v26 = vpack.c.bf16 %v20795_v10, %v1556_v61  ;;  %v24381_v62 = vmul.f32 343.0, %v9082_v23 }
 0x232   : > { %28643 = vst [vmem:[#allocation30_spill] sm:$0xff] %v24334_v35  ;;  %v7906_v29 = vadd.f32 %v24244_v16, %v7746_v27  ;;  %v8224_v9 = vadd.f32 %v24183_v49, %v8064_v28  ;;  %v24347_v34 = vmul.f32 %v8986_v0, %v24278_v24  ;;  %v24349_v14 = vpop.f32.mrb[18].mxu1  ;;  %v7905_v38 = vadd.f32 %v7745_v39, %v24259_v20 }
 0x233   : > { %v8223_v2 = vadd.f32 %v8063_v5, %v24192_v53  ;;  %v24354_v22 = vmul.f32 %v8985_v60, %v24285_v56  ;;  %v24358_v37 = vmul.f32 %v24310_v11, %v24310_v11  ;;  %v7748_v27 = vadd.f32 %v24349_v14, %v24315_v40  ;;  %v20798_v10 = vpop.f32.mrb[128].mxu0  ;;  %v24366_v61 = vpop.f32.mrb[19].mxu1  ;;  %22470 = vmatprep.subr.bf16.mxu1 %v22469_v26 }
 0x234   : > { %28644 = vst [vmem:[#allocation31_spill] sm:$0xff] %v24347_v34  ;;  %v8066_v28 = vadd.f32 %v24349_v14, %v7906_v29  ;;  %v24364_v0 = vadd.f32 %v24349_v14, %v8224_v9  ;;  %21283 = vmatmul.mubr.msk.f32.vlgmr.msra.gmra.mrb[124].mxu1 %vm379_vm0, %v23625_v17  ;;  %v24371_v60 = vmul.f32 343.0, %v24253_v21  ;;  %v7747_v39 = vadd.f32 %v24366_v61, %v24329_v32  ;;  %v1566_v9 = vpop.f32.mrb[129].mxu0 }
 0x235   : > { %28645 = vst [vmem:[#allocation32_spill] sm:$0xff] %v24354_v22  ;;  %v8065_v5 = vadd.f32 %v7905_v38, %v24366_v61  ;;  %v24377_v29 = vadd.f32 %v8223_v2, %v24366_v61  ;;  %22472 = vmatpush3.bf16.msra.mxu1 %v22469_v26  ;;  %21289 = vmatprep.mubr.msk.f32.mxu1 %vm379_vm0, %v23153_v18  ;;  %28647 = vst [vmem:[#allocation34_spill] sm:$0xff] %v24381_v62 }
 0x236   : > { %28646 = vst [vmem:[#allocation33_spill] sm:$0xff] %v24371_v60  ;;  %v22473_v11 = vpack.c.bf16 %v20798_v10, %v1566_v9  ;;  %v7908_v56 = vadd.f32 %v24280_v36, %v7748_v27  ;;  %v8226_v21 = vadd.f32 %v24209_v3, %v8066_v28  ;;  %v24387_v57 = vadd.f32 %v24121_v58, %v24294_v45  ;;  %v24389_v38 = vpop.f32.mrb[20].mxu1 }
 0x237   : > { %v7907_v2 = vadd.f32 %v7747_v39, %v24296_v7  ;;  %v8225_v26 = vadd.f32 %v8065_v5, %v24226_v8  ;;  %v24394_v24 = vadd.f32 %v8379_v33, %v24125_v4  ;;  %v24397_v23 = vadd.f32 %v24137_v50, %v8382_v51  ;;  %v20801_v45 = vpop.f32.mrb[130].mxu0  ;;  %v24405_v10 = vpop.f32.mrb[21].mxu1 }
 0x238   : > { %28648 = vst [vmem:[#allocation35_spill] sm:$0xff] %v24387_v57  ;;  %v7750_v27 = vadd.f32 %v24389_v38, %v24349_v14  ;;  %v8068_v28 = vadd.f32 %v24389_v38, %v7908_v56  ;;  %v24403_v58 = vadd.f32 %v24389_v38, %v8226_v21  ;;  %21290 = vmatmul.mubr.msk.f32.vlgmr.msra.gmra.mrb[126].mxu1 %vm379_vm0, %v23625_v17  ;;  %v24410_v4 = vmul.f32 0.002915452, %v24387_v57  ;;  %v1576_v51 = vpop.f32.mrb[131].mxu0 }
 0x239   : > { %28649 = vst [vmem:[#allocation36_spill] sm:$0xff] %v24394_v24  ;;  %28650 = vst [vmem:[#allocation37_spill] sm:$0xff] %v24397_v23  ;;  %22474 = vmatprep.subr.bf16.mxu1 %v22473_v11  ;;  %v7749_v50 = vadd.f32 %v24405_v10, %v24366_v61  ;;  %v8067_v33 = vadd.f32 %v7907_v2, %v24405_v10  ;;  %v24416_v56 = vadd.f32 %v8225_v26, %v24405_v10 }
 0x23a   : > { %28651 = vst [vmem:[#allocation38_spill] sm:$0xff] %v24410_v4  ;;  %22476 = vmatpush3.bf16.msra.mxu1 %v22473_v11  ;;  %21296 = vmatprep.mubr.msk.f32.mxu1 %vm379_vm0, %v23153_v18  ;;  %v24421_v39 = vmul.f32 0.002915452, %v24394_v24  ;;  %v22477_v5 = vpack.c.bf16 %v20801_v45, %v1576_v51  ;;  %v8228_v9 = vadd.f32 %v24244_v16, %v8068_v28  ;;  %v8988_v44 = vmul.f32 2.0, %v24410_v4  ;;  %v24426_v59 = vpop.f32.mrb[22].mxu1 }
 0x23b   : > { %v7910_v21 = vadd.f32 %v24315_v40, %v7750_v27  ;;  %v8227_v2 = vadd.f32 %v8067_v33, %v24259_v20  ;;  %v7909_v26 = vadd.f32 %v7749_v50, %v24329_v32  ;;  %v9084_v11 = vmul.f32 %v24410_v4, %v24410_v4  ;;  %v20804_v45 = vpop.f32.mrb[132].mxu0  ;;  %v24436_v28 = vpop.f32.mrb[23].mxu1 }
 0x23c   : > { %28652 = vst [vmem:[#allocation39_spill] sm:$0xff] %v24421_v39  ;;  %v8987_v42 = vmul.f32 2.0, %v24421_v39  ;;  %v24434_v12 = vadd.f32 %v24426_v59, %v8228_v9  ;;  %22478 = vmatprep.subr.bf16.mxu1 %v22477_v5  ;;  %v7752_v50 = vadd.f32 %v24426_v59, %v24389_v38  ;;  %v24444_v33 = vmul.f32 0.002915452, %v24397_v23  ;;  %v1586_v9 = vpop.f32.mrb[133].mxu0 }
 0x23d   : > { %21297 = vmatmul.mubr.msk.f32.vlgmr.msra.gmra.mrb[128].mxu1 %vm379_vm0, %v23625_v17  ;;  %v8070_v27 = vadd.f32 %v24426_v59, %v7910_v21  ;;  %v24447_v51 = vadd.f32 %v8227_v2, %v24436_v28  ;;  %v8069_v4 = vadd.f32 %v7909_v26, %v24436_v28  ;;  %v7751_v15 = vadd.f32 %v24436_v28, %v24405_v10 }
 0x23e   : > { %28653 = vst [vmem:[#allocation40_spill] sm:$0xff] %v24444_v33  ;;  %22480 = vmatpush3.bf16.msra.mxu1 %v22477_v5  ;;  %21303 = vmatprep.mubr.msk.f32.mxu1 %vm379_vm0, %v23153_v18  ;;  %v24455_v21 = vmul.f32 343.0, %v24358_v37  ;;  %v22481_v30 = vpack.c.bf16 %v20804_v45, %v1586_v9  ;;  %v7912_v22 = vadd.f32 %v24349_v14, %v7752_v50  ;;  %v24462_v5 = vpop.f32.mrb[24].mxu1 }
 0x23f   : > { %v8230_v62 = vadd.f32 %v24280_v36, %v8070_v27  ;;  %v24460_v2 = vmul.f32 %v8988_v44, %v24387_v57  ;;  %v8229_v34 = vadd.f32 %v8069_v4, %v24296_v7  ;;  %v7911_v26 = vadd.f32 %v7751_v15, %v24366_v61  ;;  %v20807_v27 = vpop.f32.mrb[134].mxu0  ;;  %v24472_v9 = vpop.f32.mrb[25].mxu1 }
 0x240   : > { %28654 = vst [vmem:[#allocation41_spill] sm:$0xff] %v24455_v21  ;;  %v24467_v35 = vmul.f32 %v8987_v42, %v24394_v24  ;;  %v9083_v37 = vmul.f32 %v24421_v39, %v24421_v39  ;;  %22482 = vmatprep.subr.bf16.mxu1 %v22481_v30  ;;  %v7754_v44 = vadd.f32 %v24462_v5, %v24426_v59  ;;  %v8990_v42 = vmul.f32 2.0, %v24444_v33  ;;  %v1596_v50 = vpop.f32.mrb[135].mxu0 }
 0x241   : > { %28655 = vst [vmem:[#allocation42_spill] sm:$0xff] %v24460_v2  ;;  %v8390_v45 = vadd.f32 %v24462_v5, %v8230_v62  ;;  %21304 = vmatmul.mubr.msk.f32.vlgmr.msra.gmra.mrb[130].mxu1 %vm379_vm0, %v23625_v17  ;;  %v8072_v15 = vadd.f32 %v24462_v5, %v7912_v22  ;;  %v8389_v4 = vadd.f32 %v8229_v34, %v24472_v9  ;;  %v24486_v24 = vmul.f32 343.0, %v9084_v11 }
 0x242   : > { %28656 = vst [vmem:[#allocation43_spill] sm:$0xff] %v24467_v35  ;;  %22484 = vmatpush3.bf16.msra.mxu1 %v22481_v30  ;;  %21310 = vmatprep.mubr.msk.f32.mxu1 %vm379_vm0, %v23153_v18  ;;  %v7753_v62 = vadd.f32 %v24472_v9, %v24436_v28  ;;  %v8071_v39 = vadd.f32 %v7911_v26, %v24472_v9  ;;  %v24496_v2 = vpop.f32.mrb[26].mxu1 }
 0x243   : > { %28657 = vst [vmem:[#allocation44_spill] sm:$0xff] %v24486_v24  ;;  %v24489_v57 = vadd.f32 %v24244_v16, %v8390_v45  ;;  %v22485_v22 = vpack.c.bf16 %v20807_v27, %v1596_v50  ;;  %v7914_v35 = vadd.f32 %v24389_v38, %v7754_v44  ;;  %v8232_v34 = vadd.f32 %v24315_v40, %v8072_v15  ;;  %v20810_v27 = vpop.f32.mrb[136].mxu0  ;;  %v24507_v44 = vpop.f32.mrb[27].mxu1 }
 0x244   : > { %v24494_v30 = vadd.f32 %v8389_v4, %v24259_v20  ;;  %v7913_v21 = vadd.f32 %v7753_v62, %v24405_v10  ;;  %v8231_v31 = vadd.f32 %v8071_v39, %v24329_v32  ;;  %v24501_v11 = vmul.f32 %v8990_v42, %v24397_v23  ;;  %v1606_v4 = vpop.f32.mrb[137].mxu0 }
 0x245   : > { %28658 = vst [vmem:[#allocation45_spill] sm:$0xff] %v24489_v57  ;;  %v7756_v16 = vadd.f32 %v24496_v2, %v24462_v5  ;;  %v8074_v26 = vadd.f32 %v24496_v2, %v7914_v35  ;;  %v8392_v45 = vadd.f32 %v24496_v2, %v8232_v34  ;;  %21311 = vmatmul.mubr.msk.f32.vlgmr.msra.gmra.mrb[132].mxu1 %vm379_vm0, %v23625_v17  ;;  %v24511_v20 = vmul.f32 343.0, %v9083_v37 }
 0x246   : > { %28659 = vst [vmem:[#allocation46_spill] sm:$0xff] %v24494_v30  ;;  %28660 = vst [vmem:[#allocation47_spill] sm:$0xff] %v24501_v11  ;;  %22486 = vmatprep.subr.bf16.mxu1 %v22485_v22  ;;  %v24514_v39 = vmul.f32 0.002915452, %v24489_v57  ;;  %v7755_v15 = vadd.f32 %v24507_v44, %v24472_v9  ;;  %v8073_v42 = vadd.f32 %v7913_v21, %v24507_v44  ;;  %21317 = vmatprep.mubr.msk.f32.mxu1 %vm379_vm0, %v23153_v18  ;;  %v20948_v11 = vpop.f32.mrb[28].mxu1 }
 0x247   : > { %28661 = vst [vmem:[#allocation48_spill] sm:$0xff] %v24511_v20  ;;  %v8391_v35 = vadd.f32 %v8231_v31, %v24507_v44  ;;  %22488 = vmatpush3.bf16.msra.mxu1 %v22485_v22  ;;  %v24523_v50 = vadd.f32 %v24280_v36, %v8392_v45  ;;  %v22489_v37 = vpack.c.bf16 %v20810_v27, %v1606_v4  ;;  %v24535_v20 = vmul.f32 0.002915452, %v24494_v30  ;;  %v20813_v27 = vpop.f32.mrb[138].mxu0 }
 0x248   : > { %28662 = vst [vmem:[#allocation49_spill] sm:$0xff] %v24514_v39  ;;  %v7916_v62 = vadd.f32 %v24426_v59, %v7756_v16  ;;  %v8234_v34 = vadd.f32 %v24349_v14, %v8074_v26  ;;  %v7915_v21 = vadd.f32 %v7755_v15, %v24436_v28  ;;  %v8233_v31 = vadd.f32 %v8073_v42, %v24366_v61  ;;  %v2847_v26 = vpop.f32.mrb[29].mxu1  ;;  %v1616_v4 = vpop.f32.mrb[139].mxu0 }
 0x249   : > { %28663 = vst [vmem:[#allocation50_spill] sm:$0xff] %v24523_v50  ;;  %v24528_v23 = vadd.f32 %v8391_v35, %v24296_v7  ;;  %v9086_v22 = vmul.f32 %v24444_v33, %v24444_v33  ;;  %28665 = vst [vmem:[#allocation52_spill] sm:$0xff] %v24535_v20  ;;  %v7758_v36 = vadd.f32 %v20948_v11, %v24496_v2  ;;  %22490 = vmatprep.subr.bf16.mxu1 %v22489_v37 }
 0x24a   : > { %v8076_v45 = vadd.f32 %v20948_v11, %v7916_v62  ;;  %v8394_v16 = vadd.f32 %v20948_v11, %v8234_v34  ;;  %21318 = vmatmul.mubr.msk.f32.vlgmr.msra.gmra.mrb[134].mxu1 %vm379_vm0, %v23625_v17  ;;  %v24541_v7 = vmul.f32 0.002915452, %v24523_v50  ;;  %v7757_v15 = vadd.f32 %v2847_v26, %v24507_v44 }
 0x24b   : > { %28664 = vst [vmem:[#allocation51_spill] sm:$0xff] %v24528_v23  ;;  %v8075_v42 = vadd.f32 %v7915_v21, %v2847_v26  ;;  %v8393_v35 = vadd.f32 %v8233_v31, %v2847_v26  ;;  %22492 = vmatpush3.bf16.msra.mxu1 %v22489_v37  ;;  %21324 = vmatprep.mubr.msk.f32.mxu1 %vm379_vm0, %v23153_v18  ;;  %v24552_v54 = vmul.f32 0.002915452, %v24528_v23  ;;  %v20955_v21 = vpop.f32.mrb[30].mxu1 }
 0x24c   : > { %28666 = vst [vmem:[#allocation53_spill] sm:$0xff] %v24541_v7  ;;  %v24547_v62 = vadd.f32 %v24315_v40, %v8394_v16  ;;  %v22493_v34 = vpack.c.bf16 %v20813_v27, %v1616_v4  ;;  %v7918_v33 = vadd.f32 %v24462_v5, %v7758_v36  ;;  %v8236_v24 = vadd.f32 %v24389_v38, %v8076_v45  ;;  %v20816_v16 = vpop.f32.mrb[140].mxu0  ;;  %v2922_v27 = vpop.f32.mrb[31].mxu1 }
 0x24d   : > { %28668 = vst [vmem:[#allocation55_spill] sm:$0xff] %v24552_v54  ;;  %v24555_v60 = vadd.f32 %v8393_v35, %v24329_v32  ;;  %v7917_v37 = vadd.f32 %v7757_v15, %v24472_v9  ;;  %v8235_v31 = vadd.f32 %v8075_v42, %v24405_v10  ;;  %v7760_v48 = vadd.f32 %v20955_v21, %v20948_v11  ;;  %v1626_v15 = vpop.f32.mrb[141].mxu0 }
 0x24e   : > { %28667 = vst [vmem:[#allocation54_spill] sm:$0xff] %v24547_v62  ;;  %v8078_v47 = vadd.f32 %v20955_v21, %v7918_v33  ;;  %v8396_v40 = vadd.f32 %v20955_v21, %v8236_v24  ;;  %21325 = vmatmul.mubr.msk.f32.vlgmr.msra.gmra.mrb[136].mxu1 %vm379_vm0, %v23625_v17  ;;  %22494 = vmatprep.subr.bf16.mxu1 %v22493_v34  ;;  %v24561_v36 = vmul.f32 343.0, %v9086_v22  ;;  %v24564_v45 = vmul.f32 0.002915452, %v24547_v62 }
 0x24f   : > { %28669 = vst [vmem:[#allocation56_spill] sm:$0xff] %v24555_v60  ;;  %v7759_v32 = vadd.f32 %v2922_v27, %v2847_v26  ;;  %v8077_v35 = vadd.f32 %v7917_v37, %v2922_v27  ;;  %v8395_v4 = vadd.f32 %v8235_v31, %v2922_v27  ;;  %22496 = vmatpush3.bf16.msra.mxu1 %v22493_v34  ;;  %v24578_v37 = vpop.f32.mrb[32].mxu1 }
 0x250   : > { %28670 = vst [vmem:[#allocation57_spill] sm:$0xff] %v24561_v36  ;;  %28671 = vst [vmem:[#allocation58_spill] sm:$0xff] %v24564_v45  ;;  %21331 = vmatprep.mubr.msk.f32.mxu1 %vm379_vm0, %v23153_v18  ;;  %v7920_v24 = vadd.f32 %v24496_v2, %v7760_v48  ;;  %v8238_v33 = vadd.f32 %v24426_v59, %v8078_v47  ;;  %v24571_v11 = vadd.f32 %v24349_v14, %v8396_v40  ;;  %v20819_v2 = vpop.f32.mrb[142].mxu0 }
 0x251   : > { %v22497_v22 = vpack.c.bf16 %v20816_v16, %v1626_v15  ;;  %v7919_v42 = vadd.f32 %v7759_v32, %v24507_v44  ;;  %v8237_v21 = vadd.f32 %v8077_v35, %v24436_v28  ;;  %v24576_v26 = vadd.f32 %v8395_v4, %v24366_v61  ;;  %28674 = vst [vmem:[#allocation61_spill] sm:$0xff] %v24578_v37  ;;  %v24593_v44 = vpop.f32.mrb[33].mxu1 }
 0x252   : > { %28672 = vst [vmem:[#allocation59_spill] sm:$0xff] %v24571_v11  ;;  %v24582_v34 = vadd.f32 %v24340_v1, %v24142_v13  ;;  %v24585_v48 = vmul.f32 0.002915452, %v24555_v60  ;;  %v24588_v47 = vadd.f32 %v24462_v5, %v7920_v24  ;;  %v24591_v14 = vadd.f32 %v24389_v38, %v8238_v33  ;;  %28679 = vst [vmem:[#allocation66_spill] sm:$0xff] %v24593_v44  ;;  %v1636_v5 = vpop.f32.mrb[143].mxu0  ;;  %v24630_v27 = vpop.f32.mrb[34].mxu1 }
 0x253   : > { %28673 = vst [vmem:[#allocation60_spill] sm:$0xff] %v24576_v26  ;;  %21332 = vmatmul.mubr.msk.f32.vlgmr.msra.gmra.mrb[138].mxu1 %vm379_vm0, %v23625_v17  ;;  %22498 = vmatprep.subr.bf16.mxu1 %v22497_v22  ;;  %v24599_v13 = vadd.f32 %v24157_v41, %v24364_v0  ;;  %v24602_v1 = vmul.f32 0.002915452, %v24571_v11  ;;  %v24605_v61 = vadd.f32 %v7919_v42, %v24472_v9  ;;  %v24619_v0 = vmul.f32 0.002915452, %v24576_v26  ;;  %v20822_v15 = vpop.f32.mrb[144].mxu0 }
 0x254   : > { %28675 = vst [vmem:[#allocation62_spill] sm:$0xff] %v24582_v34  ;;  %28676 = vst [vmem:[#allocation63_spill] sm:$0xff] %v24585_v48  ;;  %v24608_v38 = vadd.f32 %v8237_v21, %v24405_v10  ;;  %22500 = vmatpush3.bf16.msra.mxu1 %v22497_v22  ;;  %21338 = vmatprep.mubr.msk.f32.mxu1 %vm379_vm0, %v23153_v18  ;;  %v24613_v31 = vmul.f32 0.002915452, %v24582_v34  ;;  %v24616_v41 = vmul.f32 0.002915452, %v24591_v14 }
 0x255   : > { %28677 = vst [vmem:[#allocation64_spill] sm:$0xff] %v24588_v47  ;;  %28678 = vst [vmem:[#allocation65_spill] sm:$0xff] %v24591_v14  ;;  %v22501_v40 = vpack.c.bf16 %v20819_v2, %v1636_v5  ;;  %v24622_v9 = vmul.f32 0.002915452, %v24599_v13  ;;  %v24625_v10 = vmul.f32 0.002915452, %v24588_v47  ;;  %v7764_v4 = vadd.f32 %v24630_v27, %v24578_v37 }
 0x256   : > { %28680 = vst [vmem:[#allocation67_spill] sm:$0xff] %v24599_v13  ;;  %28681 = vst [vmem:[#allocation68_spill] sm:$0xff] %v24602_v1  ;;  %v24628_v16 = vmul.f32 0.002915452, %v24608_v38  ;;  %v8989_v32 = vmul.f32 2.0, %v24613_v31  ;;  %v9085_v35 = vmul.f32 %v24613_v31, %v24613_v31  ;;  %v24637_v24 = vpop.f32.mrb[35].mxu1  ;;  %v24646_v42 = vadd.f32 %v24377_v29, %v24165_v43 }
 0x257   : > { %28682 = vst [vmem:[#allocation69_spill] sm:$0xff] %v24605_v61  ;;  %28683 = vst [vmem:[#allocation70_spill] sm:$0xff] %v24608_v38  ;;  %21339 = vmatmul.mubr.msk.f32.vlgmr.msra.gmra.mrb[140].mxu1 %vm379_vm0, %v23625_v17  ;;  %22502 = vmatprep.subr.bf16.mxu1 %v22501_v40  ;;  %v8992_v33 = vmul.f32 2.0, %v24622_v9  ;;  %v9088_v22 = vmul.f32 %v24622_v9, %v24622_v9  ;;  %v24649_v21 = vmul.f32 0.002915452, %v24605_v61  ;;  %v1646_v5 = vpop.f32.mrb[145].mxu0 }
 0x258   : > { %28684 = vst [vmem:[#allocation71_spill] sm:$0xff] %v24613_v31  ;;  %28685 = vst [vmem:[#allocation72_spill] sm:$0xff] %v24616_v41  ;;  %v7763_v2 = vadd.f32 %v24637_v24, %v24593_v44  ;;  %22504 = vmatpush3.bf16.msra.mxu1 %v22501_v40  ;;  %21345 = vmatprep.mubr.msk.f32.mxu1 %vm379_vm0, %v23153_v18  ;;  %v24656_v31 = vmul.f32 %v8989_v32, %v24582_v34  ;;  %v24662_v29 = vmul.f32 343.0, %v9085_v35  ;;  %v24670_v40 = vpop.f32.mrb[36].mxu1 }
 0x259   : > { %28686 = vst [vmem:[#allocation73_spill] sm:$0xff] %v24619_v0  ;;  %28687 = vst [vmem:[#allocation74_spill] sm:$0xff] %v24622_v9  ;;  %v24660_v9 = vadd.f32 %v24183_v49, %v24403_v58  ;;  %v22505_v43 = vpack.c.bf16 %v20822_v15, %v1646_v5  ;;  %v24665_v36 = vmul.f32 %v8992_v33, %v24599_v13  ;;  %v24668_v19 = vmul.f32 0.002915452, %v24646_v42  ;;  %v20825_v33 = vpop.f32.mrb[146].mxu0  ;;  %v24692_v5 = vpop.f32.mrb[37].mxu1 }
 0x25a   : > { %28688 = vst [vmem:[#allocation75_spill] sm:$0xff] %v24625_v10  ;;  %28689 = vst [vmem:[#allocation76_spill] sm:$0xff] %v24628_v16  ;;  %v24677_v32 = vadd.f32 %v24416_v56, %v24192_v53  ;;  %v24681_v49 = vadd.f32 %v24209_v3, %v24434_v12  ;;  %v24685_v58 = vadd.f32 %v24447_v51, %v24226_v8  ;;  %v1656_v56 = vpop.f32.mrb[147].mxu0  ;;  %v24706_v51 = vmul.f32 343.0, %v9088_v22 }
 0x25b   : > { %28690 = vst [vmem:[#allocation77_spill] sm:$0xff] %v24630_v27  ;;  %28691 = vst [vmem:[#allocation78_spill] sm:$0xff] %v24637_v24  ;;  %v24673_v25 = vmul.f32 0.002915452, %v24660_v9  ;;  %v7766_v35 = vadd.f32 %v24670_v40, %v24630_v27  ;;  %v24690_v15 = vadd.f32 %v24670_v40, %v7764_v4  ;;  %21346 = vmatmul.mubr.msk.f32.vlgmr.msra.gmra.mrb[142].mxu1 %vm379_vm0, %v23625_v17  ;;  %22506 = vmatprep.subr.bf16.mxu1 %v22505_v43 }
 0x25c   : > { %28692 = vst [vmem:[#allocation79_spill] sm:$0xff] %v24646_v42  ;;  %28693 = vst [vmem:[#allocation80_spill] sm:$0xff] %v24649_v21  ;;  %v8991_v53 = vmul.f32 2.0, %v24668_v19  ;;  %v9087_v3 = vmul.f32 %v24668_v19, %v24668_v19  ;;  %v7765_v8 = vadd.f32 %v24692_v5, %v24637_v24  ;;  %v24702_v12 = vadd.f32 %v7763_v2, %v24692_v5 }
 0x25d   : > { %28694 = vst [vmem:[#allocation81_spill] sm:$0xff] %v24656_v31  ;;  %28695 = vst [vmem:[#allocation82_spill] sm:$0xff] %v24660_v9  ;;  %22508 = vmatpush3.bf16.msra.mxu1 %v22505_v43  ;;  %21352 = vmatprep.mubr.msk.f32.mxu1 %vm379_vm0, %v23153_v18  ;;  %v8994_v4 = vmul.f32 2.0, %v24673_v25  ;;  %v7926_v13 = vadd.f32 %v24578_v37, %v7766_v35  ;;  %v22509_v34 = vpack.c.bf16 %v20825_v33, %v1656_v56 }
 0x25e   : > { %28696 = vst [vmem:[#allocation83_spill] sm:$0xff] %v24662_v29  ;;  %28697 = vst [vmem:[#allocation84_spill] sm:$0xff] %v24665_v36  ;;  %v9090_v36 = vmul.f32 %v24673_v25, %v24673_v25  ;;  %v7925_v2 = vadd.f32 %v7765_v8, %v24593_v44  ;;  %v24716_v29 = vpop.f32.mrb[38].mxu1  ;;  %v24718_v43 = vmul.f32 343.0, %v9087_v3  ;;  %v24736_v3 = vmul.f32 0.002915452, %v24681_v49 }
 0x25f   : > { %28698 = vst [vmem:[#allocation85_spill] sm:$0xff] %v24668_v19  ;;  %28699 = vst [vmem:[#allocation86_spill] sm:$0xff] %v24670_v40  ;;  %v24711_v19 = vmul.f32 %v8991_v53, %v24646_v42  ;;  %v24721_v22 = vmul.f32 %v8994_v4, %v24660_v9  ;;  %v7768_v35 = vadd.f32 %v24716_v29, %v24670_v40  ;;  %v20828_v53 = vpop.f32.mrb[148].mxu0  ;;  %v24731_v56 = vpop.f32.mrb[39].mxu1  ;;  %22510 = vmatprep.subr.bf16.mxu1 %v22509_v34 }
 0x260   : > { %28700 = vst [vmem:[#allocation87_spill] sm:$0xff] %v24673_v25  ;;  %28701 = vst [vmem:[#allocation88_spill] sm:$0xff] %v24677_v32  ;;  %v24729_v33 = vadd.f32 %v24716_v29, %v7926_v13  ;;  %21353 = vmatmul.mubr.msk.f32.vlgmr.msra.gmra.mrb[144].mxu1 %vm379_vm0, %v23625_v17  ;;  %v24739_v8 = vmul.f32 0.002915452, %v24685_v58  ;;  %v7767_v4 = vadd.f32 %v24731_v56, %v24692_v5  ;;  %v1666_v13 = vpop.f32.mrb[149].mxu0 }
 0x261   : > { %28702 = vst [vmem:[#allocation89_spill] sm:$0xff] %v24681_v49  ;;  %28703 = vst [vmem:[#allocation90_spill] sm:$0xff] %v24685_v58  ;;  %v24744_v25 = vadd.f32 %v7925_v2, %v24731_v56  ;;  %22512 = vmatpush3.bf16.msra.mxu1 %v22509_v34  ;;  %21359 = vmatprep.mubr.msk.f32.mxu1 %vm379_vm0, %v23153_v18  ;;  %v22513_v44 = vpack.c.bf16 %v20828_v53, %v1666_v13  ;;  %v24755_v2 = vpop.f32.mrb[40].mxu1  ;;  %v20831_v13 = vpop.f32.mrb[150].mxu0 }
 0x262   : > { %28704 = vst [vmem:[#allocation91_spill] sm:$0xff] %v24692_v5  ;;  %28705 = vst [vmem:[#allocation92_spill] sm:$0xff] %v24706_v51  ;;  %v24724_v51 = vmul.f32 0.002915452, %v24677_v32  ;;  %v7928_v37 = vadd.f32 %v24630_v27, %v7768_v35  ;;  %v7927_v34 = vadd.f32 %v7767_v4, %v24637_v24  ;;  %v7770_v53 = vadd.f32 %v24755_v2, %v24716_v29 }
 0x263   : > { %28706 = vst [vmem:[#allocation93_spill] sm:$0xff] %v24711_v19  ;;  %28707 = vst [vmem:[#allocation94_spill] sm:$0xff] %v24716_v29  ;;  %v24758_v19 = vmul.f32 343.0, %v9090_v36  ;;  %22514 = vmatprep.subr.bf16.mxu1 %v22513_v44 }
 0x264   : > { %28708 = vst [vmem:[#allocation95_spill] sm:$0xff] %v24718_v43  ;;  %28709 = vst [vmem:[#allocation96_spill] sm:$0xff] %v24721_v22  ;;  %v8993_v9 = vmul.f32 2.0, %v24724_v51  ;;  %v9089_v42 = vmul.f32 %v24724_v51, %v24724_v51  ;;  %v8996_v22 = vmul.f32 2.0, %v24736_v3  ;;  %v9092_v43 = vmul.f32 %v24736_v3, %v24736_v3  ;;  %21360 = vmatmul.mubr.msk.f32.vlgmr.msra.gmra.mrb[146].mxu1 %vm379_vm0, %v23625_v17 }
 0x265   : > { %28710 = vst [vmem:[#allocation97_spill] sm:$0xff] %v24724_v51  ;;  %28711 = vst [vmem:[#allocation98_spill] sm:$0xff] %v24731_v56  ;;  %v24767_v35 = vadd.f32 %v24755_v2, %v7928_v37  ;;  %v24769_v51 = vpop.f32.mrb[41].mxu1  ;;  %v1676_v37 = vpop.f32.mrb[151].mxu0  ;;  %22516 = vmatpush3.bf16.msra.mxu1 %v22513_v44  ;;  %21366 = vmatprep.mubr.msk.f32.mxu1 %vm379_vm0, %v23153_v18 }
 0x266   : > { %28712 = vst [vmem:[#allocation99_spill] sm:$0xff] %v24736_v3  ;;  %28713 = vst [vmem:[#allocation100_spill] sm:$0xff] %v24739_v8  ;;  %v24761_v31 = vmul.f32 %v8993_v9, %v24677_v32  ;;  %v24773_v36 = vmul.f32 343.0, %v9089_v42  ;;  %v24776_v9 = vmul.f32 %v8996_v22, %v24681_v49  ;;  %v7769_v4 = vadd.f32 %v24769_v51, %v24731_v56 }
 0x267   : > { %28714 = vst [vmem:[#allocation101_spill] sm:$0xff] %v24744_v25  ;;  %28715 = vst [vmem:[#allocation102_spill] sm:$0xff] %v24755_v2  ;;  %v8995_v25 = vmul.f32 2.0, %v24739_v8  ;;  %v24781_v3 = vadd.f32 %v7927_v34, %v24769_v51  ;;  %v24785_v32 = vmul.f32 343.0, %v9092_v43  ;;  %v22517_v42 = vpack.c.bf16 %v20831_v13, %v1676_v37  ;;  %v24793_v34 = vpop.f32.mrb[42].mxu1 }
 0x268   : > { %28716 = vst [vmem:[#allocation103_spill] sm:$0xff] %v24767_v35  ;;  %28717 = vst [vmem:[#allocation104_spill] sm:$0xff] %v24769_v51  ;;  %v8998_v35 = vmul.f32 2.0, %v24514_v39  ;;  %v9091_v22 = vmul.f32 %v24739_v8, %v24739_v8  ;;  %v9094_v49 = vmul.f32 %v24514_v39, %v24514_v39  ;;  %v7929_v44 = vadd.f32 %v7769_v4, %v24692_v5  ;;  %v20834_v8 = vpop.f32.mrb[152].mxu0 }
 0x269   : > { %28718 = vst [vmem:[#allocation105_spill] sm:$0xff] %v24773_v36  ;;  %28719 = vst [vmem:[#allocation106_spill] sm:$0xff] %v24781_v3  ;;  %v7930_v36 = vadd.f32 %v24670_v40, %v7770_v53  ;;  %v24797_v3 = vmul.f32 %v8995_v25, %v24685_v58  ;;  %v8997_v13 = vmul.f32 2.0, %v24535_v20  ;;  %v7772_v53 = vadd.f32 %v24793_v34, %v24755_v2 }
 0x26a   : > { %28720 = vst [vmem:[#allocation107_spill] sm:$0xff] %v24785_v32  ;;  %28721 = vst [vmem:[#allocation108_spill] sm:$0xff] %v24793_v34  ;;  %v24800_v43 = vmul.f32 %v8998_v35, %v24489_v57  ;;  %v24806_v32 = vpop.f32.mrb[43].mxu1  ;;  %21367 = vmatmul.mubr.msk.f32.vlgmr.msra.gmra.mrb[148].mxu1 %vm379_vm0, %v23625_v17  ;;  %22518 = vmatprep.subr.bf16.mxu1 %v22517_v42  ;;  %v24810_v4 = vmul.f32 343.0, %v9091_v22  ;;  %v9093_v25 = vmul.f32 %v24535_v20, %v24535_v20  ;;  %v1686_v57 = vpop.f32.mrb[153].mxu0 }
 0x26b   : > { %28722 = vst [vmem:[#allocation109_spill] sm:$0xff] %v24797_v3  ;;  %v8090_v37 = vadd.f32 %v24793_v34, %v7930_v36  ;;  %28724 = vst [vmem:[#allocation111_spill] sm:$0xff] %v24806_v32  ;;  %v7771_v35 = vadd.f32 %v24806_v32, %v24769_v51  ;;  %v8089_v39 = vadd.f32 %v7929_v44, %v24806_v32  ;;  %22520 = vmatpush3.bf16.msra.mxu1 %v22517_v42  ;;  %v24827_v3 = vpop.f32.mrb[44].mxu1 }
 0x26c   : > { %28723 = vst [vmem:[#allocation110_spill] sm:$0xff] %v24800_v43  ;;  %28725 = vst [vmem:[#allocation112_spill] sm:$0xff] %v24810_v4  ;;  %21373 = vmatprep.mubr.msk.f32.mxu1 %vm379_vm0, %v23153_v18  ;;  %v24819_v36 = vmul.f32 343.0, %v9094_v49  ;;  %v24822_v58 = vmul.f32 %v8997_v13, %v24494_v30  ;;  %v22521_v22 = vpack.c.bf16 %v20834_v8, %v1686_v57  ;;  %v9000_v43 = vmul.f32 2.0, %v24541_v7 }
 0x26d   : > { %v7932_v4 = vadd.f32 %v24716_v29, %v7772_v53  ;;  %v8250_v20 = vadd.f32 %v24630_v27, %v8090_v37  ;;  %v7931_v44 = vadd.f32 %v7771_v35, %v24731_v56  ;;  %v8249_v42 = vadd.f32 %v8089_v39, %v24637_v24  ;;  %v20837_v53 = vpop.f32.mrb[154].mxu0  ;;  %v24840_v37 = vpop.f32.mrb[45].mxu1 }
 0x26e   : > { %28726 = vst [vmem:[#allocation113_spill] sm:$0xff] %v24819_v36  ;;  %v9096_v49 = vmul.f32 %v24541_v7, %v24541_v7  ;;  %v8999_v36 = vmul.f32 2.0, %v24552_v54  ;;  %v7774_v57 = vadd.f32 %v24827_v3, %v24793_v34  ;;  %21374 = vmatmul.mubr.msk.f32.vlgmr.msra.gmra.mrb[150].mxu1 %vm379_vm0, %v23625_v17  ;;  %22522 = vmatprep.subr.bf16.mxu1 %v22521_v22  ;;  %v24844_v39 = vmul.f32 343.0, %v9093_v25 }
 0x26f   : > { %v8092_v8 = vadd.f32 %v24827_v3, %v7932_v4  ;;  %v24838_v13 = vadd.f32 %v24827_v3, %v8250_v20  ;;  %v7773_v35 = vadd.f32 %v24840_v37, %v24806_v32  ;;  %v8091_v7 = vadd.f32 %v7931_v44, %v24840_v37  ;;  %v1696_v4 = vpop.f32.mrb[155].mxu0  ;;  %22524 = vmatpush3.bf16.msra.mxu1 %v22521_v22 }
 0x270   : > { %28728 = vst [vmem:[#allocation115_spill] sm:$0xff] %v24844_v39  ;;  %v24850_v30 = vadd.f32 %v8249_v42, %v24840_v37  ;;  %21380 = vmatprep.mubr.msk.f32.mxu1 %vm379_vm0, %v23153_v18  ;;  %v9002_v20 = vmul.f32 2.0, %v24564_v45  ;;  %v22525_v24 = vpack.c.bf16 %v20837_v53, %v1696_v4  ;;  %v7934_v27 = vadd.f32 %v24755_v2, %v7774_v57  ;;  %v24860_v39 = vpop.f32.mrb[46].mxu1  ;;  %v20840_v53 = vpop.f32.mrb[156].mxu0 }
 0x271   : > { %28727 = vst [vmem:[#allocation114_spill] sm:$0xff] %v24838_v13  ;;  %v8252_v25 = vadd.f32 %v24670_v40, %v8092_v8  ;;  %v24858_v13 = vmul.f32 %v9000_v43, %v24523_v50  ;;  %v7933_v44 = vadd.f32 %v7773_v35, %v24769_v51  ;;  %v8251_v42 = vadd.f32 %v8091_v7, %v24692_v5  ;;  %v24875_v4 = vpop.f32.mrb[47].mxu1 }
 0x272   : > { %28729 = vst [vmem:[#allocation116_spill] sm:$0xff] %v24850_v30  ;;  %v24865_v22 = vmul.f32 %v8999_v36, %v24528_v23  ;;  %v9095_v30 = vmul.f32 %v24552_v54, %v24552_v54  ;;  %v7776_v57 = vadd.f32 %v24860_v39, %v24827_v3  ;;  %v8094_v8 = vadd.f32 %v24860_v39, %v7934_v27  ;;  %v1706_v27 = vpop.f32.mrb[157].mxu0 }
 0x273   : > { %v24873_v43 = vadd.f32 %v24860_v39, %v8252_v25  ;;  %21381 = vmatmul.mubr.msk.f32.vlgmr.msra.gmra.mrb[152].mxu1 %vm379_vm0, %v23625_v17  ;;  %22526 = vmatprep.subr.bf16.mxu1 %v22525_v24  ;;  %v9001_v7 = vmul.f32 2.0, %v24585_v48  ;;  %v7775_v36 = vadd.f32 %v24875_v4, %v24840_v37  ;;  %v8093_v35 = vadd.f32 %v7933_v44, %v24875_v4 }
 0x274   : > { %v24884_v54 = vadd.f32 %v8251_v42, %v24875_v4  ;;  %22528 = vmatpush3.bf16.msra.mxu1 %v22525_v24  ;;  %21387 = vmatprep.mubr.msk.f32.mxu1 %vm379_vm0, %v23153_v18  ;;  %v24888_v25 = vmul.f32 343.0, %v9096_v49  ;;  %v22529_v23 = vpack.c.bf16 %v20840_v53, %v1706_v27  ;;  %v7936_v50 = vadd.f32 %v24793_v34, %v7776_v57  ;;  %v20843_v53 = vpop.f32.mrb[158].mxu0 }
 0x275   : > { %28730 = vst [vmem:[#allocation117_spill] sm:$0xff] %v24873_v43  ;;  %v8254_v5 = vadd.f32 %v24716_v29, %v8094_v8  ;;  %v24893_v40 = vmul.f32 %v9002_v20, %v24547_v62  ;;  %v24895_v43 = vpop.f32.mrb[48].mxu1  ;;  %v7935_v44 = vadd.f32 %v7775_v36, %v24806_v32  ;;  %v8253_v42 = vadd.f32 %v8093_v35, %v24731_v56 }
 0x276   : > { %28731 = vst [vmem:[#allocation118_spill] sm:$0xff] %v24884_v54  ;;  %v9098_v24 = vmul.f32 %v24564_v45, %v24564_v45  ;;  %v24902_v49 = vmul.f32 %v9001_v7, %v24555_v60  ;;  %v7778_v57 = vadd.f32 %v24895_v43, %v24860_v39  ;;  %v8096_v8 = vadd.f32 %v24895_v43, %v7936_v50  ;;  %v24910_v27 = vpop.f32.mrb[49].mxu1  ;;  %v1716_v50 = vpop.f32.mrb[159].mxu0 }
 0x277   : > { %28732 = vst [vmem:[#allocation119_spill] sm:$0xff] %v24893_v40  ;;  %v24908_v20 = vadd.f32 %v24895_v43, %v8254_v5  ;;  %21388 = vmatmul.mubr.msk.f32.vlgmr.msra.gmra.mrb[154].mxu1 %vm379_vm0, %v23625_v17  ;;  %22530 = vmatprep.subr.bf16.mxu1 %v22529_v23  ;;  %v24914_v36 = vmul.f32 343.0, %v9095_v30  ;;  %v7777_v7 = vadd.f32 %v24910_v27, %v24875_v4  ;;  %v9004_v5 = vmul.f32 2.0, %v24602_v1  ;;  %v24929_v54 = vpop.f32.mrb[50].mxu1 }
 0x278   : > { %28733 = vst [vmem:[#allocation120_spill] sm:$0xff] %v24902_v49  ;;  %v8095_v35 = vadd.f32 %v7935_v44, %v24910_v27  ;;  %v24920_v60 = vadd.f32 %v8253_v42, %v24910_v27  ;;  %22532 = vmatpush3.bf16.msra.mxu1 %v22529_v23  ;;  %21394 = vmatprep.mubr.msk.f32.mxu1 %vm379_vm0, %v23153_v18  ;;  %v28402_v40 = vmov 0.0|0.0  }
 0x279   : > { %28734 = vst [vmem:[#allocation121_spill] sm:$0xff] %v24908_v20  ;;  %28735 = vst [vmem:[#allocation122_spill] sm:$0xff] %v24914_v36  ;;  %v22533_v45 = vpack.c.bf16 %v20843_v53, %v1716_v50  ;;  %v7938_v62 = vadd.f32 %v24827_v3, %v7778_v57  ;;  %v8256_v30 = vadd.f32 %v24755_v2, %v8096_v8  ;;  %v24927_v20 = vmul.f32 343.0, %v9098_v24  ;;  %v24945_v53 = vpop.f32.mrb[51].mxu1 }
 0x27a   : > { %28736 = vst [vmem:[#allocation123_spill] sm:$0xff] %v24920_v60  ;;  %v7937_v44 = vadd.f32 %v7777_v7, %v24840_v37  ;;  %v8255_v42 = vadd.f32 %v8095_v35, %v24769_v51  ;;  %v9097_v23 = vmul.f32 %v24585_v48, %v24585_v48  ;;  %v24937_v60 = vadd.f32 %v24426_v59, %v24588_v47  ;;  %v21410_v7 = vpop.f32.mrb[160].mxu0 }
 0x27b   : > { %28737 = vst [vmem:[#allocation124_spill] sm:$0xff] %v24927_v20  ;;  %v7780_v57 = vadd.f32 %v24929_v54, %v24895_v43  ;;  %v8098_v8 = vadd.f32 %v24929_v54, %v7938_v62  ;;  %v24943_v24 = vadd.f32 %v24929_v54, %v8256_v30  ;;  %21395 = vmatmul.mubr.msk.f32.vlgmr.msra.gmra.mrb[156].mxu1 %vm379_vm0, %v23625_v17  ;;  %v9006_v35 = vmul.f32 2.0, %v24616_v41  ;;  %v9691_v62 = vpop.f32.mrb[161].mxu0 }
 0x27c   : > { %28738 = vst [vmem:[#allocation125_spill] sm:$0xff] %v24937_v60  ;;  %22534 = vmatprep.subr.bf16.mxu1 %v22533_v45  ;;  %v7779_v59 = vadd.f32 %v24945_v53, %v24910_v27  ;;  %v8097_v50 = vadd.f32 %v7937_v44, %v24945_v53  ;;  %v24954_v48 = vadd.f32 %v8255_v42, %v24945_v53  ;;  %v24959_v30 = vmul.f32 0.002915452, %v24937_v60  ;;  %v24965_v42 = vpop.f32.mrb[52].mxu1 }
 0x27d   : > { %28739 = vst [vmem:[#allocation126_spill] sm:$0xff] %v24943_v24  ;;  %22536 = vmatpush3.bf16.msra.mxu1 %v22533_v45  ;;  %21401 = vmatprep.mubr.msk.f32.mxu1 %vm379_vm0, %v23153_v18  ;;  %v22542_v24 = vpack.c.bf16 %v21410_v7, %v9691_v62  ;;  %v7940_v49 = vadd.f32 %v24860_v39, %v7780_v57  ;;  %v9010_v44 = vmul.f32 2.0, %v24625_v10  ;;  %v24979_v62 = vpop.f32.mrb[53].mxu1 }
 0x27e   : > { %28740 = vst [vmem:[#allocation127_spill] sm:$0xff] %v24954_v48  ;;  %28741 = vst [vmem:[#allocation128_spill] sm:$0xff] %v24959_v30  ;;  %v8258_v20 = vadd.f32 %v24793_v34, %v8098_v8  ;;  %22541 = vmatprep.subr.bf16.mxu1 %v28402_v40  ;;  %v7939_v45 = vadd.f32 %v7779_v59, %v24875_v4  ;;  %v8257_v48 = vadd.f32 %v8097_v50, %v24806_v32  ;;  %v21413_v59 = vpop.f32.mrb[162].mxu0 }
 0x27f   : > { %v9008_v18 = vmul.f32 2.0, %v24959_v30  ;;  %v24971_v36 = vmul.f32 %v9004_v5, %v24571_v11  ;;  %v7782_v57 = vadd.f32 %v24965_v42, %v24929_v54  ;;  %v8100_v8 = vadd.f32 %v24965_v42, %v7940_v49  ;;  %v9701_v49 = vpop.f32.mrb[163].mxu0 }
 0x280   : > { %v24977_v7 = vadd.f32 %v24965_v42, %v8258_v20  ;;  %21402 = vmatmul.mubr.msk.f32.vlgmr.msra.gmra.mrb[158].mxu1 %vm379_vm0, %v23625_v17  ;;  %v24984_v50 = vmul.f32 %v9006_v35, %v24591_v14  ;;  %v7781_v5 = vadd.f32 %v24979_v62, %v24945_v53  ;;  %v8099_v40 = vadd.f32 %v7939_v45, %v24979_v62 }
 0x281   : > { %28742 = vst [vmem:[#allocation129_spill] sm:$0xff] %v24971_v36  ;;  %v24990_v11 = vadd.f32 %v8257_v48, %v24979_v62  ;;  %22543 = vmatpush3.bf16.msra.mxu1 %v22542_v24  ;;  %21508 = vmatprep.mubr.msk.f32.mxu1 %vm22961_vm8, %v28597_v63  ;;  %v24994_v20 = vmul.f32 343.0, %v9097_v23  ;;  %v22545_v17 = vpack.c.bf16 %v21413_v59, %v9701_v49  ;;  %v28746_v14 = vmov 0.0|0.0   ;;  %v25002_v48 = vpop.f32.mrb[54].mxu1 }
 0x282   : > { %28743 = vst [vmem:[#allocation130_spill] sm:$0xff] %v24977_v7  ;;  %28744 = vst [vmem:[#allocation131_spill] sm:$0xff] %v24984_v50  ;;  %v8260_v35 = vadd.f32 %v24827_v3, %v8100_v8  ;;  %22544 = vmatprep.subr.bf16.mxu1 %v28746_v14  ;;  %v7942_v7 = vadd.f32 %v24895_v43, %v7782_v57  ;;  %v25000_v45 = vmul.f32 %v9008_v18, %v24937_v60  ;;  %v25014_v59 = vpop.f32.mrb[55].mxu1  ;;  %v21416_v57 = vpop.f32.mrb[164].mxu0 }
 0x283   : > { %28745 = vst [vmem:[#allocation132_spill] sm:$0xff] %v24990_v11  ;;  %28748 = vst [vmem:[#allocation134_spill] sm:$0xff] %v25002_v48  ;;  %v8259_v24 = vadd.f32 %v8099_v40, %v24840_v37  ;;  %v7941_v11 = vadd.f32 %v7781_v5, %v24910_v27  ;;  %v25007_v32 = vmul.f32 %v9010_v44, %v24588_v47  ;;  %v9711_v49 = vpop.f32.mrb[165].mxu0 }
 0x284   : > { %28747 = vst [vmem:[#allocation133_spill] sm:$0xff] %v25000_v45  ;;  %v9100_v23 = vmul.f32 %v24602_v1, %v24602_v1  ;;  %v25012_v8 = vadd.f32 %v25002_v48, %v8260_v35  ;;  %28750 = vst [vmem:[#allocation136_spill] sm:$0xff] %v25014_v59  ;;  %21509 = vmatmul.mubr.msk.f32.vlgmr.msra.gmra.mrb[160].mxu1 %vm379_vm0, %v24214_v6  ;;  %v8102_v18 = vadd.f32 %v25002_v48, %v7942_v7 }
 0x285   : > { %v7784_v40 = vadd.f32 %v25002_v48, %v24965_v42  ;;  %v9102_v44 = vmul.f32 %v24616_v41, %v24616_v41  ;;  %v25024_v5 = vadd.f32 %v8259_v24, %v25014_v59  ;;  %22546 = vmatpush3.bf16.msra.mxu1 %v22545_v17  ;;  %21515 = vmatprep.mubr.msk.f32.mxu1 %vm22961_vm8, %v28597_v63  ;;  %v25032_v7 = vmul.f32 2.0, %v24619_v0  ;;  %v25039_v41 = vpop.f32.mrb[56].mxu1 }
 0x286   : > { %28749 = vst [vmem:[#allocation135_spill] sm:$0xff] %v25012_v8  ;;  %v8101_v35 = vadd.f32 %v7941_v11, %v25014_v59  ;;  %v7783_v47 = vadd.f32 %v25014_v59, %v24979_v62  ;;  %v22548_v1 = vpack.c.bf16 %v21416_v57, %v9711_v49  ;;  %v8262_v60 = vadd.f32 %v24860_v39, %v8102_v18  ;;  %v25048_v18 = vpop.f32.mrb[57].mxu1  ;;  %v21419_v49 = vpop.f32.mrb[166].mxu0 }
 0x287   : > { %28751 = vst [vmem:[#allocation137_spill] sm:$0xff] %v25024_v5  ;;  %22547 = vmatprep.subr.bf16.mxu1 %v28746_v14  ;;  %v7944_v24 = vadd.f32 %v24929_v54, %v7784_v40  ;;  %v9104_v17 = vmul.f32 %v24959_v30, %v24959_v30  ;;  %v9106_v8 = vmul.f32 %v24625_v10, %v24625_v10  ;;  %v25045_v34 = vmul.f32 343.0, %v9100_v23  ;;  %v9721_v10 = vpop.f32.mrb[167].mxu0 }
 0x288   : > { %v8261_v11 = vadd.f32 %v8101_v35, %v24875_v4  ;;  %v7943_v5 = vadd.f32 %v7783_v47, %v24945_v53  ;;  %v8422_v57 = vadd.f32 %v25039_v41, %v8262_v60  ;;  %21516 = vmatmul.mubr.msk.f32.vlgmr.msra.gmra.mrb[162].mxu1 %vm379_vm0, %v24214_v6  ;;  %v7786_v40 = vadd.f32 %v25039_v41, %v25002_v48 }
 0x289   : > { %28752 = vst [vmem:[#allocation138_spill] sm:$0xff] %v25045_v34  ;;  %v8104_v35 = vadd.f32 %v25039_v41, %v7944_v24  ;;  %v25055_v30 = vmul.f32 343.0, %v9102_v44  ;;  %22549 = vmatpush3.bf16.msra.mxu1 %v22548_v1  ;;  %21522 = vmatprep.mubr.msk.f32.mxu1 %vm22961_vm8, %v28597_v63  ;;  %v7785_v60 = vadd.f32 %v25048_v18, %v25014_v59  ;;  %v25063_v34 = vmul.f32 343.0, %v9104_v17 }
 0x28a   : > { %v8421_v47 = vadd.f32 %v8261_v11, %v25048_v18  ;;  %v8103_v23 = vadd.f32 %v7943_v5, %v25048_v18  ;;  %v25066_v45 = vadd.f32 %v24827_v3, %v8422_v57  ;;  %v22551_v24 = vpack.c.bf16 %v21419_v49, %v9721_v10  ;;  %22550 = vmatprep.subr.bf16.mxu1 %v28746_v14 }
 0x28b   : > { %28753 = vst [vmem:[#allocation139_spill] sm:$0xff] %v25055_v30  ;;  %28754 = vst [vmem:[#allocation140_spill] sm:$0xff] %v25063_v34  ;;  %v7946_v44 = vadd.f32 %v24965_v42, %v7786_v40  ;;  %v8264_v11 = vadd.f32 %v24895_v43, %v8104_v35  ;;  %v25074_v30 = vpop.f32.mrb[58].mxu1  ;;  %v7945_v50 = vadd.f32 %v7785_v60, %v24979_v62  ;;  %v25090_v40 = vmul.f32 343.0, %v9106_v8 }
 0x28c   : > { %28755 = vst [vmem:[#allocation141_spill] sm:$0xff] %v25066_v45  ;;  %v25072_v1 = vadd.f32 %v8421_v47, %v24840_v37  ;;  %v8263_v5 = vadd.f32 %v8103_v23, %v24910_v27  ;;  %v25080_v3 = vadd.f32 %v24605_v61, %v24436_v28  ;;  %v7788_v10 = vadd.f32 %v25074_v30, %v25039_v41  ;;  %v25086_v49 = vpop.f32.mrb[59].mxu1  ;;  %v21422_v37 = vpop.f32.mrb[168].mxu0 }
 0x28d   : > { %v8106_v17 = vadd.f32 %v25074_v30, %v7946_v44  ;;  %v8424_v57 = vadd.f32 %v25074_v30, %v8264_v11  ;;  %21523 = vmatmul.mubr.msk.f32.vlgmr.msra.gmra.mrb[164].mxu1 %vm379_vm0, %v24214_v6  ;;  %28758 = vst [vmem:[#allocation144_spill] sm:$0xff] %v25090_v40  ;;  %v25093_v35 = vmul.f32 0.002915452, %v25066_v45  ;;  %v7787_v28 = vadd.f32 %v25086_v49, %v25048_v18  ;;  %v9731_v23 = vpop.f32.mrb[169].mxu0 }
 0x28e   : > { %28756 = vst [vmem:[#allocation142_spill] sm:$0xff] %v25072_v1  ;;  %28757 = vst [vmem:[#allocation143_spill] sm:$0xff] %v25080_v3  ;;  %v8105_v47 = vadd.f32 %v7945_v50, %v25086_v49  ;;  %v8423_v60 = vadd.f32 %v8263_v5, %v25086_v49  ;;  %22552 = vmatpush3.bf16.msra.mxu1 %v22551_v24  ;;  %21529 = vmatprep.mubr.msk.f32.mxu1 %vm22961_vm8, %v28597_v63  ;;  %v21060_v24 = vpop.f32.mrb[60].mxu1 }
 0x28f   : > { %28759 = vst [vmem:[#allocation145_spill] sm:$0xff] %v25093_v35  ;;  %v25102_v44 = vadd.f32 %v24860_v39, %v8424_v57  ;;  %v22554_v8 = vpack.c.bf16 %v21422_v37, %v9731_v23  ;;  %v7948_v11 = vadd.f32 %v25002_v48, %v7788_v10  ;;  %v8266_v45 = vadd.f32 %v24929_v54, %v8106_v17  ;;  %v4047_v10 = vpop.f32.mrb[61].mxu1  ;;  %v21425_v23 = vpop.f32.mrb[170].mxu0 }
 0x290   : > { %22553 = vmatprep.subr.bf16.mxu1 %v28746_v14  ;;  %v25108_v35 = vmul.f32 0.002915452, %v25072_v1  ;;  %v25111_v50 = vadd.f32 %v8423_v60, %v24875_v4  ;;  %v7947_v5 = vadd.f32 %v7787_v28, %v25014_v59  ;;  %v8265_v34 = vadd.f32 %v8105_v47, %v24945_v53  ;;  %v9741_v47 = vpop.f32.mrb[171].mxu0 }
 0x291   : > { %28760 = vst [vmem:[#allocation146_spill] sm:$0xff] %v25102_v44  ;;  %v7790_v39 = vadd.f32 %v21060_v24, %v25074_v30  ;;  %v8108_v57 = vadd.f32 %v21060_v24, %v7948_v11  ;;  %v8426_v37 = vadd.f32 %v21060_v24, %v8266_v45  ;;  %21530 = vmatmul.mubr.msk.f32.vlgmr.msra.gmra.mrb[166].mxu1 %vm379_vm0, %v24214_v6  ;;  %v25119_v17 = vmul.f32 0.002915452, %v25080_v3 }
 0x292   : > { %28761 = vst [vmem:[#allocation147_spill] sm:$0xff] %v25108_v35  ;;  %28762 = vst [vmem:[#allocation148_spill] sm:$0xff] %v25111_v50  ;;  %v25122_v4 = vmul.f32 0.002915452, %v25102_v44  ;;  %v7789_v60 = vadd.f32 %v4047_v10, %v25086_v49  ;;  %v8107_v28 = vadd.f32 %v7947_v5, %v4047_v10  ;;  %v8425_v1 = vadd.f32 %v8265_v34, %v4047_v10 }
 0x293   : > { %28763 = vst [vmem:[#allocation149_spill] sm:$0xff] %v25119_v17  ;;  %22555 = vmatpush3.bf16.msra.mxu1 %v22554_v8  ;;  %21536 = vmatprep.mubr.msk.f32.mxu1 %vm22961_vm8, %v28597_v63  ;;  %v25128_v45 = vadd.f32 %v24895_v43, %v8426_v37  ;;  %v22557_v11 = vpack.c.bf16 %v21425_v23, %v9741_v47  ;;  %v25134_v44 = vmul.f32 0.002915452, %v25111_v50  ;;  %v21067_v8 = vpop.f32.mrb[62].mxu1 }
 0x294   : > { %28764 = vst [vmem:[#allocation150_spill] sm:$0xff] %v25122_v4  ;;  %v7950_v35 = vadd.f32 %v25039_v41, %v7790_v39  ;;  %v8268_v40 = vadd.f32 %v24965_v42, %v8108_v57  ;;  %22556 = vmatprep.subr.bf16.mxu1 %v28746_v14  ;;  %v25137_v34 = vadd.f32 %v8425_v1, %v24910_v27  ;;  %v4122_v47 = vpop.f32.mrb[63].mxu1  ;;  %v21428_v39 = vpop.f32.mrb[172].mxu0  ;;  %v9005_v57 = vmul.f32 2.0, %v24628_v16 }
 0x295   : > { %28765 = vst [vmem:[#allocation151_spill] sm:$0xff] %v25128_v45  ;;  %28766 = vst [vmem:[#allocation152_spill] sm:$0xff] %v25134_v44  ;;  %v7949_v5 = vadd.f32 %v7789_v60, %v25048_v18  ;;  %v8267_v4 = vadd.f32 %v8107_v28, %v24979_v62  ;;  %v7792_v43 = vadd.f32 %v21067_v8, %v21060_v24  ;;  %v25145_v50 = vmul.f32 0.002915452, %v25128_v45  ;;  %v9751_v36 = vpop.f32.mrb[173].mxu0  ;;  %v28792_v45 = vld [vmem:[#allocation23_spill] sm:$0xff] }
 0x296   : > { %28767 = vst [vmem:[#allocation153_spill] sm:$0xff] %v25137_v34  ;;  %v8110_v37 = vadd.f32 %v21067_v8, %v7950_v35  ;;  %v8428_v23 = vadd.f32 %v21067_v8, %v8268_v40  ;;  %21537 = vmatmul.mubr.msk.f32.vlgmr.msra.gmra.mrb[168].mxu1 %vm379_vm0, %v24214_v6  ;;  %v7791_v27 = vadd.f32 %v4122_v47, %v4047_v10  ;;  %v9007_v8 = vmul.f32 2.0, %v25119_v17 }
 0x297   : > { %28768 = vst [vmem:[#allocation154_spill] sm:$0xff] %v25145_v50  ;;  %v8109_v1 = vadd.f32 %v7949_v5, %v4122_v47  ;;  %v8427_v44 = vadd.f32 %v8267_v4, %v4122_v47  ;;  %22558 = vmatpush3.bf16.msra.mxu1 %v22557_v11  ;;  %21543 = vmatprep.mubr.msk.f32.mxu1 %vm22961_vm8, %v28597_v63  ;;  %v25160_v11 = vpop.f32.mrb[64].mxu1 }
 0x298   : > { %v7952_v40 = vadd.f32 %v25074_v30, %v7792_v43  ;;  %v8270_v35 = vadd.f32 %v25002_v48, %v8110_v37  ;;  %v25152_v24 = vadd.f32 %v24929_v54, %v8428_v23  ;;  %v22560_v60 = vpack.c.bf16 %v21428_v39, %v9751_v36  ;;  %22559 = vmatprep.subr.bf16.mxu1 %v28746_v14  ;;  %v25172_v5 = vpop.f32.mrb[65].mxu1 }
 0x299   : > { %v7951_v28 = vadd.f32 %v7791_v27, %v25086_v49  ;;  %v8269_v10 = vadd.f32 %v8109_v1, %v25014_v59  ;;  %v25158_v4 = vadd.f32 %v8427_v44, %v24945_v53  ;;  %v25164_v30 = vmul.f32 0.002915452, %v25137_v34  ;;  %v21431_v49 = vpop.f32.mrb[174].mxu0  ;;  %v25205_v27 = vpop.f32.mrb[66].mxu1 }
 0x29a   : > { %28769 = vst [vmem:[#allocation155_spill] sm:$0xff] %v25152_v24  ;;  %v25167_v54 = vadd.f32 %v25039_v41, %v7952_v40  ;;  %v25170_v36 = vadd.f32 %v24965_v42, %v8270_v35  ;;  %21544 = vmatmul.mubr.msk.f32.vlgmr.msra.gmra.mrb[170].mxu1 %vm379_vm0, %v24214_v6  ;;  %v9009_v53 = vmul.f32 2.0, %v24649_v21  ;;  %v25178_v44 = vmul.f32 0.002915452, %v25152_v24  ;;  %v9761_v37 = vpop.f32.mrb[175].mxu0 }
 0x29b   : > { %28770 = vst [vmem:[#allocation156_spill] sm:$0xff] %v25158_v4  ;;  %28771 = vst [vmem:[#allocation157_spill] sm:$0xff] %v25164_v30  ;;  %v25181_v43 = vadd.f32 %v7951_v28, %v25048_v18  ;;  %v25184_v41 = vadd.f32 %v8269_v10, %v24979_v62  ;;  %v25187_v42 = vmul.f32 0.002915452, %v25158_v4  ;;  %22561 = vmatpush3.bf16.msra.mxu1 %v22560_v60  ;;  %21550 = vmatprep.mubr.msk.f32.mxu1 %vm22961_vm8, %v28597_v63  ;;  %v25218_v28 = vpop.f32.mrb[67].mxu1 }
 0x29c   : > { %28772 = vst [vmem:[#allocation158_spill] sm:$0xff] %v25167_v54  ;;  %28773 = vst [vmem:[#allocation159_spill] sm:$0xff] %v25170_v36  ;;  %v25192_v23 = vmul.f32 0.002915452, %v25170_v36  ;;  %v25195_v47 = vmul.f32 0.002915452, %v25167_v54  ;;  %v22563_v39 = vpack.c.bf16 %v21431_v49, %v9761_v37  ;;  %22562 = vmatprep.subr.bf16.mxu1 %v28746_v14  ;;  %v25200_v62 = vmul.f32 %v25032_v7, %v24576_v26 }
 0x29d   : > { %28774 = vst [vmem:[#allocation160_spill] sm:$0xff] %v25178_v44  ;;  %28775 = vst [vmem:[#allocation161_spill] sm:$0xff] %v25181_v43  ;;  %v25203_v18 = vmul.f32 0.002915452, %v25184_v41  ;;  %v25208_v1 = vmul.f32 %v9005_v57, %v24608_v38  ;;  %v25211_v40 = vmul.f32 %v9007_v8, %v25080_v3  ;;  %v25214_v35 = vmul.f32 %v9009_v53, %v24605_v61  ;;  %v21434_v7 = vpop.f32.mrb[176].mxu0  ;;  %v28790_v44 = vld [vmem:[#allocation25_spill] sm:$0xff] }
 0x29e   : > { %28776 = vst [vmem:[#allocation162_spill] sm:$0xff] %v25184_v41  ;;  %28777 = vst [vmem:[#allocation163_spill] sm:$0xff] %v25187_v42  ;;  %v7796_v60 = vadd.f32 %v25205_v27, %v25160_v11  ;;  %21551 = vmatmul.mubr.msk.f32.vlgmr.msra.gmra.mrb[172].mxu1 %vm379_vm0, %v24214_v6  ;;  %v9099_v10 = vmul.f32 %v24619_v0, %v24619_v0  ;;  %v9101_v57 = vmul.f32 %v24628_v16, %v24628_v16  ;;  %v9771_v37 = vpop.f32.mrb[177].mxu0 }
 0x29f   : > { %28778 = vst [vmem:[#allocation164_spill] sm:$0xff] %v25192_v23  ;;  %28779 = vst [vmem:[#allocation165_spill] sm:$0xff] %v25195_v47  ;;  %v9103_v8 = vmul.f32 %v25119_v17, %v25119_v17  ;;  %v25229_v49 = vmul.f32 0.002915452, %v25181_v43  ;;  %v7795_v53 = vadd.f32 %v25218_v28, %v25172_v5  ;;  %22564 = vmatpush3.bf16.msra.mxu1 %v22563_v39  ;;  %21557 = vmatprep.mubr.msk.f32.mxu1 %vm22961_vm8, %v28597_v63  ;;  %v25249_v39 = vpop.f32.mrb[68].mxu1  ;;  %v21437_v41 = vpop.f32.mrb[178].mxu0 }
 0x2a0   : > { %28780 = vst [vmem:[#allocation166_spill] sm:$0xff] %v25203_v18  ;;  %v9105_v0 = vmul.f32 %v24649_v21, %v24649_v21  ;;  %v25239_v16 = vadd.f32 %v24716_v29, %v24690_v15  ;;  %v22566_v61 = vpack.c.bf16 %v21434_v7, %v9771_v37  ;;  %22565 = vmatprep.subr.bf16.mxu1 %v28746_v14  ;;  %v25242_v17 = vmul.f32 343.0, %v9099_v10  ;;  %v25265_v37 = vpop.f32.mrb[69].mxu1  ;;  %v28787_v18 = vld [vmem:[#allocation18_spill] sm:$0xff] }
 0x2a1   : > { %28781 = vst [vmem:[#allocation167_spill] sm:$0xff] %v25229_v49  ;;  %v25244_v3 = vmul.f32 343.0, %v9101_v57  ;;  %v25247_v38 = vmul.f32 2.0, %v24323_v46  ;;  %v25251_v26 = vmul.f32 343.0, %v9103_v8  ;;  %v25258_v15 = vadd.f32 %v24702_v12, %v24731_v56  ;;  %v9781_v49 = vpop.f32.mrb[179].mxu0  ;;  %v25293_v59 = vpop.f32.mrb[70].mxu1 }
 0x2a2   : > { %28782 = vst [vmem:[#allocation168_spill] sm:$0xff] %v25239_v16  ;;  %v25254_v21 = vmul.f32 0.002915452, %v25239_v16  ;;  %v9075_v7 = vmul.f32 %v24205_v55, %v24205_v55  ;;  %v7798_v10 = vadd.f32 %v25249_v39, %v25205_v27  ;;  %v8116_v57 = vadd.f32 %v25249_v39, %v7796_v60  ;;  %21558 = vmatmul.mubr.msk.f32.vlgmr.msra.gmra.mrb[174].mxu1 %vm379_vm0, %v24214_v6  ;;  %v21440_v24 = vpop.f32.mrb[180].mxu0 }
 0x2a3   : > { %28783 = vst [vmem:[#allocation169_spill] sm:$0xff] %v25247_v38  ;;  %28785 = vst [vmem:[#allocation171_spill] sm:$0xff] %v25258_v15  ;;  %v25269_v8 = vmul.f32 343.0, %v9105_v0  ;;  %v25273_v12 = vadd.f32 %v24755_v2, %v24729_v33  ;;  %v7797_v55 = vadd.f32 %v25265_v37, %v25218_v28  ;;  %v8115_v4 = vadd.f32 %v7795_v53, %v25265_v37  ;;  %v9791_v47 = vpop.f32.mrb[181].mxu0 }
 0x2a4   : > { %28784 = vst [vmem:[#allocation170_spill] sm:$0xff] %v25254_v21  ;;  %22567 = vmatpush3.bf16.msra.mxu1 %v22566_v61  ;;  %21564 = vmatprep.mubr.msk.f32.mxu1 %vm22961_vm8, %v28597_v63  ;;  %v9172_v60 = vmul.f32 2.0, %v25254_v21  ;;  %v25283_v0 = vmul.f32 %v28787_v18, %v24190_v52  ;;  %v7958_v42 = vadd.f32 %v25160_v11, %v7798_v10  ;;  %v25290_v53 = vmul.f32 0.002915452, %v25258_v15 }
 0x2a5   : > { %28786 = vst [vmem:[#allocation172_spill] sm:$0xff] %v25273_v12  ;;  %v22569_v33 = vpack.c.bf16 %v21437_v41, %v9781_v49  ;;  %22568 = vmatprep.subr.bf16.mxu1 %v28746_v14  ;;  %v9268_v43 = vmul.f32 %v25254_v21, %v25254_v21  ;;  %v7957_v61 = vadd.f32 %v7797_v55, %v25172_v5  ;;  %v9107_v18 = vmul.f32 343.0, %v9075_v7  ;;  %v25305_v21 = vpop.f32.mrb[71].mxu1 }
 0x2a6   : > { %28788 = vst [vmem:[#allocation18_spill] sm:$0xff] %v25290_v53  ;;  %v25296_v36 = vmul.f32 %v9172_v60, %v25239_v16  ;;  %v25299_v52 = vmul.f32 0.002915452, %v25273_v12  ;;  %v7800_v41 = vadd.f32 %v25293_v59, %v25249_v39  ;;  %v8118_v49 = vadd.f32 %v25293_v59, %v7958_v42 }
 0x2a7   : > { %v8436_v10 = vadd.f32 %v25293_v59, %v8116_v57  ;;  %21565 = vmatmul.mubr.msk.f32.vlgmr.msra.gmra.mrb[176].mxu1 %vm379_vm0, %v24214_v6  ;;  %v9171_v55 = vmul.f32 2.0, %v25290_v53  ;;  %v7799_v7 = vadd.f32 %v25305_v21, %v25265_v37  ;;  %v8117_v60 = vadd.f32 %v7957_v61, %v25305_v21  ;;  %v25323_v61 = vpop.f32.mrb[72].mxu1 }
 0x2a8   : > { %28789 = vst [vmem:[#allocation173_spill] sm:$0xff] %v25299_v52  ;;  %v8435_v16 = vadd.f32 %v8115_v4, %v25305_v21  ;;  %22570 = vmatpush3.bf16.msra.mxu1 %v22569_v33  ;;  %21571 = vmatprep.mubr.msk.f32.mxu1 %vm22961_vm8, %v28597_v63  ;;  %v9174_v42 = vmul.f32 2.0, %v25299_v52  ;;  %v22572_v57 = vpack.c.bf16 %v21440_v24, %v9791_v47  ;;  %v28791_v33 = vld [vmem:[#allocation20_spill] sm:$0xff] }
 0x2a9   : > { %v7960_v23 = vadd.f32 %v25205_v27, %v7800_v41  ;;  %22571 = vmatprep.subr.bf16.mxu1 %v28746_v14  ;;  %v9044_v48 = vsub.f32 %v8436_v10, %v28790_v44  ;;  %v25321_v54 = vmul.f32 %v9171_v55, %v25258_v15  ;;  %v7959_v4 = vadd.f32 %v7799_v7, %v25218_v28  ;;  %v25333_v44 = vpop.f32.mrb[73].mxu1  ;;  %v21443_v10 = vpop.f32.mrb[182].mxu0 }
 0x2aa   : > { %v9043_v34 = vsub.f32 %v8435_v16, %v28791_v33  ;;  %v9267_v30 = vmul.f32 %v25290_v53, %v25290_v53  ;;  %v9078_v24 = vmul.f32 %v28792_v45, %v28792_v45  ;;  %v8438_v41 = vadd.f32 %v25323_v61, %v8118_v49  ;;  %v28793_v16 = vld [vmem:[#allocation33_spill] sm:$0xff] }
 0x2ab   : > { %v8120_v47 = vadd.f32 %v25323_v61, %v7960_v23  ;;  %21572 = vmatmul.mubr.msk.f32.vlgmr.msra.gmra.mrb[178].mxu1 %vm379_vm0, %v24214_v6  ;;  %v7802_v55 = vadd.f32 %v25323_v61, %v25293_v59  ;;  %v25340_v7 = vadd.f32 %v28793_v16, %v9044_v48  ;;  %v8119_v33 = vadd.f32 %v7959_v4, %v25333_v44  ;;  %v9801_v23 = vpop.f32.mrb[183].mxu0 }
 0x2ac   : > { %v25344_v45 = vadd.f32 %v8117_v60, %v25333_v44  ;;  %22573 = vmatpush3.bf16.msra.mxu1 %v22572_v57  ;;  %21578 = vmatprep.mubr.msk.f32.mxu1 %vm22961_vm8, %v28597_v63  ;;  %v7801_v49 = vadd.f32 %v25333_v44, %v25305_v21  ;;  %v25350_v15 = vmul.f32 343.0, %v9268_v43  ;;  %v22575_v53 = vpack.c.bf16 %v21443_v10, %v9801_v23  ;;  %v25357_v60 = vpop.f32.mrb[74].mxu1 }
 0x2ad   : > { %28794 = vst [vmem:[#allocation25_spill] sm:$0xff] %v25340_v7  ;;  %v8280_v50 = vadd.f32 %v25160_v11, %v8120_v47  ;;  %22574 = vmatprep.subr.bf16.mxu1 %v28746_v14  ;;  %v7962_v48 = vadd.f32 %v25249_v39, %v7802_v55  ;;  %v25355_v4 = vadd.f32 %v9107_v18, %v9043_v34  ;;  %v9110_v56 = vmul.f32 343.0, %v9078_v24  ;;  %v25365_v10 = vpop.f32.mrb[75].mxu1  ;;  %v21446_v47 = vpop.f32.mrb[184].mxu0 }
 0x2ae   : > { %v8279_v57 = vadd.f32 %v8119_v33, %v25172_v5  ;;  %v7961_v16 = vadd.f32 %v7801_v49, %v25265_v37  ;;  %v9046_v2 = vsub.f32 %v8438_v41, %v25283_v0  ;;  %v7804_v34 = vadd.f32 %v25357_v60, %v25323_v61  ;;  %v9811_v24 = vpop.f32.mrb[185].mxu0 }
 0x2af   : > { %28795 = vst [vmem:[#allocation20_spill] sm:$0xff] %v25355_v4  ;;  %v25363_v43 = vadd.f32 %v25357_v60, %v8280_v50  ;;  %21579 = vmatmul.mubr.msk.f32.vlgmr.msra.gmra.mrb[180].mxu1 %vm379_vm0, %v24214_v6  ;;  %v8122_v18 = vadd.f32 %v25357_v60, %v7962_v48  ;;  %v25373_v55 = vmul.f32 %v9174_v42, %v25273_v12  ;;  %v25383_v33 = vmul.f32 343.0, %v9267_v30  ;;  %v28800_v30 = vld [vmem:[#allocation101_spill] sm:$0xff] }
 0x2b0   : > { %v25376_v0 = vadd.f32 %v8279_v57, %v25365_v10  ;;  %22576 = vmatpush3.bf16.msra.mxu1 %v22575_v53  ;;  %21585 = vmatprep.mubr.msk.f32.mxu1 %vm22961_vm8, %v28597_v63  ;;  %v7803_v50 = vadd.f32 %v25365_v10, %v25333_v44  ;;  %v8121_v41 = vadd.f32 %v7961_v16, %v25365_v10  ;;  %v25390_v53 = vpop.f32.mrb[76].mxu1 }
 0x2b1   : > { %28796 = vst [vmem:[#allocation33_spill] sm:$0xff] %v25363_v43  ;;  %28797 = vst [vmem:[#allocation174_spill] sm:$0xff] %v25373_v55  ;;  %v22578_v23 = vpack.c.bf16 %v21446_v47, %v9811_v24  ;;  %v7964_v49 = vadd.f32 %v25293_v59, %v7804_v34  ;;  %v8282_v42 = vadd.f32 %v25205_v27, %v8122_v18  ;;  %22577 = vmatprep.subr.bf16.mxu1 %v28746_v14  ;;  %v25406_v18 = vpop.f32.mrb[77].mxu1  ;;  %v21449_v24 = vpop.f32.mrb[186].mxu0 }
 0x2b2   : > { %28798 = vst [vmem:[#allocation175_spill] sm:$0xff] %v25376_v0  ;;  %v25388_v48 = vadd.f32 %v9110_v56, %v9046_v2  ;;  %v7963_v57 = vadd.f32 %v7803_v50, %v25305_v21  ;;  %v8281_v12 = vadd.f32 %v8121_v41, %v25218_v28  ;;  %v25396_v16 = vmul.f32 %v25299_v52, %v25299_v52  ;;  %v28802_v50 = vld [vmem:[#allocation22_spill] sm:$0xff] }
 0x2b3   : > { %v25400_v47 = vadd.f32 %v28800_v30, %v24769_v51  ;;  %v7806_v34 = vadd.f32 %v25390_v53, %v25357_v60  ;;  %v8124_v56 = vadd.f32 %v25390_v53, %v7964_v49  ;;  %v8442_v2 = vadd.f32 %v25390_v53, %v8282_v42  ;;  %21586 = vmatmul.mubr.msk.f32.vlgmr.msra.gmra.mrb[182].mxu1 %vm379_vm0, %v24214_v6  ;;  %v28803_v41 = vld [vmem:[#allocation26_spill] sm:$0xff]  ;;  %v9821_v49 = vpop.f32.mrb[187].mxu0 }
 0x2b4   : > { %28799 = vst [vmem:[#allocation176_spill] sm:$0xff] %v25388_v48  ;;  %v25412_v52 = vmul.f32 %v28803_v41, %v28802_v50  ;;  %v7805_v30 = vadd.f32 %v25406_v18, %v25365_v10  ;;  %v8123_v51 = vadd.f32 %v7963_v57, %v25406_v18  ;;  %v8441_v29 = vadd.f32 %v8281_v12, %v25406_v18  ;;  %v28804_v42 = vld [vmem:[#allocation30_spill] sm:$0xff]  ;;  %v25428_v12 = vpop.f32.mrb[78].mxu1 }
 0x2b5   : > { %28801 = vst [vmem:[#allocation101_spill] sm:$0xff] %v25400_v47  ;;  %22579 = vmatpush3.bf16.msra.mxu1 %v22578_v23  ;;  %21592 = vmatprep.mubr.msk.f32.mxu1 %vm22961_vm8, %v28597_v63  ;;  %v25421_v0 = vmul.f32 2.0, %v28804_v42  ;;  %v8602_v43 = vadd.f32 %v25160_v11, %v8442_v2  ;;  %v22581_v48 = vpack.c.bf16 %v21449_v24, %v9821_v49  ;;  %v25433_v42 = vmul.f32 0.002915452, %v25400_v47  ;;  %v25440_v24 = vpop.f32.mrb[79].mxu1 }
 0x2b6   : > { %v7966_v41 = vadd.f32 %v25323_v61, %v7806_v34  ;;  %v8284_v50 = vadd.f32 %v25249_v39, %v8124_v56  ;;  %22580 = vmatprep.subr.bf16.mxu1 %v28746_v14  ;;  %v8601_v57 = vadd.f32 %v8441_v29, %v25172_v5  ;;  %v7965_v23 = vadd.f32 %v7805_v30, %v25333_v44  ;;  %v21452_v29 = vpop.f32.mrb[188].mxu0  ;;  %v28808_v5 = vld [vmem:[#allocation32_spill] sm:$0xff]  ;;  %v25460_v7 = vpop.f32.mrb[80].mxu1 }
 0x2b7   : > { %28805 = vst [vmem:[#allocation26_spill] sm:$0xff] %v25421_v0  ;;  %v8283_v46 = vadd.f32 %v8123_v51, %v25265_v37  ;;  %28806 = vst [vmem:[#allocation177_spill] sm:$0xff] %v25433_v42  ;;  %v28807_v0 = vld [vmem:[#allocation31_spill] sm:$0xff]  ;;  %v7808_v34 = vadd.f32 %v25428_v12, %v25390_v53  ;;  %v7807_v30 = vadd.f32 %v25440_v24, %v25406_v18  ;;  %v9831_v49 = vpop.f32.mrb[189].mxu0 }
 0x2b8   : > { %v9050_v11 = vsub.f32 %v8602_v43, %v28807_v0  ;;  %v8126_v56 = vadd.f32 %v25428_v12, %v7966_v41  ;;  %v8444_v2 = vadd.f32 %v25428_v12, %v8284_v50  ;;  %21593 = vmatmul.mubr.msk.f32.vlgmr.msra.gmra.mrb[184].mxu1 %vm379_vm0, %v24214_v6  ;;  %v9049_v51 = vsub.f32 %v8601_v57, %v28808_v5  ;;  %v28809_v41 = vld [vmem:[#allocation34_spill] sm:$0xff]  ;;  %v28811_v57 = vld [vmem:[#allocation41_spill] sm:$0xff] }
 0x2b9   : > { %v8125_v43 = vadd.f32 %v7965_v23, %v25440_v24  ;;  %v8443_v0 = vadd.f32 %v8283_v46, %v25440_v24  ;;  %22582 = vmatpush3.bf16.msra.mxu1 %v22581_v48  ;;  %v22584_v55 = vpack.c.bf16 %v21452_v29, %v9831_v49  ;;  %v7968_v4 = vadd.f32 %v25357_v60, %v7808_v34  ;;  %v25469_v29 = vpop.f32.mrb[81].mxu1 }
 0x2ba   : > { %v25450_v38 = vadd.f32 %v28809_v41, %v9050_v11  ;;  %v8604_v50 = vadd.f32 %v25205_v27, %v8444_v2  ;;  %21599 = vmatprep.mubr.msk.f32.mxu1 %vm22961_vm8, %v28597_v63  ;;  %v25457_v5 = vadd.f32 %v28811_v57, %v9049_v51  ;;  %v8286_v46 = vadd.f32 %v25293_v59, %v8126_v56  ;;  %v28813_v27 = vld [vmem:[#allocation42_spill] sm:$0xff]  ;;  %v28814_v56 = vld [vmem:[#allocation43_spill] sm:$0xff] }
 0x2bb   : > { %v8603_v23 = vadd.f32 %v8443_v0, %v25218_v28  ;;  %v7967_v48 = vadd.f32 %v7807_v30, %v25365_v10  ;;  %22583 = vmatprep.subr.bf16.mxu1 %v28746_v14  ;;  %v7810_v34 = vadd.f32 %v25460_v7, %v25428_v12  ;;  %v8128_v2 = vadd.f32 %v25460_v7, %v7968_v4  ;;  %v21455_v28 = vpop.f32.mrb[190].mxu0  ;;  %v28815_v4 = vld [vmem:[#allocation44_spill] sm:$0xff] }
 0x2bc   : > { %28810 = vst [vmem:[#allocation31_spill] sm:$0xff] %v25450_v38  ;;  %28812 = vst [vmem:[#allocation32_spill] sm:$0xff] %v25457_v5  ;;  %v9052_v11 = vsub.f32 %v8604_v50, %v28813_v27  ;;  %v8285_v51 = vadd.f32 %v8125_v43, %v25305_v21  ;;  %21600 = vmatmul.mubr.msk.f32.vlgmr.msra.gmra.mrb[186].mxu1 %vm379_vm0, %v24214_v6  ;;  %v8446_v30 = vadd.f32 %v25460_v7, %v8286_v46  ;;  %v9841_v50 = vpop.f32.mrb[191].mxu0  ;;  %v25490_v38 = vpop.f32.mrb[82].mxu1 }
 0x2bd   : > { %v9051_v0 = vsub.f32 %v8603_v23, %v28814_v56  ;;  %v7809_v49 = vadd.f32 %v25469_v29, %v25440_v24  ;;  %v8127_v41 = vadd.f32 %v7967_v48, %v25469_v29  ;;  %22585 = vmatpush3.bf16.msra.mxu1 %v22584_v55  ;;  %v22587_v27 = vpack.c.bf16 %v21455_v28, %v9841_v50  ;;  %v28817_v23 = vld [vmem:[#allocation48_spill] sm:$0xff]  ;;  %v25499_v28 = vpop.f32.mrb[83].mxu1 }
 0x2be   : > { %v25480_v57 = vadd.f32 %v28815_v4, %v9052_v11  ;;  %v8445_v43 = vadd.f32 %v8285_v51, %v25469_v29  ;;  %v7970_v5 = vadd.f32 %v25390_v53, %v7810_v34  ;;  %21606 = vmatprep.mubr.msk.f32.mxu1 %vm22961_vm8, %v28597_v63  ;;  %v8606_v56 = vadd.f32 %v25249_v39, %v8446_v30  ;;  %v21458_v39 = vpop.f32.mrb[192].mxu0 }
 0x2bf   : > { %v25487_v46 = vadd.f32 %v28817_v23, %v9051_v0  ;;  %v8288_v55 = vadd.f32 %v25323_v61, %v8128_v2  ;;  %v7969_v48 = vadd.f32 %v7809_v49, %v25406_v18  ;;  %22586 = vmatprep.subr.bf16.mxu1 %v28746_v14  ;;  %v7812_v34 = vadd.f32 %v25490_v38, %v25460_v7  ;;  %v28819_v2 = vld [vmem:[#allocation47_spill] sm:$0xff]  ;;  %v9851_v4 = vpop.f32.mrb[193].mxu0 }
 0x2c0   : > { %28816 = vst [vmem:[#allocation34_spill] sm:$0xff] %v25480_v57  ;;  %v8605_v11 = vadd.f32 %v8445_v43, %v25265_v37  ;;  %v8130_v51 = vadd.f32 %v25490_v38, %v7970_v5  ;;  %v8287_v0 = vadd.f32 %v8127_v41, %v25333_v44  ;;  %21607 = vmatmul.mubr.msk.f32.vlgmr.msra.gmra.mrb[188].mxu1 %vm379_vm0, %v24214_v6  ;;  %v28820_v5 = vld [vmem:[#allocation81_spill] sm:$0xff]  ;;  %v25518_v57 = vpop.f32.mrb[84].mxu1 }
 0x2c1   : > { %28818 = vst [vmem:[#allocation41_spill] sm:$0xff] %v25487_v46  ;;  %v9054_v30 = vsub.f32 %v8606_v56, %v28819_v2  ;;  %v8448_v49 = vadd.f32 %v25490_v38, %v8288_v55  ;;  %v7811_v37 = vadd.f32 %v25499_v28, %v25469_v29  ;;  %v8129_v50 = vadd.f32 %v7969_v48, %v25499_v28  ;;  %v28821_v56 = vld [vmem:[#allocation57_spill] sm:$0xff] }
 0x2c2   : > { %22588 = vmatpush3.bf16.msra.mxu1 %v22587_v27  ;;  %v9053_v43 = vsub.f32 %v8605_v11, %v28820_v5  ;;  %v8447_v23 = vadd.f32 %v8287_v0, %v25499_v28  ;;  %v22590_v41 = vpack.c.bf16 %v21458_v39, %v9851_v4  ;;  %v7972_v46 = vadd.f32 %v25428_v12, %v7812_v34  ;;  %v28823_v11 = vld [vmem:[#allocation83_spill] sm:$0xff]  ;;  %v25530_v4 = vpop.f32.mrb[85].mxu1 }
 0x2c3   : > { %21613 = vmatprep.mubr.msk.f32.mxu1 %vm22961_vm8, %v28597_v63  ;;  %v25515_v2 = vadd.f32 %v28821_v56, %v9054_v30  ;;  %v8608_v55 = vadd.f32 %v25293_v59, %v8448_v49  ;;  %v8290_v48 = vadd.f32 %v25357_v60, %v8130_v51  ;;  %v7971_v27 = vadd.f32 %v7811_v37, %v25440_v24  ;;  %v21461_v59 = vpop.f32.mrb[194].mxu0  ;;  %v28825_v51 = vld [vmem:[#allocation84_spill] sm:$0xff] }
 0x2c4   : > { %22589 = vmatprep.subr.bf16.mxu1 %v28746_v14  ;;  %v25524_v0 = vadd.f32 %v28823_v11, %v9053_v43  ;;  %v8607_v34 = vadd.f32 %v8447_v23, %v25305_v21  ;;  %v7814_v39 = vadd.f32 %v25518_v57, %v25490_v38  ;;  %v8132_v30 = vadd.f32 %v25518_v57, %v7972_v46  ;;  %v9861_v43 = vpop.f32.mrb[195].mxu0  ;;  %v28826_v23 = vld [vmem:[#allocation93_spill] sm:$0xff] }
 0x2c5   : > { %28822 = vst [vmem:[#allocation42_spill] sm:$0xff] %v25515_v2  ;;  %21614 = vmatmul.mubr.msk.f32.vlgmr.msra.gmra.mrb[190].mxu1 %vm379_vm0, %v24214_v6  ;;  %v9056_v49 = vsub.f32 %v8608_v55, %v28825_v51  ;;  %v8450_v37 = vadd.f32 %v25518_v57, %v8290_v48  ;;  %v7813_v5 = vadd.f32 %v25530_v4, %v25499_v28  ;;  %v28827_v55 = vld [vmem:[#allocation92_spill] sm:$0xff]  ;;  %v25548_v2 = vpop.f32.mrb[86].mxu1 }
 0x2c6   : > { %28824 = vst [vmem:[#allocation43_spill] sm:$0xff] %v25524_v0  ;;  %v8131_v21 = vadd.f32 %v7971_v27, %v25530_v4  ;;  %22591 = vmatpush3.bf16.msra.mxu1 %v22590_v41  ;;  %v9055_v56 = vsub.f32 %v8607_v34, %v28826_v23  ;;  %v8289_v46 = vadd.f32 %v8129_v50, %v25365_v10  ;;  %v28828_v50 = vld [vmem:[#allocation95_spill] sm:$0xff] }
 0x2c7   : > { %v22593_v11 = vpack.c.bf16 %v21461_v59, %v9861_v43  ;;  %v7974_v0 = vadd.f32 %v25460_v7, %v7814_v39  ;;  %21620 = vmatprep.mubr.msk.f32.mxu1 %vm22961_vm8, %v28597_v63  ;;  %v25545_v51 = vadd.f32 %v28827_v55, %v9056_v49  ;;  %v8610_v48 = vadd.f32 %v25323_v61, %v8450_v37  ;;  %v25560_v43 = vpop.f32.mrb[87].mxu1  ;;  %v21464_v61 = vpop.f32.mrb[196].mxu0 }
 0x2c8   : > { %v8292_v27 = vadd.f32 %v25390_v53, %v8132_v30  ;;  %v7973_v41 = vadd.f32 %v7813_v5, %v25469_v29  ;;  %22592 = vmatprep.subr.bf16.mxu1 %v28746_v14  ;;  %v25554_v34 = vadd.f32 %v28828_v50, %v9055_v56  ;;  %v8449_v39 = vadd.f32 %v8289_v46, %v25530_v4  ;;  %v28830_v30 = vld [vmem:[#allocation96_spill] sm:$0xff]  ;;  %v9871_v46 = vpop.f32.mrb[197].mxu0 }
 0x2c9   : > { %v7816_v59 = vadd.f32 %v25548_v2, %v25518_v57  ;;  %v8134_v49 = vadd.f32 %v25548_v2, %v7974_v0  ;;  %21621 = vmatmul.mubr.msk.f32.vlgmr.msra.gmra.mrb[192].mxu1 %vm379_vm0, %v24214_v6  ;;  %v9058_v37 = vsub.f32 %v8610_v48, %v28830_v30  ;;  %v7815_v23 = vadd.f32 %v25560_v43, %v25530_v4  ;;  %v25578_v30 = vpop.f32.mrb[88].mxu1 }
 0x2ca   : > { %28829 = vst [vmem:[#allocation44_spill] sm:$0xff] %v25554_v34  ;;  %v8452_v5 = vadd.f32 %v25548_v2, %v8292_v27  ;;  %v8133_v56 = vadd.f32 %v7973_v41, %v25560_v43  ;;  %22594 = vmatpush3.bf16.msra.mxu1 %v22593_v11  ;;  %v8609_v55 = vadd.f32 %v8449_v39, %v25333_v44 }
 0x2cb   : > { %v8291_v0 = vadd.f32 %v8131_v21, %v25406_v18  ;;  %v22596_v50 = vpack.c.bf16 %v21464_v61, %v9871_v46  ;;  %v7976_v34 = vadd.f32 %v25490_v38, %v7816_v59  ;;  %21627 = vmatprep.mubr.msk.f32.mxu1 %vm22961_vm8, %v28597_v63  ;;  %v25575_v48 = vadd.f32 %v24758_v19, %v9058_v37  ;;  %v25588_v59 = vpop.f32.mrb[89].mxu1 }
 0x2cc   : > { %v8612_v27 = vadd.f32 %v25357_v60, %v8452_v5  ;;  %v8294_v41 = vadd.f32 %v25428_v12, %v8134_v49  ;;  %v7975_v11 = vadd.f32 %v7815_v23, %v25499_v28  ;;  %22595 = vmatprep.subr.bf16.mxu1 %v28746_v14  ;;  %v9057_v44 = vsub.f32 %v8609_v55, %v24761_v31  ;;  %v21467_v60 = vpop.f32.mrb[198].mxu0  ;;  %v28832_v23 = vld [vmem:[#allocation105_spill] sm:$0xff] }
 0x2cd   : > { %28831 = vst [vmem:[#allocation48_spill] sm:$0xff] %v25575_v48  ;;  %v8451_v21 = vadd.f32 %v8291_v0, %v25560_v43  ;;  %v7818_v39 = vadd.f32 %v25578_v30, %v25548_v2  ;;  %v8136_v19 = vadd.f32 %v25578_v30, %v7976_v34  ;;  %21628 = vmatmul.mubr.msk.f32.vlgmr.msra.gmra.mrb[194].mxu1 %vm379_vm0, %v24214_v6  ;;  %v9881_v5 = vpop.f32.mrb[199].mxu0  ;;  %v25608_v48 = vpop.f32.mrb[90].mxu1 }
 0x2ce   : > { %v9060_v49 = vsub.f32 %v8612_v27, %v24776_v9  ;;  %v8454_v61 = vadd.f32 %v25578_v30, %v8294_v41  ;;  %v7817_v31 = vadd.f32 %v25588_v59, %v25560_v43  ;;  %v8135_v37 = vadd.f32 %v7975_v11, %v25588_v59  ;;  %22597 = vmatpush3.bf16.msra.mxu1 %v22596_v50  ;;  %v28834_v9 = vld [vmem:[#allocation107_spill] sm:$0xff] }
 0x2cf   : > { %v25598_v46 = vadd.f32 %v28832_v23, %v9057_v44  ;;  %v8611_v34 = vadd.f32 %v8451_v21, %v25365_v10  ;;  %v8293_v55 = vadd.f32 %v8133_v56, %v25440_v24  ;;  %v22599_v0 = vpack.c.bf16 %v21467_v60, %v9881_v5  ;;  %21634 = vmatprep.mubr.msk.f32.mxu1 %vm22961_vm8, %v28597_v63  ;;  %v28836_v10 = vld [vmem:[#allocation109_spill] sm:$0xff]  ;;  %v25617_v60 = vpop.f32.mrb[91].mxu1 }
 0x2d0   : > { %v25605_v27 = vadd.f32 %v28834_v9, %v9060_v49  ;;  %v8614_v41 = vadd.f32 %v25390_v53, %v8454_v61  ;;  %v7978_v50 = vadd.f32 %v25518_v57, %v7818_v39  ;;  %v8296_v11 = vadd.f32 %v25460_v7, %v8136_v19  ;;  %22598 = vmatprep.subr.bf16.mxu1 %v28746_v14  ;;  %v21470_v53 = vpop.f32.mrb[200].mxu0  ;;  %v28837_v39 = vld [vmem:[#allocation110_spill] sm:$0xff] }
 0x2d1   : > { %28833 = vst [vmem:[#allocation47_spill] sm:$0xff] %v25598_v46  ;;  %v9059_v44 = vsub.f32 %v8611_v34, %v28836_v10  ;;  %v8453_v56 = vadd.f32 %v8293_v55, %v25588_v59  ;;  %v7820_v21 = vadd.f32 %v25608_v48, %v25578_v30  ;;  %v7977_v49 = vadd.f32 %v7817_v31, %v25530_v4  ;;  %v9891_v34 = vpop.f32.mrb[201].mxu0  ;;  %v28838_v55 = vld [vmem:[#allocation112_spill] sm:$0xff]  ;;  %v21172_v46 = vpop.f32.mrb[92].mxu1 }
 0x2d2   : > { %28835 = vst [vmem:[#allocation81_spill] sm:$0xff] %v25605_v27  ;;  %21635 = vmatmul.mubr.msk.f32.vlgmr.msra.gmra.mrb[196].mxu1 %vm379_vm0, %v24214_v6  ;;  %v9062_v61 = vsub.f32 %v8614_v41, %v28837_v39  ;;  %v8138_v19 = vadd.f32 %v25608_v48, %v7978_v50  ;;  %v8456_v5 = vadd.f32 %v25608_v48, %v8296_v11  ;;  %v28839_v41 = vld [vmem:[#allocation113_spill] sm:$0xff] }
 0x2d3   : > { %v7819_v23 = vadd.f32 %v25617_v60, %v25588_v59  ;;  %22600 = vmatpush3.bf16.msra.mxu1 %v22599_v0  ;;  %v25628_v9 = vadd.f32 %v28838_v55, %v9059_v44  ;;  %v8613_v31 = vadd.f32 %v8453_v56, %v25406_v18  ;;  %v8137_v10 = vadd.f32 %v7977_v49, %v25617_v60  ;;  %v5247_v49 = vpop.f32.mrb[93].mxu1  ;;  %v21473_v55 = vpop.f32.mrb[202].mxu0 }
 0x2d4   : > { %v8295_v27 = vadd.f32 %v8135_v37, %v25469_v29  ;;  %21641 = vmatprep.mubr.msk.f32.mxu1 %vm22961_vm8, %v28597_v63  ;;  %v25636_v50 = vadd.f32 %v28839_v41, %v9062_v61  ;;  %v8616_v11 = vadd.f32 %v25428_v12, %v8456_v5  ;;  %v22602_v39 = vpack.c.bf16 %v21470_v53, %v9891_v34  ;;  %v9901_v5 = vpop.f32.mrb[203].mxu0 }
 0x2d5   : > { %v7980_v0 = vadd.f32 %v25548_v2, %v7820_v21  ;;  %22601 = vmatprep.subr.bf16.mxu1 %v28746_v14  ;;  %v9061_v18 = vsub.f32 %v8613_v31, %v24822_v58  ;;  %v7822_v37 = vadd.f32 %v21172_v46, %v25608_v48  ;;  %v8298_v56 = vadd.f32 %v25490_v38, %v8138_v19  ;;  %v28840_v58 = vld [vmem:[#allocation115_spill] sm:$0xff] }
 0x2d6   : > { %v8455_v44 = vadd.f32 %v8295_v27, %v25617_v60  ;;  %21642 = vmatmul.mubr.msk.f32.vlgmr.msra.gmra.mrb[198].mxu1 %vm379_vm0, %v24214_v6  ;;  %v9064_v12 = vsub.f32 %v8616_v11, %v24858_v13  ;;  %v7821_v21 = vadd.f32 %v5247_v49, %v25617_v60  ;;  %v7979_v61 = vadd.f32 %v7819_v23, %v25560_v43 }
 0x2d7   : > { %v8140_v53 = vadd.f32 %v21172_v46, %v7980_v0  ;;  %22603 = vmatpush3.bf16.msra.mxu1 %v22602_v39  ;;  %v25651_v27 = vadd.f32 %v28840_v58, %v9061_v18  ;;  %v8458_v19 = vadd.f32 %v21172_v46, %v8298_v56  ;;  %v8297_v31 = vadd.f32 %v8137_v10, %v25499_v28  ;;  %v21179_v0 = vpop.f32.mrb[94].mxu1  ;;  %v21476_v56 = vpop.f32.mrb[204].mxu0 }
 0x2d8   : > { %v8615_v34 = vadd.f32 %v8455_v44, %v25440_v24  ;;  %21648 = vmatprep.mubr.msk.f32.mxu1 %vm22961_vm8, %v28597_v63  ;;  %v25658_v13 = vadd.f32 %v24888_v25, %v9064_v12  ;;  %v8139_v41 = vadd.f32 %v7979_v61, %v5247_v49  ;;  %v22605_v11 = vpack.c.bf16 %v21473_v55, %v9901_v5  ;;  %v5322_v10 = vpop.f32.mrb[95].mxu1  ;;  %v28841_v5 = vld [vmem:[#allocation122_spill] sm:$0xff] }
 0x2d9   : > { %v7982_v23 = vadd.f32 %v25578_v30, %v7822_v37  ;;  %22604 = vmatprep.subr.bf16.mxu1 %v28746_v14  ;;  %v8618_v24 = vadd.f32 %v25460_v7, %v8458_v19  ;;  %v8457_v18 = vadd.f32 %v8297_v31, %v5247_v49  ;;  %v7824_v44 = vadd.f32 %v21179_v0, %v21172_v46  ;;  %v9911_v37 = vpop.f32.mrb[205].mxu0  ;;  %v25678_v31 = vpop.f32.mrb[96].mxu1 }
 0x2da   : > { %v9063_v39 = vsub.f32 %v8615_v34, %v24865_v22  ;;  %21649 = vmatmul.mubr.msk.f32.vlgmr.msra.gmra.mrb[200].mxu1 %vm379_vm0, %v24214_v6  ;;  %v8300_v12 = vadd.f32 %v25518_v57, %v8140_v53  ;;  %v7823_v55 = vadd.f32 %v5322_v10, %v5247_v49  ;;  %v7981_v61 = vadd.f32 %v7821_v21, %v25588_v59  ;;  %v28842_v22 = vld [vmem:[#allocation119_spill] sm:$0xff] }
 0x2db   : > { %v8142_v25 = vadd.f32 %v21179_v0, %v7982_v23  ;;  %22606 = vmatpush3.bf16.msra.mxu1 %v22605_v11  ;;  %v9066_v7 = vsub.f32 %v8618_v24, %v28842_v22  ;;  %v8617_v46 = vadd.f32 %v8457_v18, %v25469_v29  ;;  %v7984_v34 = vadd.f32 %v25608_v48, %v7824_v44  ;;  %v28843_v11 = vld [vmem:[#allocation124_spill] sm:$0xff]  ;;  %v25687_v18 = vpop.f32.mrb[97].mxu1  ;;  %v21479_v44 = vpop.f32.mrb[206].mxu0  ;;  %v28846_v22 = vld [vmem:[#allocation129_spill] sm:$0xff] }
 0x2dc   : > { %v25669_v58 = vadd.f32 %v28841_v5, %v9063_v39  ;;  %21655 = vmatprep.mubr.msk.f32.mxu1 %vm22961_vm8, %v28597_v63  ;;  %v8460_v53 = vadd.f32 %v21179_v0, %v8300_v12  ;;  %v7983_v49 = vadd.f32 %v7823_v55, %v25617_v60  ;;  %v8141_v21 = vadd.f32 %v7981_v61, %v5322_v10  ;;  %v28844_v39 = vld [vmem:[#allocation120_spill] sm:$0xff]  ;;  %v9921_v55 = vpop.f32.mrb[207].mxu0 }
 0x2dd   : > { %v8302_v19 = vadd.f32 %v25548_v2, %v8142_v25  ;;  %22607 = vmatprep.subr.bf16.mxu1 %v28746_v14  ;;  %v25682_v23 = vadd.f32 %v28843_v11, %v9066_v7  ;;  %v9065_v29 = vsub.f32 %v8617_v46, %v28844_v39  ;;  %v8304_v48 = vadd.f32 %v25578_v30, %v7984_v34  ;;  %v28847_v7 = vld [vmem:[#allocation131_spill] sm:$0xff]  ;;  %v25706_v34 = vpop.f32.mrb[98].mxu1  ;;  %v28851_v11 = vld [vmem:[#allocation138_spill] sm:$0xff] }
 0x2de   : > { %v8299_v24 = vadd.f32 %v8139_v41, %v25530_v4  ;;  %21656 = vmatmul.mubr.msk.f32.vlgmr.msra.gmra.mrb[202].mxu1 %vm379_vm0, %v24214_v6  ;;  %v8620_v60 = vadd.f32 %v25490_v38, %v8460_v53  ;;  %v8301_v25 = vadd.f32 %v8141_v21, %v25560_v43  ;;  %v8303_v12 = vadd.f32 %v7983_v49, %v25588_v59  ;;  %v28849_v49 = vld [vmem:[#allocation144_spill] sm:$0xff]  ;;  %v21482_v21 = vpop.f32.mrb[208].mxu0 }
 0x2df   : > { %v8622_v0 = vadd.f32 %v25518_v57, %v8302_v19  ;;  %21662 = vmatprep.mubr.msk.f32.mxu1 %vm22961_vm8, %v28597_v63  ;;  %v25698_v30 = vadd.f32 %v24994_v20, %v9065_v29  ;;  %v8624_v41 = vadd.f32 %v25548_v2, %v8304_v48  ;;  %v9074_v61 = vsub.f32 %v8304_v48, %v25007_v32  ;;  %v28848_v19 = vld [vmem:[#allocation133_spill] sm:$0xff] }
 0x2e0   : > { %v8459_v5 = vadd.f32 %v8299_v24, %v5322_v10  ;;  %v9068_v38 = vsub.f32 %v8620_v60, %v28846_v22  ;;  %v8621_v46 = vadd.f32 %v8301_v25, %v25530_v4  ;;  %v8623_v59 = vadd.f32 %v8303_v12, %v25560_v43  ;;  %v25714_v10 = vpop.f32.mrb[99].mxu1  ;;  %v28853_v4 = vld [vmem:[#allocation139_spill] sm:$0xff]  ;;  %v9931_v24 = vpop.f32.mrb[209].mxu0  ;;  %v28855_v60 = vld [vmem:[#allocation140_spill] sm:$0xff] }
 0x2e1   : > { %28845 = vst [vmem:[#allocation57_spill] sm:$0xff] %v25698_v30  ;;  %v9070_v57 = vsub.f32 %v8622_v0, %v28847_v7  ;;  %v9072_v53 = vsub.f32 %v8624_v41, %v28848_v19  ;;  %v25710_v20 = vadd.f32 %v28849_v49, %v9074_v61  ;;  %v9073_v32 = vsub.f32 %v8303_v12, %v25214_v35  ;;  %v28861_v22 = vld [vmem:[#allocation24_spill] sm:$0xff] }
 0x2e2   : > { %v8619_v2 = vadd.f32 %v8459_v5, %v25499_v28  ;;  %v25717_v39 = vadd.f32 %v28851_v11, %v9068_v38  ;;  %v9069_v43 = vsub.f32 %v8621_v46, %v25208_v1  ;;  %v9071_v48 = vsub.f32 %v8623_v59, %v25211_v40  ;;  %v25739_v40 = vpop.f32.mrb[100].mxu1 }
 0x2e3   : > { %28850 = vst [vmem:[#allocation83_spill] sm:$0xff] %v25710_v20  ;;  %v25720_v29 = vadd.f32 %v28853_v4, %v9070_v57  ;;  %v25725_v0 = vadd.f32 %v28855_v60, %v9072_v53  ;;  %v25729_v35 = vadd.f32 %v25269_v8, %v9073_v32  ;;  %v22608_v25 = vpack.c.bf16 %v21476_v56, %v9911_v37  ;;  %v25748_v56 = vpop.f32.mrb[101].mxu1 }
 0x2e4   : > { %28852 = vst [vmem:[#allocation84_spill] sm:$0xff] %v25717_v39  ;;  %v9067_v28 = vsub.f32 %v8619_v2, %v25200_v62  ;;  %v25732_v12 = vadd.f32 %v25244_v3, %v9069_v43  ;;  %v25735_v41 = vadd.f32 %v25251_v26, %v9071_v48  ;;  %v22611_v61 = vpack.c.bf16 %v21479_v44, %v9921_v55  ;;  %v25750_v26 = vpop.f32.mrb[210].mxu0  ;;  %v25767_v53 = vpop.f32.mrb[102].mxu1  ;;  %v28863_v2 = vld [vmem:[#allocation61_spill] sm:$0xff] }
 0x2e5   : > { %28854 = vst [vmem:[#allocation93_spill] sm:$0xff] %v25720_v29  ;;  %28856 = vst [vmem:[#allocation92_spill] sm:$0xff] %v25725_v0  ;;  %v7828_v1 = vadd.f32 %v25706_v34, %v25678_v31  ;;  %22609 = vmatpush3.bf16.msra.mxu1 %v22608_v25  ;;  %v7827_v62 = vadd.f32 %v25714_v10, %v25687_v18  ;;  %v22614_v8 = vpack.c.bf16 %v21482_v21, %v9931_v24  ;;  %v9941_v44 = vpop.f32.mrb[211].mxu0  ;;  %v25779_v43 = vpop.f32.mrb[103].mxu1 }
 0x2e6   : > { %28857 = vst [vmem:[#allocation95_spill] sm:$0xff] %v25729_v35  ;;  %28858 = vst [vmem:[#allocation96_spill] sm:$0xff] %v25732_v12  ;;  %v25742_v5 = vadd.f32 %v25242_v17, %v9067_v28  ;;  %v7830_v3 = vadd.f32 %v25739_v40, %v25706_v34  ;;  %22610 = vmatprep.subr.bf16.mxu1 %v28746_v14  ;;  %v7829_v17 = vadd.f32 %v25748_v56, %v25714_v10  ;;  %v25781_v48 = vpop.f32.mrb[212].mxu0 }
 0x2e7   : > { %28859 = vst [vmem:[#allocation105_spill] sm:$0xff] %v25735_v41  ;;  %v8148_v37 = vadd.f32 %v25739_v40, %v7828_v1  ;;  %v9045_v55 = vsub.f32 %v25344_v45, %v25412_v52  ;;  %v9077_v38 = vmul.f32 %v28861_v22, %v28861_v22  ;;  %v8147_v57 = vadd.f32 %v7827_v62, %v25748_v56  ;;  %v28862_v45 = vld [vmem:[#allocation103_spill] sm:$0xff] }
 0x2e8   : > { %28860 = vst [vmem:[#allocation107_spill] sm:$0xff] %v25742_v5  ;;  %v7990_v7 = vadd.f32 %v25678_v31, %v7830_v3  ;;  %v22617_v46 = vpack.c.bf16 %v25750_v26, %v9941_v44  ;;  %v9173_v59 = vmul.f32 2.0, %v25433_v42  ;;  %21663 = vmatmul.mubr.msk.f32.vlgmr.msra.gmra.mrb[204].mxu1 %vm379_vm0, %v24214_v6  ;;  %v7989_v19 = vadd.f32 %v7829_v17, %v25687_v18  ;;  %v25798_v44 = vpop.f32.mrb[104].mxu1  ;;  %v28878_v41 = vld [vmem:[#allocation111_spill] sm:$0xff] }
 0x2e9   : > { %v9109_v49 = vmul.f32 343.0, %v9077_v38  ;;  %v9269_v52 = vmul.f32 %v25433_v42, %v25433_v42  ;;  %v8248_v32 = vadd.f32 %v28863_v2, %v28862_v45  ;;  %22612 = vmatpush3.bf16.msra.mxu1 %v22611_v61  ;;  %21669 = vmatprep.mubr.msk.f32.mxu1 %vm22961_vm8, %v28597_v63  ;;  %v7832_v21 = vadd.f32 %v25767_v53, %v25739_v40  ;;  %v9951_v61 = vpop.f32.mrb[213].mxu0  ;;  %v28874_v42 = vld [vmem:[#allocation176_spill] sm:$0xff] }
 0x2ea   : > { %v8150_v11 = vadd.f32 %v25767_v53, %v7990_v7  ;;  %v8468_v4 = vadd.f32 %v25767_v53, %v8148_v37  ;;  %v9302_v24 = vmul.f32 343.0, %v25396_v16  ;;  %22613 = vmatprep.subr.bf16.mxu1 %v28746_v14  ;;  %v7831_v60 = vadd.f32 %v25779_v43, %v25748_v56  ;;  %v28864_v37 = vld [vmem:[#allocation145_spill] sm:$0xff]  ;;  %v28865_v7 = vld [vmem:[#allocation108_spill] sm:$0xff] }
 0x2eb   : > { %v8149_v28 = vadd.f32 %v7989_v19, %v25779_v43  ;;  %v8467_v25 = vadd.f32 %v8147_v57, %v25779_v43  ;;  %v9141_v1 = vadd.f32 %v9109_v49, %v9045_v55  ;;  %v22620_v3 = vpack.c.bf16 %v25781_v48, %v9951_v61  ;;  %v25811_v49 = vpop.f32.mrb[105].mxu1  ;;  %v28867_v48 = vld [vmem:[#allocation25_spill] sm:$0xff]  ;;  %v28868_v61 = vld [vmem:[#allocation20_spill] sm:$0xff] }
 0x2ec   : > { %v9236_v62 = vsub.f32 %v8468_v4, %v25296_v36  ;;  %v7992_v26 = vadd.f32 %v25706_v34, %v7832_v21  ;;  %v25793_v17 = vmul.f32 2.0, %v28864_v37  ;;  %21670 = vmatmul.mubr.msk.f32.vlgmr.msra.gmra.mrb[206].mxu1 %vm379_vm0, %v24214_v6  ;;  %v7991_v38 = vadd.f32 %v7831_v60, %v25714_v10  ;;  %v25813_v21 = vpop.f32.mrb[214].mxu0 }
 0x2ed   : > { %v9235_v16 = vsub.f32 %v8467_v25, %v25321_v54  ;;  %v9205_v55 = vmul.f32 %v9173_v59, %v25400_v47  ;;  %v25803_v36 = vadd.f32 %v28865_v7, %v8248_v32  ;;  %22615 = vmatpush3.bf16.msra.mxu1 %v22614_v8  ;;  %21676 = vmatprep.mubr.msk.f32.mxu1 %vm22961_vm8, %v28597_v63  ;;  %v9301_v45 = vmul.f32 343.0, %v9269_v52  ;;  %v25821_v4 = vpop.f32.mrb[215].mxu0 }
 0x2ee   : > { %v9332_v57 = vadd.f32 %v25350_v15, %v9236_v62  ;;  %v7834_v19 = vadd.f32 %v25798_v44, %v25767_v53  ;;  %v8152_v54 = vadd.f32 %v25798_v44, %v7992_v26  ;;  %22616 = vmatprep.subr.bf16.mxu1 %v28746_v14  ;;  %v8470_v8 = vadd.f32 %v25798_v44, %v8150_v11  ;;  %v28869_v11 = vld [vmem:[#allocation174_spill] sm:$0xff] }
 0x2ef   : > { %28866 = vst [vmem:[#allocation109_spill] sm:$0xff] %v25803_v36  ;;  %v9331_v59 = vadd.f32 %v25383_v33, %v9235_v16  ;;  %v7833_v15 = vadd.f32 %v25811_v49, %v25779_v43  ;;  %v8151_v32 = vadd.f32 %v7991_v38, %v25811_v49  ;;  %v8469_v25 = vadd.f32 %v8149_v28, %v25811_v49  ;;  %v25832_v16 = vpop.f32.mrb[106].mxu1 }
 0x2f0   : > { %v9396_v60 = vmul.f32 %v9332_v57, %v28867_v48  ;;  %v22623_v52 = vpack.c.bf16 %v25813_v21, %v25821_v4  ;;  %v7994_v33 = vadd.f32 %v25739_v40, %v7834_v19  ;;  %21677 = vmatmul.mubr.msk.f32.vlgmr.msra.gmra.mrb[208].mxu1 %vm379_vm0, %v24214_v6  ;;  %v9238_v26 = vsub.f32 %v8470_v8, %v28869_v11  ;;  %v25843_v4 = vpop.f32.mrb[107].mxu1  ;;  %v25845_v8 = vpop.f32.mrb[216].mxu0 }
 0x2f1   : > { %v9395_v62 = vmul.f32 %v9331_v59, %v28868_v61  ;;  %v8312_v38 = vadd.f32 %v25678_v31, %v8152_v54  ;;  %v25836_v57 = vmul.f32 0.002915452, %v25803_v36  ;;  %22618 = vmatpush3.bf16.msra.mxu1 %v22617_v46  ;;  %21683 = vmatprep.mubr.msk.f32.mxu1 %vm22961_vm8, %v28597_v63  ;;  %v9237_v19 = vsub.f32 %v8469_v25, %v9205_v55  ;;  %v28871_v46 = vld [vmem:[#allocation16_spill] sm:$0xff]  ;;  %v28872_v61 = vld [vmem:[#allocation169_spill] sm:$0xff]  ;;  %v25851_v22 = vpop.f32.mrb[217].mxu0 }
 0x2f2   : > { %v9428_v28 = vadd.f32 1e-08, %v9396_v60  ;;  %v7836_v21 = vadd.f32 %v25832_v16, %v25798_v44  ;;  %v8154_v59 = vadd.f32 %v25832_v16, %v7994_v33  ;;  %v9334_v54 = vadd.f32 %v9302_v24, %v9238_v26  ;;  %22619 = vmatprep.subr.bf16.mxu1 %v28746_v14  ;;  %v28873_v25 = vld [vmem:[#allocation29_spill] sm:$0xff] }
 0x2f3   : > { %28870 = vst [vmem:[#allocation110_spill] sm:$0xff] %v25836_v57  ;;  %v9427_v48 = vadd.f32 1e-08, %v9395_v62  ;;  %v8472_v60 = vadd.f32 %v25832_v16, %v8312_v38  ;;  %v9016_v11 = vmul.f32 %v28872_v61, %v28871_v46  ;;  %v9333_v55 = vadd.f32 %v9301_v45, %v9237_v19  ;;  %v28875_v24 = vld [vmem:[#allocation33_spill] sm:$0xff]  ;;  %v25862_v61 = vpop.f32.mrb[108].mxu1 }
 0x2f4   : > { %22698 = vrcp.f32 %v9428_v28  ;;  %v9080_v33 = vmul.f32 %v28873_v25, %v28873_v25  ;;  %v9176_v47 = vmul.f32 2.0, %v25836_v57  ;;  %v9398_v62 = vmul.f32 %v9334_v54, %v28874_v42  ;;  %21684 = vmatmul.mubr.msk.f32.vlgmr.msra.gmra.mrb[210].mxu1 %vm379_vm0, %v24214_v6  ;;  %v25871_v54 = vpop.f32.mrb[218].mxu0 }
 0x2f5   : > { %22700 = vrcp.f32 %v9427_v48  ;;  %v9048_v26 = vsub.f32 %v28875_v24, %v9016_v11  ;;  %v9272_v38 = vmul.f32 %v25836_v57, %v25836_v57  ;;  %v9397_v28 = vmul.f32 %v9333_v55, %v9141_v1  ;;  %22621 = vmatpush3.bf16.msra.mxu1 %v22620_v3  ;;  %21690 = vmatprep.mubr.msk.f32.mxu1 %vm22961_vm8, %v28597_v63  ;;  %v25869_v48 = vpop.f32.mrb[109].mxu1  ;;  %v28876_v57 = vld [vmem:[#allocation66_spill] sm:$0xff] }
 0x2f6   : > { %v9112_v45 = vmul.f32 343.0, %v9080_v33  ;;  %v9208_v19 = vmul.f32 %v9176_v47, %v25803_v36  ;;  %v7835_v42 = vadd.f32 %v25843_v4, %v25811_v49  ;;  %v9430_v11 = vadd.f32 1e-08, %v9398_v62  ;;  %v28877_v1 = vld [vmem:[#allocation106_spill] sm:$0xff]  ;;  %22622 = vmatprep.subr.bf16.mxu1 %v28746_v14  ;;  %v25877_v47 = vpop.f32.mrb[219].mxu0 }
 0x2f7   : > { %v9304_v24 = vmul.f32 343.0, %v9272_v38  ;;  %v7993_v25 = vadd.f32 %v7833_v15, %v25748_v56  ;;  %v8247_v3 = vadd.f32 %v28877_v1, %v28876_v57  ;;  %v9429_v55 = vadd.f32 1e-08, %v9397_v28  ;;  %v28880_v38 = vld [vmem:[#allocation17_spill] sm:$0xff]  ;;  %v28881_v15 = vld [vmem:[#allocation26_spill] sm:$0xff]  ;;  %v25888_v1 = vpop.f32.mrb[110].mxu1 }
 0x2f8   : > { %v9144_v33 = vadd.f32 %v9112_v45, %v9048_v26  ;;  %v9240_v36 = vsub.f32 %v8472_v60, %v9208_v19  ;;  %v8311_v46 = vadd.f32 %v8151_v32, %v25687_v18  ;;  %22702 = vrcp.f32 %v9430_v11  ;;  %21691 = vmatmul.mubr.msk.f32.vlgmr.msra.gmra.mrb[212].mxu1 %vm379_vm0, %v24214_v6  ;;  %v28882_v26 = vld [vmem:[#allocation30_spill] sm:$0xff]  ;;  %v25897_v45 = vpop.f32.mrb[220].mxu0  ;;  %v28884_v11 = vld [vmem:[#allocation175_spill] sm:$0xff] }
 0x2f9   : > { %v8153_v35 = vadd.f32 %v7993_v25, %v25843_v4  ;;  %v25882_v62 = vadd.f32 %v8247_v3, %v28878_v41  ;;  %v9015_v12 = vmul.f32 %v28881_v15, %v28880_v38  ;;  %22704 = vrcp.f32 %v9429_v55  ;;  %22624 = vmatpush3.bf16.msra.mxu1 %v22623_v52  ;;  %21697 = vmatprep.mubr.msk.f32.mxu1 %vm22961_vm8, %v28597_v63  ;;  %v25895_v25 = vpop.f32.mrb[111].mxu1  ;;  %v25908_v52 = vpop.f32.mrb[221].mxu0 }
 0x2fa   : > { %v9336_v28 = vadd.f32 %v9304_v24, %v9240_v36  ;;  %v8471_v60 = vadd.f32 %v8311_v46, %v25843_v4  ;;  %v9079_v32 = vmul.f32 %v28882_v26, %v28882_v26  ;;  %v22626_v36 = vpack.c.bf16 %v25845_v8, %v25851_v22  ;;  %22625 = vmatprep.subr.bf16.mxu1 %v28746_v14 }
 0x2fb   : > { %28879 = vst [vmem:[#allocation112_spill] sm:$0xff] %v25882_v62  ;;  %v25900_v19 = vmul.f32 0.002915452, %v25882_v62  ;;  %v9047_v3 = vsub.f32 %v28884_v11, %v9015_v12  ;;  %v7838_v46 = vadd.f32 %v25862_v61, %v25832_v16  ;;  %v7996_v15 = vadd.f32 %v25767_v53, %v7836_v21  ;;  %v28885_v11 = vld [vmem:[#allocation114_spill] sm:$0xff] }
 0x2fc   : > { %v9400_v24 = vmul.f32 %v9336_v28, %v9144_v33  ;;  %v9111_v55 = vmul.f32 343.0, %v9079_v32  ;;  %v8314_v26 = vadd.f32 %v25706_v34, %v8154_v59  ;;  %v25917_v22 = vadd.f32 %v28863_v2, %v28885_v11  ;;  %21698 = vmatmul.mubr.msk.f32.vlgmr.msra.gmra.mrb[214].mxu1 %vm379_vm0, %v24214_v6  ;;  %v25923_v33 = vpop.f32.mrb[112].mxu1  ;;  %v25933_v11 = vpop.f32.mrb[222].mxu0 }
 0x2fd   : > { %28883 = vst [vmem:[#allocation113_spill] sm:$0xff] %v25900_v19  ;;  %v9175_v38 = vmul.f32 2.0, %v25900_v19  ;;  %v9271_v12 = vmul.f32 %v25900_v19, %v25900_v19  ;;  %v7837_v8 = vadd.f32 %v25869_v48, %v25843_v4  ;;  %v8156_v32 = vadd.f32 %v25862_v61, %v7996_v15  ;;  %22627 = vmatpush3.bf16.msra.mxu1 %v22626_v36  ;;  %v25931_v2 = vpop.f32.mrb[113].mxu1  ;;  %v28890_v15 = vld [vmem:[#allocation116_spill] sm:$0xff] }
 0x2fe   : > { %28886 = vst [vmem:[#allocation115_spill] sm:$0xff] %v25917_v22  ;;  %v25925_v21 = vpop.eup %22698  ;;  %v9432_v59 = vadd.f32 1e-08, %v9400_v24  ;;  %v9143_v28 = vadd.f32 %v9111_v55, %v9047_v3  ;;  %v8474_v19 = vadd.f32 %v25862_v61, %v8314_v26  ;;  %21704 = vmatprep.mubr.msk.f32.mxu1 %vm22961_vm8, %v28597_v63  ;;  %v25939_v24 = vmul.f32 0.002915452, %v25917_v22  ;;  %22628 = vmatprep.subr.bf16.mxu1 %v28746_v14  ;;  %v25943_v26 = vpop.f32.mrb[223].mxu0 }
 0x2ff   : > { %28887 = vst [vmem:[#allocation122_spill] sm:$0xff] %v25925_v21  ;;  %v25935_v5 = vpop.eup %22700  ;;  %v9207_v20 = vmul.f32 %v9175_v38, %v25882_v62  ;;  %v9303_v0 = vmul.f32 343.0, %v9271_v12  ;;  %v7995_v3 = vadd.f32 %v7835_v42, %v25779_v43  ;;  %v8313_v55 = vadd.f32 %v8153_v35, %v25714_v10 }
 0x300   : > { %28888 = vst [vmem:[#allocation119_spill] sm:$0xff] %v25935_v5  ;;  %28889 = vst [vmem:[#allocation124_spill] sm:$0xff] %v25939_v24  ;;  %22706 = vrcp.f32 %v9432_v59  ;;  %v8634_v36 = vadd.f32 %v25678_v31, %v8474_v19  ;;  %v25949_v5 = vadd.f32 %v28890_v15, %v28876_v57  ;;  %v9178_v12 = vmul.f32 2.0, %v25939_v24  ;;  %21705 = vmatmul.mubr.msk.f32.vlgmr.msra.gmra.mrb[216].mxu1 %vm379_vm0, %v24214_v6  ;;  %v25957_v59 = vpop.f32.mrb[114].mxu1 }
 0x301   : > { %v9239_v38 = vsub.f32 %v8471_v60, %v9207_v20  ;;  %v9274_v62 = vmul.f32 %v25939_v24, %v25939_v24  ;;  %v8155_v42 = vadd.f32 %v7995_v3, %v25869_v48  ;;  %v8473_v31 = vadd.f32 %v8313_v55, %v25869_v48  ;;  %21711 = vmatprep.mubr.msk.f32.mxu1 %vm22961_vm8, %v28597_v63  ;;  %v25969_v60 = vpop.f32.mrb[115].mxu1 }
 0x302   : > { %28891 = vst [vmem:[#allocation120_spill] sm:$0xff] %v25949_v5  ;;  %v25961_v35 = vmul.f32 0.002915452, %v25949_v5  ;;  %v22629_v20 = vpack.c.bf16 %v25871_v54, %v25877_v47  ;;  %v7840_v57 = vadd.f32 %v25888_v1, %v25862_v61  ;;  %v25971_v19 = vpop.eup %22702  ;;  %v9210_v15 = vmul.f32 %v9178_v12, %v25917_v22 }
 0x303   : > { %28893 = vst [vmem:[#allocation131_spill] sm:$0xff] %v25971_v19  ;;  %v9335_v3 = vadd.f32 %v9303_v0, %v9239_v38  ;;  %v9306_v55 = vmul.f32 343.0, %v9274_v62  ;;  %v7998_v24 = vadd.f32 %v25798_v44, %v7838_v46  ;;  %v25975_v21 = vpop.eup %22704  ;;  %v8633_v54 = vadd.f32 %v8473_v31, %v25687_v18  ;;  %v28895_v38 = vld [vmem:[#allocation117_spill] sm:$0xff]  ;;  %v25988_v46 = vpop.f32.mrb[116].mxu1 }
 0x304   : > { %28892 = vst [vmem:[#allocation129_spill] sm:$0xff] %v25961_v35  ;;  %28894 = vst [vmem:[#allocation133_spill] sm:$0xff] %v25975_v21  ;;  %v9177_v47 = vmul.f32 2.0, %v25961_v35  ;;  %v9273_v29 = vmul.f32 %v25961_v35, %v25961_v35  ;;  %v8316_v39 = vadd.f32 %v25739_v40, %v8156_v32  ;;  %22630 = vmatpush3.bf16.msra.mxu1 %v22629_v20  ;;  %v28896_v62 = vld [vmem:[#allocation77_spill] sm:$0xff] }
 0x305   : > { %v9399_v30 = vmul.f32 %v9335_v3, %v9143_v28  ;;  %v9242_v19 = vsub.f32 %v8634_v36, %v9210_v15  ;;  %v8158_v0 = vadd.f32 %v25888_v1, %v7998_v24  ;;  %v25985_v12 = vadd.f32 %v28896_v62, %v28895_v38  ;;  %22631 = vmatprep.subr.bf16.mxu1 %v28746_v14  ;;  %v25994_v28 = vpop.f32.mrb[117].mxu1  ;;  %v28900_v38 = vld [vmem:[#allocation118_spill] sm:$0xff] }
 0x306   : > { %v9209_v18 = vmul.f32 %v9177_v47, %v25949_v5  ;;  %v9305_v31 = vmul.f32 343.0, %v9273_v29  ;;  %v8476_v35 = vadd.f32 %v25888_v1, %v8316_v39  ;;  %v7839_v32 = vadd.f32 %v25895_v25, %v25869_v48  ;;  %v28899_v47 = vld [vmem:[#allocation78_spill] sm:$0xff]  ;;  %v28905_v5 = vld [vmem:[#allocation32_spill] sm:$0xff] }
 0x307   : > { %28897 = vst [vmem:[#allocation144_spill] sm:$0xff] %v25985_v12  ;;  %v9431_v36 = vadd.f32 1e-08, %v9399_v30  ;;  %v9338_v24 = vadd.f32 %v9306_v55, %v9242_v19  ;;  %v25997_v20 = vmul.f32 0.002915452, %v25985_v12  ;;  %v7997_v3 = vadd.f32 %v7837_v8, %v25811_v49  ;;  %21712 = vmatmul.mubr.msk.f32.vlgmr.msra.gmra.mrb[218].mxu1 %vm379_vm0, %v24214_v6  ;;  %v28902_v30 = vld [vmem:[#allocation31_spill] sm:$0xff] }
 0x308   : > { %v9241_v15 = vsub.f32 %v8633_v54, %v9209_v18  ;;  %v8636_v29 = vadd.f32 %v25706_v34, %v8476_v35  ;;  %v8315_v39 = vadd.f32 %v8155_v42, %v25748_v56  ;;  %v26006_v62 = vadd.f32 %v28900_v38, %v28899_v47  ;;  %21718 = vmatprep.mubr.msk.f32.mxu1 %vm22961_vm8, %v28597_v63  ;;  %v26014_v54 = vpop.f32.mrb[118].mxu1 }
 0x309   : > { %28898 = vst [vmem:[#allocation138_spill] sm:$0xff] %v25997_v20  ;;  %22708 = vrcp.f32 %v9431_v36  ;;  %v9402_v19 = vmul.f32 %v9338_v24, %v28902_v30  ;;  %v9180_v8 = vmul.f32 2.0, %v25997_v20  ;;  %v9276_v55 = vmul.f32 %v25997_v20, %v25997_v20  ;;  %v26023_v36 = vpop.f32.mrb[119].mxu1 }
 0x30a   : > { %28901 = vst [vmem:[#allocation139_spill] sm:$0xff] %v26006_v62  ;;  %v26016_v34 = vpop.eup %22706  ;;  %v9337_v42 = vadd.f32 %v9305_v31, %v9241_v15  ;;  %v8157_v35 = vadd.f32 %v7997_v3, %v25895_v25  ;;  %v8475_v18 = vadd.f32 %v8315_v39, %v25895_v25  ;;  %v26021_v47 = vmul.f32 0.002915452, %v26006_v62 }
 0x30b   : > { %28903 = vst [vmem:[#allocation140_spill] sm:$0xff] %v26016_v34  ;;  %v9434_v24 = vadd.f32 1e-08, %v9402_v19  ;;  %v9212_v38 = vmul.f32 %v9180_v8, %v25985_v12  ;;  %v9308_v30 = vmul.f32 343.0, %v9276_v55  ;;  %v22632_v20 = vpack.c.bf16 %v25897_v45, %v25908_v52  ;;  %v26036_v55 = vpop.f32.mrb[120].mxu1 }
 0x30c   : > { %28904 = vst [vmem:[#allocation103_spill] sm:$0xff] %v26021_v47  ;;  %v9401_v22 = vmul.f32 %v9337_v42, %v28905_v5  ;;  %v8635_v31 = vadd.f32 %v8475_v18, %v25714_v10  ;;  %v9179_v3 = vmul.f32 2.0, %v26021_v47  ;;  %v9275_v15 = vmul.f32 %v26021_v47, %v26021_v47  ;;  %v26041_v42 = vpop.f32.mrb[121].mxu1 }
 0x30d   : > { %22710 = vrcp.f32 %v9434_v24  ;;  %v9244_v39 = vsub.f32 %v8636_v29, %v9212_v38  ;;  %v7842_v19 = vadd.f32 %v25923_v33, %v25888_v1  ;;  %v8000_v8 = vadd.f32 %v25832_v16, %v7840_v57  ;;  %22633 = vmatpush3.bf16.msra.mxu1 %v22632_v20  ;;  %v28906_v24 = vld [vmem:[#allocation121_spill] sm:$0xff]  ;;  %v28907_v38 = vld [vmem:[#allocation86_spill] sm:$0xff] }
 0x30e   : > { %v9433_v45 = vadd.f32 1e-08, %v9401_v22  ;;  %v9211_v5 = vmul.f32 %v9179_v3, %v26006_v62  ;;  %v9307_v52 = vmul.f32 343.0, %v9275_v15  ;;  %v8318_v10 = vadd.f32 %v25767_v53, %v8158_v0  ;;  %22634 = vmatprep.subr.bf16.mxu1 %v28746_v14  ;;  %v28909_v14 = vld [vmem:[#allocation34_spill] sm:$0xff] }
 0x30f   : > { %v9340_v18 = vadd.f32 %v9308_v30, %v9244_v39  ;;  %v8160_v29 = vadd.f32 %v25923_v33, %v8000_v8  ;;  %v26046_v47 = vadd.f32 %v28907_v38, %v28906_v24  ;;  %v7841_v57 = vadd.f32 %v25931_v2, %v25895_v25  ;;  %v28911_v39 = vld [vmem:[#allocation91_spill] sm:$0xff] }
 0x310   : > { %22712 = vrcp.f32 %v9433_v45  ;;  %v9243_v22 = vsub.f32 %v8635_v31, %v9211_v5  ;;  %v8478_v20 = vadd.f32 %v25923_v33, %v8318_v10  ;;  %v7999_v0 = vadd.f32 %v7839_v32, %v25843_v4  ;;  %21719 = vmatmul.mubr.msk.f32.vlgmr.msra.gmra.mrb[220].mxu1 %vm379_vm0, %v24214_v6  ;;  %v28912_v8 = vld [vmem:[#allocation123_spill] sm:$0xff]  ;;  %v26065_v31 = vpop.f32.mrb[122].mxu1 }
 0x311   : > { %28908 = vst [vmem:[#allocation61_spill] sm:$0xff] %v26046_v47  ;;  %v9404_v30 = vmul.f32 %v9340_v18, %v28909_v14  ;;  %v26056_v3 = vmul.f32 0.002915452, %v26046_v47  ;;  %v8317_v15 = vadd.f32 %v8157_v35, %v25779_v43  ;;  %v26061_v24 = vadd.f32 %v28912_v8, %v28911_v39  ;;  %21725 = vmatprep.mubr.msk.f32.mxu1 %vm22961_vm8, %v28597_v63  ;;  %v26071_v18 = vpop.f32.mrb[123].mxu1 }
 0x312   : > { %v9339_v32 = vadd.f32 %v9307_v52, %v9243_v22  ;;  %v8638_v45 = vadd.f32 %v25739_v40, %v8478_v20  ;;  %v8159_v5 = vadd.f32 %v7999_v0, %v25931_v2  ;;  %v22635_v10 = vpack.c.bf16 %v25933_v11, %v25943_v26  ;;  %v28915_v52 = vld [vmem:[#allocation41_spill] sm:$0xff] }
 0x313   : > { %28910 = vst [vmem:[#allocation108_spill] sm:$0xff] %v26056_v3  ;;  %28913 = vst [vmem:[#allocation25_spill] sm:$0xff] %v26061_v24  ;;  %v26073_v35 = vpop.eup %22708  ;;  %v9436_v38 = vadd.f32 1e-08, %v9404_v30  ;;  %v9182_v14 = vmul.f32 2.0, %v26056_v3  ;;  %v9278_v39 = vmul.f32 %v26056_v3, %v26056_v3  ;;  %v8477_v8 = vadd.f32 %v8317_v15, %v25931_v2  ;;  %v28917_v30 = vld [vmem:[#allocation147_spill] sm:$0xff] }
 0x314   : > { %28914 = vst [vmem:[#allocation20_spill] sm:$0xff] %v26073_v35  ;;  %v9403_v22 = vmul.f32 %v9339_v32, %v28915_v52  ;;  %v26081_v40 = vmul.f32 0.002915452, %v26061_v24  ;;  %v7844_v11 = vadd.f32 %v25957_v59, %v25923_v33  ;;  %v8002_v26 = vadd.f32 %v25862_v61, %v7842_v19  ;;  %22636 = vmatpush3.bf16.msra.mxu1 %v22635_v10  ;;  %v26091_v15 = vpop.f32.mrb[124].mxu1 }
 0x315   : > { %22714 = vrcp.f32 %v9436_v38  ;;  %v9214_v20 = vmul.f32 %v9182_v14, %v26046_v47  ;;  %v8637_v0 = vadd.f32 %v8477_v8, %v25748_v56  ;;  %v26089_v3 = vmul.f32 2.0, %v28917_v30  ;;  %21790 = vmatprep.subr.mxu1 %v28597_v63  ;;  %v26098_v10 = vpop.f32.mrb[125].mxu1  ;;  %v28919_v8 = vld [vmem:[#allocation126_spill] sm:$0xff] }
 0x316   : > { %28916 = vst [vmem:[#allocation174_spill] sm:$0xff] %v26081_v40  ;;  %v9310_v32 = vmul.f32 343.0, %v9278_v39  ;;  %v9181_v52 = vmul.f32 2.0, %v26081_v40  ;;  %v9277_v62 = vmul.f32 %v26081_v40, %v26081_v40  ;;  %v8162_v19 = vadd.f32 %v25957_v59, %v8002_v26  ;;  %v28920_v47 = vld [vmem:[#allocation94_spill] sm:$0xff] }
 0x317   : > { %v26100_v38 = vpop.eup %22710  ;;  %v9246_v56 = vsub.f32 %v8638_v45, %v9214_v20  ;;  %v8320_v14 = vadd.f32 %v25798_v44, %v8160_v29  ;;  %v26105_v12 = vadd.f32 %v28920_v47, %v28919_v8  ;;  %v7843_v39 = vadd.f32 %v25969_v60, %v25931_v2  ;;  %21726 = vmatmul.mubr.msk.f32.vlgmr.msra.gmra.mrb[222].mxu1 %vm379_vm0, %v24214_v6  ;;  %v26120_v8 = vpop.f32.mrb[126].mxu1 }
 0x318   : > { %28918 = vst [vmem:[#allocation169_spill] sm:$0xff] %v26100_v38  ;;  %v9435_v40 = vadd.f32 1e-08, %v9403_v22  ;;  %v9213_v26 = vmul.f32 %v9181_v52, %v26061_v24  ;;  %v9309_v35 = vmul.f32 343.0, %v9277_v62  ;;  %v8001_v34 = vadd.f32 %v7841_v57, %v25869_v48  ;;  %21792 = vmatprep.mubr.msk.f32.mxu1 %vm22961_vm8, %v28597_v63  ;;  %v28924_v52 = vld [vmem:[#allocation98_spill] sm:$0xff]  ;;  %v28925_v57 = vld [vmem:[#allocation127_spill] sm:$0xff] }
 0x319   : > { %28921 = vst [vmem:[#allocation176_spill] sm:$0xff] %v26105_v12  ;;  %v9342_v29 = vadd.f32 %v9310_v32, %v9246_v56  ;;  %v8480_v45 = vadd.f32 %v25957_v59, %v8320_v14  ;;  %v26117_v47 = vmul.f32 0.002915452, %v26105_v12  ;;  %v8319_v20 = vadd.f32 %v8159_v5, %v25811_v49  ;;  %v26131_v56 = vpop.f32.mrb[127].mxu1  ;;  %v28927_v14 = vld [vmem:[#allocation42_spill] sm:$0xff] }
 0x31a   : > { %v26122_v6 = vpop.eup %22712  ;;  %v9245_v22 = vsub.f32 %v8637_v0, %v9213_v26  ;;  %v8161_v62 = vadd.f32 %v8001_v34, %v25969_v60  ;;  %v26127_v24 = vadd.f32 %v28925_v57, %v28924_v52  ;;  %v7846_v32 = vadd.f32 %v25988_v46, %v25957_v59 }
 0x31b   : > { %28922 = vst [vmem:[#allocation33_spill] sm:$0xff] %v26117_v47  ;;  %28923 = vst [vmem:[#allocation66_spill] sm:$0xff] %v26122_v6  ;;  %v9406_v63 = vmul.f32 %v9342_v29, %v28927_v14  ;;  %v8640_v5 = vadd.f32 %v25767_v53, %v8480_v45  ;;  %v9184_v38 = vmul.f32 2.0, %v26117_v47  ;;  %v9280_v0 = vmul.f32 %v26117_v47, %v26117_v47  ;;  %v26145_v53 = vpop.f32.mrb[128].mxu1  ;;  %v28930_v45 = vld [vmem:[#allocation43_spill] sm:$0xff] }
 0x31c   : > { %28926 = vst [vmem:[#allocation106_spill] sm:$0xff] %v26127_v24  ;;  %v9341_v26 = vadd.f32 %v9309_v35, %v9245_v22  ;;  %v8479_v34 = vadd.f32 %v8319_v20, %v25969_v60  ;;  %v26140_v52 = vmul.f32 0.002915452, %v26127_v24  ;;  %v8004_v57 = vadd.f32 %v25888_v1, %v7844_v11  ;;  %28929 = vst [vmem:[#allocation26_spill] sm:$0xff] %v26145_v53  ;;  %v26152_v22 = vpop.f32.mrb[129].mxu1 }
 0x31d   : > { %22716 = vrcp.f32 %v9435_v40  ;;  %v9438_v6 = vadd.f32 1e-08, %v9406_v63  ;;  %v9216_v21 = vmul.f32 %v9184_v38, %v26105_v12  ;;  %v8322_v29 = vadd.f32 %v25832_v16, %v8162_v19 }
 0x31e   : > { %28928 = vst [vmem:[#allocation111_spill] sm:$0xff] %v26140_v52  ;;  %v9405_v14 = vmul.f32 %v9341_v26, %v28930_v45  ;;  %v8639_v47 = vadd.f32 %v8479_v34, %v25779_v43  ;;  %v9183_v35 = vmul.f32 2.0, %v26140_v52  ;;  %v9279_v20 = vmul.f32 %v26140_v52, %v26140_v52  ;;  %v28932_v43 = vld [vmem:[#allocation130_spill] sm:$0xff] }
 0x31f   : > { %v26154_v11 = vpop.eup %22714  ;;  %v9248_v63 = vsub.f32 %v8640_v5, %v9216_v21  ;;  %v9312_v40 = vmul.f32 343.0, %v9280_v0  ;;  %v8164_v38 = vadd.f32 %v25988_v46, %v8004_v57  ;;  %v8482_v19 = vadd.f32 %v25988_v46, %v8322_v29  ;;  %v28933_v34 = vld [vmem:[#allocation102_spill] sm:$0xff]  ;;  %v26167_v5 = vpop.f32.mrb[130].mxu1 }
 0x320   : > { %28931 = vst [vmem:[#allocation175_spill] sm:$0xff] %v26154_v11  ;;  %22718 = vrcp.f32 %v9438_v6  ;;  %v9437_v12 = vadd.f32 1e-08, %v9405_v14  ;;  %v9215_v26 = vmul.f32 %v9183_v35, %v26127_v24  ;;  %v26161_v45 = vadd.f32 %v28933_v34, %v28932_v43  ;;  %v26173_v14 = vpop.f32.mrb[131].mxu1 }
 0x321   : > { %v9344_v53 = vadd.f32 %v9312_v40, %v9248_v63  ;;  %v8642_v52 = vadd.f32 %v25798_v44, %v8482_v19  ;;  %v7845_v11 = vadd.f32 %v25994_v28, %v25969_v60  ;;  %v8003_v21 = vadd.f32 %v7843_v39, %v25895_v25  ;;  %v28936_v63 = vld [vmem:[#allocation104_spill] sm:$0xff] }
 0x322   : > { %28934 = vst [vmem:[#allocation114_spill] sm:$0xff] %v26161_v45  ;;  %v9247_v0 = vsub.f32 %v8639_v47, %v9215_v26  ;;  %v9311_v57 = vmul.f32 343.0, %v9279_v20  ;;  %v26170_v6 = vmul.f32 0.002915452, %v26161_v45  ;;  %v8321_v29 = vadd.f32 %v8161_v62, %v25843_v4  ;;  %v28937_v40 = vld [vmem:[#allocation132_spill] sm:$0xff] }
 0x323   : > { %v9408_v35 = vmul.f32 %v9344_v53, %v25545_v51  ;;  %v8163_v44 = vadd.f32 %v8003_v21, %v25994_v28  ;;  %v26179_v19 = vadd.f32 %v28937_v40, %v28936_v63  ;;  %v7848_v39 = vadd.f32 %v26014_v54, %v25988_v46  ;;  %v26192_v21 = vpop.f32.mrb[132].mxu1  ;;  %v28940_v63 = vld [vmem:[#allocation44_spill] sm:$0xff] }
 0x324   : > { %28935 = vst [vmem:[#allocation116_spill] sm:$0xff] %v26170_v6  ;;  %v9343_v47 = vadd.f32 %v9311_v57, %v9247_v0  ;;  %v9186_v20 = vmul.f32 2.0, %v26170_v6  ;;  %v9282_v26 = vmul.f32 %v26170_v6, %v26170_v6  ;;  %v8481_v62 = vadd.f32 %v8321_v29, %v25994_v28  ;;  %v26197_v6 = vpop.f32.mrb[133].mxu1 }
 0x325   : > { %28938 = vst [vmem:[#allocation117_spill] sm:$0xff] %v26179_v19  ;;  %v9440_v43 = vadd.f32 1e-08, %v9408_v35  ;;  %v26188_v51 = vmul.f32 0.002915452, %v26179_v19  ;;  %v8006_v53 = vadd.f32 %v25923_v33, %v7846_v32  ;;  %v8324_v34 = vadd.f32 %v25862_v61, %v8164_v38 }
 0x326   : > { %22720 = vrcp.f32 %v9437_v12  ;;  %v9407_v0 = vmul.f32 %v9343_v47, %v28940_v63  ;;  %v9218_v57 = vmul.f32 %v9186_v20, %v26161_v45  ;;  %v8641_v40 = vadd.f32 %v8481_v62, %v25811_v49  ;;  %v28942_v63 = vld [vmem:[#allocation135_spill] sm:$0xff] }
 0x327   : > { %28939 = vst [vmem:[#allocation77_spill] sm:$0xff] %v26188_v51  ;;  %v26199_v29 = vpop.eup %22716  ;;  %v9314_v35 = vmul.f32 343.0, %v9282_v26  ;;  %v9185_v24 = vmul.f32 2.0, %v26188_v51  ;;  %v9281_v32 = vmul.f32 %v26188_v51, %v26188_v51  ;;  %v8166_v38 = vadd.f32 %v26014_v54, %v8006_v53 }
 0x328   : > { %28941 = vst [vmem:[#allocation78_spill] sm:$0xff] %v26199_v29  ;;  %22722 = vrcp.f32 %v9440_v43  ;;  %v9250_v12 = vsub.f32 %v8642_v52, %v9218_v57  ;;  %v8484_v47 = vadd.f32 %v26014_v54, %v8324_v34  ;;  %v26208_v20 = vadd.f32 %v28865_v7, %v28942_v63  ;;  %v26214_v29 = vpop.f32.mrb[134].mxu1 }
 0x329   : > { %v9439_v49 = vadd.f32 1e-08, %v9407_v0  ;;  %v9217_v62 = vmul.f32 %v9185_v24, %v26179_v19  ;;  %v7847_v26 = vadd.f32 %v26023_v36, %v25994_v28  ;;  %v8005_v45 = vadd.f32 %v7845_v11, %v25931_v2  ;;  %v26222_v7 = vpop.f32.mrb[135].mxu1  ;;  %v28946_v11 = vld [vmem:[#allocation137_spill] sm:$0xff]  ;;  %v28948_v19 = vld [vmem:[#allocation48_spill] sm:$0xff] }
 0x32a   : > { %28943 = vst [vmem:[#allocation118_spill] sm:$0xff] %v26208_v20  ;;  %v26216_v51 = vpop.eup %22718  ;;  %v9346_v43 = vadd.f32 %v9314_v35, %v9250_v12  ;;  %v9313_v52 = vmul.f32 343.0, %v9281_v32  ;;  %v8644_v53 = vadd.f32 %v25832_v16, %v8484_v47  ;;  %v26220_v34 = vmul.f32 0.002915452, %v26208_v20 }
 0x32b   : > { %28944 = vst [vmem:[#allocation31_spill] sm:$0xff] %v26216_v51  ;;  %v9249_v0 = vsub.f32 %v8641_v40, %v9217_v62  ;;  %v8165_v24 = vadd.f32 %v8005_v45, %v26023_v36  ;;  %v8323_v57 = vadd.f32 %v8163_v44, %v25869_v48  ;;  %v26228_v63 = vadd.f32 %v28946_v11, %v28878_v41  ;;  %v26241_v41 = vpop.f32.mrb[136].mxu1  ;;  %v28951_v11 = vld [vmem:[#allocation47_spill] sm:$0xff] }
 0x32c   : > { %28945 = vst [vmem:[#allocation32_spill] sm:$0xff] %v26220_v34  ;;  %v9410_v51 = vmul.f32 %v9346_v43, %v28948_v19  ;;  %v9188_v35 = vmul.f32 2.0, %v26220_v34  ;;  %v9284_v16 = vmul.f32 %v26220_v34, %v26220_v34  ;;  %v7850_v32 = vadd.f32 %v26036_v55, %v26014_v54  ;;  %28950 = vst [vmem:[#allocation34_spill] sm:$0xff] %v26241_v41  ;;  %v26245_v43 = vpop.f32.mrb[137].mxu1 }
 0x32d   : > { %28947 = vst [vmem:[#allocation121_spill] sm:$0xff] %v26228_v63  ;;  %v9345_v12 = vadd.f32 %v9313_v52, %v9249_v0  ;;  %v8483_v40 = vadd.f32 %v8323_v57, %v26023_v36  ;;  %v26238_v45 = vmul.f32 0.002915452, %v26228_v63  ;;  %v8008_v44 = vadd.f32 %v25957_v59, %v7848_v39 }
 0x32e   : > { %22724 = vrcp.f32 %v9439_v49  ;;  %v9442_v19 = vadd.f32 1e-08, %v9410_v51  ;;  %v9220_v47 = vmul.f32 %v9188_v35, %v26208_v20  ;;  %v8326_v62 = vadd.f32 %v25888_v1, %v8166_v38 }
 0x32f   : > { %28949 = vst [vmem:[#allocation86_spill] sm:$0xff] %v26238_v45  ;;  %v9409_v34 = vmul.f32 %v9345_v12, %v28951_v11  ;;  %v8643_v52 = vadd.f32 %v8483_v40, %v25843_v4  ;;  %v9187_v0 = vmul.f32 2.0, %v26238_v45  ;;  %v9283_v57 = vmul.f32 %v26238_v45, %v26238_v45  ;;  %v28953_v12 = vld [vmem:[#allocation141_spill] sm:$0xff]  ;;  %v26259_v40 = vpop.f32.mrb[138].mxu1 }
 0x330   : > { %v26252_v39 = vpop.eup %22720  ;;  %v9252_v41 = vsub.f32 %v8644_v53, %v9220_v47  ;;  %v9316_v49 = vmul.f32 343.0, %v9284_v16  ;;  %v8168_v51 = vadd.f32 %v26036_v55, %v8008_v44  ;;  %v8486_v35 = vadd.f32 %v26036_v55, %v8326_v62  ;;  %v26268_v44 = vpop.f32.mrb[139].mxu1  ;;  %v28954_v62 = vld [vmem:[#allocation81_spill] sm:$0xff] }
 0x331   : > { %28952 = vst [vmem:[#allocation91_spill] sm:$0xff] %v26252_v39  ;;  %22726 = vrcp.f32 %v9442_v19  ;;  %v9441_v38 = vadd.f32 1e-08, %v9409_v34  ;;  %v9219_v20 = vmul.f32 %v9187_v0, %v26228_v63  ;;  %v9222_v4 = vmul.f32 %v25793_v17, %v28953_v12  ;;  %v26277_v63 = vpop.f32.mrb[140].mxu1 }
 0x332   : > { %v26261_v11 = vpop.eup %22722  ;;  %v9348_v45 = vadd.f32 %v9316_v49, %v9252_v41  ;;  %v8646_v39 = vadd.f32 %v25862_v61, %v8486_v35  ;;  %v9286_v53 = vmul.f32 %v28864_v37, %v28864_v37  ;;  %v7849_v16 = vadd.f32 %v26041_v42, %v26023_v36 }
 0x333   : > { %v9251_v34 = vsub.f32 %v8643_v52, %v9219_v20  ;;  %v9315_v19 = vmul.f32 343.0, %v9283_v57  ;;  %v8007_v47 = vadd.f32 %v7847_v26, %v25969_v60  ;;  %v8325_v17 = vadd.f32 %v8165_v24, %v25895_v25 }
 0x334   : > { %22728 = vrcp.f32 %v9441_v38  ;;  %v9412_v0 = vmul.f32 %v9348_v45, %v28954_v62  ;;  %v9254_v41 = vsub.f32 %v8646_v39, %v9222_v4  ;;  %v9318_v49 = vmul.f32 343.0, %v9286_v53  ;;  %v26282_v45 = vpop.f32.mrb[141].mxu1  ;;  %v28955_v38 = vld [vmem:[#allocation142_spill] sm:$0xff] }
 0x335   : > { %v9347_v61 = vadd.f32 %v9315_v19, %v9251_v34  ;;  %v8167_v35 = vadd.f32 %v8007_v47, %v26041_v42  ;;  %v8485_v12 = vadd.f32 %v8325_v17, %v26041_v42  ;;  %v9285_v37 = vmul.f32 %v28917_v30, %v28917_v30  ;;  %v28956_v62 = vld [vmem:[#allocation150_spill] sm:$0xff] }
 0x336   : > { %v9444_v20 = vadd.f32 1e-08, %v9412_v0  ;;  %v9350_v52 = vadd.f32 %v9318_v49, %v9254_v41  ;;  %v7852_v26 = vadd.f32 %v26065_v31, %v26036_v55  ;;  %v8010_v24 = vadd.f32 %v25988_v46, %v7850_v32 }
 0x337   : > { %v9411_v57 = vmul.f32 %v9347_v61, %v25628_v9  ;;  %v8645_v39 = vadd.f32 %v8485_v12, %v25869_v48  ;;  %v9221_v4 = vmul.f32 %v26089_v3, %v28955_v38  ;;  %v8328_v53 = vadd.f32 %v25923_v33, %v8168_v51  ;;  %v26297_v12 = vpop.f32.mrb[142].mxu1 }
 0x338   : > { %v26289_v34 = vpop.eup %22724  ;;  %v9414_v19 = vmul.f32 %v9350_v52, %v25636_v50  ;;  %v9317_v47 = vmul.f32 343.0, %v9285_v37  ;;  %v8170_v17 = vadd.f32 %v26065_v31, %v8010_v24  ;;  %v9192_v32 = vmul.f32 2.0, %v28956_v62  ;;  %v26302_v37 = vpop.f32.mrb[143].mxu1  ;;  %v28958_v24 = vld [vmem:[#allocation146_spill] sm:$0xff] }
 0x339   : > { %v9443_v0 = vadd.f32 1e-08, %v9411_v57  ;;  %v9253_v41 = vsub.f32 %v8645_v39, %v9221_v4  ;;  %v8488_v9 = vadd.f32 %v26065_v31, %v8328_v53  ;;  %v9288_v48 = vmul.f32 %v28956_v62, %v28956_v62  ;;  %v28959_v53 = vld [vmem:[#allocation152_spill] sm:$0xff] }
 0x33a   : > { %22730 = vrcp.f32 %v9444_v20  ;;  %v9446_v3 = vadd.f32 1e-08, %v9414_v19  ;;  %v7851_v51 = vadd.f32 %v26071_v18, %v26041_v42  ;;  %v8009_v50 = vadd.f32 %v7849_v16, %v25994_v28 }
 0x33b   : > { %v26304_v49 = vpop.eup %22726  ;;  %22732 = vrcp.f32 %v9443_v0  ;;  %v9349_v61 = vadd.f32 %v9317_v47, %v9253_v41  ;;  %v8648_v52 = vadd.f32 %v25888_v1, %v8488_v9  ;;  %v9224_v57 = vmul.f32 %v9192_v32, %v28958_v24  ;;  %v26316_v0 = vpop.f32.mrb[144].mxu1 }
 0x33c   : > { %28957 = vst [vmem:[#allocation123_spill] sm:$0xff] %v26304_v49  ;;  %v9320_v39 = vmul.f32 343.0, %v9288_v48  ;;  %v8169_v4 = vadd.f32 %v8009_v50, %v26071_v18  ;;  %v8327_v20 = vadd.f32 %v8167_v35, %v25931_v2  ;;  %v9191_v19 = vmul.f32 2.0, %v28959_v53  ;;  %v26323_v9 = vpop.f32.mrb[145].mxu1  ;;  %v28961_v50 = vld [vmem:[#allocation148_spill] sm:$0xff] }
 0x33d   : > { %v9413_v62 = vmul.f32 %v9349_v61, %v25651_v27  ;;  %v9256_v16 = vsub.f32 %v8648_v52, %v9224_v57  ;;  %v9287_v38 = vmul.f32 %v28959_v53, %v28959_v53  ;;  %v7854_v47 = vadd.f32 %v26091_v15, %v26065_v31  ;;  %v28962_v52 = vld [vmem:[#allocation154_spill] sm:$0xff] }
 0x33e   : > { %v26318_v1 = vpop.eup %22728  ;;  %22734 = vrcp.f32 %v9446_v3  ;;  %v8487_v32 = vadd.f32 %v8327_v20, %v26071_v18  ;;  %v8012_v35 = vadd.f32 %v26014_v54, %v7852_v26  ;;  %v8330_v41 = vadd.f32 %v25957_v59, %v8170_v17 }
 0x33f   : > { %28960 = vst [vmem:[#allocation41_spill] sm:$0xff] %v26318_v1  ;;  %v9445_v27 = vadd.f32 1e-08, %v9413_v62  ;;  %v9352_v48 = vadd.f32 %v9320_v39, %v9256_v16  ;;  %v9223_v61 = vmul.f32 %v9191_v19, %v28961_v50  ;;  %v9194_v57 = vmul.f32 2.0, %v28962_v52  ;;  %v26337_v39 = vpop.f32.mrb[146].mxu1  ;;  %v28963_v16 = vld [vmem:[#allocation151_spill] sm:$0xff] }
 0x340   : > { %v8647_v53 = vadd.f32 %v8487_v32, %v25895_v25  ;;  %v8172_v24 = vadd.f32 %v26091_v15, %v8012_v35  ;;  %v8490_v3 = vadd.f32 %v26091_v15, %v8330_v41  ;;  %v9290_v20 = vmul.f32 %v28962_v52, %v28962_v52  ;;  %v26342_v41 = vpop.f32.mrb[147].mxu1 }
 0x341   : > { %22736 = vrcp.f32 %v9445_v27  ;;  %v9416_v26 = vmul.f32 %v9352_v48, %v25658_v13  ;;  %v9319_v17 = vmul.f32 343.0, %v9287_v38  ;;  %v26335_v62 = vadd.f32 %v26098_v10, %v26071_v18  ;;  %v28964_v13 = vld [vmem:[#allocation157_spill] sm:$0xff]  ;;  %v26357_v1 = vpop.f32.mrb[148].mxu1 }
 0x342   : > { %v9255_v19 = vsub.f32 %v8647_v53, %v9223_v61  ;;  %v8650_v25 = vadd.f32 %v25923_v33, %v8490_v3  ;;  %v9226_v32 = vmul.f32 %v9194_v57, %v28963_v16  ;;  %v8011_v35 = vadd.f32 %v7851_v51, %v26023_v36 }
 0x343   : > { %v9322_v52 = vmul.f32 343.0, %v9290_v20  ;;  %v8329_v27 = vadd.f32 %v8169_v4, %v25969_v60  ;;  %v9193_v38 = vmul.f32 2.0, %v28964_v13  ;;  %v9289_v48 = vmul.f32 %v28964_v13, %v28964_v13  ;;  %v28967_v4 = vld [vmem:[#allocation153_spill] sm:$0xff] }
 0x344   : > { %v26348_v50 = vpop.eup %22730  ;;  %v9351_v30 = vadd.f32 %v9319_v17, %v9255_v19  ;;  %v9258_v53 = vsub.f32 %v8650_v25, %v9226_v32  ;;  %v8171_v33 = vadd.f32 %v8011_v35, %v26098_v10  ;;  %v7856_v61 = vadd.f32 %v26120_v8, %v26091_v15  ;;  %v26362_v25 = vpop.f32.mrb[149].mxu1  ;;  %v28968_v32 = vld [vmem:[#allocation158_spill] sm:$0xff] }
 0x345   : > { %28965 = vst [vmem:[#allocation126_spill] sm:$0xff] %v26348_v50  ;;  %v26353_v51 = vpop.eup %22732  ;;  %v9448_v57 = vadd.f32 1e-08, %v9416_v26  ;;  %v8489_v3 = vadd.f32 %v8329_v27, %v26098_v10  ;;  %v9225_v20 = vmul.f32 %v9193_v38, %v28967_v4  ;;  %v9321_v16 = vmul.f32 343.0, %v9289_v48  ;;  %v28969_v35 = vld [vmem:[#allocation134_spill] sm:$0xff]  ;;  %v28971_v38 = vld [vmem:[#allocation160_spill] sm:$0xff] }
 0x346   : > { %28966 = vst [vmem:[#allocation94_spill] sm:$0xff] %v26353_v51  ;;  %v9415_v13 = vmul.f32 %v9351_v30, %v25669_v58  ;;  %v9354_v50 = vadd.f32 %v9322_v52, %v9258_v53  ;;  %v8014_v17 = vadd.f32 %v26036_v55, %v7854_v47  ;;  %v8016_v19 = vadd.f32 %v26065_v31, %v7856_v61  ;;  %v28974_v53 = vld [vmem:[#allocation164_spill] sm:$0xff]  ;;  %v28979_v51 = vld [vmem:[#allocation57_spill] sm:$0xff] }
 0x347   : > { %v8649_v15 = vadd.f32 %v8489_v3, %v25931_v2  ;;  %v8332_v26 = vadd.f32 %v25988_v46, %v8172_v24  ;;  %v26368_v27 = vadd.f32 %v28969_v35, %v28968_v32  ;;  %v9196_v48 = vmul.f32 2.0, %v28971_v38  ;;  %v26381_v3 = vpop.f32.mrb[150].mxu1 }
 0x348   : > { %v26371_v4 = vpop.eup %22734  ;;  %v9447_v58 = vadd.f32 1e-08, %v9415_v13  ;;  %v9418_v30 = vmul.f32 %v9354_v50, %v25682_v23  ;;  %v8174_v47 = vadd.f32 %v26120_v8, %v8014_v17  ;;  %v8336_v31 = vadd.f32 %v26036_v55, %v8016_v19  ;;  %v26385_v50 = vpop.f32.mrb[151].mxu1  ;;  %v28976_v19 = vld [vmem:[#allocation165_spill] sm:$0xff] }
 0x349   : > { %28970 = vst [vmem:[#allocation98_spill] sm:$0xff] %v26368_v27  ;;  %28972 = vst [vmem:[#allocation127_spill] sm:$0xff] %v26371_v4  ;;  %v9257_v52 = vsub.f32 %v8649_v15, %v9225_v20  ;;  %v8492_v2 = vadd.f32 %v26120_v8, %v8332_v26  ;;  %v26378_v24 = vmul.f32 0.002915452, %v26368_v27  ;;  %v9198_v61 = vmul.f32 2.0, %v28974_v53  ;;  %v28978_v4 = vld [vmem:[#allocation159_spill] sm:$0xff] }
 0x34a   : > { %22738 = vrcp.f32 %v9448_v57  ;;  %v9450_v35 = vadd.f32 1e-08, %v9418_v30  ;;  %v8334_v13 = vadd.f32 %v26014_v54, %v8174_v47  ;;  %v8656_v23 = vadd.f32 %v26014_v54, %v8336_v31  ;;  %v28977_v57 = vld [vmem:[#allocation155_spill] sm:$0xff] }
 0x34b   : > { %28973 = vst [vmem:[#allocation42_spill] sm:$0xff] %v26378_v24  ;;  %v26387_v17 = vpop.eup %22736  ;;  %v9353_v55 = vadd.f32 %v9321_v16, %v9257_v52  ;;  %v8652_v8 = vadd.f32 %v25957_v59, %v8492_v2  ;;  %v9200_v20 = vmul.f32 2.0, %v26378_v24  ;;  %v9202_v15 = vmul.f32 2.0, %v28976_v19  ;;  %v26400_v16 = vpop.f32.mrb[152].mxu1 }
 0x34c   : > { %28975 = vst [vmem:[#allocation43_spill] sm:$0xff] %v26387_v17  ;;  %22740 = vrcp.f32 %v9447_v58  ;;  %v8654_v26 = vadd.f32 %v25988_v46, %v8334_v13  ;;  %v9228_v30 = vmul.f32 %v9196_v48, %v28977_v57  ;;  %v9230_v47 = vmul.f32 %v9198_v61, %v28978_v4  ;;  %v26406_v58 = vpop.f32.mrb[153].mxu1 }
 0x34d   : > { %v9417_v54 = vmul.f32 %v9353_v55, %v28979_v51  ;;  %v9232_v49 = vmul.f32 %v9200_v20, %v26368_v27  ;;  %v9234_v17 = vmul.f32 %v9202_v15, %v28968_v32  ;;  %v9292_v59 = vmul.f32 %v28971_v38, %v28971_v38  ;;  %v26415_v27 = vpop.f32.mrb[154].mxu1  ;;  %v29028_v38 = vld [vmem:[#allocation122_spill] sm:$0xff] }
 0x34e   : > { %v9260_v52 = vsub.f32 %v8652_v8, %v9228_v30  ;;  %v9262_v2 = vsub.f32 %v8654_v26, %v9230_v47  ;;  %v9294_v46 = vmul.f32 %v28974_v53, %v28974_v53  ;;  %v9296_v48 = vmul.f32 %v26378_v24, %v26378_v24 }
 0x34f   : > { %22742 = vrcp.f32 %v9450_v35  ;;  %v9264_v51 = vsub.f32 %v8656_v23, %v9232_v49  ;;  %v9266_v61 = vsub.f32 %v8336_v31, %v9234_v17  ;;  %v9298_v13 = vmul.f32 %v28976_v19, %v28976_v19  ;;  %v26418_v17 = vpop.f32.mrb[155].mxu1 }
 0x350   : > { %v9324_v55 = vmul.f32 343.0, %v9292_v59  ;;  %v9326_v20 = vmul.f32 343.0, %v9294_v46  ;;  %v9328_v15 = vmul.f32 343.0, %v9296_v48  ;;  %v7855_v8 = vadd.f32 %v26131_v56, %v26098_v10  ;;  %v28981_v48 = vld [vmem:[#allocation161_spill] sm:$0xff] }
 0x351   : > { %v9449_v26 = vadd.f32 1e-08, %v9417_v54  ;;  %v9330_v30 = vmul.f32 343.0, %v9298_v13  ;;  %v8013_v47 = vadd.f32 %v26335_v62, %v26041_v42  ;;  %v8331_v32 = vadd.f32 %v8171_v33, %v25994_v28  ;;  %v28980_v54 = vld [vmem:[#allocation136_spill] sm:$0xff] }
 0x352   : > { %v9356_v49 = vadd.f32 %v9324_v55, %v9260_v52  ;;  %v9358_v31 = vadd.f32 %v9326_v20, %v9262_v2  ;;  %v9360_v35 = vadd.f32 %v9328_v15, %v9264_v51  ;;  %v8015_v23 = vadd.f32 %v7855_v8, %v26071_v18  ;;  %v28984_v33 = vld [vmem:[#allocation84_spill] sm:$0xff]  ;;  %v28985_v52 = vld [vmem:[#allocation93_spill] sm:$0xff]  ;;  %v28987_v20 = vld [vmem:[#allocation83_spill] sm:$0xff]  ;;  %v26438_v8 = vpop.f32.mrb[156].mxu1 }
 0x353   : > { %v9362_v59 = vadd.f32 %v9330_v30, %v9266_v61  ;;  %v8173_v46 = vadd.f32 %v8013_v47, %v26131_v56  ;;  %v8491_v10 = vadd.f32 %v8331_v32, %v26131_v56  ;;  %v26424_v13 = vadd.f32 %v28981_v48, %v28980_v54  ;;  %v28986_v51 = vld [vmem:[#allocation92_spill] sm:$0xff]  ;;  %v26446_v54 = vpop.f32.mrb[157].mxu1 }
 0x354   : > { %v26426_v62 = vpop.eup %22738  ;;  %v9420_v19 = vmul.f32 %v9356_v49, %v28984_v33  ;;  %v9422_v2 = vmul.f32 %v9358_v31, %v28985_v52  ;;  %v9424_v55 = vmul.f32 %v9360_v35, %v28986_v51  ;;  %v8335_v18 = vadd.f32 %v8015_v23, %v26041_v42  ;;  %v28990_v35 = vld [vmem:[#allocation163_spill] sm:$0xff]  ;;  %v28996_v51 = vld [vmem:[#allocation162_spill] sm:$0xff]  ;;  %v26460_v4 = vpop.f32.mrb[158].mxu1 }
 0x355   : > { %28982 = vst [vmem:[#allocation130_spill] sm:$0xff] %v26424_v13  ;;  %28983 = vst [vmem:[#allocation102_spill] sm:$0xff] %v26426_v62  ;;  %v9426_v61 = vmul.f32 %v9362_v59, %v28987_v20  ;;  %v8333_v15 = vadd.f32 %v8173_v46, %v26023_v36  ;;  %v8651_v56 = vadd.f32 %v8491_v10, %v25969_v60  ;;  %v26436_v32 = vmul.f32 0.002915452, %v26424_v13  ;;  %v28991_v59 = vld [vmem:[#allocation166_spill] sm:$0xff]  ;;  %v28992_v33 = vld [vmem:[#allocation167_spill] sm:$0xff] }
 0x356   : > { %v26440_v30 = vpop.eup %22740  ;;  %22744 = vrcp.f32 %v9449_v26  ;;  %v9452_v47 = vadd.f32 1e-08, %v9420_v19  ;;  %v8655_v49 = vadd.f32 %v8335_v18, %v26023_v36  ;;  %v9454_v31 = vadd.f32 1e-08, %v9422_v2  ;;  %v28995_v2 = vld [vmem:[#allocation156_spill] sm:$0xff]  ;;  %28997 = vst [vmem:[#allocation137_spill] sm:$0xff] %v26460_v4 }
 0x357   : > { %28988 = vst [vmem:[#allocation104_spill] sm:$0xff] %v26436_v32  ;;  %28989 = vst [vmem:[#allocation132_spill] sm:$0xff] %v26440_v30  ;;  %v8653_v42 = vadd.f32 %v8333_v15, %v25994_v28  ;;  %v9195_v23 = vmul.f32 2.0, %v28990_v35  ;;  %v9197_v46 = vmul.f32 2.0, %v28991_v59  ;;  %v9456_v60 = vadd.f32 1e-08, %v9424_v55 }
 0x358   : > { %v9199_v10 = vmul.f32 2.0, %v26436_v32  ;;  %v9201_v52 = vmul.f32 2.0, %v28992_v33  ;;  %v9291_v26 = vmul.f32 %v28990_v35, %v28990_v35  ;;  %v26454_v36 = vadd.f32 1e-08, %v9426_v61  ;;  %v29026_v30 = vld [vmem:[#allocation24_spill] sm:$0xff]  ;;  %v29043_v62 = vld [vmem:[#allocation30_spill] sm:$0xff] }
 0x359   : > { %v26452_v19 = vpop.eup %22742  ;;  %v9227_v28 = vmul.f32 %v9195_v23, %v28995_v2  ;;  %v9229_v20 = vmul.f32 %v9197_v46, %v28996_v51  ;;  %v9293_v15 = vmul.f32 %v28991_v59, %v28991_v59  ;;  %22746 = vrcp.f32 %v9452_v47 }
 0x35a   : > { %28993 = vst [vmem:[#allocation44_spill] sm:$0xff] %v26452_v19  ;;  %28994 = vst [vmem:[#allocation135_spill] sm:$0xff] %v26454_v36  ;;  %v9231_v55 = vmul.f32 %v9199_v10, %v26424_v13  ;;  %v9233_v57 = vmul.f32 %v9201_v52, %v28981_v48  ;;  %v9295_v35 = vmul.f32 %v26436_v32, %v26436_v32  ;;  %v26466_v19 = vpop.f32.mrb[159].mxu1  ;;  %v9323_v46 = vmul.f32 343.0, %v9291_v26  ;;  %v28999_v10 = vld [vmem:[#allocation26_spill] sm:$0xff] }
 0x35b   : > { %28998 = vst [vmem:[#allocation48_spill] sm:$0xff] %v26466_v19  ;;  %v9259_v61 = vsub.f32 %v8651_v56, %v9227_v28  ;;  %v9261_v36 = vsub.f32 %v8653_v42, %v9229_v20  ;;  %v9297_v23 = vmul.f32 %v28992_v33, %v28992_v33  ;;  %v9325_v59 = vmul.f32 343.0, %v9293_v15  ;;  %v26474_v13 = vpop.f32.mrb[160].mxu1 }
 0x35c   : > { %v9263_v51 = vsub.f32 %v8655_v49, %v9231_v55  ;;  %v9265_v2 = vsub.f32 %v8335_v18, %v9233_v57  ;;  %v9327_v24 = vmul.f32 343.0, %v9295_v35  ;;  %v7860_v52 = vadd.f32 %v26167_v5, %v28999_v10  ;;  %29000 = vst [vmem:[#allocation47_spill] sm:$0xff] %v26474_v13  ;;  %v21510_v18 = vpop.f32.mrb[161].mxu1  ;;  %v29001_v35 = vld [vmem:[#allocation107_spill] sm:$0xff] }
 0x35d   : > { %v9329_v47 = vmul.f32 343.0, %v9297_v23  ;;  %v9355_v53 = vadd.f32 %v9323_v46, %v9259_v61  ;;  %v7859_v48 = vadd.f32 %v26173_v14, %v26152_v22  ;;  %v9357_v56 = vadd.f32 %v9325_v59, %v9261_v36  ;;  %v29003_v61 = vld [vmem:[#allocation96_spill] sm:$0xff]  ;;  %v29004_v59 = vld [vmem:[#allocation105_spill] sm:$0xff]  ;;  %v29005_v46 = vld [vmem:[#allocation95_spill] sm:$0xff] }
 0x35e   : > { %v9359_v42 = vadd.f32 %v9327_v24, %v9263_v51  ;;  %v7862_v28 = vadd.f32 %v26192_v21, %v26167_v5  ;;  %v7861_v57 = vadd.f32 %v26197_v6, %v26173_v14  ;;  %v8180_v20 = vadd.f32 %v26192_v21, %v7860_v52 }
 0x35f   : > { %v9361_v49 = vadd.f32 %v9329_v47, %v9265_v2  ;;  %v9419_v26 = vmul.f32 %v9355_v53, %v29001_v35  ;;  %v8179_v15 = vadd.f32 %v7859_v48, %v26197_v6  ;;  %v9421_v23 = vmul.f32 %v9357_v56, %v29003_v61  ;;  %v26493_v47 = vpop.f32.mrb[162].mxu1  ;;  %v29007_v56 = vld [vmem:[#allocation9_spill] sm:$0xff] }
 0x360   : > { %v26483_v55 = vpop.eup %22744  ;;  %v9423_v24 = vmul.f32 %v9359_v42, %v29004_v59  ;;  %v8022_v36 = vadd.f32 %v28999_v10, %v7862_v28  ;;  %v8021_v51 = vadd.f32 %v7861_v57, %v26152_v22  ;;  %v7864_v53 = vadd.f32 %v26214_v29, %v26192_v21  ;;  %29006 = vst [vmem:[#allocation134_spill] sm:$0xff] %v26493_v47  ;;  %v29008_v42 = vld [vmem:[#allocation170_spill] sm:$0xff]  ;;  %v21517_v28 = vpop.f32.mrb[163].mxu1  ;;  %v29015_v47 = vld [vmem:[#allocation171_spill] sm:$0xff] }
 0x361   : > { %29002 = vst [vmem:[#allocation81_spill] sm:$0xff] %v26483_v55  ;;  %v9425_v13 = vmul.f32 %v9361_v49, %v29005_v46  ;;  %v9451_v18 = vadd.f32 1e-08, %v9419_v26  ;;  %v8500_v2 = vadd.f32 %v26214_v29, %v8180_v20  ;;  %22748 = vrcp.f32 %v9454_v31  ;;  %v29009_v49 = vld [vmem:[#allocation168_spill] sm:$0xff]  ;;  %v29010_v26 = vld [vmem:[#allocation13_spill] sm:$0xff]  ;;  %v29021_v55 = vld [vmem:[#allocation23_spill] sm:$0xff] }
 0x362   : > { %v9453_v48 = vadd.f32 1e-08, %v9421_v23  ;;  %v8182_v52 = vadd.f32 %v26214_v29, %v8022_v36  ;;  %v8756_v35 = vmul.f32 %v29008_v42, %v29007_v56  ;;  %22750 = vrcp.f32 %v9456_v60  ;;  %v29013_v56 = vld [vmem:[#allocation18_spill] sm:$0xff] }
 0x363   : > { %v26498_v57 = vadd.f32 1e-08, %v9423_v24  ;;  %v8820_v61 = vmul.f32 %v29010_v26, %v29009_v49  ;;  %v8884_v59 = vmul.f32 %v29008_v42, %v29010_v26  ;;  %v26504_v20 = vpop.eup %22746  ;;  %22752 = vrcp.f32 %v9451_v18  ;;  %v29012_v24 = vld [vmem:[#allocation10_spill] sm:$0xff]  ;;  %v26514_v49 = vpop.f32.mrb[164].mxu1  ;;  %v29016_v18 = vld [vmem:[#allocation15_spill] sm:$0xff] }
 0x364   : > { %29011 = vst [vmem:[#allocation57_spill] sm:$0xff] %v26504_v20  ;;  %v8788_v31 = vsub.f32 %v8500_v2, %v8756_v35  ;;  %v7863_v23 = vadd.f32 %v26222_v7, %v26197_v6  ;;  %v8181_v36 = vadd.f32 %v8021_v51, %v26222_v7  ;;  %v26509_v46 = vadd.f32 1e-08, %v9425_v13  ;;  %29014 = vst [vmem:[#allocation136_spill] sm:$0xff] %v26514_v49  ;;  %v21524_v20 = vpop.f32.mrb[165].mxu1  ;;  %v29017_v13 = vld [vmem:[#allocation34_spill] sm:$0xff] }
 0x365   : > { %22754 = vrcp.f32 %v9453_v48  ;;  %v8499_v60 = vadd.f32 %v8179_v15, %v26222_v7  ;;  %v8755_v28 = vmul.f32 %v29013_v56, %v29012_v24  ;;  %v8916_v26 = vmul.f32 343.0, %v8884_v59  ;;  %v29018_v49 = vld [vmem:[#allocation14_spill] sm:$0xff] }
 0x366   : > { %v8852_v42 = vsub.f32 %v8788_v31, %v8820_v61  ;;  %v8819_v2 = vmul.f32 %v29016_v18, %v29015_v47  ;;  %v8883_v35 = vmul.f32 %v29013_v56, %v29016_v18  ;;  %v7866_v48 = vadd.f32 %v29017_v13, %v26214_v29  ;;  %v29019_v61 = vld [vmem:[#allocation173_spill] sm:$0xff]  ;;  %v29020_v31 = vld [vmem:[#allocation172_spill] sm:$0xff] }
 0x367   : > { %v8787_v51 = vsub.f32 %v8499_v60, %v8755_v28  ;;  %v8024_v15 = vadd.f32 %v26167_v5, %v7864_v53  ;;  %v8502_v33 = vadd.f32 %v29017_v13, %v8182_v52  ;;  %v8758_v59 = vmul.f32 %v29019_v61, %v29018_v49  ;;  %v26533_v53 = vpop.f32.mrb[166].mxu1 }
 0x368   : > { %v8948_v24 = vadd.f32 %v8916_v26, %v8852_v42  ;;  %v8915_v32 = vmul.f32 343.0, %v8883_v35  ;;  %v8822_v47 = vmul.f32 %v29021_v55, %v29020_v31  ;;  %v8886_v20 = vmul.f32 %v29019_v61, %v29021_v55  ;;  %29022 = vst [vmem:[#allocation84_spill] sm:$0xff] %v26533_v53  ;;  %v21531_v26 = vpop.f32.mrb[167].mxu1  ;;  %v29025_v31 = vld [vmem:[#allocation101_spill] sm:$0xff] }
 0x369   : > { %v8851_v19 = vsub.f32 %v8787_v51, %v8819_v2  ;;  %v8184_v56 = vadd.f32 %v29017_v13, %v8024_v15  ;;  %v7865_v60 = vadd.f32 %v26245_v43, %v26222_v7  ;;  %v8790_v28 = vsub.f32 %v8502_v33, %v8758_v59  ;;  %v29023_v2 = vld [vmem:[#allocation22_spill] sm:$0xff]  ;;  %v29024_v51 = vld [vmem:[#allocation177_spill] sm:$0xff] }
 0x36a   : > { %v9364_v52 = vmul.f32 %v8948_v24, %v8948_v24  ;;  %v8023_v42 = vadd.f32 %v7863_v23, %v26173_v14  ;;  %v8501_v49 = vadd.f32 %v8181_v36, %v26245_v43  ;;  %v8918_v35 = vmul.f32 343.0, %v8886_v20  ;;  %v26552_v20 = vpop.f32.mrb[168].mxu1 }
 0x36b   : > { %v8947_v18 = vadd.f32 %v8915_v32, %v8851_v19  ;;  %v8757_v15 = vmul.f32 %v29024_v51, %v29023_v2  ;;  %v8821_v55 = vmul.f32 %v29026_v30, %v29025_v31  ;;  %v26541_v61 = vpop.eup %22748  ;;  %v8854_v53 = vsub.f32 %v8790_v28, %v8822_v47  ;;  %29030 = vst [vmem:[#allocation83_spill] sm:$0xff] %v26552_v20 }
 0x36c   : > { %29027 = vst [vmem:[#allocation93_spill] sm:$0xff] %v26541_v61  ;;  %v9492_v4 = vmul.f32 %v29028_v38, %v9364_v52  ;;  %v8183_v33 = vadd.f32 %v8023_v42, %v26245_v43  ;;  %v8885_v23 = vmul.f32 %v29024_v51, %v29026_v30  ;;  %v26547_v36 = vpop.eup %22750  ;;  %v7868_v24 = vadd.f32 %v26259_v40, %v29017_v13  ;;  %v21538_v30 = vpop.f32.mrb[169].mxu1 }
 0x36d   : > { %29029 = vst [vmem:[#allocation92_spill] sm:$0xff] %v26547_v36  ;;  %v9363_v32 = vmul.f32 %v8947_v18, %v8947_v18  ;;  %v8789_v19 = vsub.f32 %v8501_v49, %v8757_v15  ;;  %v8026_v59 = vadd.f32 %v26192_v21, %v7866_v48  ;;  %v26554_v26 = vpop.eup %22752  ;;  %v8950_v47 = vadd.f32 %v8918_v35, %v8854_v53  ;;  %v29033_v18 = vld [vmem:[#allocation119_spill] sm:$0xff]  ;;  %v29034_v15 = vld [vmem:[#allocation16_spill] sm:$0xff]  ;;  %v29035_v48 = vld [vmem:[#allocation110_spill] sm:$0xff] }
 0x36e   : > { %29031 = vst [vmem:[#allocation26_spill] sm:$0xff] %v26554_v26  ;;  %v9524_v38 = vsel %vm379_vm0, %v9492_v4, 0.0  ;;  %v8917_v52 = vmul.f32 343.0, %v8885_v23  ;;  %v8344_v28 = vadd.f32 %v28999_v10, %v8184_v56  ;;  %v8760_v31 = vmul.f32 %v29035_v48, %v29034_v15  ;;  %v29036_v26 = vld [vmem:[#allocation109_spill] sm:$0xff] }
 0x36f   : > { %v26558_v42 = vpop.eup %22754  ;;  %v9491_v49 = vmul.f32 %v29033_v18, %v9363_v32  ;;  %v8853_v2 = vsub.f32 %v8789_v19, %v8821_v55  ;;  %v8186_v51 = vadd.f32 %v26259_v40, %v8026_v59  ;;  %v9366_v36 = vmul.f32 %v8950_v47, %v8950_v47  ;;  %v29037_v4 = vld [vmem:[#allocation29_spill] sm:$0xff]  ;;  %v26573_v19 = vpop.f32.mrb[170].mxu1  ;;  %v29039_v47 = vld [vmem:[#allocation131_spill] sm:$0xff] }
 0x370   : > { %29032 = vst [vmem:[#allocation107_spill] sm:$0xff] %v26558_v42  ;;  %v8504_v61 = vadd.f32 %v26259_v40, %v8344_v28  ;;  %v8824_v53 = vmul.f32 %v29037_v4, %v29036_v26  ;;  %v8888_v56 = vmul.f32 %v29035_v48, %v29037_v4  ;;  %v7867_v55 = vadd.f32 %v26268_v44, %v26245_v43  ;;  %v21545_v15 = vpop.f32.mrb[171].mxu1 }
 0x371   : > { %v9523_v35 = vsel %vm379_vm0, %v9491_v49, 0.0  ;;  %v8949_v23 = vadd.f32 %v8917_v52, %v8853_v2  ;;  %v8025_v32 = vadd.f32 %v7865_v60, %v26197_v6  ;;  %29038 = vst [vmem:[#allocation96_spill] sm:$0xff] %v26573_v19  ;;  %v9494_v30 = vmul.f32 %v29039_v47, %v9366_v36  ;;  %v29040_v49 = vld [vmem:[#allocation17_spill] sm:$0xff]  ;;  %v29042_v60 = vld [vmem:[#allocation112_spill] sm:$0xff]  ;;  %v29046_v47 = vld [vmem:[#allocation19_spill] sm:$0xff] }
 0x372   : > { %v9525_v59 = vadd.f32 %v9524_v38, %v9523_v35  ;;  %v8792_v28 = vsub.f32 %v8504_v61, %v8760_v31  ;;  %v8920_v18 = vmul.f32 343.0, %v8888_v56  ;;  %v8343_v48 = vadd.f32 %v8183_v33, %v26152_v22  ;;  %v29041_v52 = vld [vmem:[#allocation113_spill] sm:$0xff]  ;;  %v26590_v35 = vpop.f32.mrb[172].mxu1 }
 0x373   : > { %v9365_v26 = vmul.f32 %v8949_v23, %v8949_v23  ;;  %v8185_v42 = vadd.f32 %v8025_v32, %v26268_v44  ;;  %v8759_v2 = vmul.f32 %v29041_v52, %v29040_v49  ;;  %v9528_v4 = vsel %vm379_vm0, %v9494_v30, 0.0  ;;  %v29044_v61 = vld [vmem:[#allocation133_spill] sm:$0xff]  ;;  %29045 = vst [vmem:[#allocation105_spill] sm:$0xff] %v26590_v35  ;;  %v29047_v30 = vld [vmem:[#allocation124_spill] sm:$0xff]  ;;  %v21552_v15 = vpop.f32.mrb[173].mxu1  ;;  %v29048_v49 = vld [vmem:[#allocation115_spill] sm:$0xff] }
 0x374   : > { %v8856_v20 = vsub.f32 %v8792_v28, %v8824_v53  ;;  %v8823_v19 = vmul.f32 %v29043_v62, %v29042_v60  ;;  %v8887_v36 = vmul.f32 %v29041_v52, %v29043_v62  ;;  %v8503_v31 = vadd.f32 %v8343_v48, %v26268_v44  ;;  %v29049_v52 = vld [vmem:[#allocation28_spill] sm:$0xff]  ;;  %v29052_v15 = vld [vmem:[#allocation27_spill] sm:$0xff] }
 0x375   : > { %v9493_v38 = vmul.f32 %v29044_v61, %v9365_v26  ;;  %v7870_v56 = vadd.f32 %v26277_v63, %v26259_v40  ;;  %v8028_v33 = vadd.f32 %v26214_v29, %v7868_v24  ;;  %v8346_v53 = vadd.f32 %v26167_v5, %v8186_v51 }
 0x376   : > { %v8952_v23 = vadd.f32 %v8920_v18, %v8856_v20  ;;  %v8919_v32 = vmul.f32 343.0, %v8887_v36  ;;  %v8762_v28 = vmul.f32 %v29047_v30, %v29046_v47  ;;  %v8791_v26 = vsub.f32 %v8503_v31, %v8759_v2  ;;  %v29051_v31 = vld [vmem:[#allocation140_spill] sm:$0xff] }
 0x377   : > { %v9526_v62 = vsel %vm379_vm0, %v9493_v38, 0.0  ;;  %v8188_v48 = vadd.f32 %v26277_v63, %v8028_v33  ;;  %v8826_v60 = vmul.f32 %v29049_v52, %v29048_v49  ;;  %v8506_v35 = vadd.f32 %v26277_v63, %v8346_v53  ;;  %v26606_v38 = vpop.f32.mrb[174].mxu1  ;;  %v29054_v49 = vld [vmem:[#allocation120_spill] sm:$0xff] }
 0x378   : > { %v9527_v61 = vadd.f32 %v9526_v62, %v9525_v59  ;;  %v9368_v24 = vmul.f32 %v8952_v23, %v8952_v23  ;;  %v8890_v20 = vmul.f32 %v29047_v30, %v29049_v52  ;;  %v8855_v51 = vsub.f32 %v8791_v26, %v8823_v19  ;;  %29050 = vst [vmem:[#allocation95_spill] sm:$0xff] %v26606_v38  ;;  %v21559_v53 = vpop.f32.mrb[175].mxu1  ;;  %v29053_v62 = vld [vmem:[#allocation129_spill] sm:$0xff] }
 0x379   : > { %v7869_v18 = vadd.f32 %v26282_v45, %v26268_v44  ;;  %v8027_v36 = vadd.f32 %v7867_v55, %v26222_v7  ;;  %v8345_v2 = vadd.f32 %v8185_v42, %v26173_v14  ;;  %22756 = vrcp.f32 %v26498_v57  ;;  %v29055_v52 = vld [vmem:[#allocation21_spill] sm:$0xff] }
 0x37a   : > { %v9496_v59 = vmul.f32 %v29051_v31, %v9368_v24  ;;  %v9529_v33 = vadd.f32 %v9528_v4, %v9527_v61  ;;  %v8666_v23 = vadd.f32 %v28999_v10, %v8506_v35  ;;  %v8951_v47 = vadd.f32 %v8919_v32, %v8855_v51  ;;  %v26623_v61 = vpop.f32.mrb[176].mxu1 }
 0x37b   : > { %v8187_v19 = vadd.f32 %v8027_v36, %v26282_v45  ;;  %v8505_v30 = vadd.f32 %v8345_v2, %v26282_v45  ;;  %v8761_v55 = vmul.f32 %v29053_v62, %v29052_v15  ;;  %v8922_v42 = vmul.f32 343.0, %v8890_v20  ;;  %v29056_v20 = vld [vmem:[#allocation35_spill] sm:$0xff]  ;;  %v29057_v36 = vld [vmem:[#allocation138_spill] sm:$0xff]  ;;  %v21566_v31 = vpop.f32.mrb[177].mxu1 }
 0x37c   : > { %v8794_v26 = vsub.f32 %v8666_v23, %v8762_v28  ;;  %v8825_v38 = vmul.f32 %v29055_v52, %v29054_v49  ;;  %v8889_v57 = vmul.f32 %v29053_v62, %v29055_v52  ;;  %v9367_v4 = vmul.f32 %v8951_v47, %v8951_v47  ;;  %v29058_v23 = vld [vmem:[#allocation20_spill] sm:$0xff]  ;;  %v29060_v15 = vld [vmem:[#allocation38_spill] sm:$0xff] }
 0x37d   : > { %v8665_v10 = vadd.f32 %v8505_v30, %v26152_v22  ;;  %v7872_v35 = vadd.f32 %v26297_v12, %v26277_v63  ;;  %v8030_v32 = vadd.f32 %v29017_v13, %v7870_v56  ;;  %v8348_v28 = vadd.f32 %v26192_v21, %v8188_v48  ;;  %v29059_v30 = vld [vmem:[#allocation144_spill] sm:$0xff] }
 0x37e   : > { %v8858_v24 = vsub.f32 %v8794_v26, %v8826_v60  ;;  %v8921_v51 = vmul.f32 343.0, %v8889_v57  ;;  %v8764_v2 = vmul.f32 %v29057_v36, %v29056_v20  ;;  %v9495_v53 = vmul.f32 %v29058_v23, %v9367_v4  ;;  %v26640_v4 = vpop.f32.mrb[178].mxu1  ;;  %v29061_v23 = vld [vmem:[#allocation36_spill] sm:$0xff] }
 0x37f   : > { %v8793_v47 = vsub.f32 %v8665_v10, %v8761_v55  ;;  %v8190_v22 = vadd.f32 %v26297_v12, %v8030_v32  ;;  %v8828_v62 = vmul.f32 %v29060_v15, %v29059_v30  ;;  %v8508_v56 = vadd.f32 %v26297_v12, %v8348_v28  ;;  %v21573_v28 = vpop.f32.mrb[179].mxu1 }
 0x380   : > { %v8954_v49 = vadd.f32 %v8922_v42, %v8858_v24  ;;  %v8892_v60 = vmul.f32 %v29057_v36, %v29060_v15  ;;  %v7871_v48 = vadd.f32 %v26302_v37, %v26282_v45  ;;  %v9530_v26 = vsel %vm379_vm0, %v9495_v53, 0.0 }
 0x381   : > { %v8857_v52 = vsub.f32 %v8793_v47, %v8825_v38  ;;  %v8029_v57 = vadd.f32 %v7869_v18, %v26245_v43  ;;  %v8347_v55 = vadd.f32 %v8187_v19, %v26197_v6  ;;  %v9532_v10 = vsel %vm379_vm0, %v9496_v59, 0.0  ;;  %v29062_v38 = vld [vmem:[#allocation103_spill] sm:$0xff]  ;;  %v29063_v47 = vld [vmem:[#allocation169_spill] sm:$0xff] }
 0x382   : > { %v9531_v42 = vadd.f32 %v9530_v26, %v9529_v33  ;;  %v9370_v32 = vmul.f32 %v8954_v49, %v8954_v49  ;;  %v8668_v24 = vadd.f32 %v26167_v5, %v8508_v56  ;;  %v8763_v53 = vmul.f32 %v29062_v38, %v29061_v23  ;;  %v29064_v59 = vld [vmem:[#allocation139_spill] sm:$0xff] }
 0x383   : > { %v8953_v20 = vadd.f32 %v8921_v51, %v8857_v52  ;;  %v8189_v36 = vadd.f32 %v8029_v57, %v26302_v37  ;;  %v8507_v31 = vadd.f32 %v8347_v55, %v26302_v37  ;;  %v26648_v18 = vpop.eup %22756  ;;  %v29065_v33 = vld [vmem:[#allocation39_spill] sm:$0xff]  ;;  %v7874_v56 = vadd.f32 %v26316_v0, %v26297_v12  ;;  %v26658_v52 = vpop.f32.mrb[180].mxu1 }
 0x384   : > { %v9533_v19 = vadd.f32 %v9532_v10, %v9531_v42  ;;  %v9498_v30 = vmul.f32 %v29063_v47, %v9370_v32  ;;  %v8796_v15 = vsub.f32 %v8668_v24, %v8764_v2  ;;  %v8827_v49 = vmul.f32 %v29065_v33, %v29064_v59  ;;  %v21580_v42 = vpop.f32.mrb[181].mxu1  ;;  %v29066_v32 = vld [vmem:[#allocation66_spill] sm:$0xff] }
 0x385   : > { %v9369_v26 = vmul.f32 %v8953_v20, %v8953_v20  ;;  %v8667_v5 = vadd.f32 %v8507_v31, %v26173_v14  ;;  %v8891_v51 = vmul.f32 %v29062_v38, %v29065_v33  ;;  %v8924_v55 = vmul.f32 343.0, %v8892_v60  ;;  %v29067_v14 = vld [vmem:[#allocation37_spill] sm:$0xff]  ;;  %v29068_v31 = vld [vmem:[#allocation108_spill] sm:$0xff] }
 0x386   : > { %v8860_v57 = vsub.f32 %v8796_v15, %v8828_v62  ;;  %v8032_v10 = vadd.f32 %v26259_v40, %v7872_v35  ;;  %v8350_v2 = vadd.f32 %v26214_v29, %v8190_v22  ;;  %v8766_v23 = vmul.f32 %v29068_v31, %v29067_v14  ;;  %v29069_v33 = vld [vmem:[#allocation61_spill] sm:$0xff]  ;;  %v29070_v62 = vld [vmem:[#allocation40_spill] sm:$0xff]  ;;  %v29073_v14 = vld [vmem:[#allocation175_spill] sm:$0xff] }
 0x387   : > { %v9497_v24 = vmul.f32 %v29066_v32, %v9369_v26  ;;  %v8795_v28 = vsub.f32 %v8667_v5, %v8763_v53  ;;  %v8923_v20 = vmul.f32 343.0, %v8891_v51  ;;  %v8830_v60 = vmul.f32 %v29070_v62, %v29069_v33  ;;  %v26674_v26 = vpop.f32.mrb[182].mxu1  ;;  %v29071_v32 = vld [vmem:[#allocation62_spill] sm:$0xff] }
 0x388   : > { %v8956_v38 = vadd.f32 %v8924_v55, %v8860_v57  ;;  %v8192_v47 = vadd.f32 %v26316_v0, %v8032_v10  ;;  %v8510_v59 = vadd.f32 %v26316_v0, %v8350_v2  ;;  %v8894_v22 = vmul.f32 %v29068_v31, %v29070_v62  ;;  %v21587_v10 = vpop.f32.mrb[183].mxu1 }
 0x389   : > { %v9534_v35 = vsel %vm379_vm0, %v9497_v24, 0.0  ;;  %v8859_v15 = vsub.f32 %v8795_v28, %v8827_v49  ;;  %v7873_v53 = vadd.f32 %v26323_v9, %v26302_v37  ;;  %v8031_v55 = vadd.f32 %v7871_v48, %v26268_v44  ;;  %v29072_v24 = vld [vmem:[#allocation174_spill] sm:$0xff]  ;;  %v29075_v48 = vld [vmem:[#allocation71_spill] sm:$0xff] }
 0x38a   : > { %v9535_v5 = vadd.f32 %v9534_v35, %v9533_v19  ;;  %v9372_v51 = vmul.f32 %v8956_v38, %v8956_v38  ;;  %v8670_v57 = vadd.f32 %v26192_v21, %v8510_v59  ;;  %v9536_v2 = vsel %vm379_vm0, %v9498_v30, 0.0  ;;  %v29074_v59 = vld [vmem:[#allocation25_spill] sm:$0xff] }
 0x38b   : > { %v8955_v42 = vadd.f32 %v8923_v20, %v8859_v15  ;;  %v8349_v49 = vadd.f32 %v8189_v36, %v26222_v7  ;;  %v8765_v28 = vmul.f32 %v29072_v24, %v29071_v32  ;;  %v8191_v19 = vadd.f32 %v8031_v55, %v26323_v9  ;;  %v26689_v20 = vpop.f32.mrb[184].mxu1  ;;  %v29076_v55 = vld [vmem:[#allocation78_spill] sm:$0xff] }
 0x38c   : > { %v9500_v31 = vmul.f32 %v29073_v14, %v9372_v51  ;;  %v9537_v33 = vadd.f32 %v9536_v2, %v9535_v5  ;;  %v8798_v62 = vsub.f32 %v8670_v57, %v8766_v23  ;;  %v8829_v35 = vmul.f32 %v29075_v48, %v29074_v59  ;;  %v21594_v5 = vpop.f32.mrb[185].mxu1  ;;  %v29079_v14 = vld [vmem:[#allocation176_spill] sm:$0xff] }
 0x38d   : > { %v9371_v38 = vmul.f32 %v8955_v42, %v8955_v42  ;;  %v8509_v21 = vadd.f32 %v8349_v49, %v26323_v9  ;;  %v8893_v30 = vmul.f32 %v29072_v24, %v29075_v48  ;;  %v8926_v15 = vmul.f32 343.0, %v8894_v22  ;;  %v29077_v24 = vld [vmem:[#allocation67_spill] sm:$0xff] }
 0x38e   : > { %v8862_v36 = vsub.f32 %v8798_v62, %v8830_v60  ;;  %v7876_v51 = vadd.f32 %v26337_v39, %v26316_v0  ;;  %v8034_v23 = vadd.f32 %v26277_v63, %v7874_v56  ;;  %v9540_v57 = vsel %vm379_vm0, %v9500_v31, 0.0  ;;  %v29078_v60 = vld [vmem:[#allocation33_spill] sm:$0xff]  ;;  %v29080_v62 = vld [vmem:[#allocation74_spill] sm:$0xff] }
 0x38f   : > { %v9499_v10 = vmul.f32 %v29076_v55, %v9371_v38  ;;  %v8669_v2 = vadd.f32 %v8509_v21, %v26197_v6  ;;  %v8352_v42 = vadd.f32 %v29017_v13, %v8192_v47  ;;  %v8768_v22 = vmul.f32 %v29078_v60, %v29077_v24  ;;  %v26707_v6 = vpop.f32.mrb[186].mxu1 }
 0x390   : > { %v8958_v49 = vadd.f32 %v8926_v15, %v8862_v36  ;;  %v8194_v32 = vadd.f32 %v26337_v39, %v8034_v23  ;;  %v8832_v59 = vmul.f32 %v29080_v62, %v29079_v14  ;;  %v8896_v38 = vmul.f32 %v29078_v60, %v29080_v62  ;;  %29081 = vst [vmem:[#allocation9_spill] sm:$0xff] %v26707_v6  ;;  %v21601_v23 = vpop.f32.mrb[187].mxu1  ;;  %v29083_v14 = vld [vmem:[#allocation79_spill] sm:$0xff] }
 0x391   : > { %v9538_v56 = vsel %vm379_vm0, %v9499_v10, 0.0  ;;  %v8797_v48 = vsub.f32 %v8669_v2, %v8765_v28  ;;  %v8512_v31 = vadd.f32 %v26337_v39, %v8352_v42  ;;  %v7875_v36 = vadd.f32 %v26342_v41, %v26323_v9  ;;  %v29082_v2 = vld [vmem:[#allocation31_spill] sm:$0xff]  ;;  %v29086_v23 = vld [vmem:[#allocation85_spill] sm:$0xff] }
 0x392   : > { %v9539_v47 = vadd.f32 %v9538_v56, %v9537_v33  ;;  %v9374_v21 = vmul.f32 %v8958_v49, %v8958_v49  ;;  %v8033_v15 = vadd.f32 %v7873_v53, %v26282_v45  ;;  %v8925_v55 = vmul.f32 343.0, %v8893_v30  ;;  %v29084_v33 = vld [vmem:[#allocation111_spill] sm:$0xff]  ;;  %v29085_v53 = vld [vmem:[#allocation106_spill] sm:$0xff] }
 0x393   : > { %v8861_v5 = vsub.f32 %v8797_v48, %v8829_v35  ;;  %v8672_v10 = vadd.f32 %v26214_v29, %v8512_v31  ;;  %v8351_v28 = vadd.f32 %v8191_v19, %v26245_v43  ;;  %v8767_v49 = vmul.f32 %v29084_v33, %v29083_v14  ;;  %v26721_v30 = vpop.f32.mrb[188].mxu1  ;;  %v29091_v14 = vld [vmem:[#allocation87_spill] sm:$0xff] }
 0x394   : > { %v9502_v42 = vmul.f32 %v29082_v2, %v9374_v21  ;;  %v9541_v24 = vadd.f32 %v9540_v57, %v9539_v47  ;;  %v8193_v60 = vadd.f32 %v8033_v15, %v26342_v41  ;;  %v8831_v35 = vmul.f32 %v29086_v23, %v29085_v53  ;;  %29087 = vst [vmem:[#allocation170_spill] sm:$0xff] %v26721_v30  ;;  %v21608_v31 = vpop.f32.mrb[189].mxu1  ;;  %v29090_v2 = vld [vmem:[#allocation114_spill] sm:$0xff]  ;;  %v29092_v53 = vld [vmem:[#allocation91_spill] sm:$0xff] }
 0x395   : > { %v8957_v62 = vadd.f32 %v8925_v55, %v8861_v5  ;;  %v8800_v56 = vsub.f32 %v8672_v10, %v8768_v22  ;;  %v8511_v6 = vadd.f32 %v8351_v28, %v26342_v41  ;;  %v8928_v29 = vmul.f32 343.0, %v8896_v38  ;;  %v29088_v10 = vld [vmem:[#allocation82_spill] sm:$0xff]  ;;  %v29089_v38 = vld [vmem:[#allocation116_spill] sm:$0xff] }
 0x396   : > { %v8895_v19 = vmul.f32 %v29084_v33, %v29086_v23  ;;  %v7878_v57 = vadd.f32 %v26357_v1, %v26337_v39  ;;  %v8036_v48 = vadd.f32 %v26297_v12, %v7876_v51  ;;  %v8354_v15 = vadd.f32 %v26259_v40, %v8194_v32 }
 0x397   : > { %v9373_v47 = vmul.f32 %v8957_v62, %v8957_v62  ;;  %v8864_v21 = vsub.f32 %v8800_v56, %v8832_v59  ;;  %v8671_v22 = vadd.f32 %v8511_v6, %v26222_v7  ;;  %v8770_v28 = vmul.f32 %v29089_v38, %v29088_v10 }
 0x398   : > { %v8927_v5 = vmul.f32 343.0, %v8895_v19  ;;  %v8196_v55 = vadd.f32 %v26357_v1, %v8036_v48  ;;  %v8834_v33 = vmul.f32 %v29091_v14, %v29090_v2  ;;  %v8514_v62 = vadd.f32 %v26357_v1, %v8354_v15  ;;  %v26737_v59 = vpop.f32.mrb[190].mxu1  ;;  %v29093_v2 = vld [vmem:[#allocation88_spill] sm:$0xff] }
 0x399   : > { %v9501_v23 = vmul.f32 %v29092_v53, %v9373_v47  ;;  %v8960_v30 = vadd.f32 %v8928_v29, %v8864_v21  ;;  %v8799_v51 = vsub.f32 %v8671_v22, %v8767_v49  ;;  %v8898_v7 = vmul.f32 %v29089_v38, %v29091_v14  ;;  %v21615_v19 = vpop.f32.mrb[191].mxu1 }
 0x39a   : > { %v7877_v32 = vadd.f32 %v26362_v25, %v26342_v41  ;;  %v8035_v6 = vadd.f32 %v7875_v36, %v26302_v37  ;;  %v8353_v56 = vadd.f32 %v8193_v60, %v26268_v44  ;;  %v8674_v49 = vadd.f32 %v29017_v13, %v8514_v62  ;;  %v29094_v60 = vld [vmem:[#allocation77_spill] sm:$0xff] }
 0x39b   : > { %v9542_v48 = vsel %vm379_vm0, %v9501_v23, 0.0  ;;  %v9376_v31 = vmul.f32 %v8960_v30, %v8960_v30  ;;  %v8863_v29 = vsub.f32 %v8799_v51, %v8831_v35  ;;  %v9544_v47 = vsel %vm379_vm0, %v9502_v42, 0.0  ;;  %v29095_v13 = vld [vmem:[#allocation117_spill] sm:$0xff] }
 0x39c   : > { %v9543_v21 = vadd.f32 %v9542_v48, %v9541_v24  ;;  %v8195_v22 = vadd.f32 %v8035_v6, %v26362_v25  ;;  %v8513_v15 = vadd.f32 %v8353_v56, %v26362_v25  ;;  %v8802_v36 = vsub.f32 %v8674_v49, %v8770_v28  ;;  %v26753_v53 = vpop.f32.mrb[192].mxu1  ;;  %v29096_v23 = vld [vmem:[#allocation97_spill] sm:$0xff]  ;;  %v29098_v49 = vld [vmem:[#allocation32_spill] sm:$0xff] }
 0x39d   : > { %v9504_v10 = vmul.f32 %v26261_v11, %v9376_v31  ;;  %v8959_v38 = vadd.f32 %v8927_v5, %v8863_v29  ;;  %v8769_v14 = vmul.f32 %v29094_v60, %v29093_v2  ;;  %v8833_v42 = vmul.f32 %v29096_v23, %v29095_v13  ;;  %v21622_v51 = vpop.f32.mrb[193].mxu1  ;;  %v29097_v29 = vld [vmem:[#allocation89_spill] sm:$0xff] }
 0x39e   : > { %v9545_v30 = vadd.f32 %v9544_v47, %v9543_v21  ;;  %v8673_v35 = vadd.f32 %v8513_v15, %v26245_v43  ;;  %v8897_v24 = vmul.f32 %v29094_v60, %v29096_v23  ;;  %v8866_v6 = vsub.f32 %v8802_v36, %v8834_v33  ;;  %v29099_v21 = vld [vmem:[#allocation118_spill] sm:$0xff]  ;;  %v29100_v15 = vld [vmem:[#allocation99_spill] sm:$0xff] }
 0x39f   : > { %v9375_v62 = vmul.f32 %v8959_v38, %v8959_v38  ;;  %v8930_v11 = vmul.f32 343.0, %v8898_v7  ;;  %v7880_v5 = vadd.f32 %v26381_v3, %v26357_v1  ;;  %v8038_v19 = vadd.f32 %v26316_v0, %v7878_v57  ;;  %v29101_v51 = vld [vmem:[#allocation123_spill] sm:$0xff] }
 0x3a0   : > { %v8801_v28 = vsub.f32 %v8673_v35, %v8769_v14  ;;  %v8929_v56 = vmul.f32 343.0, %v8897_v24  ;;  %v8356_v48 = vadd.f32 %v26277_v63, %v8196_v55  ;;  %v8772_v47 = vmul.f32 %v29098_v49, %v29097_v29  ;;  %v26769_v33 = vpop.f32.mrb[194].mxu1 }
 0x3a1   : > { %v9503_v43 = vmul.f32 %v26289_v34, %v9375_v62  ;;  %v8962_v31 = vadd.f32 %v8930_v11, %v8866_v6  ;;  %v8836_v38 = vmul.f32 %v29100_v15, %v29099_v21  ;;  %v8198_v36 = vadd.f32 %v26381_v3, %v8038_v19  ;;  %v21629_v55 = vpop.f32.mrb[195].mxu1  ;;  %v29103_v19 = vld [vmem:[#allocation86_spill] sm:$0xff] }
 0x3a2   : > { %v8865_v7 = vsub.f32 %v8801_v28, %v8833_v42  ;;  %v8516_v2 = vadd.f32 %v26381_v3, %v8356_v48  ;;  %v8900_v57 = vmul.f32 %v29098_v49, %v29100_v15  ;;  %v7879_v14 = vadd.f32 %v26385_v50, %v26362_v25  ;;  %v29102_v28 = vld [vmem:[#allocation90_spill] sm:$0xff]  ;;  %v29104_v49 = vld [vmem:[#allocation121_spill] sm:$0xff] }
 0x3a3   : > { %v9546_v34 = vsel %vm379_vm0, %v9503_v43, 0.0  ;;  %v9378_v60 = vmul.f32 %v8962_v31, %v8962_v31  ;;  %v8037_v35 = vadd.f32 %v7877_v32, %v26323_v9  ;;  %v9548_v13 = vsel %vm379_vm0, %v9504_v10, 0.0  ;;  %v29105_v10 = vld [vmem:[#allocation100_spill] sm:$0xff] }
 0x3a4   : > { %v9547_v23 = vadd.f32 %v9546_v34, %v9545_v30  ;;  %v8961_v42 = vadd.f32 %v8929_v56, %v8865_v7  ;;  %v8676_v24 = vadd.f32 %v26259_v40, %v8516_v2  ;;  %v8355_v11 = vadd.f32 %v8195_v22, %v26282_v45  ;;  %v29106_v7 = vld [vmem:[#allocation41_spill] sm:$0xff] }
 0x3a5   : > { %v9506_v62 = vmul.f32 %v29101_v51, %v9378_v60  ;;  %v8197_v6 = vadd.f32 %v8037_v35, %v26385_v50  ;;  %v8771_v48 = vmul.f32 %v29103_v19, %v29102_v28  ;;  %v26786_v43 = vpop.f32.mrb[196].mxu1  ;;  %v8835_v30 = vmul.f32 %v29105_v10, %v29104_v49 }
 0x3a6   : > { %v9377_v31 = vmul.f32 %v8961_v42, %v8961_v42  ;;  %v9549_v29 = vadd.f32 %v9548_v13, %v9547_v23  ;;  %v8804_v32 = vsub.f32 %v8676_v24, %v8772_v47  ;;  %v21636_v56 = vpop.f32.mrb[197].mxu1  ;;  %v8932_v21 = vmul.f32 343.0, %v8900_v57  ;;  %v29107_v57 = vld [vmem:[#allocation45_spill] sm:$0xff] }
 0x3a7   : > { %v8515_v40 = vadd.f32 %v8355_v11, %v26385_v50  ;;  %v8899_v15 = vmul.f32 %v29103_v19, %v29105_v10  ;;  %v7882_v22 = vadd.f32 %v26400_v16, %v26381_v3  ;;  %v8040_v34 = vadd.f32 %v26337_v39, %v7880_v5  ;;  %v29108_v13 = vld [vmem:[#allocation145_spill] sm:$0xff] }
 0x3a8   : > { %v9505_v2 = vmul.f32 %v29106_v7, %v9377_v31  ;;  %v8868_v55 = vsub.f32 %v8804_v32, %v8836_v38  ;;  %v8358_v47 = vadd.f32 %v26297_v12, %v8198_v36  ;;  %v9552_v60 = vsel %vm379_vm0, %v9506_v62, 0.0  ;;  %v29109_v42 = vld [vmem:[#allocation141_spill] sm:$0xff] }
 0x3a9   : > { %v8675_v35 = vadd.f32 %v8515_v40, %v26268_v44  ;;  %v8774_v23 = vmul.f32 %v29108_v13, %v29107_v57  ;;  %v29110_v24 = vld [vmem:[#allocation49_spill] sm:$0xff]  ;;  %v26804_v11 = vpop.f32.mrb[198].mxu1  ;;  %v8200_v38 = vadd.f32 %v26400_v16, %v8040_v34  ;;  %v7881_v32 = vadd.f32 %v26406_v58, %v26385_v50  ;;  %v29112_v34 = vld [vmem:[#allocation147_spill] sm:$0xff] }
 0x3aa   : > { %v8838_v51 = vmul.f32 %v29110_v24, %v29109_v42  ;;  %v9550_v28 = vsel %vm379_vm0, %v9505_v2, 0.0  ;;  %v8964_v19 = vadd.f32 %v8932_v21, %v8868_v55  ;;  %v8518_v5 = vadd.f32 %v26400_v16, %v8358_v47  ;;  %v21643_v36 = vpop.f32.mrb[199].mxu1  ;;  %v29111_v55 = vld [vmem:[#allocation46_spill] sm:$0xff] }
 0x3ab   : > { %v9551_v31 = vadd.f32 %v9550_v28, %v9549_v29  ;;  %v8803_v62 = vsub.f32 %v8675_v35, %v8771_v48  ;;  %v8902_v44 = vmul.f32 %v29108_v13, %v29110_v24  ;;  %v8039_v56 = vadd.f32 %v7879_v14, %v26342_v41  ;;  %v29113_v47 = vld [vmem:[#allocation126_spill] sm:$0xff]  ;;  %v29115_v28 = vld [vmem:[#allocation52_spill] sm:$0xff] }
 0x3ac   : > { %v9380_v49 = vmul.f32 %v8964_v19, %v8964_v19  ;;  %v8678_v10 = vadd.f32 %v26277_v63, %v8518_v5  ;;  %v8357_v21 = vadd.f32 %v8197_v6, %v26302_v37  ;;  %v8931_v7 = vmul.f32 343.0, %v8899_v15  ;;  %v29114_v14 = vld [vmem:[#allocation142_spill] sm:$0xff] }
 0x3ad   : > { %v8867_v40 = vsub.f32 %v8803_v62, %v8835_v30  ;;  %v9553_v2 = vadd.f32 %v9552_v60, %v9551_v31  ;;  %v8773_v29 = vmul.f32 %v29112_v34, %v29111_v55  ;;  %v26818_v48 = vpop.f32.mrb[200].mxu1  ;;  %v8199_v13 = vadd.f32 %v8039_v56, %v26406_v58 }
 0x3ae   : > { %v9508_v35 = vmul.f32 %v29113_v47, %v9380_v49  ;;  %v8806_v57 = vsub.f32 %v8678_v10, %v8774_v23  ;;  %v8517_v42 = vadd.f32 %v8357_v21, %v26406_v58  ;;  %v21650_v63 = vpop.f32.mrb[201].mxu1  ;;  %v8837_v6 = vmul.f32 %v29115_v28, %v29114_v14  ;;  %v29116_v49 = vld [vmem:[#allocation50_spill] sm:$0xff] }
 0x3af   : > { %v8963_v24 = vadd.f32 %v8931_v7, %v8867_v40  ;;  %v8901_v30 = vmul.f32 %v29112_v34, %v29115_v28  ;;  %v7884_v15 = vadd.f32 %v26415_v27, %v26400_v16  ;;  %v8934_v19 = vmul.f32 343.0, %v8902_v44  ;;  %v29117_v10 = vld [vmem:[#allocation150_spill] sm:$0xff] }
 0x3b0   : > { %v8870_v60 = vsub.f32 %v8806_v57, %v8838_v51  ;;  %v8677_v5 = vadd.f32 %v8517_v42, %v26282_v45  ;;  %v8042_v23 = vadd.f32 %v26357_v1, %v7882_v22  ;;  %v8360_v62 = vadd.f32 %v26316_v0, %v8200_v38  ;;  %v29118_v34 = vld [vmem:[#allocation146_spill] sm:$0xff]  ;;  %v29119_v51 = vld [vmem:[#allocation53_spill] sm:$0xff] }
 0x3b1   : > { %v9379_v36 = vmul.f32 %v8963_v24, %v8963_v24  ;;  %v8933_v31 = vmul.f32 343.0, %v8901_v30  ;;  %v8776_v56 = vmul.f32 %v29117_v10, %v29116_v49  ;;  %v26834_v21 = vpop.f32.mrb[202].mxu1  ;;  %v8840_v44 = vmul.f32 %v29119_v51, %v29118_v34  ;;  %v29120_v45 = vld [vmem:[#allocation94_spill] sm:$0xff] }
 0x3b2   : > { %v8966_v40 = vadd.f32 %v8934_v19, %v8870_v60  ;;  %v8805_v7 = vsub.f32 %v8677_v5, %v8773_v29  ;;  %v8202_v55 = vadd.f32 %v26415_v27, %v8042_v23  ;;  %v21657_v47 = vpop.f32.mrb[203].mxu1  ;;  %v8520_v22 = vadd.f32 %v26415_v27, %v8360_v62  ;;  %v29121_v19 = vld [vmem:[#allocation51_spill] sm:$0xff]  ;;  %v29122_v5 = vld [vmem:[#allocation152_spill] sm:$0xff] }
 0x3b3   : > { %v9507_v57 = vmul.f32 %v29120_v45, %v9379_v36  ;;  %v8904_v38 = vmul.f32 %v29117_v10, %v29119_v51  ;;  %v7883_v42 = vadd.f32 %v26418_v17, %v26406_v58  ;;  %v8041_v29 = vadd.f32 %v7881_v32, %v26362_v25  ;;  %v29123_v62 = vld [vmem:[#allocation127_spill] sm:$0xff] }
 0x3b4   : > { %v9382_v63 = vmul.f32 %v8966_v40, %v8966_v40  ;;  %v8869_v24 = vsub.f32 %v8805_v7, %v8837_v6  ;;  %v8359_v14 = vadd.f32 %v8199_v13, %v26323_v9  ;;  %v9556_v28 = vsel %vm379_vm0, %v9508_v35, 0.0  ;;  %v29124_v13 = vld [vmem:[#allocation148_spill] sm:$0xff]  ;;  %v29125_v7 = vld [vmem:[#allocation55_spill] sm:$0xff] }
 0x3b5   : > { %v9554_v30 = vsel %vm379_vm0, %v9507_v57, 0.0  ;;  %v8680_v60 = vadd.f32 %v26297_v12, %v8520_v22  ;;  %v8775_v23 = vmul.f32 %v29122_v5, %v29121_v19  ;;  %v8201_v6 = vadd.f32 %v8041_v29, %v26418_v17  ;;  %v29126_v57 = vld [vmem:[#allocation43_spill] sm:$0xff]  ;;  %v29128_v29 = vld [vmem:[#allocation154_spill] sm:$0xff] }
 0x3b6   : > { %v9555_v36 = vadd.f32 %v9554_v30, %v9553_v2  ;;  %v26853_v49 = vmul.f32 %v29123_v62, %v9382_v63  ;;  %v8965_v10 = vadd.f32 %v8933_v31, %v8869_v24  ;;  %v8519_v32 = vadd.f32 %v8359_v14, %v26418_v17  ;;  %v29127_v24 = vld [vmem:[#allocation54_spill] sm:$0xff]  ;;  %v29129_v30 = vld [vmem:[#allocation151_spill] sm:$0xff] }
 0x3b7   : > { %v8808_v40 = vsub.f32 %v8680_v60, %v8776_v56  ;;  %v8839_v35 = vmul.f32 %v29125_v7, %v29124_v13  ;;  %v8903_v34 = vmul.f32 %v29122_v5, %v29125_v7  ;;  %22758 = vrcp.f32 %v26509_v46  ;;  %v29130_v46 = vld [vmem:[#allocation58_spill] sm:$0xff] }
 0x3b8   : > { %v9381_v12 = vmul.f32 %v8965_v10, %v8965_v10  ;;  %v9557_v51 = vadd.f32 %v9556_v28, %v9555_v36  ;;  %v7886_v2 = vadd.f32 %v26438_v8, %v26415_v27  ;;  %v8936_v31 = vmul.f32 343.0, %v8904_v38 }
 0x3b9   : > { %v8872_v47 = vsub.f32 %v8808_v40, %v8840_v44  ;;  %v8679_v45 = vadd.f32 %v8519_v32, %v26302_v37  ;;  %v8044_v56 = vadd.f32 %v26381_v3, %v7884_v15  ;;  %v8362_v63 = vadd.f32 %v26337_v39, %v8202_v55 }
 0x3ba   : > { %v9509_v22 = vmul.f32 %v29126_v57, %v9381_v12  ;;  %v8778_v14 = vmul.f32 %v29128_v29, %v29127_v24  ;;  %v8842_v60 = vmul.f32 %v29130_v46, %v29129_v30  ;;  %v8906_v44 = vmul.f32 %v29128_v29, %v29130_v46  ;;  %v29136_v24 = vld [vmem:[#allocation137_spill] sm:$0xff] }
 0x3bb   : > { %v8968_v28 = vadd.f32 %v8936_v31, %v8872_v47  ;;  %v8807_v19 = vsub.f32 %v8679_v45, %v8775_v23  ;;  %v8204_v5 = vadd.f32 %v26438_v8, %v8044_v56  ;;  %v8522_v15 = vadd.f32 %v26438_v8, %v8362_v63  ;;  %v26880_v36 = vpop.f32.mrb[204].mxu1  ;;  %v29131_v47 = vld [vmem:[#allocation56_spill] sm:$0xff]  ;;  %v29132_v31 = vld [vmem:[#allocation157_spill] sm:$0xff]  ;;  %v29133_v56 = vld [vmem:[#allocation102_spill] sm:$0xff] }
 0x3bc   : > { %v9558_v37 = vsel %vm379_vm0, %v9509_v22, 0.0  ;;  %v7885_v55 = vadd.f32 %v26446_v54, %v26418_v17  ;;  %v8043_v38 = vadd.f32 %v7883_v42, %v26385_v50  ;;  %v8935_v40 = vmul.f32 343.0, %v8903_v34  ;;  %v21664_v32 = vpop.f32.mrb[205].mxu1  ;;  %v29134_v22 = vld [vmem:[#allocation153_spill] sm:$0xff] }
 0x3bd   : > { %v26882_v62 = vadd.f32 %v9558_v37, %v9557_v51  ;;  %v9384_v10 = vmul.f32 %v8968_v28, %v8968_v28  ;;  %v8871_v23 = vsub.f32 %v8807_v19, %v8839_v35  ;;  %v8682_v13 = vadd.f32 %v26316_v0, %v8522_v15  ;;  %v29135_v51 = vld [vmem:[#allocation63_spill] sm:$0xff]  ;;  %v29138_v15 = vld [vmem:[#allocation160_spill] sm:$0xff] }
 0x3be   : > { %v8203_v7 = vadd.f32 %v8043_v38, %v26446_v54  ;;  %v8361_v12 = vadd.f32 %v8201_v6, %v26342_v41  ;;  %v8777_v45 = vmul.f32 %v29132_v31, %v29131_v47  ;;  %v8841_v63 = vmul.f32 %v29135_v51, %v29134_v22  ;;  %v29137_v37 = vld [vmem:[#allocation59_spill] sm:$0xff] }
 0x3bf   : > { %v26890_v57 = vmul.f32 %v29133_v56, %v9384_v10  ;;  %v8967_v42 = vadd.f32 %v8935_v40, %v8871_v23  ;;  %v8905_v35 = vmul.f32 %v29132_v31, %v29135_v51  ;;  %v8810_v34 = vsub.f32 %v8682_v13, %v8778_v14  ;;  %v26900_v30 = vpop.f32.mrb[206].mxu1  ;;  %v29142_v31 = vld [vmem:[#allocation125_spill] sm:$0xff]  ;;  %v29143_v56 = vld [vmem:[#allocation42_spill] sm:$0xff] }
 0x3c0   : > { %v8521_v0 = vadd.f32 %v8361_v12, %v26446_v54  ;;  %v7888_v29 = vadd.f32 %v29136_v24, %v26438_v8  ;;  %v8046_v6 = vadd.f32 %v26400_v16, %v7886_v2  ;;  %v8938_v28 = vmul.f32 343.0, %v8906_v44  ;;  %v21671_v10 = vpop.f32.mrb[207].mxu1  ;;  %v29139_v2 = vld [vmem:[#allocation132_spill] sm:$0xff]  ;;  %v29140_v12 = vld [vmem:[#allocation65_spill] sm:$0xff] }
 0x3c1   : > { %v9383_v46 = vmul.f32 %v8967_v42, %v8967_v42  ;;  %v8364_v19 = vadd.f32 %v26357_v1, %v8204_v5  ;;  %v8780_v38 = vmul.f32 %v29138_v15, %v29137_v37  ;;  %v26905_v23 = vpop.eup %22758  ;;  %v8874_v14 = vsub.f32 %v8810_v34, %v8842_v60  ;;  %v29141_v5 = vld [vmem:[#allocation164_spill] sm:$0xff] }
 0x3c2   : > { %v8681_v40 = vadd.f32 %v8521_v0, %v26323_v9  ;;  %v8048_v32 = vadd.f32 %v26415_v27, %v7888_v29  ;;  %v8206_v8 = vadd.f32 %v29136_v24, %v8046_v6  ;;  %v8782_v47 = vmul.f32 %v29141_v5, %v29140_v12  ;;  %v29145_v29 = vld [vmem:[#allocation68_spill] sm:$0xff] }
 0x3c3   : > { %v26911_v13 = vmul.f32 %v29139_v2, %v9383_v46  ;;  %v8524_v44 = vadd.f32 %v29136_v24, %v8364_v19  ;;  %v26918_v42 = vmul.f32 %v29143_v56, %v29142_v31  ;;  %v8970_v22 = vadd.f32 %v8938_v28, %v8874_v14  ;;  %v26924_v51 = vpop.f32.mrb[208].mxu1  ;;  %v29144_v24 = vld [vmem:[#allocation155_spill] sm:$0xff]  ;;  %v29147_v19 = vld [vmem:[#allocation72_spill] sm:$0xff] }
 0x3c4   : > { %v8809_v60 = vsub.f32 %v8681_v40, %v8777_v45  ;;  %v8366_v9 = vadd.f32 %v26381_v3, %v8206_v8  ;;  %v26922_v27 = vadd.f32 %v26400_v16, %v8048_v32  ;;  %v8937_v34 = vmul.f32 343.0, %v8905_v35  ;;  %v29146_v46 = vld [vmem:[#allocation159_spill] sm:$0xff]  ;;  %v21678_v10 = vpop.f32.mrb[209].mxu1  ;;  %v29149_v8 = vld [vmem:[#allocation44_spill] sm:$0xff] }
 0x3c5   : > { %v8684_v0 = vadd.f32 %v26337_v39, %v8524_v44  ;;  %v8844_v6 = vmul.f32 %v29145_v29, %v29144_v24  ;;  %v8846_v37 = vmul.f32 %v29147_v19, %v29146_v46  ;;  %v9386_v2 = vmul.f32 %v8970_v22, %v8970_v22  ;;  %v29148_v39 = vld [vmem:[#allocation48_spill] sm:$0xff]  ;;  %v29153_v10 = vld [vmem:[#allocation166_spill] sm:$0xff] }
 0x3c6   : > { %v8873_v28 = vsub.f32 %v8809_v60, %v8841_v63  ;;  %v8686_v45 = vadd.f32 %v26357_v1, %v8366_v9  ;;  %v26934_v16 = vadd.f32 %v26381_v3, %v26922_v27  ;;  %v8908_v35 = vmul.f32 %v29138_v15, %v29145_v29 }
 0x3c7   : > { %v8812_v14 = vsub.f32 %v8684_v0, %v8780_v38  ;;  %v7887_v40 = vadd.f32 %v29148_v39, %v26446_v54  ;;  %v8045_v32 = vadd.f32 %v7885_v55, %v26406_v58  ;;  %v26942_v44 = vmul.f32 %v29149_v8, %v9386_v2  ;;  %v26946_v31 = vpop.f32.mrb[210].mxu1  ;;  %v29150_v0 = vld [vmem:[#allocation60_spill] sm:$0xff]  ;;  %v29154_v2 = vld [vmem:[#allocation81_spill] sm:$0xff] }
 0x3c8   : > { %v8969_v12 = vadd.f32 %v8937_v34, %v8873_v28  ;;  %v8814_v63 = vsub.f32 %v8686_v45, %v8782_v47  ;;  %v8940_v38 = vmul.f32 343.0, %v8908_v35  ;;  %v21685_v60 = vpop.f32.mrb[211].mxu1  ;;  %v8363_v55 = vadd.f32 %v8203_v7, %v26362_v25  ;;  %v29151_v34 = vld [vmem:[#allocation163_spill] sm:$0xff]  ;;  %v29157_v35 = vld [vmem:[#allocation69_spill] sm:$0xff] }
 0x3c9   : > { %v8876_v3 = vsub.f32 %v8812_v14, %v8844_v6  ;;  %v8047_v22 = vadd.f32 %v7887_v40, %v26418_v17  ;;  %v8205_v15 = vadd.f32 %v8045_v32, %v29148_v39  ;;  %v8779_v47 = vmul.f32 %v29151_v34, %v29150_v0  ;;  %v29152_v6 = vld [vmem:[#allocation70_spill] sm:$0xff]  ;;  %v29155_v45 = vld [vmem:[#allocation143_spill] sm:$0xff]  ;;  %v29156_v14 = vld [vmem:[#allocation104_spill] sm:$0xff] }
 0x3ca   : > { %v9385_v54 = vmul.f32 %v8969_v12, %v8969_v12  ;;  %v26950_v9 = vsub.f32 %v8814_v63, %v8846_v37  ;;  %v8781_v17 = vmul.f32 %v29153_v10, %v29152_v6  ;;  %v8523_v37 = vadd.f32 %v8363_v55, %v29148_v39  ;;  %v29158_v40 = vld [vmem:[#allocation167_spill] sm:$0xff]  ;;  %v29161_v55 = vld [vmem:[#allocation162_spill] sm:$0xff]  ;;  %v29162_v0 = vld [vmem:[#allocation76_spill] sm:$0xff] }
 0x3cb   : > { %v8972_v24 = vadd.f32 %v8940_v38, %v8876_v3  ;;  %v8365_v29 = vadd.f32 %v8205_v15, %v26385_v50  ;;  %v26957_v46 = vadd.f32 %v8047_v22, %v26406_v58  ;;  %v8783_v7 = vmul.f32 %v29156_v14, %v29155_v45  ;;  %v26969_v8 = vpop.f32.mrb[212].mxu1  ;;  %v29159_v3 = vld [vmem:[#allocation156_spill] sm:$0xff]  ;;  %v29160_v38 = vld [vmem:[#allocation73_spill] sm:$0xff] }
 0x3cc   : > { %v26962_v28 = vmul.f32 %v29154_v2, %v9385_v54  ;;  %v8785_v32 = vmul.f32 %v29158_v40, %v29157_v35  ;;  %v8843_v22 = vmul.f32 %v29160_v38, %v29159_v3  ;;  %v21692_v15 = vpop.f32.mrb[213].mxu1  ;;  %v9560_v39 = vsel %vm379_vm0, %v26853_v49, 0.0  ;;  %v29164_v49 = vld [vmem:[#allocation47_spill] sm:$0xff]  ;;  %v29165_v3 = vld [vmem:[#allocation134_spill] sm:$0xff] }
 0x3cd   : > { %v9388_v12 = vmul.f32 %v8972_v24, %v8972_v24  ;;  %v8685_v58 = vadd.f32 %v8365_v29, %v26362_v25  ;;  %v8687_v63 = vadd.f32 %v26957_v46, %v26385_v50  ;;  %v8683_v60 = vadd.f32 %v8523_v37, %v26342_v41  ;;  %v29163_v24 = vld [vmem:[#allocation57_spill] sm:$0xff]  ;;  %v29166_v37 = vld [vmem:[#allocation136_spill] sm:$0xff] }
 0x3ce   : > { %v8817_v54 = vsub.f32 %v26957_v46, %v8785_v32  ;;  %v8845_v6 = vmul.f32 %v29162_v0, %v29161_v55  ;;  %v8907_v50 = vmul.f32 %v29151_v34, %v29160_v38  ;;  %v8909_v35 = vmul.f32 %v29153_v10, %v29162_v0  ;;  %v29167_v46 = vld [vmem:[#allocation84_spill] sm:$0xff]  ;;  %v29171_v38 = vld [vmem:[#allocation83_spill] sm:$0xff] }
 0x3cf   : > { %v26983_v2 = vmul.f32 %v29163_v24, %v9388_v12  ;;  %v8813_v25 = vsub.f32 %v8685_v58, %v8781_v17  ;;  %v8815_v29 = vsub.f32 %v8687_v63, %v8783_v7  ;;  %v8811_v45 = vsub.f32 %v8683_v60, %v8779_v47  ;;  %v26993_v15 = vpop.f32.mrb[214].mxu1  ;;  %v29169_v24 = vld [vmem:[#allocation11_spill] sm:$0xff]  ;;  %v29172_v60 = vld [vmem:[#allocation96_spill] sm:$0xff] }
 0x3d0   : > { %v12266_v41 = vadd.f32 %v29165_v3, %v29164_v49  ;;  %v12267_v32 = vadd.f32 %v29167_v46, %v29166_v37  ;;  %29168 = vst [vmem:[#allocation168_spill] sm:$0xff] %v26993_v15  ;;  %v8939_v12 = vmul.f32 343.0, %v8907_v50  ;;  %vm12338_vm9 = vcmp.le.s32.totalorder %v29169_v24, 2  ;;  %v21699_v17 = vpop.f32.mrb[215].mxu1  ;;  %v29175_v50 = vld [vmem:[#allocation64_spill] sm:$0xff]  ;;  %v29178_v37 = vld [vmem:[#allocation149_spill] sm:$0xff] }
 0x3d1   : > { %v8877_v55 = vsub.f32 %v8813_v25, %v8845_v6  ;;  %v8875_v7 = vsub.f32 %v8811_v45, %v8843_v22  ;;  %v8941_v58 = vmul.f32 343.0, %v8909_v35  ;;  %v22962_v10 = vmov 1.0   ;;  %v29173_v6 = vld [vmem:[#allocation105_spill] sm:$0xff]  ;;  %v29174_v22 = vld [vmem:[#allocation95_spill] sm:$0xff]  ;;  %v29184_v24 = vld [vmem:[#allocation80_spill] sm:$0xff] }
 0x3d2   : > { %v26996_v34 = vmul.f32 0.5, %v12266_v41  ;;  %v12283_v47 = vadd.f32 %v12267_v32, %v29165_v3  ;;  %21728 = vmatprep.subr.msk.mxu0 %vm12338_vm9, %v22962_v10  ;;  %v9562_v63 = vsel %vm379_vm0, %v26911_v13, 0.0  ;;  %v12268_v0 = vadd.f32 %v29172_v60, %v29171_v38  ;;  %v29176_v45 = vld [vmem:[#allocation165_spill] sm:$0xff]  ;;  %v29177_v13 = vld [vmem:[#allocation130_spill] sm:$0xff] }
 0x3d3   : > { %21729 = vmatpush3.msk.msra.mxu0 %vm12338_vm9, %v22962_v10  ;;  %v12269_v25 = vadd.f32 %v29174_v22, %v29173_v6  ;;  %v8786_v35 = vmul.f32 %v29176_v45, %v29175_v50  ;;  %v8971_v49 = vadd.f32 %v8939_v12, %v8875_v7  ;;  %v8973_v3 = vadd.f32 %v8941_v58, %v8877_v55  ;;  %v27017_v17 = vpop.f32.mrb[216].mxu1  ;;  %v29181_v12 = vld [vmem:[#allocation98_spill] sm:$0xff]  ;;  %v29182_v55 = vld [vmem:[#allocation128_spill] sm:$0xff] }
 0x3d4   : > { %29170 = vst [vmem:[#allocation13_spill] sm:$0xff] %v26996_v34  ;;  %21730 = vmatprep.mubr.msk.f32.mxu0 %vm9612_vm2, %v26996_v34  ;;  %v27013_v41 = vmul.f32 0.33333334, %v12283_v47  ;;  %v8847_v32 = vmul.f32 %v29178_v37, %v29177_v13  ;;  %29179 = vst [vmem:[#allocation10_spill] sm:$0xff] %v27017_v17  ;;  %v29180_v10 = vmov 0.0   ;;  %v12284_v38 = vadd.f32 %v12268_v0, %v29167_v46  ;;  %v21706_v58 = vpop.f32.mrb[217].mxu1 }
 0x3d5   : > { %21890 = vmatprep.subr.mxu0 %v29180_v10  ;;  %v12285_v6 = vadd.f32 %v12269_v25, %v29172_v60  ;;  %v8818_v50 = vsub.f32 %v26922_v27, %v8786_v35  ;;  %v8848_v7 = vmul.f32 %v29182_v55, %v29181_v12  ;;  %v9387_v1 = vmul.f32 %v8971_v49, %v8971_v49  ;;  %v29183_v13 = vld [vmem:[#allocation161_spill] sm:$0xff]  ;;  %v29185_v17 = vld [vmem:[#allocation158_spill] sm:$0xff]  ;;  %v29186_v10 = vld [vmem:[#allocation75_spill] sm:$0xff] }
 0x3d6   : > { %v9389_v47 = vmul.f32 %v8973_v3, %v8973_v3  ;;  %21731 = vmatmul.mubr.msk.f32.vlgmr.msra.gmra.mrb[224].mxu0 %vm9612_vm2, %v27013_v41  ;;  %v8849_v34 = vmul.f32 %v29184_v24, %v29183_v13  ;;  %v8850_v15 = vmul.f32 %v29186_v10, %v29185_v17  ;;  %v27031_v46 = vmul.f32 0.33333334, %v12284_v38  ;;  %v29188_v35 = vld [vmem:[#allocation26_spill] sm:$0xff] }
 0x3d7   : > { %v27033_v60 = vmul.f32 0.33333334, %v12285_v6  ;;  %v8879_v27 = vsub.f32 %v8815_v29, %v8847_v32  ;;  %v29187_v0 = vsub.f32 %v26934_v16, %v26918_v42  ;;  %v9515_v49 = vmul.f32 %v29188_v35, %v9387_v1 }
 0x3d8   : > { %v8881_v3 = vsub.f32 %v8817_v54, %v8849_v34  ;;  %v8882_v12 = vsub.f32 %v8818_v50, %v8850_v15  ;;  %v8910_v58 = vmul.f32 %v29141_v5, %v29147_v19  ;;  %21733 = vmatprep.mubr.msk.f32.mxu0 %vm9612_vm2, %v27031_v46  ;;  %v8911_v17 = vmul.f32 %v29156_v14, %v29178_v37  ;;  %v29189_v54 = vld [vmem:[#allocation135_spill] sm:$0xff] }
 0x3d9   : > { %v8880_v25 = vsub.f32 %v29187_v0, %v8848_v7  ;;  %v8912_v29 = vmul.f32 %v29143_v56, %v29182_v55  ;;  %v8913_v42 = vmul.f32 %v29158_v40, %v29184_v24  ;;  %v8914_v16 = vmul.f32 %v29176_v45, %v29186_v10  ;;  %v29190_v15 = vld [vmem:[#allocation107_spill] sm:$0xff] }
 0x3da   : > { %v8942_v1 = vmul.f32 343.0, %v8910_v58  ;;  %22760 = vrcp.f32 %v29189_v54  ;;  %v9517_v5 = vmul.f32 %v29190_v15, %v9389_v47  ;;  %v9561_v19 = vadd.f32 %v9560_v39, %v26882_v62  ;;  %21734 = vmatmul.mubr.msk.f32.gmra.mrb[226].mxu0 %vm9612_vm2, %v27033_v60  ;;  %v27056_v14 = vpop.f32.mrb[218].mxu1 }
 0x3db   : > { %v8943_v34 = vmul.f32 343.0, %v8911_v17  ;;  %v8944_v56 = vmul.f32 343.0, %v8912_v29  ;;  %v8945_v37 = vmul.f32 343.0, %v8913_v42  ;;  %v8946_v32 = vmul.f32 343.0, %v8914_v16  ;;  %v21713_v40 = vpop.f32.mrb[219].mxu1 }
 0x3dc   : > { %v9566_v24 = vsel %vm379_vm0, %v26962_v28, 0.0  ;;  %v8974_v45 = vadd.f32 %v8942_v1, %v26950_v9  ;;  %v9563_v10 = vadd.f32 %v9562_v63, %v9561_v19  ;;  %v9564_v38 = vsel %vm379_vm0, %v26890_v57, 0.0  ;;  %v29191_v9 = vld [vmem:[#allocation93_spill] sm:$0xff] }
 0x3dd   : > { %v8975_v62 = vadd.f32 %v8943_v34, %v8879_v27  ;;  %v8976_v39 = vadd.f32 %v8944_v56, %v8880_v25  ;;  %v8977_v6 = vadd.f32 %v8945_v37, %v8881_v3  ;;  %v8978_v50 = vadd.f32 %v8946_v32, %v8882_v12  ;;  %v29192_v25 = vld [vmem:[#allocation92_spill] sm:$0xff]  ;;  %v29194_v34 = vld [vmem:[#allocation170_spill] sm:$0xff] }
 0x3de   : > { %v9390_v55 = vmul.f32 %v8974_v45, %v8974_v45  ;;  %v9565_v7 = vadd.f32 %v9564_v38, %v9563_v10  ;;  %v9568_v47 = vsel %vm379_vm0, %v26942_v44, 0.0  ;;  %v9570_v28 = vsel %vm379_vm0, %v9515_v49, 0.0  ;;  %v29193_v49 = vld [vmem:[#allocation9_spill] sm:$0xff] }
 0x3df   : > { %v9391_v13 = vmul.f32 %v8975_v62, %v8975_v62  ;;  %v9392_v0 = vmul.f32 %v8976_v39, %v8976_v39  ;;  %v9393_v35 = vmul.f32 %v8977_v6, %v8977_v6  ;;  %v9394_v58 = vmul.f32 %v8978_v50, %v8978_v50  ;;  %v29196_v6 = vld [vmem:[#allocation10_spill] sm:$0xff] }
 0x3e0   : > { %v9518_v63 = vmul.f32 %v29191_v9, %v9390_v55  ;;  %v9567_v17 = vadd.f32 %v9566_v24, %v9565_v7  ;;  %v12270_v57 = vadd.f32 %v26640_v4, %v26623_v61  ;;  %v12271_v44 = vadd.f32 %v26674_v26, %v26658_v52 }
 0x3e1   : > { %v9519_v27 = vmul.f32 %v26648_v18, %v9391_v13  ;;  %v9520_v3 = vmul.f32 %v29192_v25, %v9392_v0  ;;  %v9521_v12 = vmul.f32 %v26905_v23, %v9393_v35  ;;  %v12272_v16 = vadd.f32 %v29193_v49, %v26689_v20 }
 0x3e2   : > { %v9569_v29 = vadd.f32 %v9568_v47, %v9567_v17  ;;  %v12286_v42 = vadd.f32 %v12270_v57, %v29174_v22  ;;  %v9572_v1 = vsel %vm379_vm0, %v26983_v2, 0.0  ;;  %v12287_v61 = vadd.f32 %v12271_v44, %v26640_v4 }
 0x3e3   : > { %v12192_v54 = vpop.f32.mrb[220].mxu1  ;;  %v12288_v23 = vadd.f32 %v12272_v16, %v26674_v26  ;;  %v12273_v52 = vadd.f32 %v26737_v59, %v29194_v34  ;;  %v12274_v20 = vadd.f32 %v26769_v33, %v26753_v53  ;;  %v12275_v4 = vadd.f32 %v26804_v11, %v26786_v43 }
 0x3e4   : > { %v22761_v18 = vpop.eup %22760  ;;  %v9571_v15 = vadd.f32 %v9570_v28, %v9569_v29  ;;  %v27080_v19 = vmul.f32 0.33333334, %v12286_v42  ;;  %v21720_v56 = vpop.f32.mrb[221].mxu1  ;;  %v27085_v37 = vmul.f32 0.33333334, %v12287_v61  ;;  %v12276_v59 = vadd.f32 %v26834_v21, %v26818_v48 }
 0x3e5   : > { %v9522_v22 = vmul.f32 %v22761_v18, %v9394_v58  ;;  %v27093_v32 = vmul.f32 0.33333334, %v12288_v23  ;;  %v12289_v26 = vadd.f32 %v12273_v52, %v29193_v49  ;;  %v9574_v40 = vsel %vm379_vm0, %v9517_v5, 0.0 }
 0x3e6   : > { %v9573_v2 = vadd.f32 %v9572_v1, %v9571_v15  ;;  %21736 = vmatprep.mubr.msk.f32.mxu0 %vm9612_vm2, %v27080_v19  ;;  %v27101_v53 = vmul.f32 0.5, %v12274_v20  ;;  %v12291_v43 = vadd.f32 %v12275_v4, %v26769_v33  ;;  %v12277_v24 = vadd.f32 %v26900_v30, %v26880_v36  ;;  %v29195_v33 = vld [vmem:[#allocation168_spill] sm:$0xff] }
 0x3e7   : > { %21737 = vmatmul.mubr.msk.f32.gmra.mrb[228].mxu0 %vm9612_vm2, %v27085_v37  ;;  %v27108_v10 = vmul.f32 0.33333334, %v12289_v26  ;;  %v12292_v48 = vadd.f32 %v12276_v59, %v26804_v11  ;;  %v12278_v5 = vadd.f32 %v26946_v31, %v26924_v51  ;;  %v9576_v38 = vsel %vm379_vm0, %v9518_v63, 0.0 }
 0x3e8   : > { %v9575_v45 = vadd.f32 %v9574_v40, %v9573_v2  ;;  %21739 = vmatprep.mubr.msk.f32.mxu0 %vm9612_vm2, %v27093_v32  ;;  %v12293_v62 = vadd.f32 %v12277_v24, %v26834_v21  ;;  %v12279_v39 = vadd.f32 %v29195_v33, %v26969_v8  ;;  %v12280_v36 = vadd.f32 %v27056_v14, %v29196_v6 }
 0x3e9   : > { %v12294_v55 = vadd.f32 %v12278_v5, %v26900_v30  ;;  %v9578_v47 = vsel %vm379_vm0, %v9519_v27, 0.0  ;;  %v27123_v11 = vmul.f32 0.33333334, %v12291_v43  ;;  %v27129_v0 = vmul.f32 0.33333334, %v12292_v48 }
 0x3ea   : > { %v9577_v50 = vadd.f32 %v9576_v38, %v9575_v45  ;;  %v12262_v7 = vpop.f32.mrb[222].mxu1  ;;  %v12295_v51 = vadd.f32 %v12279_v39, %v26946_v31  ;;  %v12296_v21 = vadd.f32 %v12280_v36, %v29195_v33  ;;  %v9580_v35 = vsel %vm379_vm0, %v9520_v3, 0.0 }
 0x3eb   : > { %21740 = vmatmul.mubr.msk.f32.gmra.mrb[230].mxu0 %vm9612_vm2, %v27108_v10  ;;  %v21727_v13 = vpop.f32.mrb[223].mxu1  ;;  %v12281_v30 = vadd.f32 %v12262_v7, %v12192_v54  ;;  %v9582_v9 = vsel %vm379_vm0, %v9521_v12, 0.0  ;;  %v27136_v31 = vmul.f32 0.33333334, %v12293_v62  ;;  %v27140_v17 = vmul.f32 0.33333334, %v12294_v55 }
 0x3ec   : > { %v9579_v8 = vadd.f32 %v9578_v47, %v9577_v50  ;;  %21742 = vmatprep.mubr.msk.f32.mxu0 %vm9612_vm2, %v27101_v53  ;;  %v9584_v57 = vsel %vm379_vm0, %v9522_v22, 0.0  ;;  %v27149_v25 = vmul.f32 0.33333334, %v12296_v21  ;;  %v29197_v12 = vld [vmem:[#allocation13_spill] sm:$0xff]  ;;  %v12315_v29 = vmul.f32 %v27013_v41, %v27013_v41  ;;  %v29199_v50 = vld [vmem:[#allocation8_spill] sm:$0xff] }
 0x3ed   : > { %v12297_v58 = vadd.f32 %v12281_v30, %v27056_v14  ;;  %v27145_v14 = vmul.f32 0.33333334, %v12295_v51  ;;  %v12314_v44 = vmul.f32 %v29197_v12, %v29197_v12  ;;  %v12316_v42 = vmul.f32 %v27031_v46, %v27031_v46 }
 0x3ee   : > { %v9581_v28 = vadd.f32 %v9580_v35, %v9579_v8  ;;  %v12317_v49 = vmul.f32 %v27033_v60, %v27033_v60  ;;  %v12318_v16 = vmul.f32 %v27080_v19, %v27080_v19  ;;  %v12319_v1 = vmul.f32 %v27085_v37, %v27085_v37 }
 0x3ef   : > { %21743 = vmatmul.mubr.msk.f32.gmra.mrb[232].mxu0 %vm9612_vm2, %v27123_v11  ;;  %v27153_v3 = vmul.f32 0.33333334, %v12297_v58  ;;  %v12320_v61 = vmul.f32 %v27093_v32, %v27093_v32  ;;  %v12321_v54 = vmul.f32 %v27108_v10, %v27108_v10  ;;  %v12322_v18 = vmul.f32 %v27101_v53, %v27101_v53 }
 0x3f0   : > { %v9583_v63 = vadd.f32 %v9582_v9, %v9581_v28  ;;  %21745 = vmatprep.mubr.msk.f32.mxu0 %vm9612_vm2, %v27129_v0  ;;  %v12323_v15 = vmul.f32 %v27123_v11, %v27123_v11  ;;  %v12324_v23 = vmul.f32 %v27129_v0, %v27129_v0  ;;  %v12325_v34 = vmul.f32 %v27136_v31, %v27136_v31 }
 0x3f1   : > { %v12326_v52 = vmul.f32 %v27140_v17, %v27140_v17  ;;  %v12327_v56 = vmul.f32 %v27145_v14, %v27145_v14  ;;  %v12328_v22 = vmul.f32 %v27149_v25, %v27149_v25  ;;  %v12329_v20 = vmul.f32 %v27153_v3, %v27153_v3 }
 0x3f2   : > { %v9585_v27 = vadd.f32 %v9584_v57, %v9583_v63  ;;  %v12330_v4 = vmul.f32 %v27101_v53, %v29197_v12  ;;  %v12331_v2 = vmul.f32 %v27123_v11, %v27013_v41  ;;  %v12332_v26 = vmul.f32 %v27129_v0, %v27031_v46 }
 0x3f3   : > { %21746 = vmatmul.mubr.msk.f32.gmra.mrb[234].mxu0 %vm9612_vm2, %v27136_v31  ;;  %v12333_v59 = vmul.f32 %v27136_v31, %v27033_v60  ;;  %v12334_v40 = vmul.f32 %v27140_v17, %v27080_v19  ;;  %v12335_v43 = vmul.f32 %v27145_v14, %v27085_v37  ;;  %v12336_v24 = vmul.f32 %v27149_v25, %v27093_v32 }
 0x3f4   : > { %9586 = vadd.xlane.f32.xlu1 %v9585_v27  ;;  %21748 = vmatprep.mubr.msk.f32.mxu0 %vm9612_vm2, %v27140_v17  ;;  %v12337_v45 = vmul.f32 %v27153_v3, %v27108_v10  ;;  %v29198_v48 = vmov 0.0   ;;  %v16079_v55 = vsel %vm16078_vm10, %v29199_v50, 0.0 }
 0x3f5   : > { %16080 = vadd.xlane.f32.xlu0 %v16079_v55  ;;  %v27237_v47 = vsel %vm12338_vm9, 1.0, %v29198_v48 }
 0x3f7   : > { %21749 = vmatmul.mubr.msk.f32.gmra.mrb[236].mxu0 %vm9612_vm2, %v27145_v14 }
 0x3f8   : > { %21751 = vmatprep.mubr.msk.f32.mxu0 %vm9612_vm2, %v27149_v25 }
 0x3fb   : > { %21752 = vmatmul.mubr.msk.f32.gmra.mrb[238].mxu0 %vm9612_vm2, %v27153_v3 }
 0x3fc   : > { %21754 = vmatprep.mubr.msk.f32.mxu0 %vm9612_vm2, %v12314_v44 }
 0x3ff   : > { %21755 = vmatmul.mubr.msk.f32.gmra.mrb[240].mxu0 %vm9612_vm2, %v12315_v29 }
 0x400   : > { %21757 = vmatprep.mubr.msk.f32.mxu0 %vm9612_vm2, %v12316_v42 }
 0x403   : > { %21758 = vmatmul.mubr.msk.f32.gmra.mrb[242].mxu0 %vm9612_vm2, %v12317_v49 }
 0x404   : > { %21760 = vmatprep.mubr.msk.f32.mxu0 %vm9612_vm2, %v12318_v16 }
 0x407   : > { %21761 = vmatmul.mubr.msk.f32.gmra.mrb[244].mxu0 %vm9612_vm2, %v12319_v1 }
 0x408   : > { %21763 = vmatprep.mubr.msk.f32.mxu0 %vm9612_vm2, %v12320_v61 }
 0x40b   : > { %21764 = vmatmul.mubr.msk.f32.gmra.mrb[246].mxu0 %vm9612_vm2, %v12321_v54 }
 0x40c   : > { %21766 = vmatprep.mubr.msk.f32.mxu0 %vm9612_vm2, %v12322_v18  ;;  %v29201_v18 = vld [vmem:[#allocation12_spill] sm:$0xff] }
 0x40f   : > { %21767 = vmatmul.mubr.msk.f32.gmra.mrb[248].mxu0 %vm9612_vm2, %v12323_v15  ;;  %v15924_v15 = vsel %vm15923_vm11, %v29201_v18, 0.0 }
 0x410   : > { %21769 = vmatprep.mubr.msk.f32.mxu0 %vm9612_vm2, %v12324_v23 }
 0x413   : > { %21770 = vmatmul.mubr.msk.f32.gmra.mrb[250].mxu0 %vm9612_vm2, %v12325_v34  ;;  %v15925_v34 = vrot.slane %v15924_v15, 4 }
 0x414   : > { %21772 = vmatprep.mubr.msk.f32.mxu0 %vm9612_vm2, %v12326_v52 }
 0x417   : > { %21773 = vmatmul.mubr.msk.f32.gmra.mrb[252].mxu0 %vm9612_vm2, %v12327_v56 }
 0x418   : > { %21775 = vmatprep.mubr.msk.f32.mxu0 %vm9612_vm2, %v12328_v22  ;;  %v15926_v22 = vadd.f32 %v15925_v34, %v15924_v15 }
 0x41b   : > { %21776 = vmatmul.mubr.msk.f32.gmra.mrb[254].mxu0 %vm9612_vm2, %v12329_v20 }
 0x41c   : > { %21778 = vmatprep.mubr.msk.f32.mxu0 %vm9612_vm2, %v12330_v4 }
 0x41f   : > { %21779 = vmatmul.mubr.msk.f32.gmra.mrb[0].mxu0 %vm9612_vm2, %v12331_v2  ;;  %v15927_v2 = vrot.slane %v15926_v22, 2 }
 0x420   : > { %21781 = vmatprep.mubr.msk.f32.mxu0 %vm9612_vm2, %v12332_v26 }
 0x423   : > { %21782 = vmatmul.mubr.msk.f32.gmra.mrb[2].mxu0 %vm9612_vm2, %v12333_v59 }
 0x424   : > { %21784 = vmatprep.mubr.msk.f32.mxu0 %vm9612_vm2, %v12334_v40  ;;  %v15928_v40 = vadd.f32 %v15927_v2, %v15926_v22 }
 0x427   : > { %21785 = vmatmul.mubr.msk.f32.gmra.mrb[4].mxu0 %vm9612_vm2, %v12335_v43 }
 0x428   : > { %21787 = vmatprep.mubr.msk.f32.mxu0 %vm9612_vm2, %v12336_v24 }
 0x42b   : > { %21788 = vmatmul.mubr.msk.f32.gmra.mrb[6].mxu0 %vm9612_vm2, %v12337_v45 }
 0x42c   : > { %21892 = vmatprep.mubr.msk.f32.mxu0 %vm22961_vm8, %v29198_v48 }
 0x481   : > { %v9587_v5 = vpop.xlane.xlu1 %9586 }
 0x482   : > { %v9588_v38 = vrot.slane %v9587_v5, 4 }
 0x484   : > { %v9589_v62 = vadd.f32 %v9588_v38, %v9587_v5  ;;  %v15929_v5 = vrot.slane %v15928_v40, 1 }
 0x486   : > { %v9590_v33 = vrot.slane %v9589_v62, 2 }
 0x488   : > { %v9591_v39 = vadd.f32 %v9590_v33, %v9589_v62  ;;  %v15930_v33 = vadd.f32 %v15929_v5, %v15928_v40 }
 0x48a   : > { %v9592_v6 = vrot.slane %v9591_v39, 1  ;;  %22762 = vrcp.f32 %v15930_v33 }
 0x48c   : > { %v9593_v36 = vadd.f32 %v9592_v6, %v9591_v39 }
 0x48e   : > { %22637 = vpush %v9593_v36 }
 0x4a9   : > { %v21732_v51 = vpop.f32.mrb[224].mxu0 }
 0x4aa   : > { %v12527_v21 = vpop.f32.mrb[225].mxu0 }
 0x4ab   : > { %21791 = vmatpush3.msra.mxu1 %v12527_v21 }
 0x4ac   : > { %21795 = vmatprep.subr.mxu1 %v29198_v48  ;;  %21793 = vmatmul.mubr.msk.f32.vlgmr.msra.gmra.mrb[224].mxu1 %vm9612_vm2, %v27237_v47 }
 0x4ad   : > { %21796 = vmatpush3.msra.mxu1 %v21732_v51  ;;  %21797 = vmatprep.mubr.msk.f32.mxu1 %vm22961_vm8, %v29198_v48  ;;  %v21735_v13 = vpop.f32.mrb[226].mxu0 }
 0x4ae   : > { %v12537_v8 = vpop.f32.mrb[227].mxu0  ;;  %21800 = vmatprep.subr.mxu1 %v29198_v48 }
 0x4b0   : > { %21798 = vmatmul.mubr.msk.f32.vlgmr.msra.gmra.mrb[226].mxu1 %vm9612_vm2, %v27237_v47 }
 0x4b1   : > { %21801 = vmatpush3.msra.mxu1 %v12537_v8  ;;  %21802 = vmatprep.mubr.msk.f32.mxu1 %vm22961_vm8, %v29198_v48 }
 0x4b2   : > { %21805 = vmatprep.subr.mxu1 %v29198_v48 }
 0x4b4   : > { %21803 = vmatmul.mubr.msk.f32.vlgmr.msra.gmra.mrb[228].mxu1 %vm9612_vm2, %v27237_v47 }
 0x4b5   : > { %21806 = vmatpush3.msra.mxu1 %v21735_v13  ;;  %21807 = vmatprep.mubr.msk.f32.mxu1 %vm22961_vm8, %v29198_v48  ;;  %v22763_v13 = vpop.eup %22762 }
 0x4b6   : > { %21810 = vmatprep.subr.mxu1 %v29198_v48 }
 0x4b8   : > { %21808 = vmatmul.mubr.msk.f32.vlgmr.msra.gmra.mrb[230].mxu1 %vm9612_vm2, %v27237_v47 }
 0x4b9   : > { %21812 = vmatprep.mubr.msk.f32.mxu1 %vm22961_vm8, %v29198_v48 }
 0x4ba   : > { %v21738_v30 = vpop.f32.mrb[228].mxu0 }
 0x4bb   : > { %v12547_v35 = vpop.f32.mrb[229].mxu0 }
 0x4bc   : > { %21811 = vmatpush3.msra.mxu1 %v12547_v35  ;;  %v15932_v35 = vmul.f32 %v22763_v13, %v29201_v18 }
 0x4bd   : > { %21815 = vmatprep.subr.mxu1 %v29198_v48  ;;  %21813 = vmatmul.mubr.msk.f32.vlgmr.msra.gmra.mrb[232].mxu1 %vm9612_vm2, %v27237_v47 }
 0x4be   : > { %21816 = vmatpush3.msra.mxu1 %v21738_v30  ;;  %21817 = vmatprep.mubr.msk.f32.mxu1 %vm22961_vm8, %v29198_v48  ;;  %v21741_v28 = vpop.f32.mrb[230].mxu0 }
 0x4bf   : > { %v12557_v58 = vpop.f32.mrb[231].mxu0  ;;  %21820 = vmatprep.subr.mxu1 %v29198_v48  ;;  %s22638_s18 = spop %22637 }
 0x4c0   : > { %s9595_s29 = smul.f32 -0.00012207031, %s22638_s18 }
 0x4c1   : > { %21818 = vmatmul.mubr.msk.f32.vlgmr.msra.gmra.mrb[234].mxu1 %vm9612_vm2, %v27237_v47 }
 0x4c2   : > { %21821 = vmatpush3.msra.mxu1 %v12557_v58  ;;  %21822 = vmatprep.mubr.msk.f32.mxu1 %vm22961_vm8, %v29198_v48  ;;  %v21744_v9 = vpop.f32.mrb[232].mxu0 }
 0x4c3   : > { %21825 = vmatprep.subr.mxu1 %v29198_v48  ;;  %v12567_v63 = vpop.f32.mrb[233].mxu0 }
 0x4c5   : > { %21823 = vmatmul.mubr.msk.f32.vlgmr.msra.gmra.mrb[236].mxu1 %vm9612_vm2, %v27237_v47 }
 0x4c6   : > { %21826 = vmatpush3.msra.mxu1 %v21741_v28  ;;  %21827 = vmatprep.mubr.msk.f32.mxu1 %vm22961_vm8, %v29198_v48  ;;  %v21747_v57 = vpop.f32.mrb[234].mxu0 }
 0x4c7   : > { %21830 = vmatprep.subr.mxu1 %v29198_v48  ;;  %v12577_v27 = vpop.f32.mrb[235].mxu0 }
 0x4c9   : > { %21828 = vmatmul.mubr.msk.f32.vlgmr.msra.gmra.mrb[238].mxu1 %vm9612_vm2, %v27237_v47 }
 0x4ca   : > { %21831 = vmatpush3.msra.mxu1 %v12567_v63  ;;  %21832 = vmatprep.mubr.msk.f32.mxu1 %vm22961_vm8, %v29198_v48  ;;  %v21750_v44 = vpop.f32.mrb[236].mxu0 }
 0x4cb   : > { %21835 = vmatprep.subr.mxu1 %v29198_v48  ;;  %v12587_v29 = vpop.f32.mrb[237].mxu0 }
 0x4cd   : > { %21833 = vmatmul.mubr.msk.f32.vlgmr.msra.gmra.mrb[240].mxu1 %vm9612_vm2, %v27237_v47 }
 0x4ce   : > { %21836 = vmatpush3.msra.mxu1 %v21744_v9  ;;  %21837 = vmatprep.mubr.msk.f32.mxu1 %vm22961_vm8, %v29198_v48  ;;  %v21753_v42 = vpop.f32.mrb[238].mxu0 }
 0x4cf   : > { %21840 = vmatprep.subr.mxu1 %v29198_v48  ;;  %v12597_v49 = vpop.f32.mrb[239].mxu0 }
 0x4d1   : > { %21838 = vmatmul.mubr.msk.f32.vlgmr.msra.gmra.mrb[242].mxu1 %vm9612_vm2, %v27237_v47 }
 0x4d2   : > { %21841 = vmatpush3.msra.mxu1 %v12577_v27  ;;  %21842 = vmatprep.mubr.msk.f32.mxu1 %vm22961_vm8, %v29198_v48  ;;  %v27289_v16 = vpop.f32.mrb[240].mxu0 }
 0x4d3   : > { %21845 = vmatprep.subr.mxu1 %v29198_v48  ;;  %v12607_v1 = vpop.f32.mrb[241].mxu0 }
 0x4d5   : > { %21843 = vmatmul.mubr.msk.f32.vlgmr.msra.gmra.mrb[244].mxu1 %vm9612_vm2, %v27237_v47 }
 0x4d6   : > { %21846 = vmatpush3.msra.mxu1 %v21747_v57  ;;  %21847 = vmatprep.mubr.msk.f32.mxu1 %vm22961_vm8, %v29198_v48  ;;  %v27296_v61 = vpop.f32.mrb[242].mxu0 }
 0x4d7   : > { %21850 = vmatprep.subr.mxu1 %v29198_v48  ;;  %v27299_v54 = vpop.f32.mrb[243].mxu0 }
 0x4d9   : > { %21848 = vmatmul.mubr.msk.f32.vlgmr.msra.gmra.mrb[246].mxu1 %vm9612_vm2, %v27237_v47 }
 0x4da   : > { %21851 = vmatpush3.msra.mxu1 %v12587_v29  ;;  %21852 = vmatprep.mubr.msk.f32.mxu1 %vm22961_vm8, %v29198_v48  ;;  %v27307_v23 = vpop.f32.mrb[244].mxu0 }
 0x4db   : > { %21855 = vmatprep.subr.mxu1 %v29198_v48  ;;  %v12627_v52 = vpop.f32.mrb[245].mxu0 }
 0x4dc   : > { %21891 = vmatpush3.msra.mxu0 %v12627_v52 }
 0x4dd   : > { %21853 = vmatmul.mubr.msk.f32.vlgmr.msra.gmra.mrb[248].mxu1 %vm9612_vm2, %v27237_v47  ;;  %21893 = vmatmul.mubr.msk.f32.vlgmr.msra.gmra.mrb[8].mxu0 %vm9612_vm2, %v27237_v47 }
 0x4de   : > { %21856 = vmatpush3.msra.mxu1 %v21750_v44  ;;  %21857 = vmatprep.mubr.msk.f32.mxu1 %vm22961_vm8, %v29198_v48  ;;  %v27316_v56 = vpop.f32.mrb[246].mxu0 }
 0x4df   : > { %21860 = vmatprep.subr.mxu1 %v29198_v48  ;;  %v12637_v20 = vpop.f32.mrb[247].mxu0  ;;  %21900 = vmatprep.subr.mxu0 %v29198_v48 }
 0x4e0   : > { %21901 = vmatpush3.msra.mxu0 %v12637_v20  ;;  %21902 = vmatprep.mubr.msk.f32.mxu0 %vm22961_vm8, %v29198_v48 }
 0x4e1   : > { %21858 = vmatmul.mubr.msk.f32.vlgmr.msra.gmra.mrb[250].mxu1 %vm9612_vm2, %v27237_v47  ;;  %21903 = vmatmul.mubr.msk.f32.vlgmr.msra.gmra.mrb[10].mxu0 %vm9612_vm2, %v27237_v47 }
 0x4e2   : > { %21861 = vmatpush3.msra.mxu1 %v12597_v49  ;;  %21862 = vmatprep.mubr.msk.f32.mxu1 %vm22961_vm8, %v29198_v48  ;;  %v27328_v4 = vpop.f32.mrb[248].mxu0 }
 0x4e3   : > { %21865 = vmatprep.subr.mxu1 %v29198_v48  ;;  %v12647_v26 = vpop.f32.mrb[249].mxu0  ;;  %21910 = vmatprep.subr.mxu0 %v29198_v48 }
 0x4e4   : > { %21911 = vmatpush3.msra.mxu0 %v12647_v26  ;;  %21912 = vmatprep.mubr.msk.f32.mxu0 %vm22961_vm8, %v29198_v48 }
 0x4e5   : > { %21863 = vmatmul.mubr.msk.f32.vlgmr.msra.gmra.mrb[252].mxu1 %vm9612_vm2, %v27237_v47  ;;  %21913 = vmatmul.mubr.msk.f32.vlgmr.msra.gmra.mrb[12].mxu0 %vm9612_vm2, %v27237_v47 }
 0x4e6   : > { %21866 = vmatpush3.msra.mxu1 %v21753_v42  ;;  %21867 = vmatprep.mubr.msk.f32.mxu1 %vm22961_vm8, %v29198_v48  ;;  %v27340_v59 = vpop.f32.mrb[250].mxu0 }
 0x4e7   : > { %21870 = vmatprep.subr.mxu1 %v29198_v48  ;;  %v12657_v43 = vpop.f32.mrb[251].mxu0  ;;  %21920 = vmatprep.subr.mxu0 %v29198_v48 }
 0x4e8   : > { %21921 = vmatpush3.msra.mxu0 %v12657_v43  ;;  %21922 = vmatprep.mubr.msk.f32.mxu0 %vm22961_vm8, %v29198_v48 }
 0x4e9   : > { %21868 = vmatmul.mubr.msk.f32.vlgmr.msra.gmra.mrb[254].mxu1 %vm9612_vm2, %v27237_v47  ;;  %21923 = vmatmul.mubr.msk.f32.vlgmr.msra.gmra.mrb[14].mxu0 %vm9612_vm2, %v27237_v47 }
 0x4ea   : > { %21871 = vmatpush3.msra.mxu1 %v12607_v1  ;;  %21872 = vmatprep.mubr.msk.f32.mxu1 %vm22961_vm8, %v29198_v48  ;;  %v27352_v24 = vpop.f32.mrb[252].mxu0 }
 0x4eb   : > { %21875 = vmatprep.subr.mxu1 %v29198_v48  ;;  %v12667_v45 = vpop.f32.mrb[253].mxu0  ;;  %21930 = vmatprep.subr.mxu0 %v29198_v48 }
 0x4ec   : > { %21931 = vmatpush3.msra.mxu0 %v12667_v45  ;;  %21932 = vmatprep.mubr.msk.f32.mxu0 %vm22961_vm8, %v29198_v48 }
 0x4ed   : > { %21873 = vmatmul.mubr.msk.f32.vlgmr.msra.gmra.mrb[0].mxu1 %vm9612_vm2, %v27237_v47  ;;  %21933 = vmatmul.mubr.msk.f32.vlgmr.msra.gmra.mrb[16].mxu0 %vm9612_vm2, %v27237_v47 }
 0x4ee   : > { %21876 = vmatpush3.msra.mxu1 %v27289_v16  ;;  %21877 = vmatprep.mubr.msk.f32.mxu1 %vm22961_vm8, %v29198_v48  ;;  %v27365_v38 = vpop.f32.mrb[254].mxu0 }
 0x4ef   : > { %21880 = vmatprep.subr.mxu1 %v29198_v48  ;;  %v12677_v62 = vpop.f32.mrb[255].mxu0  ;;  %21940 = vmatprep.subr.mxu0 %v29198_v48 }
 0x4f0   : > { %21941 = vmatpush3.msra.mxu0 %v12677_v62  ;;  %21942 = vmatprep.mubr.msk.f32.mxu0 %vm22961_vm8, %v29198_v48 }
 0x4f1   : > { %21878 = vmatmul.mubr.msk.f32.vlgmr.msra.gmra.mrb[2].mxu1 %vm9612_vm2, %v27237_v47  ;;  %21943 = vmatmul.mubr.msk.f32.vlgmr.msra.gmra.mrb[18].mxu0 %vm9612_vm2, %v27237_v47 }
 0x4f2   : > { %21881 = vmatpush3.msra.mxu1 %v27299_v54  ;;  %21882 = vmatprep.mubr.msk.f32.mxu1 %vm22961_vm8, %v29198_v48  ;;  %v27378_v39 = vpop.f32.mrb[0].mxu0 }
 0x4f3   : > { %21885 = vmatprep.subr.mxu1 %v29198_v48  ;;  %v12687_v6 = vpop.f32.mrb[1].mxu0  ;;  %21950 = vmatprep.subr.mxu0 %v29198_v48 }
 0x4f4   : > { %21951 = vmatpush3.msra.mxu0 %v12687_v6  ;;  %21952 = vmatprep.mubr.msk.f32.mxu0 %vm22961_vm8, %v29198_v48 }
 0x4f5   : > { %21883 = vmatmul.mubr.msk.f32.vlgmr.msra.gmra.mrb[4].mxu1 %vm9612_vm2, %v27237_v47  ;;  %21953 = vmatmul.mubr.msk.f32.vlgmr.msra.gmra.mrb[20].mxu0 %vm9612_vm2, %v27237_v47 }
 0x4f6   : > { %21886 = vmatpush3.msra.mxu1 %v27296_v61  ;;  %21887 = vmatprep.mubr.msk.f32.mxu1 %vm22961_vm8, %v29198_v48  ;;  %v21783_v36 = vpop.f32.mrb[2].mxu0 }
 0x4f7   : > { %21895 = vmatprep.subr.mxu1 %v29198_v48  ;;  %v12697_v55 = vpop.f32.mrb[3].mxu0  ;;  %21960 = vmatprep.subr.mxu0 %v29198_v48 }
 0x4f8   : > { %21961 = vmatpush3.msra.mxu0 %v12697_v55  ;;  %21962 = vmatprep.mubr.msk.f32.mxu0 %vm22961_vm8, %v29198_v48 }
 0x4f9   : > { %21888 = vmatmul.mubr.msk.f32.vlgmr.msra.gmra.mrb[6].mxu1 %vm9612_vm2, %v27237_v47  ;;  %21963 = vmatmul.mubr.msk.f32.vlgmr.msra.gmra.mrb[22].mxu0 %vm9612_vm2, %v27237_v47 }
 0x4fa   : > { %21896 = vmatpush3.msra.mxu1 %v27307_v23  ;;  %21897 = vmatprep.mubr.msk.f32.mxu1 %vm22961_vm8, %v29198_v48  ;;  %v21786_v51 = vpop.f32.mrb[4].mxu0 }
 0x4fb   : > { %21905 = vmatprep.subr.mxu1 %v29198_v48  ;;  %v12707_v21 = vpop.f32.mrb[5].mxu0  ;;  %21970 = vmatprep.subr.mxu0 %v29198_v48 }
 0x4fc   : > { %21971 = vmatpush3.msra.mxu0 %v12707_v21  ;;  %21972 = vmatprep.mubr.msk.f32.mxu0 %vm22961_vm8, %v29198_v48 }
 0x4fd   : > { %21898 = vmatmul.mubr.msk.f32.vlgmr.msra.gmra.mrb[8].mxu1 %vm9612_vm2, %v27237_v47  ;;  %21973 = vmatmul.mubr.msk.f32.vlgmr.msra.gmra.mrb[24].mxu0 %vm9612_vm2, %v27237_v47 }
 0x4fe   : > { %21906 = vmatpush3.msra.mxu1 %v27316_v56  ;;  %21907 = vmatprep.mubr.msk.f32.mxu1 %vm22961_vm8, %v29198_v48  ;;  %v21789_v8 = vpop.f32.mrb[6].mxu0 }
 0x4ff   : > { %21915 = vmatprep.subr.mxu1 %v29198_v48  ;;  %v12717_v30 = vpop.f32.mrb[7].mxu0  ;;  %21980 = vmatprep.subr.mxu0 %v29198_v48 }
 0x500   : > { %21981 = vmatpush3.msra.mxu0 %v12717_v30  ;;  %21982 = vmatprep.mubr.msk.f32.mxu0 %vm22961_vm8, %v29198_v48 }
 0x501   : > { %21908 = vmatmul.mubr.msk.f32.vlgmr.msra.gmra.mrb[10].mxu1 %vm9612_vm2, %v27237_v47  ;;  %21983 = vmatmul.mubr.msk.f32.vlgmr.msra.gmra.mrb[26].mxu0 %vm9612_vm2, %v27237_v47 }
 0x502   : > { %21916 = vmatpush3.msra.mxu1 %v27328_v4  ;;  %21917 = vmatprep.mubr.msk.f32.mxu1 %vm22961_vm8, %v29198_v48 }
 0x503   : > { %21925 = vmatprep.subr.mxu1 %v29198_v48  ;;  %21992 = vmatprep.mubr.msk.f32.mxu0 %vm9612_vm2, %v29197_v12 }
 0x504   : > { %21990 = vmatprep.subr.mxu0 %v15932_v35 }
 0x505   : > { %21918 = vmatmul.mubr.msk.f32.vlgmr.msra.gmra.mrb[12].mxu1 %vm9612_vm2, %v27237_v47  ;;  %21991 = vmatpush3.msra.mxu0 %v15932_v35 }
 0x506   : > { %21926 = vmatpush3.msra.mxu1 %v27340_v59  ;;  %21927 = vmatprep.mubr.msk.f32.mxu1 %vm22961_vm8, %v29198_v48 }
 0x507   : > { %21935 = vmatprep.subr.mxu1 %v29198_v48  ;;  %21993 = vmatmul.mubr.msk.f32.vlgmr.msra.gmra.mrb[28].mxu0 %vm9612_vm2, %v27013_v41 }
 0x508   : > { %21995 = vmatprep.mubr.msk.f32.mxu0 %vm9612_vm2, %v27031_v46  ;;  %22056 = vmatprep.subr.mxu0 %v29198_v48 }
 0x509   : > { %21928 = vmatmul.mubr.msk.f32.vlgmr.msra.gmra.mrb[14].mxu1 %vm9612_vm2, %v27237_v47 }
 0x50a   : > { %21936 = vmatpush3.msra.mxu1 %v27352_v24  ;;  %21937 = vmatprep.mubr.msk.f32.mxu1 %vm22961_vm8, %v29198_v48 }
 0x50b   : > { %21945 = vmatprep.subr.mxu1 %v29198_v48  ;;  %21996 = vmatmul.mubr.msk.f32.gmra.mrb[30].mxu0 %vm9612_vm2, %v27033_v60 }
 0x50c   : > { %21998 = vmatprep.mubr.msk.f32.mxu0 %vm9612_vm2, %v27080_v19 }
 0x50d   : > { %21938 = vmatmul.mubr.msk.f32.vlgmr.msra.gmra.mrb[16].mxu1 %vm9612_vm2, %v27237_v47 }
 0x50e   : > { %21946 = vmatpush3.msra.mxu1 %v27365_v38  ;;  %21947 = vmatprep.mubr.msk.f32.mxu1 %vm22961_vm8, %v29198_v48 }
 0x50f   : > { %21955 = vmatprep.subr.mxu1 %v29198_v48  ;;  %21999 = vmatmul.mubr.msk.f32.gmra.mrb[32].mxu0 %vm9612_vm2, %v27085_v37 }
 0x510   : > { %22001 = vmatprep.mubr.msk.f32.mxu0 %vm9612_vm2, %v27093_v32 }
 0x511   : > { %21948 = vmatmul.mubr.msk.f32.vlgmr.msra.gmra.mrb[18].mxu1 %vm9612_vm2, %v27237_v47 }
 0x512   : > { %21956 = vmatpush3.msra.mxu1 %v27378_v39  ;;  %21957 = vmatprep.mubr.msk.f32.mxu1 %vm22961_vm8, %v29198_v48 }
 0x513   : > { %21965 = vmatprep.subr.mxu1 %v29198_v48  ;;  %22002 = vmatmul.mubr.msk.f32.gmra.mrb[34].mxu0 %vm9612_vm2, %v27108_v10 }
 0x514   : > { %22004 = vmatprep.mubr.msk.f32.mxu0 %vm9612_vm2, %v27101_v53 }
 0x515   : > { %21958 = vmatmul.mubr.msk.f32.vlgmr.msra.gmra.mrb[20].mxu1 %vm9612_vm2, %v27237_v47 }
 0x516   : > { %21966 = vmatpush3.msra.mxu1 %v21783_v36  ;;  %21967 = vmatprep.mubr.msk.f32.mxu1 %vm22961_vm8, %v29198_v48 }
 0x517   : > { %21975 = vmatprep.subr.mxu1 %v29198_v48  ;;  %22005 = vmatmul.mubr.msk.f32.gmra.mrb[36].mxu0 %vm9612_vm2, %v27123_v11 }
 0x518   : > { %22007 = vmatprep.mubr.msk.f32.mxu0 %vm9612_vm2, %v27129_v0 }
 0x519   : > { %21968 = vmatmul.mubr.msk.f32.vlgmr.msra.gmra.mrb[22].mxu1 %vm9612_vm2, %v27237_v47 }
 0x51a   : > { %21976 = vmatpush3.msra.mxu1 %v21786_v51  ;;  %21977 = vmatprep.mubr.msk.f32.mxu1 %vm22961_vm8, %v29198_v48 }
 0x51b   : > { %21985 = vmatprep.subr.mxu1 %v29198_v48  ;;  %22008 = vmatmul.mubr.msk.f32.gmra.mrb[38].mxu0 %vm9612_vm2, %v27136_v31 }
 0x51c   : > { %22010 = vmatprep.mubr.msk.f32.mxu0 %vm9612_vm2, %v27140_v17 }
 0x51d   : > { %21978 = vmatmul.mubr.msk.f32.vlgmr.msra.gmra.mrb[24].mxu1 %vm9612_vm2, %v27237_v47 }
 0x51e   : > { %21986 = vmatpush3.msra.mxu1 %v21789_v8  ;;  %21987 = vmatprep.mubr.msk.f32.mxu1 %vm22961_vm8, %v29198_v48 }
 0x51f   : > { %22011 = vmatmul.mubr.msk.f32.gmra.mrb[40].mxu0 %vm9612_vm2, %v27145_v14  ;;  %22016 = vmatprep.subr.mxu1 %v29198_v48 }
 0x520   : > { %22013 = vmatprep.mubr.msk.f32.mxu0 %vm9612_vm2, %v27149_v25 }
 0x521   : > { %21988 = vmatmul.mubr.msk.f32.vlgmr.msra.gmra.mrb[26].mxu1 %vm9612_vm2, %v27237_v47 }
 0x522   : > { %22018 = vmatprep.mubr.msk.f32.mxu1 %vm22961_vm8, %v29198_v48 }
 0x523   : > { %22014 = vmatmul.mubr.msk.f32.gmra.mrb[42].mxu0 %vm9612_vm2, %v27153_v3 }
 0x524   : > { %22058 = vmatprep.mubr.msk.f32.mxu0 %vm22961_vm8, %v29198_v48 }
 0x57f   : > { %v12795_v41 = vpop.f32.mrb[224].mxu1 }
 0x580   : > { %v21794_v46 = vpop.f32.mrb[225].mxu1 }
 0x583   : > { %v12865_v60 = vpop.f32.mrb[226].mxu1 }
 0x584   : > { %v15529_v19 = vadd.f32 %v12865_v60, %v12795_v41  ;;  %v21799_v37 = vpop.f32.mrb[227].mxu1 }
 0x587   : > { %v12935_v32 = vpop.f32.mrb[228].mxu1 }
 0x588   : > { %v15530_v53 = vadd.f32 %v12935_v32, %v12865_v60  ;;  %v27504_v10 = vadd.f32 %v15529_v19, %v12935_v32  ;;  %v21804_v11 = vpop.f32.mrb[229].mxu1 }
 0x58a   : > { %v15570_v0 = vadd.f32 %v15530_v53, %v12795_v41  ;;  %v27522_v45 = vmul.f32 0.008, %v27504_v10 }
 0x58b   : > { %v13005_v31 = vpop.f32.mrb[230].mxu1 }
 0x58c   : > { %v15531_v17 = vadd.f32 %v13005_v31, %v12935_v32  ;;  %v27506_v14 = vadd.f32 %v15570_v0, %v13005_v31  ;;  %v21809_v25 = vpop.f32.mrb[231].mxu1 }
 0x58e   : > { %v15571_v3 = vadd.f32 %v15531_v17, %v12865_v60  ;;  %v27534_v55 = vmul.f32 0.008, %v27506_v14 }
 0x590   : > { %v13075_v12 = vpop.f32.mrb[232].mxu1 }
 0x591   : > { %v15532_v47 = vadd.f32 %v13075_v12, %v13005_v31  ;;  %v15611_v28 = vadd.f32 %v15571_v3, %v13075_v12  ;;  %v21814_v58 = vpop.f32.mrb[233].mxu1 }
 0x593   : > { %v27508_v9 = vadd.f32 %v15611_v28, %v12795_v41  ;;  %v15572_v63 = vadd.f32 %v15532_v47, %v12935_v32 }
 0x594   : > { %v13145_v57 = vpop.f32.mrb[234].mxu1 }
 0x595   : > { %v15533_v27 = vadd.f32 %v13145_v57, %v13075_v12  ;;  %v15612_v44 = vadd.f32 %v15572_v63, %v13145_v57  ;;  %v21819_v29 = vpop.f32.mrb[235].mxu1  ;;  %v27564_v17 = vmul.f32 0.008, %v27508_v9 }
 0x597   : > { %v27510_v42 = vadd.f32 %v15612_v44, %v12865_v60  ;;  %v15573_v49 = vadd.f32 %v15533_v27, %v13005_v31 }
 0x598   : > { %v13215_v16 = vpop.f32.mrb[236].mxu1 }
 0x599   : > { %v15534_v1 = vadd.f32 %v13215_v16, %v13145_v57  ;;  %v15613_v61 = vadd.f32 %v15573_v49, %v13215_v16  ;;  %v21824_v54 = vpop.f32.mrb[237].mxu1  ;;  %v27578_v49 = vmul.f32 0.008, %v27510_v42 }
 0x59b   : > { %v27512_v18 = vadd.f32 %v15613_v61, %v12935_v32  ;;  %v15574_v15 = vadd.f32 %v15534_v1, %v13075_v12 }
 0x59c   : > { %v13285_v23 = vpop.f32.mrb[238].mxu1 }
 0x59d   : > { %v15535_v34 = vadd.f32 %v13285_v23, %v13215_v16  ;;  %v15614_v52 = vadd.f32 %v15574_v15, %v13285_v23  ;;  %v21829_v56 = vpop.f32.mrb[239].mxu1 }
 0x59f   : > { %v27514_v22 = vadd.f32 %v15535_v34, %v13145_v57  ;;  %v27516_v20 = vadd.f32 %v15614_v52, %v13005_v31 }
 0x5a0   : > { %v13355_v4 = vpop.f32.mrb[240].mxu1 }
 0x5a1   : > { %v27519_v2 = vadd.f32 %v27514_v22, %v13075_v12  ;;  %v21834_v26 = vpop.f32.mrb[241].mxu1  ;;  %v16081_v12 = vpop.xlane.xlu0 %16080 }
 0x5a2   : > { %22764 = vrcp.f32 %v16081_v12 }
 0x5a4   : > { %v13425_v59 = vpop.f32.mrb[242].mxu1 }
 0x5a5   : > { %v15537_v40 = vadd.f32 %v13425_v59, %v13355_v4  ;;  %v21839_v43 = vpop.f32.mrb[243].mxu1 }
 0x5a8   : > { %v13495_v24 = vpop.f32.mrb[244].mxu1 }
 0x5a9   : > { %v15538_v5 = vadd.f32 %v13495_v24, %v13425_v59  ;;  %v27524_v38 = vadd.f32 %v15537_v40, %v13495_v24  ;;  %v21844_v62 = vpop.f32.mrb[245].mxu1 }
 0x5ab   : > { %v27528_v33 = vmul.f32 %v27522_v45, %v27524_v38  ;;  %v15578_v39 = vadd.f32 %v15538_v5, %v13355_v4  ;;  %v27531_v6 = vmul.f32 0.008, %v27524_v38  ;;  %v15693_v5 = vmul.f32 0.008, %v27512_v18 }
 0x5ac   : > { %v13565_v36 = vpop.f32.mrb[246].mxu1 }
 0x5ad   : > { %29202 = vst [vmem:[#allocation18_spill] sm:$0xff] %v27528_v33  ;;  %v15539_v51 = vadd.f32 %v13565_v36, %v13495_v24  ;;  %v27536_v21 = vadd.f32 %v15578_v39, %v13565_v36  ;;  %v21849_v13 = vpop.f32.mrb[247].mxu1  ;;  %v27540_v8 = vmul.f32 %v27531_v6, %v27504_v10  ;;  %v27544_v30 = vmul.f32 %v27531_v6, %v27522_v45 }
 0x5af   : > { %29203 = vst [vmem:[#allocation171_spill] sm:$0xff] %v27540_v8  ;;  %v27548_v35 = vmul.f32 %v27534_v55, %v27536_v21  ;;  %v15579_v41 = vadd.f32 %v15539_v51, %v13425_v59  ;;  %v27551_v46 = vmul.f32 0.008, %v27536_v21 }
 0x5b0   : > { %v13635_v60 = vpop.f32.mrb[248].mxu1  ;;  %v27553_v19 = vpop.f32.mrb[8].mxu0 }
 0x5b1   : > { %29204 = vst [vmem:[#allocation15_spill] sm:$0xff] %v27548_v35  ;;  %v15540_v37 = vadd.f32 %v13635_v60, %v13565_v36  ;;  %v15619_v32 = vadd.f32 %v15579_v41, %v13635_v60  ;;  %v21854_v53 = vpop.f32.mrb[249].mxu1  ;;  %v21894_v11 = vpop.f32.mrb[9].mxu0  ;;  %v27557_v0 = vmul.f32 %v27551_v46, %v27506_v14  ;;  %v27561_v31 = vmul.f32 %v27551_v46, %v27534_v55 }
 0x5b2   : > { %v15765_v35 = vmul.f32 2.0, %v15693_v5 }
 0x5b3   : > { %29205 = vst [vmem:[#allocation34_spill] sm:$0xff] %v27557_v0  ;;  %v27566_v25 = vadd.f32 %v15619_v32, %v13355_v4  ;;  %v15580_v3 = vadd.f32 %v15540_v37, %v13495_v24 }
 0x5b4   : > { %v13705_v47 = vpop.f32.mrb[250].mxu1  ;;  %v27568_v28 = vpop.f32.mrb[10].mxu0 }
 0x5b5   : > { %v27572_v58 = vmul.f32 %v27564_v17, %v27566_v25  ;;  %v15541_v63 = vadd.f32 %v13705_v47, %v13635_v60  ;;  %v15620_v57 = vadd.f32 %v15580_v3, %v13705_v47  ;;  %v21859_v27 = vpop.f32.mrb[251].mxu1  ;;  %v21904_v44 = vpop.f32.mrb[11].mxu0  ;;  %v27575_v29 = vmul.f32 0.008, %v27566_v25 }
 0x5b6   : > { %v15696_v27 = vmul.f32 0.008, %v27514_v22 }
 0x5b7   : > { %29206 = vst [vmem:[#allocation14_spill] sm:$0xff] %v27572_v58  ;;  %v27580_v16 = vadd.f32 %v15620_v57, %v13425_v59  ;;  %v15581_v1 = vadd.f32 %v15541_v63, %v13565_v36  ;;  %v27586_v15 = vmul.f32 %v27575_v29, %v27508_v9  ;;  %v27590_v23 = vmul.f32 %v27575_v29, %v27564_v17  ;;  %v22765_v57 = vpop.eup %22764 }
 0x5b8   : > { %v13775_v61 = vpop.f32.mrb[252].mxu1  ;;  %v27582_v54 = vpop.f32.mrb[12].mxu0 }
 0x5b9   : > { %29207 = vst [vmem:[#allocation173_spill] sm:$0xff] %v27586_v15  ;;  %v27593_v34 = vmul.f32 0.008, %v27580_v16  ;;  %v27597_v52 = vmul.f32 %v27578_v49, %v27580_v16  ;;  %v15542_v56 = vadd.f32 %v13775_v61, %v13705_v47  ;;  %v21864_v4 = vpop.f32.mrb[253].mxu1  ;;  %v21914_v26 = vpop.f32.mrb[13].mxu0  ;;  %v15621_v59 = vadd.f32 %v15581_v1, %v13775_v61 }
 0x5ba   : > { %v15761_v1 = vmul.f32 2.0, %v27522_v45 }
 0x5bb   : > { %29208 = vst [vmem:[#allocation172_spill] sm:$0xff] %v27597_v52  ;;  %v15582_v40 = vadd.f32 %v15542_v56, %v13635_v60  ;;  %v27601_v43 = vmul.f32 %v27593_v34, %v27510_v42  ;;  %v27604_v62 = vadd.f32 %v15621_v59, %v13495_v24  ;;  %v27610_v13 = vmul.f32 %v27593_v34, %v27578_v49 }
 0x5bc   : > { %v13845_v39 = vpop.f32.mrb[254].mxu1  ;;  %v27606_v51 = vpop.f32.mrb[14].mxu0  ;;  %v15694_v24 = vmul.f32 0.008, %v27516_v20  ;;  %v15785_v59 = vmul.f32 %v27522_v45, %v27522_v45  ;;  %v27659_v45 = vmul.f32 %v22765_v57, %v29199_v50  ;;  %v15769_v52 = vmul.f32 %v15761_v1, %v27504_v10 }
 0x5bd   : > { %29209 = vst [vmem:[#allocation23_spill] sm:$0xff] %v27601_v43  ;;  %v15543_v41 = vadd.f32 %v13845_v39, %v13775_v61  ;;  %v15622_v37 = vadd.f32 %v15582_v40, %v13845_v39  ;;  %v21869_v32 = vpop.f32.mrb[255].mxu1  ;;  %v21924_v53 = vpop.f32.mrb[15].mxu0  ;;  %v27613_v11 = vmul.f32 0.008, %v27604_v62  ;;  %v27616_v3 = vmul.f32 %v15693_v5, %v27604_v62 }
 0x5be   : > { %v15762_v40 = vmul.f32 2.0, %v27534_v55  ;;  %v15763_v53 = vmul.f32 2.0, %v27564_v17  ;;  %v15764_v43 = vmul.f32 2.0, %v27578_v49  ;;  %v15790_v8 = vmul.f32 %v15694_v24, %v15694_v24 }
 0x5bf   : > { %29210 = vst [vmem:[#allocation22_spill] sm:$0xff] %v27616_v3  ;;  %v27619_v12 = vadd.f32 %v15543_v41, %v13705_v47  ;;  %v27621_v63 = vadd.f32 %v15622_v37, %v13565_v36  ;;  %v27631_v56 = vmul.f32 %v27613_v11, %v27512_v18  ;;  %v27634_v4 = vmul.f32 %v27613_v11, %v15693_v5 }
 0x5c0   : > { %v27624_v44 = vpop.f32.mrb[0].mxu1  ;;  %v27627_v61 = vpop.f32.mrb[16].mxu0  ;;  %v15695_v41 = vmul.f32 0.008, %v27519_v2  ;;  %v15770_v15 = vmul.f32 %v15762_v40, %v27506_v14  ;;  %v15789_v14 = vmul.f32 %v15693_v5, %v15693_v5  ;;  %v15768_v5 = vmul.f32 2.0, %v15696_v27 }
 0x5c1   : > { %29211 = vst [vmem:[#allocation177_spill] sm:$0xff] %v27619_v12  ;;  %29212 = vst [vmem:[#allocation101_spill] sm:$0xff] %v27631_v56  ;;  %v27637_v47 = vadd.f32 %v27619_v12, %v13635_v60  ;;  %v27640_v36 = vmul.f32 %v15694_v24, %v27621_v63  ;;  %v21874_v26 = vpop.f32.mrb[1].mxu1  ;;  %v21934_v39 = vpop.f32.mrb[17].mxu0  ;;  %v27647_v37 = vmul.f32 0.008, %v27621_v63  ;;  %v27653_v60 = vmul.f32 %v15696_v27, %v27619_v12 }
 0x5c2   : > { %v27650_v32 = vmul.f32 0.008, %v27619_v12  ;;  %v15786_v26 = vmul.f32 %v27534_v55, %v27534_v55  ;;  %v15787_v56 = vmul.f32 %v27564_v17, %v27564_v17  ;;  %v15767_v12 = vmul.f32 2.0, %v15695_v41 }
 0x5c3   : > { %29213 = vst [vmem:[#allocation24_spill] sm:$0xff] %v27637_v47  ;;  %29214 = vst [vmem:[#allocation122_spill] sm:$0xff] %v27640_v36  ;;  %v27662_v39 = vmul.f32 0.008, %v27637_v47  ;;  %v27670_v3 = vmul.f32 %v27647_v37, %v27516_v20  ;;  %v27677_v55 = vmul.f32 %v15695_v41, %v27637_v47 }
 0x5c4   : > { %29215 = vst [vmem:[#allocation119_spill] sm:$0xff] %v27653_v60  ;;  %v27664_v7 = vpop.f32.mrb[2].mxu1  ;;  %v27666_v36 = vpop.f32.mrb[18].mxu0  ;;  %v27674_v60 = vmul.f32 %v27650_v32, %v27514_v22  ;;  %v27699_v17 = vmul.f32 %v27650_v32, %v15696_v27 }
 0x5c5   : > { %29216 = vst [vmem:[#allocation16_spill] sm:$0xff] %v27670_v3  ;;  %29218 = vst [vmem:[#allocation109_spill] sm:$0xff] %v27677_v55  ;;  %v15545_v50 = vadd.f32 %v27664_v7, %v27624_v44  ;;  %v21879_v57 = vpop.f32.mrb[3].mxu1  ;;  %v21944_v58 = vpop.f32.mrb[19].mxu0  ;;  %v15793_v3 = vmul.f32 125.0, %v15785_v59  ;;  %v27690_v55 = vmul.f32 %v27662_v39, %v27519_v2  ;;  %v27696_v10 = vmul.f32 %v27662_v39, %v15695_v41 }
 0x5c6   : > { %29217 = vst [vmem:[#allocation110_spill] sm:$0xff] %v27674_v60  ;;  %v15788_v60 = vmul.f32 %v27578_v49, %v27578_v49  ;;  %v27693_v57 = vmul.f32 %v27647_v37, %v15694_v24  ;;  %29222 = vst [vmem:[#allocation113_spill] sm:$0xff] %v27699_v17  ;;  %v27702_v58 = vmul.f32 %v15763_v53, %v27508_v9  ;;  %v15794_v49 = vmul.f32 125.0, %v15786_v26 }
 0x5c7   : > { %29219 = vst [vmem:[#allocation29_spill] sm:$0xff] %v27690_v55  ;;  %29221 = vst [vmem:[#allocation17_spill] sm:$0xff] %v27696_v10  ;;  %v15766_v59 = vmul.f32 2.0, %v15694_v24  ;;  %v27711_v10 = vmul.f32 125.0, %v15787_v56  ;;  %v27714_v17 = vmul.f32 %v15764_v43, %v27510_v42  ;;  %v15792_v26 = vmul.f32 %v15696_v27, %v15696_v27 }
 0x5c8   : > { %29220 = vst [vmem:[#allocation131_spill] sm:$0xff] %v27693_v57  ;;  %v27704_v1 = vpop.f32.mrb[4].mxu1  ;;  %v27706_v40 = vpop.f32.mrb[20].mxu0  ;;  %v27716_v53 = vmul.f32 125.0, %v15788_v60  ;;  %v27719_v57 = vmul.f32 %v15765_v35, %v27512_v18  ;;  %v15791_v42 = vmul.f32 %v15695_v41, %v15695_v41  ;;  %v15809_v43 = vmul.f32 2.0, %v27531_v6 }
 0x5c9   : > { %29223 = vst [vmem:[#allocation112_spill] sm:$0xff] %v27706_v40  ;;  %v15546_v55 = vadd.f32 %v27704_v1, %v27664_v7  ;;  %v15625_v0 = vadd.f32 %v15545_v50, %v27704_v1  ;;  %v21884_v33 = vpop.f32.mrb[5].mxu1  ;;  %v21954_v9 = vpop.f32.mrb[21].mxu0  ;;  %v27725_v56 = vmul.f32 %v15766_v59, %v27516_v20  ;;  %v27739_v20 = vmul.f32 125.0, %v15792_v26 }
 0x5ca   : > { %v27722_v33 = vmul.f32 125.0, %v15789_v14  ;;  %v27737_v14 = vmul.f32 125.0, %v15790_v8  ;;  %v15833_v41 = vmul.f32 %v27531_v6, %v27531_v6  ;;  %v27746_v9 = vmul.f32 %v15767_v12, %v27519_v2 }
 0x5cb   : > { %v15777_v40 = vsub.f32 %v15625_v0, %v15769_v52  ;;  %v15586_v47 = vadd.f32 %v15546_v55, %v27624_v44  ;;  %v27735_v55 = vmul.f32 %v15768_v5, %v27514_v22  ;;  %v27751_v22 = vmul.f32 %v15809_v43, %v27524_v38 }
 0x5cc   : > { %v14125_v50 = vpop.f32.mrb[6].mxu1  ;;  %v27728_v60 = vpop.f32.mrb[22].mxu0  ;;  %v15810_v8 = vmul.f32 2.0, %v27551_v46  ;;  %v15834_v5 = vmul.f32 %v27551_v46, %v27551_v46  ;;  %v27764_v43 = vmul.f32 125.0, %v15833_v41  ;;  %v15835_v46 = vmul.f32 %v27575_v29, %v27575_v29 }
 0x5cd   : > { %v27730_v24 = vadd.f32 %v15793_v3, %v15777_v40  ;;  %v15547_v18 = vadd.f32 %v14125_v50, %v27704_v1  ;;  %v15548_v35 = vadd.f32 %v27553_v19, %v14125_v50  ;;  %v15626_v0 = vadd.f32 %v15586_v47, %v14125_v50  ;;  %v21889_v52 = vpop.f32.mrb[7].mxu1  ;;  %v21964_v27 = vpop.f32.mrb[23].mxu0 }
 0x5ce   : > { %v27748_v52 = vmul.f32 125.0, %v15791_v42  ;;  %v15812_v41 = vmul.f32 2.0, %v27593_v34 }
 0x5cf   : > { %v15587_v3 = vadd.f32 %v15547_v18, %v27664_v7  ;;  %v15778_v59 = vsub.f32 %v15626_v0, %v15770_v15  ;;  %v15588_v40 = vadd.f32 %v15548_v35, %v27704_v1  ;;  %v15811_v35 = vmul.f32 2.0, %v27575_v29 }
 0x5d0   : > { %v14265_v47 = vpop.f32.mrb[8].mxu1  ;;  %v27756_v6 = vpop.f32.mrb[24].mxu0 }
 0x5d1   : > { %29224 = vst [vmem:[#allocation30_spill] sm:$0xff] %v27756_v6  ;;  %v15627_v15 = vadd.f32 %v15587_v3, %v27553_v19  ;;  %v27759_v26 = vadd.f32 %v15794_v49, %v15778_v59  ;;  %v15549_v2 = vadd.f32 %v14265_v47, %v27553_v19  ;;  %v15628_v12 = vadd.f32 %v15588_v40, %v14265_v47  ;;  %v21899_v18 = vpop.f32.mrb[9].mxu1  ;;  %v21974_v42 = vpop.f32.mrb[25].mxu0 }
 0x5d2   : > { %v15550_v38 = vadd.f32 %v27568_v28, %v14265_v47  ;;  %v27771_v3 = vmul.f32 125.0, %v27544_v30  ;;  %v27775_v18 = vmul.f32 %v15810_v8, %v27536_v21  ;;  %v27777_v42 = vmul.f32 125.0, %v15834_v5 }
 0x5d3   : > { %v15667_v0 = vadd.f32 %v15627_v15, %v27624_v44  ;;  %v15589_v27 = vadd.f32 %v15549_v2, %v14125_v50  ;;  %v15668_v49 = vadd.f32 %v15628_v12, %v27664_v7  ;;  %v27787_v12 = vmul.f32 %v15811_v35, %v27566_v25 }
 0x5d4   : > { %v14405_v59 = vpop.f32.mrb[10].mxu1  ;;  %v15590_v40 = vadd.f32 %v15550_v38, %v27553_v19  ;;  %v27780_v6 = vpop.f32.mrb[26].mxu0  ;;  %v27789_v8 = vmul.f32 125.0, %v15835_v46  ;;  %v27792_v5 = vmul.f32 125.0, %v27561_v31  ;;  %v27804_v25 = vmul.f32 %v15812_v41, %v27580_v16 }
 0x5d5   : > { %v15779_v29 = vsub.f32 %v15667_v0, %v27702_v58  ;;  %v15629_v44 = vadd.f32 %v15589_v27, %v27568_v28  ;;  %v15780_v7 = vsub.f32 %v15668_v49, %v27714_v17  ;;  %v15551_v30 = vadd.f32 %v14405_v59, %v27568_v28  ;;  %v21909_v15 = vpop.f32.mrb[11].mxu1  ;;  %v21984_v2 = vpop.f32.mrb[27].mxu0 }
 0x5d6   : > { %v15630_v21 = vadd.f32 %v15590_v40, %v14405_v59  ;;  %v15836_v35 = vmul.f32 %v27593_v34, %v27593_v34  ;;  %v27809_v31 = vmul.f32 125.0, %v27590_v23  ;;  %v15813_v46 = vmul.f32 2.0, %v27613_v11 }
 0x5d7   : > { %v27795_v38 = vadd.f32 %v27711_v10, %v15779_v29  ;;  %v15669_v58 = vadd.f32 %v15629_v44, %v27704_v1  ;;  %v27799_v17 = vadd.f32 %v27716_v53, %v15780_v7  ;;  %v15591_v28 = vadd.f32 %v15551_v30, %v14265_v47 }
 0x5d8   : > { %v15670_v0 = vadd.f32 %v15630_v21, %v14125_v50  ;;  %v27801_v27 = vpop.f32.mrb[12].mxu1  ;;  %v15837_v16 = vmul.f32 %v27613_v11, %v27613_v11  ;;  %v27836_v29 = vmul.f32 125.0, %v15836_v35  ;;  %v27852_v30 = vmul.f32 %v15813_v46, %v27604_v62 }
 0x5d9   : > { %v15781_v10 = vsub.f32 %v15669_v58, %v27719_v57  ;;  %v15671_v1 = vadd.f32 %v15591_v28, %v27553_v19  ;;  %v15784_v53 = vsub.f32 %v15591_v28, %v27735_v55  ;;  %v15553_v50 = vadd.f32 %v27801_v27, %v27582_v54  ;;  %v21919_v47 = vpop.f32.mrb[13].mxu1 }
 0x5da   : > { %v15782_v34 = vsub.f32 %v15670_v0, %v27725_v56  ;;  %v15554_v23 = vadd.f32 %v27606_v51, %v27801_v27  ;;  %v21994_v49 = vpop.f32.mrb[28].mxu0  ;;  %v27855_v15 = vmul.f32 125.0, %v15837_v16  ;;  %v27865_v28 = vmul.f32 125.0, %v27634_v4 }
 0x5db   : > { %v27823_v57 = vadd.f32 %v27722_v33, %v15781_v10  ;;  %v15783_v19 = vsub.f32 %v15671_v1, %v27746_v9  ;;  %v27827_v55 = vadd.f32 %v27739_v20, %v15784_v53  ;;  %v15633_v59 = vadd.f32 %v15553_v50, %v27606_v51  ;;  %v15999_v40 = vpop.f32.mrb[29].mxu0 }
 0x5dc   : > { %v27831_v41 = vadd.f32 %v27737_v14, %v15782_v34  ;;  %v15594_v11 = vadd.f32 %v15554_v23, %v27582_v54  ;;  %v27834_v56 = vpop.f32.mrb[14].mxu1  ;;  %22017 = vmatpush3.msra.mxu1 %v15999_v40  ;;  %v27839_v33 = vmul.f32 125.0, %v27610_v13  ;;  %v15816_v10 = vmul.f32 2.0, %v27650_v32 }
 0x5dd   : > { %v27842_v9 = vadd.f32 %v27748_v52, %v15783_v19  ;;  %v15825_v20 = vsub.f32 %v15633_v59, %v27751_v22  ;;  %v15555_v44 = vadd.f32 %v27834_v56, %v27606_v51  ;;  %v15556_v14 = vadd.f32 %v27627_v61, %v27834_v56  ;;  %v21929_v7 = vpop.f32.mrb[15].mxu1  ;;  %22019 = vmatmul.mubr.msk.f32.vlgmr.msra.gmra.mrb[28].mxu1 %vm9612_vm2, %v27659_v45 }
 0x5de   : > { %v15634_v13 = vadd.f32 %v15594_v11, %v27834_v56  ;;  %v15814_v52 = vmul.f32 2.0, %v27647_v37  ;;  %22021 = vmatprep.subr.mxu1 %v29198_v48  ;;  %v21997_v22 = vpop.f32.mrb[30].mxu0  ;;  %22023 = vmatprep.mubr.msk.f32.mxu1 %vm22961_vm8, %v29198_v48  ;;  %v15838_v1 = vmul.f32 %v27647_v37, %v27647_v37  ;;  %v15815_v16 = vmul.f32 2.0, %v27662_v39 }
 0x5df   : > { %v15849_v2 = vadd.f32 %v27764_v43, %v15825_v20  ;;  %v15595_v21 = vadd.f32 %v15555_v44, %v27801_v27  ;;  %v15596_v58 = vadd.f32 %v15556_v14, %v27606_v51  ;;  %22022 = vmatpush3.msra.mxu1 %v21994_v49  ;;  %v16009_v62 = vpop.f32.mrb[31].mxu0  ;;  %v15840_v43 = vmul.f32 %v27650_v32, %v27650_v32  ;;  %v29225_v20 = vld [vmem:[#allocation177_spill] sm:$0xff] }
 0x5e0   : > { %v15826_v0 = vsub.f32 %v15634_v13, %v27775_v18  ;;  %v14825_v35 = vpop.f32.mrb[16].mxu1  ;;  %22026 = vmatprep.subr.mxu1 %v29198_v48  ;;  %v15822_v32 = vmul.f32 %v15814_v52, %v27621_v63  ;;  %v15824_v44 = vmul.f32 %v15816_v10, %v29225_v20  ;;  %v15846_v7 = vmul.f32 125.0, %v15838_v1 }
 0x5e1   : > { %v15865_v53 = vmul.f32 %v15849_v2, %v27730_v24  ;;  %v15635_v50 = vadd.f32 %v15595_v21, %v27627_v61  ;;  %v15557_v4 = vadd.f32 %v14825_v35, %v27627_v61  ;;  %v15636_v47 = vadd.f32 %v15596_v58, %v14825_v35  ;;  %v21939_v46 = vpop.f32.mrb[17].mxu1  ;;  %22024 = vmatmul.mubr.msk.f32.vlgmr.msra.gmra.mrb[30].mxu1 %vm9612_vm2, %v27659_v45 }
 0x5e2   : > { %v15850_v18 = vadd.f32 %v27777_v42, %v15826_v0  ;;  %v15558_v37 = vadd.f32 %v27666_v36, %v14825_v35  ;;  %22027 = vmatpush3.msra.mxu1 %v16009_v62  ;;  %v27883_v34 = vpop.f32.mrb[32].mxu0  ;;  %22028 = vmatprep.mubr.msk.f32.mxu1 %vm22961_vm8, %v29198_v48  ;;  %v15839_v42 = vmul.f32 %v27662_v39, %v27662_v39  ;;  %v15848_v21 = vmul.f32 125.0, %v15840_v43 }
 0x5e3   : > { %v15675_v24 = vadd.f32 %v15635_v50, %v27582_v54  ;;  %v15597_v23 = vadd.f32 %v15557_v4, %v27834_v56  ;;  %v15676_v49 = vadd.f32 %v15636_v47, %v27801_v27  ;;  %v16019_v19 = vpop.f32.mrb[33].mxu0  ;;  %22031 = vmatprep.subr.mxu1 %v29198_v48  ;;  %v15873_v59 = vadd.f32 1e-08, %v15865_v53  ;;  %v29227_v50 = vld [vmem:[#allocation112_spill] sm:$0xff] }
 0x5e4   : > { %v15866_v63 = vmul.f32 %v15850_v18, %v27759_v26  ;;  %v14965_v40 = vpop.f32.mrb[18].mxu1  ;;  %v15598_v11 = vadd.f32 %v15558_v37, %v27627_v61  ;;  %v29226_v26 = vld [vmem:[#allocation24_spill] sm:$0xff]  ;;  %v15847_v0 = vmul.f32 125.0, %v15839_v42  ;;  %v29228_v37 = vld [vmem:[#allocation131_spill] sm:$0xff] }
 0x5e5   : > { %v15827_v54 = vsub.f32 %v15675_v24, %v27787_v12  ;;  %v15637_v14 = vadd.f32 %v15597_v23, %v27666_v36  ;;  %v15828_v27 = vsub.f32 %v15676_v49, %v27804_v25  ;;  %v21949_v13 = vpop.f32.mrb[19].mxu1  ;;  %22029 = vmatmul.mubr.msk.f32.vlgmr.msra.gmra.mrb[32].mxu1 %vm9612_vm2, %v27659_v45  ;;  %v15559_v39 = vadd.f32 %v14965_v40, %v27666_v36 }
 0x5e6   : > { %v15638_v52 = vadd.f32 %v15598_v11, %v14965_v40  ;;  %v15823_v2 = vmul.f32 %v15815_v16, %v29226_v26  ;;  %22032 = vmatpush3.msra.mxu1 %v21997_v22  ;;  %v27903_v58 = vpop.f32.mrb[34].mxu0  ;;  %22033 = vmatprep.mubr.msk.f32.mxu1 %vm22961_vm8, %v29198_v48  ;;  %22766 = vrcp.f32 %v15873_v59  ;;  %v15874_v36 = vadd.f32 1e-08, %v15866_v63  ;;  %v29229_v59 = vld [vmem:[#allocation171_spill] sm:$0xff]  ;;  %v29231_v13 = vld [vmem:[#allocation30_spill] sm:$0xff] }
 0x5e7   : > { %v15851_v12 = vadd.f32 %v27789_v8, %v15827_v54  ;;  %v15677_v25 = vadd.f32 %v15637_v14, %v27606_v51  ;;  %v15852_v62 = vadd.f32 %v27836_v29, %v15828_v27  ;;  %v27910_v10 = vpop.f32.mrb[35].mxu0  ;;  %22036 = vmatprep.subr.mxu1 %v29198_v48  ;;  %v15599_v1 = vadd.f32 %v15559_v39, %v14825_v35  ;;  %v29230_v27 = vld [vmem:[#allocation18_spill] sm:$0xff] }
 0x5e8   : > { %v15678_v22 = vadd.f32 %v15638_v52, %v27834_v56  ;;  %v27914_v43 = vpop.f32.mrb[20].mxu1  ;;  %v27931_v16 = vmul.f32 125.0, %v29228_v37  ;;  %22768 = vrcp.f32 %v15874_v36 }
 0x5e9   : > { %v15867_v53 = vmul.f32 %v15851_v12, %v27795_v38  ;;  %v15829_v8 = vsub.f32 %v15677_v25, %v27852_v30  ;;  %v15868_v51 = vmul.f32 %v15852_v62, %v27799_v17  ;;  %v15561_v29 = vadd.f32 %v27914_v43, %v29227_v50  ;;  %v21959_v4 = vpop.f32.mrb[21].mxu1  ;;  %22034 = vmatmul.mubr.msk.f32.vlgmr.msra.gmra.mrb[34].mxu1 %vm9612_vm2, %v27659_v45 }
 0x5ea   : > { %v15679_v47 = vadd.f32 %v15599_v1, %v27627_v61  ;;  %v15830_v35 = vsub.f32 %v15678_v22, %v15822_v32  ;;  %v15832_v46 = vsub.f32 %v15599_v1, %v15824_v44  ;;  %v15562_v56 = vadd.f32 %v27728_v60, %v27914_v43  ;;  %22037 = vmatpush3.msra.mxu1 %v16019_v19  ;;  %v27926_v38 = vpop.f32.mrb[36].mxu0  ;;  %v29233_v22 = vld [vmem:[#allocation34_spill] sm:$0xff] }
 0x5eb   : > { %v15875_v30 = vadd.f32 1e-08, %v15867_v53  ;;  %v15853_v17 = vadd.f32 %v27855_v15, %v15829_v8  ;;  %v15641_v18 = vadd.f32 %v15561_v29, %v27728_v60  ;;  %v16039_v24 = vpop.f32.mrb[37].mxu0  ;;  %22038 = vmatprep.mubr.msk.f32.mxu1 %vm22961_vm8, %v29198_v48  ;;  %22041 = vmatprep.subr.mxu1 %v29198_v48  ;;  %v15876_v19 = vadd.f32 1e-08, %v15868_v51 }
 0x5ec   : > { %v15831_v61 = vsub.f32 %v15679_v47, %v15823_v2  ;;  %v15854_v32 = vadd.f32 %v15846_v7, %v15830_v35  ;;  %v15856_v23 = vadd.f32 %v15848_v21, %v15832_v46  ;;  %v15602_v49 = vadd.f32 %v15562_v56, %v29227_v50  ;;  %v27937_v42 = vpop.f32.mrb[22].mxu1  ;;  %22057 = vmatpush3.msra.mxu0 %v16039_v24  ;;  %v29232_v2 = vld [vmem:[#allocation17_spill] sm:$0xff]  ;;  %v29234_v46 = vld [vmem:[#allocation15_spill] sm:$0xff] }
 0x5ed   : > { %v15869_v15 = vmul.f32 %v15853_v17, %v27823_v57  ;;  %v15713_v63 = vsub.f32 %v15641_v18, %v29229_v59  ;;  %v15563_v40 = vadd.f32 %v27937_v42, %v27728_v60  ;;  %v21969_v11 = vpop.f32.mrb[23].mxu1  ;;  %22039 = vmatmul.mubr.msk.f32.vlgmr.msra.gmra.mrb[36].mxu1 %vm9612_vm2, %v27659_v45  ;;  %22066 = vmatprep.subr.mxu0 %v29198_v48  ;;  %22770 = vrcp.f32 %v15875_v30  ;;  %v29235_v18 = vld [vmem:[#allocation173_spill] sm:$0xff]  ;;  %v29236_v59 = vld [vmem:[#allocation14_spill] sm:$0xff] }
 0x5ee   : > { %v15855_v20 = vadd.f32 %v15847_v0, %v15831_v61  ;;  %v15870_v44 = vmul.f32 %v15854_v32, %v27831_v41  ;;  %v15872_v54 = vmul.f32 %v15856_v23, %v27827_v55  ;;  %22042 = vmatpush3.msra.mxu1 %v27883_v34  ;;  %v27949_v57 = vpop.f32.mrb[38].mxu0  ;;  %22043 = vmatprep.mubr.msk.f32.mxu1 %vm22961_vm8, %v29198_v48  ;;  %v27965_v21 = vmul.f32 125.0, %v29232_v2 }
 0x5ef   : > { %v15877_v14 = vadd.f32 1e-08, %v15869_v15  ;;  %v15729_v7 = vsub.f32 %v15713_v63, %v29230_v27  ;;  %v15564_v39 = vadd.f32 %v29231_v13, %v27937_v42  ;;  %v15603_v52 = vadd.f32 %v15563_v40, %v27914_v43  ;;  %v16049_v26 = vpop.f32.mrb[39].mxu0  ;;  %22046 = vmatprep.subr.mxu1 %v29198_v48  ;;  %22059 = vmatmul.mubr.msk.f32.vlgmr.msra.gmra.mrb[44].mxu0 %vm9612_vm2, %v27659_v45 }
 0x5f0   : > { %v15871_v55 = vmul.f32 %v15855_v20, %v27842_v9  ;;  %v15642_v41 = vadd.f32 %v15602_v49, %v27937_v42  ;;  %v15385_v34 = vpop.f32.mrb[24].mxu1  ;;  %22067 = vmatpush3.msra.mxu0 %v16049_v26  ;;  %22068 = vmatprep.mubr.msk.f32.mxu0 %vm22961_vm8, %v29198_v48  ;;  %22772 = vrcp.f32 %v15876_v19  ;;  %v22767_v9 = vpop.eup %22766  ;;  %v15878_v36 = vadd.f32 1e-08, %v15870_v44  ;;  %v29238_v44 = vld [vmem:[#allocation23_spill] sm:$0xff] }
 0x5f1   : > { %v15753_v12 = vadd.f32 %v27771_v3, %v15729_v7  ;;  %v15643_v25 = vadd.f32 %v15603_v52, %v29231_v13  ;;  %v15565_v62 = vadd.f32 %v15385_v34, %v29231_v13  ;;  %v21979_v0 = vpop.f32.mrb[25].mxu1  ;;  %22044 = vmatmul.mubr.msk.f32.vlgmr.msra.gmra.mrb[38].mxu1 %vm9612_vm2, %v27659_v45  ;;  %22076 = vmatprep.subr.mxu0 %v29198_v48  ;;  %v15880_v1 = vadd.f32 1e-08, %v15872_v54 }
 0x5f2   : > { %v15714_v53 = vsub.f32 %v15642_v41, %v29233_v22  ;;  %v15604_v8 = vadd.f32 %v15564_v39, %v27728_v60  ;;  %22047 = vmatpush3.msra.mxu1 %v27910_v10  ;;  %v27976_v3 = vpop.f32.mrb[40].mxu0  ;;  %22048 = vmatprep.mubr.msk.f32.mxu1 %vm22961_vm8, %v29198_v48  ;;  %22774 = vrcp.f32 %v15877_v14  ;;  %v15879_v35 = vadd.f32 1e-08, %v15871_v55  ;;  %v22769_v20 = vpop.eup %22768  ;;  %v29240_v39 = vld [vmem:[#allocation110_spill] sm:$0xff]  ;;  %v29241_v55 = vld [vmem:[#allocation172_spill] sm:$0xff] }
 0x5f3   : > { %v15857_v51 = vmul.f32 %v15753_v12, %v15753_v12  ;;  %v15683_v29 = vadd.f32 %v15643_v25, %v29227_v50  ;;  %v15605_v4 = vadd.f32 %v15565_v62, %v27937_v42  ;;  %v16059_v47 = vpop.f32.mrb[41].mxu0  ;;  %22051 = vmatprep.subr.mxu1 %v29198_v48  ;;  %22069 = vmatmul.mubr.msk.f32.vlgmr.msra.gmra.mrb[46].mxu0 %vm9612_vm2, %v27659_v45  ;;  %22776 = vrcp.f32 %v15880_v1  ;;  %v29242_v62 = vld [vmem:[#allocation29_spill] sm:$0xff] }
 0x5f4   : > { %v15730_v10 = vsub.f32 %v15714_v53, %v29234_v46  ;;  %v15644_v56 = vadd.f32 %v15604_v8, %v15385_v34  ;;  %v15525_v30 = vpop.f32.mrb[26].mxu1  ;;  %v15566_v17 = vadd.f32 %v27780_v6, %v15385_v34  ;;  %22077 = vmatpush3.msra.mxu0 %v16059_v47  ;;  %22078 = vmatprep.mubr.msk.f32.mxu0 %vm22961_vm8, %v29198_v48  ;;  %22778 = vrcp.f32 %v15879_v35 }
 0x5f5   : > { %v15889_v50 = vmul.f32 %v22767_v9, %v15857_v51  ;;  %v15715_v37 = vsub.f32 %v15683_v29, %v29235_v18  ;;  %v15645_v24 = vadd.f32 %v15605_v4, %v27780_v6  ;;  %v15567_v61 = vadd.f32 %v15525_v30, %v27780_v6  ;;  %22049 = vmatmul.mubr.msk.f32.vlgmr.msra.gmra.mrb[40].mxu1 %vm9612_vm2, %v27659_v45  ;;  %v21989_v32 = vpop.f32.mrb[27].mxu1  ;;  %v29246_v29 = vld [vmem:[#allocation109_spill] sm:$0xff] }
 0x5f6   : > { %v15754_v23 = vadd.f32 %v27792_v5, %v15730_v10  ;;  %v15684_v49 = vadd.f32 %v15644_v56, %v27914_v43  ;;  %v15606_v15 = vadd.f32 %v15566_v17, %v29231_v13  ;;  %22052 = vmatpush3.msra.mxu1 %v27903_v58  ;;  %v27998_v19 = vpop.f32.mrb[42].mxu0  ;;  %22086 = vmatprep.subr.mxu0 %v29198_v48  ;;  %v29237_v5 = vld [vmem:[#allocation113_spill] sm:$0xff]  ;;  %22780 = vrcp.f32 %v15878_v36  ;;  %v29244_v36 = vld [vmem:[#allocation22_spill] sm:$0xff] }
 0x5f7   : > { %v15731_v63 = vsub.f32 %v15715_v37, %v29236_v59  ;;  %v15685_v6 = vadd.f32 %v15645_v24, %v27728_v60  ;;  %v15607_v40 = vadd.f32 %v15567_v61, %v15385_v34  ;;  %v16069_v11 = vpop.f32.mrb[43].mxu0  ;;  %22053 = vmatprep.mubr.msk.f32.mxu1 %vm22961_vm8, %v29198_v48  ;;  %22061 = vmatprep.subr.mxu1 %v29198_v48  ;;  %v15752_v43 = vmul.f32 125.0, %v29237_v5  ;;  %v29239_v60 = vld [vmem:[#allocation101_spill] sm:$0xff]  ;;  %v22771_v26 = vpop.eup %22770 }
 0x5f8   : > { %v15858_v58 = vmul.f32 %v15754_v23, %v15754_v23  ;;  %v15716_v54 = vsub.f32 %v15684_v49, %v29238_v44  ;;  %v15646_v14 = vadd.f32 %v15606_v15, %v15525_v30  ;;  %22079 = vmatmul.mubr.msk.f32.vlgmr.msra.gmra.mrb[48].mxu0 %vm9612_vm2, %v27659_v45  ;;  %v15897_v22 = vsel %vm9612_vm2, %v15889_v50, 0.0 }
 0x5f9   : > { %v15717_v27 = vsub.f32 %v15685_v6, %v29239_v60  ;;  %v15687_v7 = vadd.f32 %v15607_v40, %v29231_v13  ;;  %v15720_v52 = vsub.f32 %v15607_v40, %v29240_v39  ;;  %22087 = vmatpush3.msra.mxu0 %v16069_v11  ;;  %22054 = vmatmul.mubr.msk.f32.vlgmr.msra.gmra.mrb[42].mxu1 %vm9612_vm2, %v27659_v45  ;;  %v29243_v13 = vld [vmem:[#allocation119_spill] sm:$0xff] }
 0x5fa   : > { %v15732_v41 = vsub.f32 %v15716_v54, %v29241_v55  ;;  %v15686_v34 = vadd.f32 %v15646_v14, %v27937_v42  ;;  %22062 = vmatpush3.msra.mxu1 %v27926_v38  ;;  %v15755_v2 = vadd.f32 %v27809_v31, %v15731_v63  ;;  %v15890_v12 = vmul.f32 %v22769_v20, %v15858_v58  ;;  %v22773_v25 = vpop.eup %22772  ;;  %v29245_v38 = vld [vmem:[#allocation16_spill] sm:$0xff] }
 0x5fb   : > { %v15719_v0 = vsub.f32 %v15687_v7, %v29242_v62  ;;  %v15736_v9 = vsub.f32 %v15720_v52, %v29243_v13  ;;  %v15733_v1 = vsub.f32 %v15717_v27, %v29244_v36  ;;  %22063 = vmatprep.mubr.msk.f32.mxu1 %vm22961_vm8, %v29198_v48  ;;  %22071 = vmatprep.subr.mxu1 %v29198_v48 }
 0x5fc   : > { %v15756_v42 = vadd.f32 %v27839_v33, %v15732_v41  ;;  %v15718_v53 = vsub.f32 %v15686_v34, %v29245_v38  ;;  %v15859_v31 = vmul.f32 %v15755_v2, %v15755_v2  ;;  %v15898_v8 = vsel %vm9612_vm2, %v15890_v12, 0.0  ;;  %22088 = vmatprep.mubr.msk.f32.mxu0 %vm22961_vm8, %v29198_v48  ;;  %v22775_v51 = vpop.eup %22774  ;;  %v29247_v33 = vld [vmem:[#allocation122_spill] sm:$0xff] }
 0x5fd   : > { %v15735_v4 = vsub.f32 %v15719_v0, %v29246_v29  ;;  %v15757_v47 = vadd.f32 %v27865_v28, %v15733_v1  ;;  %v15760_v35 = vadd.f32 %v15752_v43, %v15736_v9  ;;  %v15899_v46 = vadd.f32 %v15898_v8, %v15897_v22  ;;  %22064 = vmatmul.mubr.msk.f32.vlgmr.msra.gmra.mrb[44].mxu1 %vm9612_vm2, %v27659_v45  ;;  %v22777_v28 = vpop.eup %22776 }
 0x5fe   : > { %v15860_v10 = vmul.f32 %v15756_v42, %v15756_v42  ;;  %v15734_v56 = vsub.f32 %v15718_v53, %v29247_v33  ;;  %v15891_v30 = vmul.f32 %v22771_v26, %v15859_v31  ;;  %22072 = vmatpush3.msra.mxu1 %v27949_v57  ;;  %22073 = vmatprep.mubr.msk.f32.mxu1 %vm22961_vm8, %v29198_v48 }
 0x5ff   : > { %v15759_v17 = vadd.f32 %v27965_v21, %v15735_v4  ;;  %v15861_v50 = vmul.f32 %v15757_v47, %v15757_v47  ;;  %v15864_v18 = vmul.f32 %v15760_v35, %v15760_v35  ;;  %22081 = vmatprep.subr.mxu1 %v29198_v48  ;;  %22089 = vmatmul.mubr.msk.f32.vlgmr.msra.gmra.mrb[50].mxu0 %vm9612_vm2, %v27659_v45  ;;  %v22779_v21 = vpop.eup %22778 }
 0x600   : > { %v15758_v37 = vadd.f32 %v27931_v16, %v15734_v56  ;;  %v15892_v24 = vmul.f32 %v22773_v25, %v15860_v10  ;;  %v15900_v61 = vsel %vm9612_vm2, %v15891_v30, 0.0  ;;  %v22781_v16 = vpop.eup %22780 }
 0x601   : > { %v15863_v32 = vmul.f32 %v15759_v17, %v15759_v17  ;;  %v15893_v57 = vmul.f32 %v22775_v51, %v15861_v50  ;;  %v15896_v23 = vmul.f32 %v22777_v28, %v15864_v18  ;;  %v15901_v49 = vadd.f32 %v15900_v61, %v15899_v46  ;;  %22074 = vmatmul.mubr.msk.f32.vlgmr.msra.gmra.mrb[46].mxu1 %vm9612_vm2, %v27659_v45 }
 0x602   : > { %v15862_v15 = vmul.f32 %v15758_v37, %v15758_v37  ;;  %v15902_v59 = vsel %vm9612_vm2, %v15892_v24, 0.0  ;;  %22082 = vmatpush3.msra.mxu1 %v27976_v3  ;;  %22083 = vmatprep.mubr.msk.f32.mxu1 %vm22961_vm8, %v29198_v48 }
 0x603   : > { %v15895_v63 = vmul.f32 %v22779_v21, %v15863_v32  ;;  %v15903_v6 = vadd.f32 %v15902_v59, %v15901_v49  ;;  %v15904_v40 = vsel %vm9612_vm2, %v15893_v57, 0.0  ;;  %22091 = vmatprep.subr.mxu1 %v29198_v48  ;;  %v15910_v44 = vsel %vm9612_vm2, %v15896_v23, 0.0 }
 0x604   : > { %v15894_v11 = vmul.f32 %v22781_v16, %v15862_v15 }
 0x605   : > { %v15905_v5 = vadd.f32 %v15904_v40, %v15903_v6  ;;  %22084 = vmatmul.mubr.msk.f32.vlgmr.msra.gmra.mrb[48].mxu1 %vm9612_vm2, %v27659_v45  ;;  %v15908_v20 = vsel %vm9612_vm2, %v15895_v63, 0.0 }
 0x606   : > { %v15906_v43 = vsel %vm9612_vm2, %v15894_v11, 0.0  ;;  %22092 = vmatpush3.msra.mxu1 %v27998_v19  ;;  %22093 = vmatprep.mubr.msk.f32.mxu1 %vm22961_vm8, %v29198_v48  ;;  %v29248_v19 = vld [vmem:[#allocation11_spill] sm:$0xff] }
 0x607   : > { %v15907_v3 = vadd.f32 %v15906_v43, %v15905_v5  ;;  %22113 = vmatprep.subr.mxu1 %v29198_v48  ;;  %vm17243_vm12 = vcmp.le.s32.totalorder %v29248_v19, 1 }
 0x608   : > { %v28068_v14 = vsel %vm17243_vm12, 1.0, %v29198_v48 }
 0x609   : > { %v15909_v58 = vadd.f32 %v15908_v20, %v15907_v3  ;;  %22094 = vmatmul.mubr.msk.f32.vlgmr.msra.gmra.mrb[50].mxu1 %vm9612_vm2, %v27659_v45  ;;  %22096 = vmatprep.subr.msk.mxu0 %vm17296_vm13, %v28068_v14 }
 0x60a   : > { %22115 = vmatprep.mubr.msk.f32.mxu1 %vm22961_vm8, %v29198_v48  ;;  %22097 = vmatpush3.msk.msra.mxu0 %vm17296_vm13, %v28068_v14 }
 0x60b   : > { %v15911_v54 = vadd.f32 %v15910_v44, %v15909_v58  ;;  %22138 = vmatprep.subr.mxu0 %v29198_v48 }
 0x60d   : > { %15912 = vadd.xlane.f32.xlu1 %v15911_v54 }
 0x69a   : > { %v15913_v45 = vpop.xlane.xlu1 %15912 }
 0x69b   : > { %v15914_v60 = vrot.slane %v15913_v45, 4 }
 0x69d   : > { %v15915_v27 = vadd.f32 %v15914_v60, %v15913_v45 }
 0x69f   : > { %v15916_v7 = vrot.slane %v15915_v27, 2 }
 0x6a1   : > { %v15917_v39 = vadd.f32 %v15916_v7, %v15915_v27 }
 0x6a3   : > { %v15918_v52 = vrot.slane %v15917_v39, 1 }
 0x6a5   : > { %v15919_v26 = vadd.f32 %v15918_v52, %v15917_v39 }
 0x6a7   : > { %22639 = vpush %v15919_v26 }
 0x6b0   : > { %v16153_v55 = vpop.f32.mrb[28].mxu1 }
 0x6b1   : > { %v22020_v41 = vpop.f32.mrb[29].mxu1 }
 0x6b4   : > { %v16223_v34 = vpop.f32.mrb[30].mxu1 }
 0x6b5   : > { %v17207_v2 = vadd.f32 %v16223_v34, %v16153_v55  ;;  %v22025_v12 = vpop.f32.mrb[31].mxu1 }
 0x6b7   : > { %v17223_v36 = vmul.f32 0.5, %v17207_v2 }
 0x6b8   : > { %v16293_v25 = vpop.f32.mrb[32].mxu1 }
 0x6b9   : > { %v22030_v62 = vpop.f32.mrb[33].mxu1  ;;  %v28075_v31 = vmul.f32 %v17223_v36, %v17223_v36 }
 0x6bc   : > { %v16363_v0 = vpop.f32.mrb[34].mxu1 }
 0x6bd   : > { %v17208_v13 = vadd.f32 %v16363_v0, %v16293_v25  ;;  %v22035_v9 = vpop.f32.mrb[35].mxu1 }
 0x6bf   : > { %v17216_v1 = vadd.f32 %v17208_v13, %v16223_v34 }
 0x6c0   : > { %v16433_v22 = vpop.f32.mrb[36].mxu1 }
 0x6c1   : > { %v17225_v42 = vmul.f32 0.33333334, %v17216_v1  ;;  %v22040_v38 = vpop.f32.mrb[37].mxu1 }
 0x6c2   : > { %v16713_v53 = vpop.f32.mrb[44].mxu0 }
 0x6c3   : > { %v28077_v8 = vmul.f32 %v17225_v42, %v17225_v42  ;;  %v17266_v51 = vcombine.low %v17223_v36, %v17225_v42  ;;  %v22060_v29 = vpop.f32.mrb[45].mxu0 }
 0x6c4   : > { %v16503_v4 = vpop.f32.mrb[38].mxu1 }
 0x6c5   : > { %v17209_v47 = vadd.f32 %v16503_v4, %v16433_v22  ;;  %v22045_v35 = vpop.f32.mrb[39].mxu1  ;;  %22098 = vmatprep.mubr.msk.f32.mxu0 %vm15923_vm11, %v17266_v51  ;;  %v17270_v46 = vcombine.low %v28075_v31, %v28077_v8 }
 0x6c6   : > { %v16853_v10 = vpop.f32.mrb[46].mxu0 }
 0x6c7   : > { %v17217_v33 = vadd.f32 %v17209_v47, %v16363_v0  ;;  %v22070_v56 = vpop.f32.mrb[47].mxu0 }
 0x6c8   : > { %v16573_v30 = vpop.f32.mrb[40].mxu1 }
 0x6c9   : > { %v22050_v17 = vpop.f32.mrb[41].mxu1  ;;  %v17226_v61 = vmul.f32 0.33333334, %v17217_v33 }
 0x6cb   : > { %v16993_v50 = vpop.f32.mrb[48].mxu0  ;;  %v17233_v59 = vmul.f32 %v17226_v61, %v17226_v61 }
 0x6cc   : > { %v16643_v18 = vpop.f32.mrb[42].mxu1  ;;  %v22080_v28 = vpop.f32.mrb[49].mxu0 }
 0x6cd   : > { %v17210_v37 = vadd.f32 %v16643_v18, %v16573_v30  ;;  %v22055_v24 = vpop.f32.mrb[43].mxu1 }
 0x6cf   : > { %v17218_v32 = vadd.f32 %v17210_v37, %v16503_v4 }
 0x6d0   : > { %v16783_v57 = vpop.f32.mrb[44].mxu1 }
 0x6d1   : > { %v17227_v23 = vmul.f32 0.33333334, %v17218_v32  ;;  %v17211_v49 = vadd.f32 %v16783_v57, %v16713_v53  ;;  %v22065_v21 = vpop.f32.mrb[45].mxu1 }
 0x6d2   : > { %v17133_v15 = vpop.f32.mrb[50].mxu0 }
 0x6d3   : > { %v17234_v16 = vmul.f32 %v17227_v23, %v17227_v23  ;;  %v17267_v63 = vcombine.low %v17226_v61, %v17227_v23  ;;  %v17224_v6 = vmul.f32 0.5, %v17211_v49  ;;  %v22090_v40 = vpop.f32.mrb[51].mxu0 }
 0x6d4   : > { %v16923_v11 = vpop.f32.mrb[46].mxu1 }
 0x6d5   : > { %v17271_v5 = vcombine.low %v17233_v59, %v17234_v16  ;;  %22099 = vmatmul.mubr.msk.f32.vlgmr.msra.gmra.mrb[52].mxu0 %vm15923_vm11, %v17267_v63  ;;  %v17239_v43 = vmul.f32 %v17224_v6, %v17223_v36  ;;  %v17212_v3 = vadd.f32 %v16923_v11, %v16853_v10  ;;  %v22075_v20 = vpop.f32.mrb[47].mxu1  ;;  %v17235_v60 = vmul.f32 %v17224_v6, %v17224_v6 }
 0x6d7   : > { %v17220_v58 = vadd.f32 %v17212_v3, %v16783_v57 }
 0x6d8   : > { %v17063_v44 = vpop.f32.mrb[48].mxu1  ;;  %s22640_s16 = spop %22639 }
 0x6d9   : > { %v17228_v54 = vmul.f32 0.33333334, %v17220_v58  ;;  %v17213_v19 = vadd.f32 %v17063_v44, %v16993_v50  ;;  %v22085_v45 = vpop.f32.mrb[49].mxu1  ;;  %s15921_s22 = smul.f32 -0.00048828125, %s22640_s16 }
 0x6db   : > { %v17236_v27 = vmul.f32 %v17228_v54, %v17228_v54  ;;  %v17240_v7 = vmul.f32 %v17228_v54, %v17225_v42  ;;  %v17221_v39 = vadd.f32 %v17213_v19, %v16923_v11  ;;  %v17268_v52 = vcombine.low %v17224_v6, %v17228_v54  ;;  %s15922_s4 = sadd.f32 %s15921_s22, %s9595_s29 }
 0x6dc   : > { %v17203_v26 = vpop.f32.mrb[50].mxu1 }
 0x6dd   : > { %v17229_v55 = vmul.f32 0.33333334, %v17221_v39  ;;  %v17214_v41 = vadd.f32 %v17203_v26, %v17133_v15  ;;  %22101 = vmatprep.mubr.msk.f32.mxu0 %vm15923_vm11, %v17268_v52  ;;  %v22095_v34 = vpop.f32.mrb[51].mxu1  ;;  %v17272_v2 = vcombine.low %v17235_v60, %v17236_v27  ;;  %v17274_v12 = vcombine.low %v17239_v43, %v17240_v7 }
 0x6df   : > { %v17241_v25 = vmul.f32 %v17229_v55, %v17226_v61  ;;  %v17222_v62 = vadd.f32 %v17214_v41, %v17063_v44  ;;  %v17237_v13 = vmul.f32 %v17229_v55, %v17229_v55 }
 0x6e1   : > { %v17230_v0 = vmul.f32 0.33333334, %v17222_v62 }
 0x6e3   : > { %v17238_v9 = vmul.f32 %v17230_v0, %v17230_v0  ;;  %v17242_v36 = vmul.f32 %v17230_v0, %v17227_v23  ;;  %v17269_v1 = vcombine.low %v17229_v55, %v17230_v0 }
 0x6e5   : > { %v17273_v22 = vcombine.low %v17237_v13, %v17238_v9  ;;  %v17275_v38 = vcombine.low %v17241_v25, %v17242_v36  ;;  %22102 = vmatmul.mubr.msk.f32.gmra.mrb[54].mxu0 %vm15923_vm11, %v17269_v1 }
 0x6e6   : > { %22104 = vmatprep.mubr.msk.f32.mxu0 %vm15923_vm11, %v17270_v46 }
 0x6e9   : > { %22105 = vmatmul.mubr.msk.f32.gmra.mrb[56].mxu0 %vm15923_vm11, %v17271_v5 }
 0x6ea   : > { %22107 = vmatprep.mubr.msk.f32.mxu0 %vm15923_vm11, %v17272_v2 }
 0x6ed   : > { %22108 = vmatmul.mubr.msk.f32.gmra.mrb[58].mxu0 %vm15923_vm11, %v17273_v22 }
 0x6ee   : > { %22110 = vmatprep.mubr.msk.f32.mxu0 %vm15923_vm11, %v17274_v12 }
 0x6f1   : > { %22111 = vmatmul.mubr.msk.f32.gmra.mrb[60].mxu0 %vm15923_vm11, %v17275_v38 }
 0x6f2   : > { %22140 = vmatprep.mubr.msk.f32.mxu0 %vm22961_vm8, %v29198_v48 }
 0x7a8   : > { %v22100_v42 = vpop.f32.mrb[52].mxu0 }
 0x7a9   : > { %v17366_v53 = vpop.f32.mrb[53].mxu0  ;;  %v17426_v8 = vcombine.high %v22100_v42, %v22100_v42 }
 0x7aa   : > { %v17425_v31 = vcombine.high %v17366_v53, %v17366_v53  ;;  %22114 = vmatpush3.msk.msra.mxu1 %vm17296_vm13, %v17366_v53 }
 0x7ab   : > { %22116 = vmatmul.mubr.msk.f32.vlgmr.msra.gmra.mrb[52].mxu1 %vm15923_vm11, %v28068_v14  ;;  %22118 = vmatprep.subr.mxu1 %v29198_v48 }
 0x7ac   : > { %22119 = vmatpush3.msk.msra.mxu1 %vm17296_vm13, %v17425_v31  ;;  %22120 = vmatprep.mubr.msk.f32.mxu1 %vm22961_vm8, %v29198_v48 }
 0x7ad   : > { %22123 = vmatprep.subr.mxu1 %v29198_v48 }
 0x7af   : > { %22121 = vmatmul.mubr.msk.f32.vlgmr.msra.gmra.mrb[54].mxu1 %vm15923_vm11, %v28068_v14 }
 0x7b0   : > { %22124 = vmatpush3.msk.msra.mxu1 %vm17296_vm13, %v22100_v42  ;;  %22125 = vmatprep.mubr.msk.f32.mxu1 %vm22961_vm8, %v29198_v48 }
 0x7b1   : > { %22128 = vmatprep.subr.mxu1 %v29198_v48 }
 0x7b3   : > { %22126 = vmatmul.mubr.msk.f32.vlgmr.msra.gmra.mrb[56].mxu1 %vm15923_vm11, %v28068_v14 }
 0x7b4   : > { %22129 = vmatpush3.msk.msra.mxu1 %vm17296_vm13, %v17426_v8  ;;  %22130 = vmatprep.mubr.msk.f32.mxu1 %vm22961_vm8, %v29198_v48 }
 0x7b5   : > { %22133 = vmatprep.subr.mxu1 %v29198_v48 }
 0x7b7   : > { %22131 = vmatmul.mubr.msk.f32.vlgmr.msra.gmra.mrb[58].mxu1 %vm15923_vm11, %v28068_v14 }
 0x7b8   : > { %v22103_v51 = vpop.f32.mrb[54].mxu0  ;;  %22135 = vmatprep.mubr.msk.f32.mxu1 %vm22961_vm8, %v29198_v48 }
 0x7b9   : > { %v17376_v29 = vpop.f32.mrb[55].mxu0  ;;  %v17428_v35 = vcombine.high %v22103_v51, %v22103_v51 }
 0x7ba   : > { %v17427_v4 = vcombine.high %v17376_v29, %v17376_v29  ;;  %22134 = vmatpush3.msk.msra.mxu1 %vm17296_vm13, %v17376_v29 }
 0x7bb   : > { %22136 = vmatmul.mubr.msk.f32.vlgmr.msra.gmra.mrb[60].mxu1 %vm15923_vm11, %v28068_v14  ;;  %22143 = vmatprep.subr.mxu1 %v29198_v48 }
 0x7bc   : > { %22139 = vmatpush3.msk.msra.mxu0 %vm17296_vm13, %v17427_v4  ;;  %22144 = vmatpush3.msk.msra.mxu1 %vm17296_vm13, %v22103_v51  ;;  %v22106_v47 = vpop.f32.mrb[56].mxu0 }
 0x7bd   : > { %22141 = vmatmul.mubr.msk.f32.vlgmr.msra.gmra.mrb[62].mxu0 %vm15923_vm11, %v28068_v14  ;;  %22145 = vmatprep.mubr.msk.f32.mxu1 %vm22961_vm8, %v29198_v48  ;;  %v17386_v46 = vpop.f32.mrb[57].mxu0  ;;  %v17430_v17 = vcombine.high %v22106_v47, %v22106_v47 }
 0x7be   : > { %22148 = vmatprep.subr.mxu0 %v29198_v48  ;;  %22150 = vmatprep.mubr.msk.f32.mxu0 %vm22961_vm8, %v29198_v48  ;;  %v17429_v10 = vcombine.high %v17386_v46, %v17386_v46 }
 0x7bf   : > { %22146 = vmatmul.mubr.msk.f32.vlgmr.msra.gmra.mrb[62].mxu1 %vm15923_vm11, %v28068_v14  ;;  %22149 = vmatpush3.msk.msra.mxu0 %vm17296_vm13, %v17428_v35 }
 0x7c0   : > { %22153 = vmatprep.subr.mxu1 %v29198_v48  ;;  %22155 = vmatprep.mubr.msk.f32.mxu1 %vm22961_vm8, %v29198_v48  ;;  %v22109_v33 = vpop.f32.mrb[58].mxu0 }
 0x7c1   : > { %22151 = vmatmul.mubr.msk.f32.vlgmr.msra.gmra.mrb[64].mxu0 %vm15923_vm11, %v28068_v14  ;;  %22154 = vmatpush3.msk.msra.mxu1 %vm17296_vm13, %v17386_v46  ;;  %v17396_v56 = vpop.f32.mrb[59].mxu0  ;;  %v17432_v28 = vcombine.high %v22109_v33, %v22109_v33 }
 0x7c2   : > { %22158 = vmatprep.subr.mxu0 %v29198_v48  ;;  %22160 = vmatprep.mubr.msk.f32.mxu0 %vm22961_vm8, %v29198_v48  ;;  %v17431_v18 = vcombine.high %v17396_v56, %v17396_v56 }
 0x7c3   : > { %22156 = vmatmul.mubr.msk.f32.vlgmr.msra.gmra.mrb[64].mxu1 %vm15923_vm11, %v28068_v14  ;;  %22159 = vmatpush3.msk.msra.mxu0 %vm17296_vm13, %v17429_v10 }
 0x7c4   : > { %22163 = vmatprep.subr.mxu1 %v29198_v48  ;;  %22165 = vmatprep.mubr.msk.f32.mxu1 %vm22961_vm8, %v29198_v48  ;;  %v22112_v30 = vpop.f32.mrb[60].mxu0 }
 0x7c5   : > { %22161 = vmatmul.mubr.msk.f32.vlgmr.msra.gmra.mrb[66].mxu0 %vm15923_vm11, %v28068_v14  ;;  %22164 = vmatpush3.msk.msra.mxu1 %vm17296_vm13, %v22106_v47  ;;  %v17406_v50 = vpop.f32.mrb[61].mxu0  ;;  %v17434_v24 = vcombine.high %v22112_v30, %v22112_v30 }
 0x7c6   : > { %22168 = vmatprep.subr.mxu0 %v29198_v48  ;;  %22170 = vmatprep.mubr.msk.f32.mxu0 %vm22961_vm8, %v29198_v48  ;;  %v17433_v37 = vcombine.high %v17406_v50, %v17406_v50 }
 0x7c7   : > { %22166 = vmatmul.mubr.msk.f32.vlgmr.msra.gmra.mrb[66].mxu1 %vm15923_vm11, %v28068_v14  ;;  %22169 = vmatpush3.msk.msra.mxu0 %vm17296_vm13, %v17430_v17 }
 0x7c8   : > { %22173 = vmatprep.subr.mxu1 %v29198_v48  ;;  %22175 = vmatprep.mubr.msk.f32.mxu1 %vm22961_vm8, %v29198_v48 }
 0x7c9   : > { %22171 = vmatmul.mubr.msk.f32.vlgmr.msra.gmra.mrb[68].mxu0 %vm15923_vm11, %v28068_v14  ;;  %22174 = vmatpush3.msk.msra.mxu1 %vm17296_vm13, %v17396_v56 }
 0x7ca   : > { %22178 = vmatprep.subr.mxu0 %v29198_v48  ;;  %22183 = vmatprep.subr.mxu1 %v29198_v48 }
 0x7cb   : > { %22176 = vmatmul.mubr.msk.f32.vlgmr.msra.gmra.mrb[68].mxu1 %vm15923_vm11, %v28068_v14  ;;  %22179 = vmatpush3.msk.msra.mxu0 %vm17296_vm13, %v17431_v18 }
 0x7cc   : > { %22184 = vmatpush3.msk.msra.mxu1 %vm17296_vm13, %v22109_v33  ;;  %22180 = vmatprep.mubr.msk.f32.mxu0 %vm22961_vm8, %v29198_v48 }
 0x7cd   : > { %22188 = vmatprep.subr.mxu0 %v29198_v48  ;;  %22181 = vmatmul.mubr.msk.f32.vlgmr.msra.gmra.mrb[70].mxu0 %vm15923_vm11, %v28068_v14 }
 0x7ce   : > { %22189 = vmatpush3.msk.msra.mxu0 %vm17296_vm13, %v17432_v28  ;;  %22185 = vmatprep.mubr.msk.f32.mxu1 %vm22961_vm8, %v29198_v48 }
 0x7cf   : > { %22193 = vmatprep.subr.mxu1 %v29198_v48  ;;  %22186 = vmatmul.mubr.msk.f32.vlgmr.msra.gmra.mrb[70].mxu1 %vm15923_vm11, %v28068_v14 }
 0x7d0   : > { %22194 = vmatpush3.msk.msra.mxu1 %vm17296_vm13, %v17406_v50  ;;  %22190 = vmatprep.mubr.msk.f32.mxu0 %vm22961_vm8, %v29198_v48 }
 0x7d1   : > { %22198 = vmatprep.subr.mxu0 %v29198_v48  ;;  %22191 = vmatmul.mubr.msk.f32.vlgmr.msra.gmra.mrb[72].mxu0 %vm15923_vm11, %v28068_v14 }
 0x7d2   : > { %22199 = vmatpush3.msk.msra.mxu0 %vm17296_vm13, %v17433_v37  ;;  %22195 = vmatprep.mubr.msk.f32.mxu1 %vm22961_vm8, %v29198_v48 }
 0x7d3   : > { %22203 = vmatprep.subr.mxu1 %v29198_v48  ;;  %22196 = vmatmul.mubr.msk.f32.vlgmr.msra.gmra.mrb[72].mxu1 %vm15923_vm11, %v28068_v14 }
 0x7d4   : > { %22204 = vmatpush3.msk.msra.mxu1 %vm17296_vm13, %v22112_v30  ;;  %22200 = vmatprep.mubr.msk.f32.mxu0 %vm22961_vm8, %v29198_v48 }
 0x7d5   : > { %22208 = vmatprep.subr.mxu0 %v29198_v48  ;;  %22201 = vmatmul.mubr.msk.f32.vlgmr.msra.gmra.mrb[74].mxu0 %vm15923_vm11, %v28068_v14 }
 0x7d6   : > { %22209 = vmatpush3.msk.msra.mxu0 %vm17296_vm13, %v17434_v24  ;;  %22205 = vmatprep.mubr.msk.f32.mxu1 %vm22961_vm8, %v29198_v48 }
 0x7d7   : > { %22206 = vmatmul.mubr.msk.f32.vlgmr.msra.gmra.mrb[74].mxu1 %vm15923_vm11, %v28068_v14  ;;  %22210 = vmatprep.mubr.msk.f32.mxu0 %vm22961_vm8, %v29198_v48 }
 0x7d9   : > { %22211 = vmatmul.mubr.msk.f32.vlgmr.msra.gmra.mrb[76].mxu0 %vm15923_vm11, %v28068_v14 }
 0x87e   : > { %v17505_v61 = vpop.f32.mrb[52].mxu1 }
 0x87f   : > { %v22117_v32 = vpop.f32.mrb[53].mxu1 }
 0x882   : > { %v17577_v57 = vpop.f32.mrb[54].mxu1 }
 0x883   : > { %v18877_v23 = vadd.f32 %v17577_v57, %v17505_v61  ;;  %v22122_v49 = vpop.f32.mrb[55].mxu1 }
 0x885   : > { %v18917_v14 = vmul.f32 0.037037037, %v18877_v23 }
 0x886   : > { %v17649_v21 = vpop.f32.mrb[56].mxu1 }
 0x887   : > { %v18878_v15 = vadd.f32 %v17649_v21, %v17577_v57  ;;  %v22127_v59 = vpop.f32.mrb[57].mxu1  ;;  %v18953_v41 = vmul.f32 2.0, %v18917_v14  ;;  %v18965_v2 = vmul.f32 %v18917_v14, %v18917_v14 }
 0x889   : > { %v18898_v16 = vadd.f32 %v18878_v15, %v17505_v61  ;;  %v18957_v51 = vmul.f32 %v18953_v41, %v18877_v23  ;;  %v18969_v17 = vmul.f32 27.0, %v18965_v2 }
 0x88a   : > { %v17721_v63 = vpop.f32.mrb[58].mxu1 }
 0x88b   : > { %v28207_v6 = vadd.f32 %v17721_v63, %v17649_v21  ;;  %v22132_v40 = vpop.f32.mrb[59].mxu1  ;;  %v18918_v58 = vmul.f32 0.037037037, %v18898_v16 }
 0x88d   : > { %v28210_v11 = vadd.f32 %v28207_v6, %v17577_v57  ;;  %v18920_v7 = vmul.f32 0.037037037, %v28207_v6  ;;  %v18954_v12 = vmul.f32 2.0, %v18918_v58  ;;  %v18966_v1 = vmul.f32 %v18918_v58, %v18918_v58 }
 0x88e   : > { %v17793_v48 = vpop.f32.mrb[60].mxu1 }
 0x88f   : > { %v22137_v5 = vpop.f32.mrb[61].mxu1  ;;  %v18919_v27 = vmul.f32 0.037037037, %v28210_v11  ;;  %v18956_v42 = vmul.f32 2.0, %v18920_v7  ;;  %v18968_v53 = vmul.f32 %v18920_v7, %v18920_v7  ;;  %v18958_v18 = vmul.f32 %v18954_v12, %v18898_v16 }
 0x890   : > { %v17865_v43 = vpop.f32.mrb[62].mxu0  ;;  %v18970_v37 = vmul.f32 27.0, %v18966_v1 }
 0x891   : > { %v18881_v3 = vadd.f32 %v17865_v43, %v17793_v48  ;;  %v22142_v20 = vpop.f32.mrb[63].mxu0  ;;  %v18955_v38 = vmul.f32 2.0, %v18919_v27  ;;  %v18967_v4 = vmul.f32 %v18919_v27, %v18919_v27  ;;  %v18960_v32 = vmul.f32 %v18956_v42, %v28207_v6 }
 0x892   : > { %v17937_v44 = vpop.f32.mrb[62].mxu1  ;;  %v18972_v57 = vmul.f32 27.0, %v18968_v53 }
 0x893   : > { %v18921_v54 = vmul.f32 0.037037037, %v18881_v3  ;;  %v28212_v19 = vmul.f32 %v18917_v14, %v18881_v3  ;;  %v18882_v45 = vadd.f32 %v17937_v44, %v17865_v43  ;;  %v22147_v60 = vpop.f32.mrb[63].mxu1  ;;  %v18959_v61 = vmul.f32 %v18955_v38, %v28210_v11 }
 0x894   : > { %v18009_v39 = vpop.f32.mrb[64].mxu0  ;;  %v18971_v15 = vmul.f32 27.0, %v18967_v4 }
 0x895   : > { %v28216_v52 = vadd.f32 %v18882_v45, %v17793_v48  ;;  %v28218_v26 = vadd.f32 %v18009_v39, %v17937_v44  ;;  %v22152_v55 = vpop.f32.mrb[65].mxu0  ;;  %v28220_v25 = vmul.f32 %v18921_v54, %v18877_v23  ;;  %v28222_v62 = vmul.f32 %v18921_v54, %v18917_v14 }
 0x896   : > { %v18081_v34 = vpop.f32.mrb[64].mxu1  ;;  %v18977_v47 = vmul.f32 2.0, %v18921_v54  ;;  %v18989_v48 = vmul.f32 %v18921_v54, %v18921_v54 }
 0x897   : > { %v18922_v0 = vmul.f32 0.037037037, %v28216_v52  ;;  %v28226_v13 = vmul.f32 %v18918_v58, %v28216_v52  ;;  %v28229_v9 = vadd.f32 %v28218_v26, %v17865_v43  ;;  %v22157_v36 = vpop.f32.mrb[65].mxu1  ;;  %v28232_v31 = vmul.f32 %v18920_v7, %v28218_v26 }
 0x898   : > { %v18153_v22 = vpop.f32.mrb[66].mxu0  ;;  %v18924_v46 = vmul.f32 0.037037037, %v28218_v26  ;;  %v18981_v40 = vmul.f32 %v18977_v47, %v18881_v3  ;;  %v18993_v42 = vmul.f32 27.0, %v18989_v48 }
 0x899   : > { %v18885_v8 = vadd.f32 %v18153_v22, %v18081_v34  ;;  %v22162_v29 = vpop.f32.mrb[67].mxu0  ;;  %v18923_v35 = vmul.f32 0.037037037, %v28229_v9  ;;  %v28236_v33 = vmul.f32 %v18922_v0, %v18898_v16  ;;  %v28238_v56 = vmul.f32 %v18922_v0, %v18918_v58 }
 0x89a   : > { %v18225_v10 = vpop.f32.mrb[66].mxu1  ;;  %v28246_v16 = vmul.f32 %v18924_v46, %v28207_v6  ;;  %v28249_v44 = vmul.f32 %v18919_v27, %v28229_v9  ;;  %v18978_v60 = vmul.f32 2.0, %v18922_v0  ;;  %v18980_v39 = vmul.f32 2.0, %v18924_v46 }
 0x89b   : > { %v18961_v30 = vsub.f32 %v18885_v8, %v18957_v51  ;;  %v18886_v50 = vadd.f32 %v18225_v10, %v18153_v22  ;;  %v22167_v28 = vpop.f32.mrb[67].mxu1  ;;  %v28243_v5 = vmul.f32 %v18923_v35, %v28210_v11  ;;  %v28251_v55 = vmul.f32 %v18923_v35, %v18919_v27 }
 0x89c   : > { %v18297_v24 = vpop.f32.mrb[68].mxu0  ;;  %v28253_v3 = vmul.f32 %v18924_v46, %v18920_v7  ;;  %v18990_v12 = vmul.f32 %v18922_v0, %v18922_v0  ;;  %v18979_v36 = vmul.f32 2.0, %v18923_v35  ;;  %v18992_v1 = vmul.f32 %v18924_v46, %v18924_v46 }
 0x89d   : > { %v18973_v23 = vadd.f32 %v18969_v17, %v18961_v30  ;;  %v18906_v49 = vadd.f32 %v18886_v50, %v18081_v34  ;;  %v18887_v21 = vadd.f32 %v18297_v24, %v18225_v10  ;;  %v22172_v59 = vpop.f32.mrb[69].mxu0  ;;  %v18982_v51 = vmul.f32 %v18978_v60, %v28216_v52 }
 0x89e   : > { %v18369_v63 = vpop.f32.mrb[68].mxu1  ;;  %v18991_v29 = vmul.f32 %v18923_v35, %v18923_v35  ;;  %v18984_v10 = vmul.f32 %v18980_v39, %v28218_v26  ;;  %v18994_v17 = vmul.f32 27.0, %v18990_v12  ;;  %v18983_v0 = vmul.f32 %v18979_v36, %v28229_v9 }
 0x89f   : > { %v18962_v43 = vsub.f32 %v18906_v49, %v18958_v18  ;;  %v18907_v14 = vadd.f32 %v18887_v21, %v18153_v22  ;;  %v18964_v20 = vsub.f32 %v18887_v21, %v18960_v32  ;;  %v22177_v58 = vpop.f32.mrb[69].mxu1  ;;  %v18996_v50 = vmul.f32 27.0, %v18992_v1 }
 0x8a0   : > { %v18441_v45 = vpop.f32.mrb[70].mxu0  ;;  %v18995_v32 = vmul.f32 27.0, %v18991_v29 }
 0x8a1   : > { %v18974_v54 = vadd.f32 %v18970_v37, %v18962_v43  ;;  %v18963_v11 = vsub.f32 %v18907_v14, %v18959_v61  ;;  %v18976_v41 = vadd.f32 %v18972_v57, %v18964_v20  ;;  %v18889_v34 = vadd.f32 %v18441_v45, %v18369_v63  ;;  %v22182_v6 = vpop.f32.mrb[71].mxu0 }
 0x8a2   : > { %v18513_v2 = vpop.f32.mrb[70].mxu1 }
 0x8a3   : > { %v18975_v22 = vadd.f32 %v18971_v15, %v18963_v11  ;;  %v18985_v38 = vsub.f32 %v18889_v34, %v18981_v40  ;;  %v18890_v53 = vadd.f32 %v18513_v2, %v18441_v45  ;;  %v22187_v8 = vpop.f32.mrb[71].mxu1  ;;  %v18945_v34 = vmul.f32 27.0, %v28222_v62 }
 0x8a4   : > { %v18585_v27 = vpop.f32.mrb[72].mxu0  ;;  %v18946_v62 = vmul.f32 27.0, %v28238_v56 }
 0x8a5   : > { %v18997_v7 = vadd.f32 %v18993_v42, %v18985_v38  ;;  %v18910_v4 = vadd.f32 %v18890_v53, %v18369_v63  ;;  %v18891_v47 = vadd.f32 %v18585_v27, %v18513_v2  ;;  %v22192_v30 = vpop.f32.mrb[73].mxu0  ;;  %v18947_v42 = vmul.f32 27.0, %v28251_v55 }
 0x8a6   : > { %v18657_v46 = vpop.f32.mrb[72].mxu1 }
 0x8a7   : > { %v19005_v18 = vmul.f32 %v18997_v7, %v18973_v23  ;;  %v18986_v28 = vsub.f32 %v18910_v4, %v18982_v51  ;;  %v18911_v37 = vadd.f32 %v18891_v47, %v18441_v45  ;;  %v18988_v24 = vsub.f32 %v18891_v47, %v18984_v10  ;;  %v22197_v61 = vpop.f32.mrb[73].mxu1 }
 0x8a8   : > { %v18729_v52 = vpop.f32.mrb[74].mxu0 }
 0x8a9   : > { %v19009_v57 = vadd.f32 1e-08, %v19005_v18  ;;  %v18998_v35 = vadd.f32 %v18994_v17, %v18986_v28  ;;  %v18987_v49 = vsub.f32 %v18911_v37, %v18983_v0  ;;  %v19000_v21 = vadd.f32 %v18996_v50, %v18988_v24  ;;  %v22202_v15 = vpop.f32.mrb[75].mxu0 }
 0x8aa   : > { %v18893_v59 = vadd.f32 %v18729_v52, %v18657_v46  ;;  %v18801_v26 = vpop.f32.mrb[74].mxu1 }
 0x8ab   : > { %22782 = vrcp.f32 %v19009_v57  ;;  %v19006_v63 = vmul.f32 %v18998_v35, %v18974_v54  ;;  %v18999_v40 = vadd.f32 %v18995_v32, %v18987_v49  ;;  %v19008_v9 = vmul.f32 %v19000_v21, %v18976_v41  ;;  %v22207_v48 = vpop.f32.mrb[75].mxu1 }
 0x8ac   : > { %v18929_v23 = vsub.f32 %v18893_v59, %v28220_v25  ;;  %v18894_v43 = vadd.f32 %v18801_v26, %v18729_v52  ;;  %v18873_v14 = vpop.f32.mrb[76].mxu0 }
 0x8ad   : > { %v19010_v20 = vadd.f32 1e-08, %v19006_v63  ;;  %v19007_v58 = vmul.f32 %v18999_v40, %v18975_v22  ;;  %v19012_v45 = vadd.f32 1e-08, %v19008_v9  ;;  %v18895_v60 = vadd.f32 %v18873_v14, %v18801_v26  ;;  %v22212_v39 = vpop.f32.mrb[77].mxu0 }
 0x8ae   : > { %v18937_v11 = vsub.f32 %v18929_v23, %v28212_v19  ;;  %v18914_v6 = vadd.f32 %v18894_v43, %v18657_v46  ;;  %v18948_v22 = vmul.f32 27.0, %v28253_v3 }
 0x8af   : > { %22784 = vrcp.f32 %v19010_v20  ;;  %v19011_v2 = vadd.f32 1e-08, %v19007_v58  ;;  %v18915_v54 = vadd.f32 %v18895_v60, %v18729_v52  ;;  %v18932_v41 = vsub.f32 %v18895_v60, %v28246_v16 }
 0x8b0   : > { %22786 = vrcp.f32 %v19012_v45  ;;  %v18949_v12 = vadd.f32 %v18945_v34, %v18937_v11  ;;  %v18930_v25 = vsub.f32 %v18914_v6, %v28236_v33 }
 0x8b1   : > { %22788 = vrcp.f32 %v19011_v2  ;;  %v18931_v36 = vsub.f32 %v18915_v54, %v28243_v5  ;;  %v18940_v1 = vsub.f32 %v18932_v41, %v28232_v31 }
 0x8b2   : > { %v18938_v19 = vsub.f32 %v18930_v25, %v28226_v13  ;;  %v19001_v53 = vmul.f32 %v18949_v12, %v18949_v12 }
 0x8b3   : > { %v18939_v38 = vsub.f32 %v18931_v36, %v28249_v44  ;;  %v18952_v16 = vadd.f32 %v18948_v22, %v18940_v1 }
 0x8b4   : > { %v18950_v8 = vadd.f32 %v18946_v62, %v18938_v19 }
 0x8b5   : > { %v22783_v51 = vpop.eup %22782  ;;  %v18951_v33 = vadd.f32 %v18947_v42, %v18939_v38  ;;  %v19004_v7 = vmul.f32 %v18952_v16, %v18952_v16 }
 0x8b6   : > { %v19017_v27 = vmul.f32 %v22783_v51, %v19001_v53  ;;  %v19002_v29 = vmul.f32 %v18950_v8, %v18950_v8 }
 0x8b7   : > { %v19003_v3 = vmul.f32 %v18951_v33, %v18951_v33 }
 0x8b8   : > { %v19022_v10 = vsel %vm19021_vm14, %v19017_v27, 0.0 }
 0x8b9   : > { %v22785_v5 = vpop.eup %22784 }
 0x8ba   : > { %v22787_v31 = vpop.eup %22786  ;;  %v19018_v4 = vmul.f32 %v22785_v5, %v19002_v29 }
 0x8bb   : > { %v22789_v13 = vpop.eup %22788  ;;  %v19020_v47 = vmul.f32 %v22787_v31, %v19004_v7 }
 0x8bc   : > { %v19019_v56 = vmul.f32 %v22789_v13, %v19003_v3  ;;  %v19023_v44 = vsel %vm19021_vm14, %v19018_v4, 0.0 }
 0x8bd   : > { %v19024_v30 = vadd.f32 %v19023_v44, %v19022_v10  ;;  %v19027_v0 = vsel %vm19021_vm14, %v19020_v47, 0.0 }
 0x8be   : > { %v19025_v55 = vsel %vm19021_vm14, %v19019_v56, 0.0 }
 0x8bf   : > { %v19026_v17 = vadd.f32 %v19025_v55, %v19024_v30 }
 0x8c1   : > { %v19028_v50 = vadd.f32 %v19027_v0, %v19026_v17 }
 0x8c3   : > { %19029 = vadd.xlane.f32.xlu0 %v19028_v50 }
 0x950   : > { %v19030_v46 = vpop.xlane.xlu0 %19029 }
 0x951   : > { %v19031_v18 = vrot.slane %v19030_v46, 4 }
 0x953   : > { %v19032_v28 = vadd.f32 %v19031_v18, %v19030_v46 }
 0x955   : > { %v19033_v37 = vrot.slane %v19032_v28, 2 }
 0x957   : > { %v19034_v24 = vadd.f32 %v19033_v37, %v19032_v28 }
 0x959   : > { %v19035_v61 = vrot.slane %v19034_v24, 1 }
 0x95b   : > { %v19036_v32 = vadd.f32 %v19035_v61, %v19034_v24 }
 0x95d   : > { %22641 = vpush %v19036_v32 }
 0x98e   : > { %s22642_s30 = spop %22641 }
 0x98f   : > { %s19038_s24 = smul.f32 -0.001953125, %s22642_s30 }
 0x991   : > { %s19039_s28 = sadd.f32 %s19038_s24, %s15922_s4 }
 0x993   : > { %v19040_v52 = vstv %s19039_s28 }
 0x994   : > { %19042 = vst.msk [vmem:[%s199_s21] sm:$0x1] %vm19041_vm15, %v19040_v52 }
 0x995 PF: > { %p15_p11 = scmp.ge.s32.totalorder %s23000_s14, 4   ;;  %s29249_s9 = smov %s22944_s10 }
 0x996   : > { %s29250_s10 = smov %s22948_s11  ;;  %s29251_s11 = smov %s23010_s17 }
 0x997   : > { %s29252_s12 = smov %s23000_s14  ;;  %17 = sbr.rel (!%p15_p11) target bundleno = 5 (0x5), region = 81 }
 0x99e   :  { %19060 = vsyncpa [#allocation3], 1 }
 0x99f   :  { %19062 = vsyncpa [#allocation3 + $0x1], 1 }
 0x9a0   :  { %19063 = vsyncpa [#allocation5], 1 }
 0x9a1   :  { %19065 = vsyncpa [#allocation5 + $0x1], 1 }

</bundles_post_ra>
